<compile_context>
chip_gen: v5e
topology: v5e:2x2
jax: 0.10.0
libtpu: 0.0.40
codegen_flags: <defaults>
</compile_context>

<pallas_src>
import jax
import jax.numpy as jnp
from jax import lax
from jax.experimental import pallas as pl
from jax.experimental.pallas import tpu as pltpu

KSZ = 7
PAD = 3
EPS = 1e-6


# ----------------------------- in-kernel math --------------------------------
def _erf(x):
    # erfc rational approximation (Numerical Recipes), |abs error| < 1.2e-7, built
    # only from ops with guaranteed Mosaic lowerings.  Reproduces PyTorch's exact
    # (erf-based) nn.GELU().  The divide runs as an EUP approx reciprocal.
    a = jnp.abs(x)
    t = pl.reciprocal(1.0 + 0.5 * a, approx=True)
    poly = -1.26551223 + t * (1.00002368 + t * (0.37409196 + t * (0.09678418
           + t * (-0.18628806 + t * (0.27886807 + t * (-1.13520398
           + t * (1.48851587 + t * (-0.82215223 + t * 0.17087277))))))))
    erfc_a = t * jnp.exp(-a * a + poly)
    return jnp.where(x >= 0.0, 1.0 - erfc_a, erfc_a - 1.0)


def _gelu_exact(x):
    return 0.5 * x * (1.0 + _erf(x * 0.7071067811865476))


# --------------------------- tiling / budget helpers --------------------------
def _vmem_capacity_bytes():
    try:
        cap = getattr(pltpu.get_tpu_info(), "vmem_capacity_bytes", None)
        if cap:
            return int(cap)
    except Exception:
        pass
    return 64 * 1024 * 1024          # conservative default (v7x per-TC VMEM)


def _pick_td(N, D, H, W, C, budget_bytes):
    """Largest depth tile TD (divisor of D) such that the flattened output tile
    is lane-dense ((TD*H*W) % 128 == 0 or TD == D), the estimated per-tile VMEM
    footprint fits the budget, and (when possible) the parallel grid axes expose
    >= 2 tiles (v7x has 2 TensorCores)."""
    HW = H * W
    Hp, Wp = H + 2 * PAD, W + 2 * PAD

    def vmem_need(td):
        st = td * HW
        conv = 2 * st * C + 2 * st * C + Hp * Wp * C + 2 * HW * C   # acc+res, out x2, pad, in x2
        mlp = 8 * st * C                                            # live LN/MLP values (h is 4x)
        wts = KSZ ** 3 * C + 9 * C * C + 12 * C                     # dw + eye + w1 + w2 + vectors
        return 4 * (conv + mlp + wts)

    divisors = [d for d in range(D, 0, -1) if D % d == 0]
    lane_ok = [d for d in divisors if d == D or (d * HW) % 128 == 0]
    for need_two_tiles in (True, False):
        for td in lane_ok:
            if vmem_need(td) > budget_bytes:
                continue
            if need_two_tiles and N * (D // td) < 2:
                continue
            return td
    return lane_ok[-1]               # smallest lane-dense tile as a last resort


def _pick_rh(H, W, C):
    """Largest divisor of H whose live f32 accumulator strip stays <= ~128 KiB."""
    limit = 128 * 1024
    best = 1
    for r in range(1, H + 1):
        if H % r == 0 and r * W * C * 4 <= limit:
            best = r
    return best


# ------------------------------ fused kernel ----------------------------------
def _make_block_kernel(TD, D, H, W, C, RH):
    HW = H * W
    S_t = TD * HW
    last_kz = TD + 2 * PAD - 1

    def kernel(x_ref, eye_ref, w_ref, b_ref, lnw_ref, lnb_ref,
               w1_ref, b1_ref, w2_ref, b2_ref, g_ref,
               o_ref, xpad_ref, acc_ref, res_ref):
        # x_ref   : (H, W, C)          one channels-last input depth plane
        # eye_ref : (C, C)             precomputed identity (relayout matmul)
        # w_ref   : (KSZ, KSZ, KSZ, C) depthwise taps, (kd, kh, kw, c)
        # b_ref   : (1, C)             depthwise bias
        # ln*_ref : (1, C)             LayerNorm scale / shift
        # w1_ref  : (C, 4C)  b1: (1, 4C)   pwconv1 (pre-transposed to (in, out))
        # w2_ref  : (4C, C)  b2: (1, C)    pwconv2 (pre-transposed to (in, out))
        # g_ref   : (1, C)             layer scale gamma
        # o_ref   : (1, C, TD*H*W)     channels-first output tile (resident over kz)
        t = pl.program_id(1)
        kz = pl.program_id(2)

        # ---- phase 0: per-tile init (bias-filled accumulator, zeroed halo) ----
        @pl.when(kz == 0)
        def _init():
            acc_ref[...] = jnp.broadcast_to(b_ref[...], acc_ref.shape)
            xpad_ref[...] = jnp.zeros(xpad_ref.shape, xpad_ref.dtype)

        # Depth position of the streamed input plane (virtual zero padding outside [0, D)).
        pz = t * TD + kz - PAD

        # ---- phase 1: depthwise accumulation for this input plane -------------
        @pl.when((pz >= 0) & (pz < D))
        def _accumulate():
            plane = x_ref[...].astype(jnp.float32)                    # (H, W, C)
            xpad_ref[PAD:PAD + H, PAD:PAD + W, :] = plane             # interior only

            od_r = kz - PAD
            @pl.when((od_r >= 0) & (od_r < TD))
            def _capture_residual():
                # This plane is exactly the residual for output depth od_r of the
                # tile: capture it here instead of re-reading x from HBM later.
                res_ref[pl.ds(od_r, 1), :, :, :] = plane.reshape(1, H, W, C)

            @pl.loop(0, KSZ)                       # <=7 live depth taps, rolled
            def _kd(kd):
                od = kz - kd                       # output depth (within tile) fed by tap kd
                @pl.when((od >= 0) & (od < TD))
                def _taps():
                    wk = w_ref[pl.ds(kd, 1), :, :, :]                 # (1, KSZ, KSZ, C), hoisted
                    for h0 in range(0, H, RH):                        # static row strips
                        a = acc_ref[pl.ds(od, 1), h0:h0 + RH, :, :]   # (1, RH, W, C) live value
                        for kh in range(KSZ):
                            for kw in range(KSZ):
                                a = a + (xpad_ref[h0 + kh:h0 + kh + RH, kw:kw + W, :]
                                         * wk[0, kh, kw])
                        acc_ref[pl.ds(od, 1), h0:h0 + RH, :, :] = a

        # ---- phase 2: fused LayerNorm -> MLP -> layer-scale -> residual -------
        @pl.when(kz == last_kz)
        def _store():
            y = acc_ref[...].reshape(S_t, C)                 # channels-last rows
            mu = jnp.mean(y, axis=-1, keepdims=True)
            var = jnp.maximum(jnp.mean(y * y, axis=-1, keepdims=True) - mu * mu, 0.0)
            xn = (y - mu) * lax.rsqrt(var + EPS) * lnw_ref[...] + lnb_ref[...]
            h = jnp.dot(xn, w1_ref[...], preferred_element_type=jnp.float32) + b1_ref[...]
            h = _gelu_exact(h)
            z = jnp.dot(h, w2_ref[...], preferred_element_type=jnp.float32) + b2_ref[...]
            out_cl = res_ref[...].reshape(S_t, C) + g_ref[...] * z
            # channels-last -> channels-first with an identity matmul on the idle
            # MXU; the single HBM store of the block is lane-dense (last dim TD*H*W).
            out_cf = lax.dot_general(eye_ref[...], out_cl, (((1,), (1,)), ((), ())),
                                     preferred_element_type=jnp.float32)
            o_ref[0, :, :] = out_cf.astype(o_ref.dtype)

    return kernel


def _fused_block(x_cl, eye, dw_w, dw_b, ln_w, ln_b, w1t, b1, w2t, b2, gamma,
                 *, out_dtype):
    """x_cl: (N, D, H, W, C) channels-last input.  Returns (N, C, D*H*W) NC(S)."""
    N, D, H, W, C = x_cl.shape
    S = D * H * W
    HW = H * W

    cap = _vmem_capacity_bytes()                       # generation-aware budgets
    vmem_limit = min(3 * cap // 4, 96 * 1024 * 1024)
    TD = _pick_td(N, D, H, W, C, int(vmem_limit * 0.85))
    RH = _pick_rh(H, W, C)

    def x_map(n, t, kz):
        pz = t * TD + kz - PAD
        return (n, jnp.clip(pz, 0, D - 1), 0, 0, 0)    # clamp; OOR planes skipped in-kernel

    # Single-buffer the large resident weights (their block index never changes);
    # only enabled when they are big enough to matter (>> test size) so it is the
    # difference between fitting and not fitting on v7x's 64 MiB VMEM at large C.
    wbytes = 4 * (KSZ ** 3 * C + 9 * C * C + 12 * C)
    const_kw = dict(pipeline_mode=pl.Buffered(1)) if wbytes > 4 * 1024 * 1024 else {}

    cmap2 = lambda n, t, kz: (0, 0)
    cmap4 = lambda n, t, kz: (0, 0, 0, 0)

    in_specs = [
        pl.BlockSpec((None, None, H, W, C), x_map),              # streamed depth plane
        pl.BlockSpec((C, C), cmap2, **const_kw),                 # identity (relayout)
        pl.BlockSpec((KSZ, KSZ, KSZ, C), cmap4, **const_kw),     # depthwise weights
        pl.BlockSpec((1, C), cmap2, **const_kw),                 # depthwise bias
        pl.BlockSpec((1, C), cmap2, **const_kw),                 # LN weight
        pl.BlockSpec((1, C), cmap2, **const_kw),                 # LN bias
        pl.BlockSpec((C, 4 * C), cmap2, **const_kw),             # pwconv1 weight (in, out)
        pl.BlockSpec((1, 4 * C), cmap2, **const_kw),             # pwconv1 bias
        pl.BlockSpec((4 * C, C), cmap2, **const_kw),             # pwconv2 weight (in, out)
        pl.BlockSpec((1, C), cmap2, **const_kw),                 # pwconv2 bias
        pl.BlockSpec((1, C), cmap2, **const_kw),                 # gamma (layer scale)
    ]

    return pl.pallas_call(
        _make_block_kernel(TD, D, H, W, C, RH),
        out_shape=jax.ShapeDtypeStruct((N, C, S), out_dtype),
        grid=(N, D // TD, TD + 2 * PAD),
        in_specs=in_specs,
        out_specs=pl.BlockSpec((1, C, TD * HW), lambda n, t, kz: (n, 0, t)),
        scratch_shapes=[
            pltpu.VMEM((H + 2 * PAD, W + 2 * PAD, C), jnp.float32),  # zero-padded plane
            pltpu.VMEM((TD, H, W, C), jnp.float32),                  # f32 conv accumulator
            pltpu.VMEM((TD, H, W, C), jnp.float32),                  # residual capture
        ],
        compiler_params=pltpu.CompilerParams(
            dimension_semantics=("parallel", "parallel", "arbitrary"),
            vmem_limit_bytes=int(vmem_limit)),
    )(x_cl, eye, dw_w, dw_b, ln_w, ln_b, w1t, b1, w2t, b2, gamma)


def block3d_forward(x, params):
    """x: (N, C, D, H, W) float32, same convention as the PyTorch module."""
    N, C, D, H, W = x.shape
    # Single remaining layout pass: NCDHW -> NDHWC for the conv.  The 49-tap
    # depthwise conv is VALU-bound at real ConvNeXt sizes, so keeping C on the
    # 128-lane axis inside the kernel is worth this one relayout.
    # TODO(synk): fold this transpose in-kernel (per-plane identity-matmul
    # relayout) to make the block fully transpose-free at small C.
    x_cl = jnp.transpose(x, (0, 2, 3, 4, 1))
    eye = jnp.eye(C, dtype=jnp.float32)
    out_cf = _fused_block(
        x_cl, eye, params["dw_w"], params["dw_b"], params["ln_w"], params["ln_b"],
        params["w1t"], params["b1"], params["w2t"], params["b2"], params["gamma"],
        out_dtype=x.dtype)
    # drop_path = 0.0 -> Identity; residual + layer scale already applied in-kernel.
    return out_cf.reshape(N, C, D, H, W)


# ------------------------------ pure-JAX reference ----------------------------
def block3d_reference(x, params):
    N, C, D, H, W = x.shape
    w_oidhw = jnp.transpose(params["dw_w"], (3, 0, 1, 2))[:, None]   # (C,1,7,7,7)
    y = lax.conv_general_dilated(
        x, w_oidhw, window_strides=(1, 1, 1), padding=[(PAD, PAD)] * 3,
        dimension_numbers=("NCDHW", "OIDHW", "NCDHW"), feature_group_count=C)
    y = y + params["dw_b"].reshape(1, C, 1, 1, 1)
    yl = jnp.transpose(y, (0, 2, 3, 4, 1))
    mu = jnp.mean(yl, axis=-1, keepdims=True)
    var = jnp.mean((yl - mu) ** 2, axis=-1, keepdims=True)
    xn = (yl - mu) / jnp.sqrt(var + EPS) * params["ln_w"][0] + params["ln_b"][0]
    h = jax.nn.gelu(xn @ params["w1t"] + params["b1"][0], approximate=False)
    z = h @ params["w2t"] + params["b2"][0]
    out_cl = jnp.transpose(x, (0, 2, 3, 4, 1)) + params["gamma"][0] * z
    return jnp.transpose(out_cl, (0, 4, 1, 2, 3))


if __name__ == "__main__":
    dim = 8                        # Block3D(dim=8)
    layer_scale_init_value = 0.1   # constructor hyperparameter (module default 1e-6)
    N, D, H, W = 2, 8, 8, 8

    key = jax.random.PRNGKey(0)
    ks = jax.random.split(key, 7)
    params = {
        # Conv3d(dim, dim, 7, groups=dim): torch weight (dim,1,7,7,7) stored as (7,7,7,dim)
        "dw_w": 0.05 * jax.random.normal(ks[0], (KSZ, KSZ, KSZ, dim), jnp.float32),
        "dw_b": 0.05 * jax.random.normal(ks[1], (1, dim), jnp.float32),
        "ln_w": jnp.ones((1, dim), jnp.float32),     # LayerNorm weight init = 1
        "ln_b": jnp.zeros((1, dim), jnp.float32),    # LayerNorm bias init = 0
        # Linear(dim, 4*dim): torch (out,in) pre-transposed to (in,out) for the kernel
        "w1t": 0.2 * jax.random.normal(ks[2], (dim, 4 * dim), jnp.float32),
        "b1": 0.1 * jax.random.normal(ks[3], (1, 4 * dim), jnp.float32),
        # Linear(4*dim, dim): torch (out,in) pre-transposed to (in,out)
        "w2t": 0.2 * jax.random.normal(ks[4], (4 * dim, dim), jnp.float32),
        "b2": 0.1 * jax.random.normal(ks[5], (1, dim), jnp.float32),
        "gamma": jnp.full((1, dim), layer_scale_init_value, jnp.float32),
    }
    x = jax.random.normal(ks[6], (N, dim, D, H, W), jnp.float32)

    out = jax.block_until_ready(jax.jit(block3d_forward)(x, params))
    ref = jax.block_until_ready(block3d_reference(x, params))
    assert out.shape == x.shape and out.dtype == x.dtype
    max_err = float(jnp.max(jnp.abs(out - ref)))
    # 2e-3 leaves headroom for the EUP approx reciprocal inside the erf polynomial.
    assert max_err < 2e-3, f"max abs error too large: {max_err}"
    print("KERNEL_OK")
</pallas_src>

<mosaic_0001>
module attributes {stable_mosaic.version = 11 : i64} {
  func.func @kernel(%arg0: i32, %arg1: i32, %arg2: i32, %arg3: memref<1x1x8x8x8xf32, #tpu.memory_space<vmem>>, %arg4: memref<8x8xf32, #tpu.memory_space<vmem>>, %arg5: memref<7x7x7x8xf32, #tpu.memory_space<vmem>>, %arg6: memref<1x8xf32, #tpu.memory_space<vmem>>, %arg7: memref<1x8xf32, #tpu.memory_space<vmem>>, %arg8: memref<1x8xf32, #tpu.memory_space<vmem>>, %arg9: memref<8x32xf32, #tpu.memory_space<vmem>>, %arg10: memref<1x32xf32, #tpu.memory_space<vmem>>, %arg11: memref<32x8xf32, #tpu.memory_space<vmem>>, %arg12: memref<1x8xf32, #tpu.memory_space<vmem>>, %arg13: memref<1x8xf32, #tpu.memory_space<vmem>>, %arg14: memref<1x8x512xf32, #tpu.memory_space<vmem>>, %arg15: memref<14x14x8xf32, #tpu.memory_space<vmem>>, %arg16: memref<8x8x8x8xf32, #tpu.memory_space<vmem>>, %arg17: memref<8x8x8x8xf32, #tpu.memory_space<vmem>>) attributes {dimension_semantics = [#tpu.dimension_semantics<parallel>, #tpu.dimension_semantics<parallel>, #tpu.dimension_semantics<arbitrary>], iteration_bounds = array<i64: 2, 1, 14>, scalar_prefetch = 0 : i64, scratch_operands = 3 : i64, tpu.core_type = #tpu.core_type<tc>, window_params = [{transform_indices = @transform_0, window_bounds = array<i64: 1, 1, 8, 8, 8>}, {pipeline_mode = #tpu.pipeline_mode<synchronous>, transform_indices = @transform_1, window_bounds = array<i64: 8, 8>}, {pipeline_mode = #tpu.pipeline_mode<synchronous>, transform_indices = @transform_2, window_bounds = array<i64: 7, 7, 7, 8>}, {pipeline_mode = #tpu.pipeline_mode<synchronous>, transform_indices = @transform_3, window_bounds = array<i64: 1, 8>}, {pipeline_mode = #tpu.pipeline_mode<synchronous>, transform_indices = @transform_4, window_bounds = array<i64: 1, 8>}, {pipeline_mode = #tpu.pipeline_mode<synchronous>, transform_indices = @transform_5, window_bounds = array<i64: 1, 8>}, {pipeline_mode = #tpu.pipeline_mode<synchronous>, transform_indices = @transform_6, window_bounds = array<i64: 8, 32>}, {pipeline_mode = #tpu.pipeline_mode<synchronous>, transform_indices = @transform_7, window_bounds = array<i64: 1, 32>}, {pipeline_mode = #tpu.pipeline_mode<synchronous>, transform_indices = @transform_8, window_bounds = array<i64: 32, 8>}, {pipeline_mode = #tpu.pipeline_mode<synchronous>, transform_indices = @transform_9, window_bounds = array<i64: 1, 8>}, {pipeline_mode = #tpu.pipeline_mode<synchronous>, transform_indices = @transform_10, window_bounds = array<i64: 1, 8>}, {transform_indices = @transform_11, window_bounds = array<i64: 1, 8, 512>}]} {
    %c0_i32 = arith.constant 0 : i32
    %0 = arith.cmpi eq, %arg2, %c0_i32 : i32
    %1 = arith.extui %0 : i1 to i32
    %c0_i32_0 = arith.constant 0 : i32
    %2 = arith.cmpi ne, %1, %c0_i32_0 : i32
    scf.if %2 {
      %c0 = arith.constant 0 : index
      %c0_5 = arith.constant 0 : index
      %14 = vector.load %arg6[%c0, %c0_5] : memref<1x8xf32, #tpu.memory_space<vmem>>, vector<1x8xf32>
      %15 = vector.shape_cast %14 : vector<1x8xf32> to vector<1x1x1x8xf32>
      %16 = vector.broadcast %15 : vector<1x1x1x8xf32> to vector<8x8x8x8xf32>
      %c0_6 = arith.constant 0 : index
      %c0_7 = arith.constant 0 : index
      %c0_8 = arith.constant 0 : index
      %c0_9 = arith.constant 0 : index
      %17 = vector.load %arg16[%c0_6, %c0_7, %c0_8, %c0_9] : memref<8x8x8x8xf32, #tpu.memory_space<vmem>>, vector<8x8x8x8xf32>
      tpu.vector_store %arg16[%c0_6, %c0_7, %c0_8, %c0_9], %16 {strides = array<i32>} : memref<8x8x8x8xf32, #tpu.memory_space<vmem>>, vector<8x8x8x8xf32>,
      %cst = arith.constant 0.000000e+00 : f32
      %18 = vector.broadcast %cst : f32 to vector<14x14x8xf32>
      %c0_10 = arith.constant 0 : index
      %c0_11 = arith.constant 0 : index
      %c0_12 = arith.constant 0 : index
      %19 = vector.load %arg15[%c0_10, %c0_11, %c0_12] : memref<14x14x8xf32, #tpu.memory_space<vmem>>, vector<14x14x8xf32>
      tpu.vector_store %arg15[%c0_10, %c0_11, %c0_12], %18 {strides = array<i32>} : memref<14x14x8xf32, #tpu.memory_space<vmem>>, vector<14x14x8xf32>,
    } else {
    }
    %c8_i32 = arith.constant 8 : i32
    %3 = arith.muli %arg1, %c8_i32 : i32
    %4 = arith.addi %3, %arg2 : i32
    %c3_i32 = arith.constant 3 : i32
    %5 = arith.subi %4, %c3_i32 : i32
    %c0_i32_1 = arith.constant 0 : i32
    %6 = arith.cmpi sge, %5, %c0_i32_1 : i32
    %c8_i32_2 = arith.constant 8 : i32
    %7 = arith.cmpi slt, %5, %c8_i32_2 : i32
    %8 = arith.andi %6, %7 : i1
    %9 = arith.extui %8 : i1 to i32
    %c0_i32_3 = arith.constant 0 : i32
    %10 = arith.cmpi ne, %9, %c0_i32_3 : i32
    scf.if %10 {
      %c0 = arith.constant 0 : index
      %c0_5 = arith.constant 0 : index
      %c0_6 = arith.constant 0 : index
      %c0_7 = arith.constant 0 : index
      %c0_8 = arith.constant 0 : index
      %14 = vector.load %arg3[%c0, %c0_5, %c0_6, %c0_7, %c0_8] : memref<1x1x8x8x8xf32, #tpu.memory_space<vmem>>, vector<1x1x8x8x8xf32>
      %15 = vector.shape_cast %14 : vector<1x1x8x8x8xf32> to vector<8x8x8xf32>
      %c3 = arith.constant 3 : index
      %c3_9 = arith.constant 3 : index
      %c0_10 = arith.constant 0 : index
      %16 = vector.load %arg15[%c3, %c3_9, %c0_10] : memref<14x14x8xf32, #tpu.memory_space<vmem>>, vector<8x8x8xf32>
      tpu.vector_store %arg15[%c3, %c3_9, %c0_10], %15 {strides = array<i32>} : memref<14x14x8xf32, #tpu.memory_space<vmem>>, vector<8x8x8xf32>,
      %c3_i32_11 = arith.constant 3 : i32
      %17 = arith.subi %arg2, %c3_i32_11 : i32
      %c0_i32_12 = arith.constant 0 : i32
      %18 = arith.cmpi sge, %17, %c0_i32_12 : i32
      %c8_i32_13 = arith.constant 8 : i32
      %19 = arith.cmpi slt, %17, %c8_i32_13 : i32
      %20 = arith.andi %18, %19 : i1
      %21 = arith.extui %20 : i1 to i32
      %c0_i32_14 = arith.constant 0 : i32
      %22 = arith.cmpi ne, %21, %c0_i32_14 : i32
      scf.if %22 {
        %24 = vector.shape_cast %15 : vector<8x8x8xf32> to vector<1x8x8x8xf32>
        %25 = arith.index_cast %17 : i32 to index
        %c0_17 = arith.constant 0 : index
        %c0_18 = arith.constant 0 : index
        %c0_19 = arith.constant 0 : index
        %26 = vector.load %arg17[%25, %c0_17, %c0_18, %c0_19] : memref<8x8x8x8xf32, #tpu.memory_space<vmem>>, vector<1x8x8x8xf32>
        tpu.vector_store %arg17[%25, %c0_17, %c0_18, %c0_19], %24 {strides = array<i32>} : memref<8x8x8x8xf32, #tpu.memory_space<vmem>>, vector<1x8x8x8xf32>,
      } else {
      }
      %c0_i32_15 = arith.constant 0 : i32
      %c7_i32 = arith.constant 7 : i32
      %23 = arith.addi %c0_i32_15, %c7_i32 : i32
      %c1_i32 = arith.constant 1 : i32
      scf.for %arg18 = %c0_i32_15 to %23 step %c1_i32  : i32 {
        %c1_i32_17 = arith.constant 1 : i32
        %24 = arith.muli %arg18, %c1_i32_17 : i32
        %c0_i32_18 = arith.constant 0 : i32
        %25 = arith.addi %c0_i32_18, %24 : i32
        %26 = arith.subi %arg2, %25 : i32
        %c0_i32_19 = arith.constant 0 : i32
        %27 = arith.cmpi sge, %26, %c0_i32_19 : i32
        %c8_i32_20 = arith.constant 8 : i32
        %28 = arith.cmpi slt, %26, %c8_i32_20 : i32
        %29 = arith.andi %27, %28 : i1
        %30 = arith.extui %29 : i1 to i32
        %c0_i32_21 = arith.constant 0 : i32
        %31 = arith.cmpi ne, %30, %c0_i32_21 : i32
        scf.if %31 {
          %32 = arith.index_cast %25 : i32 to index
          %c0_22 = arith.constant 0 : index
          %c0_23 = arith.constant 0 : index
          %c0_24 = arith.constant 0 : index
          %33 = vector.load %arg5[%32, %c0_22, %c0_23, %c0_24] : memref<7x7x7x8xf32, #tpu.memory_space<vmem>>, vector<1x7x7x8xf32>
          %34 = arith.index_cast %26 : i32 to index
          %c0_25 = arith.constant 0 : index
          %c0_26 = arith.constant 0 : index
          %c0_27 = arith.constant 0 : index
          %35 = vector.load %arg16[%34, %c0_25, %c0_26, %c0_27] : memref<8x8x8x8xf32, #tpu.memory_space<vmem>>, vector<1x8x8x8xf32>
          %c0_28 = arith.constant 0 : index
          %c0_29 = arith.constant 0 : index
          %c0_30 = arith.constant 0 : index
          %36 = vector.load %arg15[%c0_28, %c0_29, %c0_30] : memref<14x14x8xf32, #tpu.memory_space<vmem>>, vector<8x8x8xf32>
          %37 = vector.extract_strided_slice %33 {offsets = [0, 0, 0, 0], sizes = [1, 1, 1, 8], strides = [1, 1, 1, 1]} : vector<1x7x7x8xf32> to vector<1x1x1x8xf32>
          %38 = vector.shape_cast %37 : vector<1x1x1x8xf32> to vector<8xf32>
          %39 = vector.shape_cast %38 : vector<8xf32> to vector<1x1x8xf32>
          %40 = vector.broadcast %39 : vector<1x1x8xf32> to vector<8x8x8xf32>
          %41 = arith.mulf %36, %40 : vector<8x8x8xf32>
          %42 = vector.shape_cast %41 : vector<8x8x8xf32> to vector<1x8x8x8xf32>
          %43 = arith.addf %35, %42 : vector<1x8x8x8xf32>
          %c0_31 = arith.constant 0 : index
          %c1 = arith.constant 1 : index
          %c0_32 = arith.constant 0 : index
          %44 = vector.load %arg15[%c0_31, %c1, %c0_32] : memref<14x14x8xf32, #tpu.memory_space<vmem>>, vector<8x8x8xf32>
          %45 = vector.extract_strided_slice %33 {offsets = [0, 0, 1, 0], sizes = [1, 1, 1, 8], strides = [1, 1, 1, 1]} : vector<1x7x7x8xf32> to vector<1x1x1x8xf32>
          %46 = vector.shape_cast %45 : vector<1x1x1x8xf32> to vector<8xf32>
          %47 = vector.shape_cast %46 : vector<8xf32> to vector<1x1x8xf32>
          %48 = vector.broadcast %47 : vector<1x1x8xf32> to vector<8x8x8xf32>
          %49 = arith.mulf %44, %48 : vector<8x8x8xf32>
          %50 = vector.shape_cast %49 : vector<8x8x8xf32> to vector<1x8x8x8xf32>
          %51 = arith.addf %43, %50 : vector<1x8x8x8xf32>
          %c0_33 = arith.constant 0 : index
          %c2 = arith.constant 2 : index
          %c0_34 = arith.constant 0 : index
          %52 = vector.load %arg15[%c0_33, %c2, %c0_34] : memref<14x14x8xf32, #tpu.memory_space<vmem>>, vector<8x8x8xf32>
          %53 = vector.extract_strided_slice %33 {offsets = [0, 0, 2, 0], sizes = [1, 1, 1, 8], strides = [1, 1, 1, 1]} : vector<1x7x7x8xf32> to vector<1x1x1x8xf32>
          %54 = vector.shape_cast %53 : vector<1x1x1x8xf32> to vector<8xf32>
          %55 = vector.shape_cast %54 : vector<8xf32> to vector<1x1x8xf32>
          %56 = vector.broadcast %55 : vector<1x1x8xf32> to vector<8x8x8xf32>
          %57 = arith.mulf %52, %56 : vector<8x8x8xf32>
          %58 = vector.shape_cast %57 : vector<8x8x8xf32> to vector<1x8x8x8xf32>
          %59 = arith.addf %51, %58 : vector<1x8x8x8xf32>
          %c0_35 = arith.constant 0 : index
          %c3_36 = arith.constant 3 : index
          %c0_37 = arith.constant 0 : index
          %60 = vector.load %arg15[%c0_35, %c3_36, %c0_37] : memref<14x14x8xf32, #tpu.memory_space<vmem>>, vector<8x8x8xf32>
          %61 = vector.extract_strided_slice %33 {offsets = [0, 0, 3, 0], sizes = [1, 1, 1, 8], strides = [1, 1, 1, 1]} : vector<1x7x7x8xf32> to vector<1x1x1x8xf32>
          %62 = vector.shape_cast %61 : vector<1x1x1x8xf32> to vector<8xf32>
          %63 = vector.shape_cast %62 : vector<8xf32> to vector<1x1x8xf32>
          %64 = vector.broadcast %63 : vector<1x1x8xf32> to vector<8x8x8xf32>
          %65 = arith.mulf %60, %64 : vector<8x8x8xf32>
          %66 = vector.shape_cast %65 : vector<8x8x8xf32> to vector<1x8x8x8xf32>
          %67 = arith.addf %59, %66 : vector<1x8x8x8xf32>
          %c0_38 = arith.constant 0 : index
          %c4 = arith.constant 4 : index
          %c0_39 = arith.constant 0 : index
          %68 = vector.load %arg15[%c0_38, %c4, %c0_39] : memref<14x14x8xf32, #tpu.memory_space<vmem>>, vector<8x8x8xf32>
          %69 = vector.extract_strided_slice %33 {offsets = [0, 0, 4, 0], sizes = [1, 1, 1, 8], strides = [1, 1, 1, 1]} : vector<1x7x7x8xf32> to vector<1x1x1x8xf32>
          %70 = vector.shape_cast %69 : vector<1x1x1x8xf32> to vector<8xf32>
          %71 = vector.shape_cast %70 : vector<8xf32> to vector<1x1x8xf32>
          %72 = vector.broadcast %71 : vector<1x1x8xf32> to vector<8x8x8xf32>
          %73 = arith.mulf %68, %72 : vector<8x8x8xf32>
          %74 = vector.shape_cast %73 : vector<8x8x8xf32> to vector<1x8x8x8xf32>
          %75 = arith.addf %67, %74 : vector<1x8x8x8xf32>
          %c0_40 = arith.constant 0 : index
          %c5 = arith.constant 5 : index
          %c0_41 = arith.constant 0 : index
          %76 = vector.load %arg15[%c0_40, %c5, %c0_41] : memref<14x14x8xf32, #tpu.memory_space<vmem>>, vector<8x8x8xf32>
          %77 = vector.extract_strided_slice %33 {offsets = [0, 0, 5, 0], sizes = [1, 1, 1, 8], strides = [1, 1, 1, 1]} : vector<1x7x7x8xf32> to vector<1x1x1x8xf32>
          %78 = vector.shape_cast %77 : vector<1x1x1x8xf32> to vector<8xf32>
          %79 = vector.shape_cast %78 : vector<8xf32> to vector<1x1x8xf32>
          %80 = vector.broadcast %79 : vector<1x1x8xf32> to vector<8x8x8xf32>
          %81 = arith.mulf %76, %80 : vector<8x8x8xf32>
          %82 = vector.shape_cast %81 : vector<8x8x8xf32> to vector<1x8x8x8xf32>
          %83 = arith.addf %75, %82 : vector<1x8x8x8xf32>
          %c0_42 = arith.constant 0 : index
          %c6 = arith.constant 6 : index
          %c0_43 = arith.constant 0 : index
          %84 = vector.load %arg15[%c0_42, %c6, %c0_43] : memref<14x14x8xf32, #tpu.memory_space<vmem>>, vector<8x8x8xf32>
          %85 = vector.extract_strided_slice %33 {offsets = [0, 0, 6, 0], sizes = [1, 1, 1, 8], strides = [1, 1, 1, 1]} : vector<1x7x7x8xf32> to vector<1x1x1x8xf32>
          %86 = vector.shape_cast %85 : vector<1x1x1x8xf32> to vector<8xf32>
          %87 = vector.shape_cast %86 : vector<8xf32> to vector<1x1x8xf32>
          %88 = vector.broadcast %87 : vector<1x1x8xf32> to vector<8x8x8xf32>
          %89 = arith.mulf %84, %88 : vector<8x8x8xf32>
          %90 = vector.shape_cast %89 : vector<8x8x8xf32> to vector<1x8x8x8xf32>
          %91 = arith.addf %83, %90 : vector<1x8x8x8xf32>
          %c1_44 = arith.constant 1 : index
          %c0_45 = arith.constant 0 : index
          %c0_46 = arith.constant 0 : index
          %92 = vector.load %arg15[%c1_44, %c0_45, %c0_46] : memref<14x14x8xf32, #tpu.memory_space<vmem>>, vector<8x8x8xf32>
          %93 = vector.extract_strided_slice %33 {offsets = [0, 1, 0, 0], sizes = [1, 1, 1, 8], strides = [1, 1, 1, 1]} : vector<1x7x7x8xf32> to vector<1x1x1x8xf32>
          %94 = vector.shape_cast %93 : vector<1x1x1x8xf32> to vector<8xf32>
          %95 = vector.shape_cast %94 : vector<8xf32> to vector<1x1x8xf32>
          %96 = vector.broadcast %95 : vector<1x1x8xf32> to vector<8x8x8xf32>
          %97 = arith.mulf %92, %96 : vector<8x8x8xf32>
          %98 = vector.shape_cast %97 : vector<8x8x8xf32> to vector<1x8x8x8xf32>
          %99 = arith.addf %91, %98 : vector<1x8x8x8xf32>
          %c1_47 = arith.constant 1 : index
          %c1_48 = arith.constant 1 : index
          %c0_49 = arith.constant 0 : index
          %100 = vector.load %arg15[%c1_47, %c1_48, %c0_49] : memref<14x14x8xf32, #tpu.memory_space<vmem>>, vector<8x8x8xf32>
          %101 = vector.extract_strided_slice %33 {offsets = [0, 1, 1, 0], sizes = [1, 1, 1, 8], strides = [1, 1, 1, 1]} : vector<1x7x7x8xf32> to vector<1x1x1x8xf32>
          %102 = vector.shape_cast %101 : vector<1x1x1x8xf32> to vector<8xf32>
          %103 = vector.shape_cast %102 : vector<8xf32> to vector<1x1x8xf32>
          %104 = vector.broadcast %103 : vector<1x1x8xf32> to vector<8x8x8xf32>
          %105 = arith.mulf %100, %104 : vector<8x8x8xf32>
          %106 = vector.shape_cast %105 : vector<8x8x8xf32> to vector<1x8x8x8xf32>
          %107 = arith.addf %99, %106 : vector<1x8x8x8xf32>
          %c1_50 = arith.constant 1 : index
          %c2_51 = arith.constant 2 : index
          %c0_52 = arith.constant 0 : index
          %108 = vector.load %arg15[%c1_50, %c2_51, %c0_52] : memref<14x14x8xf32, #tpu.memory_space<vmem>>, vector<8x8x8xf32>
          %109 = vector.extract_strided_slice %33 {offsets = [0, 1, 2, 0], sizes = [1, 1, 1, 8], strides = [1, 1, 1, 1]} : vector<1x7x7x8xf32> to vector<1x1x1x8xf32>
          %110 = vector.shape_cast %109 : vector<1x1x1x8xf32> to vector<8xf32>
          %111 = vector.shape_cast %110 : vector<8xf32> to vector<1x1x8xf32>
          %112 = vector.broadcast %111 : vector<1x1x8xf32> to vector<8x8x8xf32>
          %113 = arith.mulf %108, %112 : vector<8x8x8xf32>
          %114 = vector.shape_cast %113 : vector<8x8x8xf32> to vector<1x8x8x8xf32>
          %115 = arith.addf %107, %114 : vector<1x8x8x8xf32>
          %c1_53 = arith.constant 1 : index
          %c3_54 = arith.constant 3 : index
          %c0_55 = arith.constant 0 : index
          %116 = vector.load %arg15[%c1_53, %c3_54, %c0_55] : memref<14x14x8xf32, #tpu.memory_space<vmem>>, vector<8x8x8xf32>
          %117 = vector.extract_strided_slice %33 {offsets = [0, 1, 3, 0], sizes = [1, 1, 1, 8], strides = [1, 1, 1, 1]} : vector<1x7x7x8xf32> to vector<1x1x1x8xf32>
          %118 = vector.shape_cast %117 : vector<1x1x1x8xf32> to vector<8xf32>
          %119 = vector.shape_cast %118 : vector<8xf32> to vector<1x1x8xf32>
          %120 = vector.broadcast %119 : vector<1x1x8xf32> to vector<8x8x8xf32>
          %121 = arith.mulf %116, %120 : vector<8x8x8xf32>
          %122 = vector.shape_cast %121 : vector<8x8x8xf32> to vector<1x8x8x8xf32>
          %123 = arith.addf %115, %122 : vector<1x8x8x8xf32>
          %c1_56 = arith.constant 1 : index
          %c4_57 = arith.constant 4 : index
          %c0_58 = arith.constant 0 : index
          %124 = vector.load %arg15[%c1_56, %c4_57, %c0_58] : memref<14x14x8xf32, #tpu.memory_space<vmem>>, vector<8x8x8xf32>
          %125 = vector.extract_strided_slice %33 {offsets = [0, 1, 4, 0], sizes = [1, 1, 1, 8], strides = [1, 1, 1, 1]} : vector<1x7x7x8xf32> to vector<1x1x1x8xf32>
          %126 = vector.shape_cast %125 : vector<1x1x1x8xf32> to vector<8xf32>
          %127 = vector.shape_cast %126 : vector<8xf32> to vector<1x1x8xf32>
          %128 = vector.broadcast %127 : vector<1x1x8xf32> to vector<8x8x8xf32>
          %129 = arith.mulf %124, %128 : vector<8x8x8xf32>
          %130 = vector.shape_cast %129 : vector<8x8x8xf32> to vector<1x8x8x8xf32>
          %131 = arith.addf %123, %130 : vector<1x8x8x8xf32>
          %c1_59 = arith.constant 1 : index
          %c5_60 = arith.constant 5 : index
          %c0_61 = arith.constant 0 : index
          %132 = vector.load %arg15[%c1_59, %c5_60, %c0_61] : memref<14x14x8xf32, #tpu.memory_space<vmem>>, vector<8x8x8xf32>
          %133 = vector.extract_strided_slice %33 {offsets = [0, 1, 5, 0], sizes = [1, 1, 1, 8], strides = [1, 1, 1, 1]} : vector<1x7x7x8xf32> to vector<1x1x1x8xf32>
          %134 = vector.shape_cast %133 : vector<1x1x1x8xf32> to vector<8xf32>
          %135 = vector.shape_cast %134 : vector<8xf32> to vector<1x1x8xf32>
          %136 = vector.broadcast %135 : vector<1x1x8xf32> to vector<8x8x8xf32>
          %137 = arith.mulf %132, %136 : vector<8x8x8xf32>
          %138 = vector.shape_cast %137 : vector<8x8x8xf32> to vector<1x8x8x8xf32>
          %139 = arith.addf %131, %138 : vector<1x8x8x8xf32>
          %c1_62 = arith.constant 1 : index
          %c6_63 = arith.constant 6 : index
          %c0_64 = arith.constant 0 : index
          %140 = vector.load %arg15[%c1_62, %c6_63, %c0_64] : memref<14x14x8xf32, #tpu.memory_space<vmem>>, vector<8x8x8xf32>
          %141 = vector.extract_strided_slice %33 {offsets = [0, 1, 6, 0], sizes = [1, 1, 1, 8], strides = [1, 1, 1, 1]} : vector<1x7x7x8xf32> to vector<1x1x1x8xf32>
          %142 = vector.shape_cast %141 : vector<1x1x1x8xf32> to vector<8xf32>
          %143 = vector.shape_cast %142 : vector<8xf32> to vector<1x1x8xf32>
          %144 = vector.broadcast %143 : vector<1x1x8xf32> to vector<8x8x8xf32>
          %145 = arith.mulf %140, %144 : vector<8x8x8xf32>
          %146 = vector.shape_cast %145 : vector<8x8x8xf32> to vector<1x8x8x8xf32>
          %147 = arith.addf %139, %146 : vector<1x8x8x8xf32>
          %c2_65 = arith.constant 2 : index
          %c0_66 = arith.constant 0 : index
          %c0_67 = arith.constant 0 : index
          %148 = vector.load %arg15[%c2_65, %c0_66, %c0_67] : memref<14x14x8xf32, #tpu.memory_space<vmem>>, vector<8x8x8xf32>
          %149 = vector.extract_strided_slice %33 {offsets = [0, 2, 0, 0], sizes = [1, 1, 1, 8], strides = [1, 1, 1, 1]} : vector<1x7x7x8xf32> to vector<1x1x1x8xf32>
          %150 = vector.shape_cast %149 : vector<1x1x1x8xf32> to vector<8xf32>
          %151 = vector.shape_cast %150 : vector<8xf32> to vector<1x1x8xf32>
          %152 = vector.broadcast %151 : vector<1x1x8xf32> to vector<8x8x8xf32>
          %153 = arith.mulf %148, %152 : vector<8x8x8xf32>
          %154 = vector.shape_cast %153 : vector<8x8x8xf32> to vector<1x8x8x8xf32>
          %155 = arith.addf %147, %154 : vector<1x8x8x8xf32>
          %c2_68 = arith.constant 2 : index
          %c1_69 = arith.constant 1 : index
          %c0_70 = arith.constant 0 : index
          %156 = vector.load %arg15[%c2_68, %c1_69, %c0_70] : memref<14x14x8xf32, #tpu.memory_space<vmem>>, vector<8x8x8xf32>
          %157 = vector.extract_strided_slice %33 {offsets = [0, 2, 1, 0], sizes = [1, 1, 1, 8], strides = [1, 1, 1, 1]} : vector<1x7x7x8xf32> to vector<1x1x1x8xf32>
          %158 = vector.shape_cast %157 : vector<1x1x1x8xf32> to vector<8xf32>
          %159 = vector.shape_cast %158 : vector<8xf32> to vector<1x1x8xf32>
          %160 = vector.broadcast %159 : vector<1x1x8xf32> to vector<8x8x8xf32>
          %161 = arith.mulf %156, %160 : vector<8x8x8xf32>
          %162 = vector.shape_cast %161 : vector<8x8x8xf32> to vector<1x8x8x8xf32>
          %163 = arith.addf %155, %162 : vector<1x8x8x8xf32>
          %c2_71 = arith.constant 2 : index
          %c2_72 = arith.constant 2 : index
          %c0_73 = arith.constant 0 : index
          %164 = vector.load %arg15[%c2_71, %c2_72, %c0_73] : memref<14x14x8xf32, #tpu.memory_space<vmem>>, vector<8x8x8xf32>
          %165 = vector.extract_strided_slice %33 {offsets = [0, 2, 2, 0], sizes = [1, 1, 1, 8], strides = [1, 1, 1, 1]} : vector<1x7x7x8xf32> to vector<1x1x1x8xf32>
          %166 = vector.shape_cast %165 : vector<1x1x1x8xf32> to vector<8xf32>
          %167 = vector.shape_cast %166 : vector<8xf32> to vector<1x1x8xf32>
          %168 = vector.broadcast %167 : vector<1x1x8xf32> to vector<8x8x8xf32>
          %169 = arith.mulf %164, %168 : vector<8x8x8xf32>
          %170 = vector.shape_cast %169 : vector<8x8x8xf32> to vector<1x8x8x8xf32>
          %171 = arith.addf %163, %170 : vector<1x8x8x8xf32>
          %c2_74 = arith.constant 2 : index
          %c3_75 = arith.constant 3 : index
          %c0_76 = arith.constant 0 : index
          %172 = vector.load %arg15[%c2_74, %c3_75, %c0_76] : memref<14x14x8xf32, #tpu.memory_space<vmem>>, vector<8x8x8xf32>
          %173 = vector.extract_strided_slice %33 {offsets = [0, 2, 3, 0], sizes = [1, 1, 1, 8], strides = [1, 1, 1, 1]} : vector<1x7x7x8xf32> to vector<1x1x1x8xf32>
          %174 = vector.shape_cast %173 : vector<1x1x1x8xf32> to vector<8xf32>
          %175 = vector.shape_cast %174 : vector<8xf32> to vector<1x1x8xf32>
          %176 = vector.broadcast %175 : vector<1x1x8xf32> to vector<8x8x8xf32>
          %177 = arith.mulf %172, %176 : vector<8x8x8xf32>
          %178 = vector.shape_cast %177 : vector<8x8x8xf32> to vector<1x8x8x8xf32>
          %179 = arith.addf %171, %178 : vector<1x8x8x8xf32>
          %c2_77 = arith.constant 2 : index
          %c4_78 = arith.constant 4 : index
          %c0_79 = arith.constant 0 : index
          %180 = vector.load %arg15[%c2_77, %c4_78, %c0_79] : memref<14x14x8xf32, #tpu.memory_space<vmem>>, vector<8x8x8xf32>
          %181 = vector.extract_strided_slice %33 {offsets = [0, 2, 4, 0], sizes = [1, 1, 1, 8], strides = [1, 1, 1, 1]} : vector<1x7x7x8xf32> to vector<1x1x1x8xf32>
          %182 = vector.shape_cast %181 : vector<1x1x1x8xf32> to vector<8xf32>
          %183 = vector.shape_cast %182 : vector<8xf32> to vector<1x1x8xf32>
          %184 = vector.broadcast %183 : vector<1x1x8xf32> to vector<8x8x8xf32>
          %185 = arith.mulf %180, %184 : vector<8x8x8xf32>
          %186 = vector.shape_cast %185 : vector<8x8x8xf32> to vector<1x8x8x8xf32>
          %187 = arith.addf %179, %186 : vector<1x8x8x8xf32>
          %c2_80 = arith.constant 2 : index
          %c5_81 = arith.constant 5 : index
          %c0_82 = arith.constant 0 : index
          %188 = vector.load %arg15[%c2_80, %c5_81, %c0_82] : memref<14x14x8xf32, #tpu.memory_space<vmem>>, vector<8x8x8xf32>
          %189 = vector.extract_strided_slice %33 {offsets = [0, 2, 5, 0], sizes = [1, 1, 1, 8], strides = [1, 1, 1, 1]} : vector<1x7x7x8xf32> to vector<1x1x1x8xf32>
          %190 = vector.shape_cast %189 : vector<1x1x1x8xf32> to vector<8xf32>
          %191 = vector.shape_cast %190 : vector<8xf32> to vector<1x1x8xf32>
          %192 = vector.broadcast %191 : vector<1x1x8xf32> to vector<8x8x8xf32>
          %193 = arith.mulf %188, %192 : vector<8x8x8xf32>
          %194 = vector.shape_cast %193 : vector<8x8x8xf32> to vector<1x8x8x8xf32>
          %195 = arith.addf %187, %194 : vector<1x8x8x8xf32>
          %c2_83 = arith.constant 2 : index
          %c6_84 = arith.constant 6 : index
          %c0_85 = arith.constant 0 : index
          %196 = vector.load %arg15[%c2_83, %c6_84, %c0_85] : memref<14x14x8xf32, #tpu.memory_space<vmem>>, vector<8x8x8xf32>
          %197 = vector.extract_strided_slice %33 {offsets = [0, 2, 6, 0], sizes = [1, 1, 1, 8], strides = [1, 1, 1, 1]} : vector<1x7x7x8xf32> to vector<1x1x1x8xf32>
          %198 = vector.shape_cast %197 : vector<1x1x1x8xf32> to vector<8xf32>
          %199 = vector.shape_cast %198 : vector<8xf32> to vector<1x1x8xf32>
          %200 = vector.broadcast %199 : vector<1x1x8xf32> to vector<8x8x8xf32>
          %201 = arith.mulf %196, %200 : vector<8x8x8xf32>
          %202 = vector.shape_cast %201 : vector<8x8x8xf32> to vector<1x8x8x8xf32>
          %203 = arith.addf %195, %202 : vector<1x8x8x8xf32>
          %c3_86 = arith.constant 3 : index
          %c0_87 = arith.constant 0 : index
          %c0_88 = arith.constant 0 : index
          %204 = vector.load %arg15[%c3_86, %c0_87, %c0_88] : memref<14x14x8xf32, #tpu.memory_space<vmem>>, vector<8x8x8xf32>
          %205 = vector.extract_strided_slice %33 {offsets = [0, 3, 0, 0], sizes = [1, 1, 1, 8], strides = [1, 1, 1, 1]} : vector<1x7x7x8xf32> to vector<1x1x1x8xf32>
          %206 = vector.shape_cast %205 : vector<1x1x1x8xf32> to vector<8xf32>
          %207 = vector.shape_cast %206 : vector<8xf32> to vector<1x1x8xf32>
          %208 = vector.broadcast %207 : vector<1x1x8xf32> to vector<8x8x8xf32>
          %209 = arith.mulf %204, %208 : vector<8x8x8xf32>
          %210 = vector.shape_cast %209 : vector<8x8x8xf32> to vector<1x8x8x8xf32>
          %211 = arith.addf %203, %210 : vector<1x8x8x8xf32>
          %c3_89 = arith.constant 3 : index
          %c1_90 = arith.constant 1 : index
          %c0_91 = arith.constant 0 : index
          %212 = vector.load %arg15[%c3_89, %c1_90, %c0_91] : memref<14x14x8xf32, #tpu.memory_space<vmem>>, vector<8x8x8xf32>
          %213 = vector.extract_strided_slice %33 {offsets = [0, 3, 1, 0], sizes = [1, 1, 1, 8], strides = [1, 1, 1, 1]} : vector<1x7x7x8xf32> to vector<1x1x1x8xf32>
          %214 = vector.shape_cast %213 : vector<1x1x1x8xf32> to vector<8xf32>
          %215 = vector.shape_cast %214 : vector<8xf32> to vector<1x1x8xf32>
          %216 = vector.broadcast %215 : vector<1x1x8xf32> to vector<8x8x8xf32>
          %217 = arith.mulf %212, %216 : vector<8x8x8xf32>
          %218 = vector.shape_cast %217 : vector<8x8x8xf32> to vector<1x8x8x8xf32>
          %219 = arith.addf %211, %218 : vector<1x8x8x8xf32>
          %c3_92 = arith.constant 3 : index
          %c2_93 = arith.constant 2 : index
          %c0_94 = arith.constant 0 : index
          %220 = vector.load %arg15[%c3_92, %c2_93, %c0_94] : memref<14x14x8xf32, #tpu.memory_space<vmem>>, vector<8x8x8xf32>
          %221 = vector.extract_strided_slice %33 {offsets = [0, 3, 2, 0], sizes = [1, 1, 1, 8], strides = [1, 1, 1, 1]} : vector<1x7x7x8xf32> to vector<1x1x1x8xf32>
          %222 = vector.shape_cast %221 : vector<1x1x1x8xf32> to vector<8xf32>
          %223 = vector.shape_cast %222 : vector<8xf32> to vector<1x1x8xf32>
          %224 = vector.broadcast %223 : vector<1x1x8xf32> to vector<8x8x8xf32>
          %225 = arith.mulf %220, %224 : vector<8x8x8xf32>
          %226 = vector.shape_cast %225 : vector<8x8x8xf32> to vector<1x8x8x8xf32>
          %227 = arith.addf %219, %226 : vector<1x8x8x8xf32>
          %c3_95 = arith.constant 3 : index
          %c3_96 = arith.constant 3 : index
          %c0_97 = arith.constant 0 : index
          %228 = vector.load %arg15[%c3_95, %c3_96, %c0_97] : memref<14x14x8xf32, #tpu.memory_space<vmem>>, vector<8x8x8xf32>
          %229 = vector.extract_strided_slice %33 {offsets = [0, 3, 3, 0], sizes = [1, 1, 1, 8], strides = [1, 1, 1, 1]} : vector<1x7x7x8xf32> to vector<1x1x1x8xf32>
          %230 = vector.shape_cast %229 : vector<1x1x1x8xf32> to vector<8xf32>
          %231 = vector.shape_cast %230 : vector<8xf32> to vector<1x1x8xf32>
          %232 = vector.broadcast %231 : vector<1x1x8xf32> to vector<8x8x8xf32>
          %233 = arith.mulf %228, %232 : vector<8x8x8xf32>
          %234 = vector.shape_cast %233 : vector<8x8x8xf32> to vector<1x8x8x8xf32>
          %235 = arith.addf %227, %234 : vector<1x8x8x8xf32>
          %c3_98 = arith.constant 3 : index
          %c4_99 = arith.constant 4 : index
          %c0_100 = arith.constant 0 : index
          %236 = vector.load %arg15[%c3_98, %c4_99, %c0_100] : memref<14x14x8xf32, #tpu.memory_space<vmem>>, vector<8x8x8xf32>
          %237 = vector.extract_strided_slice %33 {offsets = [0, 3, 4, 0], sizes = [1, 1, 1, 8], strides = [1, 1, 1, 1]} : vector<1x7x7x8xf32> to vector<1x1x1x8xf32>
          %238 = vector.shape_cast %237 : vector<1x1x1x8xf32> to vector<8xf32>
          %239 = vector.shape_cast %238 : vector<8xf32> to vector<1x1x8xf32>
          %240 = vector.broadcast %239 : vector<1x1x8xf32> to vector<8x8x8xf32>
          %241 = arith.mulf %236, %240 : vector<8x8x8xf32>
          %242 = vector.shape_cast %241 : vector<8x8x8xf32> to vector<1x8x8x8xf32>
          %243 = arith.addf %235, %242 : vector<1x8x8x8xf32>
          %c3_101 = arith.constant 3 : index
          %c5_102 = arith.constant 5 : index
          %c0_103 = arith.constant 0 : index
          %244 = vector.load %arg15[%c3_101, %c5_102, %c0_103] : memref<14x14x8xf32, #tpu.memory_space<vmem>>, vector<8x8x8xf32>
          %245 = vector.extract_strided_slice %33 {offsets = [0, 3, 5, 0], sizes = [1, 1, 1, 8], strides = [1, 1, 1, 1]} : vector<1x7x7x8xf32> to vector<1x1x1x8xf32>
          %246 = vector.shape_cast %245 : vector<1x1x1x8xf32> to vector<8xf32>
          %247 = vector.shape_cast %246 : vector<8xf32> to vector<1x1x8xf32>
          %248 = vector.broadcast %247 : vector<1x1x8xf32> to vector<8x8x8xf32>
          %249 = arith.mulf %244, %248 : vector<8x8x8xf32>
          %250 = vector.shape_cast %249 : vector<8x8x8xf32> to vector<1x8x8x8xf32>
          %251 = arith.addf %243, %250 : vector<1x8x8x8xf32>
          %c3_104 = arith.constant 3 : index
          %c6_105 = arith.constant 6 : index
          %c0_106 = arith.constant 0 : index
          %252 = vector.load %arg15[%c3_104, %c6_105, %c0_106] : memref<14x14x8xf32, #tpu.memory_space<vmem>>, vector<8x8x8xf32>
          %253 = vector.extract_strided_slice %33 {offsets = [0, 3, 6, 0], sizes = [1, 1, 1, 8], strides = [1, 1, 1, 1]} : vector<1x7x7x8xf32> to vector<1x1x1x8xf32>
          %254 = vector.shape_cast %253 : vector<1x1x1x8xf32> to vector<8xf32>
          %255 = vector.shape_cast %254 : vector<8xf32> to vector<1x1x8xf32>
          %256 = vector.broadcast %255 : vector<1x1x8xf32> to vector<8x8x8xf32>
          %257 = arith.mulf %252, %256 : vector<8x8x8xf32>
          %258 = vector.shape_cast %257 : vector<8x8x8xf32> to vector<1x8x8x8xf32>
          %259 = arith.addf %251, %258 : vector<1x8x8x8xf32>
          %c4_107 = arith.constant 4 : index
          %c0_108 = arith.constant 0 : index
          %c0_109 = arith.constant 0 : index
          %260 = vector.load %arg15[%c4_107, %c0_108, %c0_109] : memref<14x14x8xf32, #tpu.memory_space<vmem>>, vector<8x8x8xf32>
          %261 = vector.extract_strided_slice %33 {offsets = [0, 4, 0, 0], sizes = [1, 1, 1, 8], strides = [1, 1, 1, 1]} : vector<1x7x7x8xf32> to vector<1x1x1x8xf32>
          %262 = vector.shape_cast %261 : vector<1x1x1x8xf32> to vector<8xf32>
          %263 = vector.shape_cast %262 : vector<8xf32> to vector<1x1x8xf32>
          %264 = vector.broadcast %263 : vector<1x1x8xf32> to vector<8x8x8xf32>
          %265 = arith.mulf %260, %264 : vector<8x8x8xf32>
          %266 = vector.shape_cast %265 : vector<8x8x8xf32> to vector<1x8x8x8xf32>
          %267 = arith.addf %259, %266 : vector<1x8x8x8xf32>
          %c4_110 = arith.constant 4 : index
          %c1_111 = arith.constant 1 : index
          %c0_112 = arith.constant 0 : index
          %268 = vector.load %arg15[%c4_110, %c1_111, %c0_112] : memref<14x14x8xf32, #tpu.memory_space<vmem>>, vector<8x8x8xf32>
          %269 = vector.extract_strided_slice %33 {offsets = [0, 4, 1, 0], sizes = [1, 1, 1, 8], strides = [1, 1, 1, 1]} : vector<1x7x7x8xf32> to vector<1x1x1x8xf32>
          %270 = vector.shape_cast %269 : vector<1x1x1x8xf32> to vector<8xf32>
          %271 = vector.shape_cast %270 : vector<8xf32> to vector<1x1x8xf32>
          %272 = vector.broadcast %271 : vector<1x1x8xf32> to vector<8x8x8xf32>
          %273 = arith.mulf %268, %272 : vector<8x8x8xf32>
          %274 = vector.shape_cast %273 : vector<8x8x8xf32> to vector<1x8x8x8xf32>
          %275 = arith.addf %267, %274 : vector<1x8x8x8xf32>
          %c4_113 = arith.constant 4 : index
          %c2_114 = arith.constant 2 : index
          %c0_115 = arith.constant 0 : index
          %276 = vector.load %arg15[%c4_113, %c2_114, %c0_115] : memref<14x14x8xf32, #tpu.memory_space<vmem>>, vector<8x8x8xf32>
          %277 = vector.extract_strided_slice %33 {offsets = [0, 4, 2, 0], sizes = [1, 1, 1, 8], strides = [1, 1, 1, 1]} : vector<1x7x7x8xf32> to vector<1x1x1x8xf32>
          %278 = vector.shape_cast %277 : vector<1x1x1x8xf32> to vector<8xf32>
          %279 = vector.shape_cast %278 : vector<8xf32> to vector<1x1x8xf32>
          %280 = vector.broadcast %279 : vector<1x1x8xf32> to vector<8x8x8xf32>
          %281 = arith.mulf %276, %280 : vector<8x8x8xf32>
          %282 = vector.shape_cast %281 : vector<8x8x8xf32> to vector<1x8x8x8xf32>
          %283 = arith.addf %275, %282 : vector<1x8x8x8xf32>
          %c4_116 = arith.constant 4 : index
          %c3_117 = arith.constant 3 : index
          %c0_118 = arith.constant 0 : index
          %284 = vector.load %arg15[%c4_116, %c3_117, %c0_118] : memref<14x14x8xf32, #tpu.memory_space<vmem>>, vector<8x8x8xf32>
          %285 = vector.extract_strided_slice %33 {offsets = [0, 4, 3, 0], sizes = [1, 1, 1, 8], strides = [1, 1, 1, 1]} : vector<1x7x7x8xf32> to vector<1x1x1x8xf32>
          %286 = vector.shape_cast %285 : vector<1x1x1x8xf32> to vector<8xf32>
          %287 = vector.shape_cast %286 : vector<8xf32> to vector<1x1x8xf32>
          %288 = vector.broadcast %287 : vector<1x1x8xf32> to vector<8x8x8xf32>
          %289 = arith.mulf %284, %288 : vector<8x8x8xf32>
          %290 = vector.shape_cast %289 : vector<8x8x8xf32> to vector<1x8x8x8xf32>
          %291 = arith.addf %283, %290 : vector<1x8x8x8xf32>
          %c4_119 = arith.constant 4 : index
          %c4_120 = arith.constant 4 : index
          %c0_121 = arith.constant 0 : index
          %292 = vector.load %arg15[%c4_119, %c4_120, %c0_121] : memref<14x14x8xf32, #tpu.memory_space<vmem>>, vector<8x8x8xf32>
          %293 = vector.extract_strided_slice %33 {offsets = [0, 4, 4, 0], sizes = [1, 1, 1, 8], strides = [1, 1, 1, 1]} : vector<1x7x7x8xf32> to vector<1x1x1x8xf32>
          %294 = vector.shape_cast %293 : vector<1x1x1x8xf32> to vector<8xf32>
          %295 = vector.shape_cast %294 : vector<8xf32> to vector<1x1x8xf32>
          %296 = vector.broadcast %295 : vector<1x1x8xf32> to vector<8x8x8xf32>
          %297 = arith.mulf %292, %296 : vector<8x8x8xf32>
          %298 = vector.shape_cast %297 : vector<8x8x8xf32> to vector<1x8x8x8xf32>
          %299 = arith.addf %291, %298 : vector<1x8x8x8xf32>
          %c4_122 = arith.constant 4 : index
          %c5_123 = arith.constant 5 : index
          %c0_124 = arith.constant 0 : index
          %300 = vector.load %arg15[%c4_122, %c5_123, %c0_124] : memref<14x14x8xf32, #tpu.memory_space<vmem>>, vector<8x8x8xf32>
          %301 = vector.extract_strided_slice %33 {offsets = [0, 4, 5, 0], sizes = [1, 1, 1, 8], strides = [1, 1, 1, 1]} : vector<1x7x7x8xf32> to vector<1x1x1x8xf32>
          %302 = vector.shape_cast %301 : vector<1x1x1x8xf32> to vector<8xf32>
          %303 = vector.shape_cast %302 : vector<8xf32> to vector<1x1x8xf32>
          %304 = vector.broadcast %303 : vector<1x1x8xf32> to vector<8x8x8xf32>
          %305 = arith.mulf %300, %304 : vector<8x8x8xf32>
          %306 = vector.shape_cast %305 : vector<8x8x8xf32> to vector<1x8x8x8xf32>
          %307 = arith.addf %299, %306 : vector<1x8x8x8xf32>
          %c4_125 = arith.constant 4 : index
          %c6_126 = arith.constant 6 : index
          %c0_127 = arith.constant 0 : index
          %308 = vector.load %arg15[%c4_125, %c6_126, %c0_127] : memref<14x14x8xf32, #tpu.memory_space<vmem>>, vector<8x8x8xf32>
          %309 = vector.extract_strided_slice %33 {offsets = [0, 4, 6, 0], sizes = [1, 1, 1, 8], strides = [1, 1, 1, 1]} : vector<1x7x7x8xf32> to vector<1x1x1x8xf32>
          %310 = vector.shape_cast %309 : vector<1x1x1x8xf32> to vector<8xf32>
          %311 = vector.shape_cast %310 : vector<8xf32> to vector<1x1x8xf32>
          %312 = vector.broadcast %311 : vector<1x1x8xf32> to vector<8x8x8xf32>
          %313 = arith.mulf %308, %312 : vector<8x8x8xf32>
          %314 = vector.shape_cast %313 : vector<8x8x8xf32> to vector<1x8x8x8xf32>
          %315 = arith.addf %307, %314 : vector<1x8x8x8xf32>
          %c5_128 = arith.constant 5 : index
          %c0_129 = arith.constant 0 : index
          %c0_130 = arith.constant 0 : index
          %316 = vector.load %arg15[%c5_128, %c0_129, %c0_130] : memref<14x14x8xf32, #tpu.memory_space<vmem>>, vector<8x8x8xf32>
          %317 = vector.extract_strided_slice %33 {offsets = [0, 5, 0, 0], sizes = [1, 1, 1, 8], strides = [1, 1, 1, 1]} : vector<1x7x7x8xf32> to vector<1x1x1x8xf32>
          %318 = vector.shape_cast %317 : vector<1x1x1x8xf32> to vector<8xf32>
          %319 = vector.shape_cast %318 : vector<8xf32> to vector<1x1x8xf32>
          %320 = vector.broadcast %319 : vector<1x1x8xf32> to vector<8x8x8xf32>
          %321 = arith.mulf %316, %320 : vector<8x8x8xf32>
          %322 = vector.shape_cast %321 : vector<8x8x8xf32> to vector<1x8x8x8xf32>
          %323 = arith.addf %315, %322 : vector<1x8x8x8xf32>
          %c5_131 = arith.constant 5 : index
          %c1_132 = arith.constant 1 : index
          %c0_133 = arith.constant 0 : index
          %324 = vector.load %arg15[%c5_131, %c1_132, %c0_133] : memref<14x14x8xf32, #tpu.memory_space<vmem>>, vector<8x8x8xf32>
          %325 = vector.extract_strided_slice %33 {offsets = [0, 5, 1, 0], sizes = [1, 1, 1, 8], strides = [1, 1, 1, 1]} : vector<1x7x7x8xf32> to vector<1x1x1x8xf32>
          %326 = vector.shape_cast %325 : vector<1x1x1x8xf32> to vector<8xf32>
          %327 = vector.shape_cast %326 : vector<8xf32> to vector<1x1x8xf32>
          %328 = vector.broadcast %327 : vector<1x1x8xf32> to vector<8x8x8xf32>
          %329 = arith.mulf %324, %328 : vector<8x8x8xf32>
          %330 = vector.shape_cast %329 : vector<8x8x8xf32> to vector<1x8x8x8xf32>
          %331 = arith.addf %323, %330 : vector<1x8x8x8xf32>
          %c5_134 = arith.constant 5 : index
          %c2_135 = arith.constant 2 : index
          %c0_136 = arith.constant 0 : index
          %332 = vector.load %arg15[%c5_134, %c2_135, %c0_136] : memref<14x14x8xf32, #tpu.memory_space<vmem>>, vector<8x8x8xf32>
          %333 = vector.extract_strided_slice %33 {offsets = [0, 5, 2, 0], sizes = [1, 1, 1, 8], strides = [1, 1, 1, 1]} : vector<1x7x7x8xf32> to vector<1x1x1x8xf32>
          %334 = vector.shape_cast %333 : vector<1x1x1x8xf32> to vector<8xf32>
          %335 = vector.shape_cast %334 : vector<8xf32> to vector<1x1x8xf32>
          %336 = vector.broadcast %335 : vector<1x1x8xf32> to vector<8x8x8xf32>
          %337 = arith.mulf %332, %336 : vector<8x8x8xf32>
          %338 = vector.shape_cast %337 : vector<8x8x8xf32> to vector<1x8x8x8xf32>
          %339 = arith.addf %331, %338 : vector<1x8x8x8xf32>
          %c5_137 = arith.constant 5 : index
          %c3_138 = arith.constant 3 : index
          %c0_139 = arith.constant 0 : index
          %340 = vector.load %arg15[%c5_137, %c3_138, %c0_139] : memref<14x14x8xf32, #tpu.memory_space<vmem>>, vector<8x8x8xf32>
          %341 = vector.extract_strided_slice %33 {offsets = [0, 5, 3, 0], sizes = [1, 1, 1, 8], strides = [1, 1, 1, 1]} : vector<1x7x7x8xf32> to vector<1x1x1x8xf32>
          %342 = vector.shape_cast %341 : vector<1x1x1x8xf32> to vector<8xf32>
          %343 = vector.shape_cast %342 : vector<8xf32> to vector<1x1x8xf32>
          %344 = vector.broadcast %343 : vector<1x1x8xf32> to vector<8x8x8xf32>
          %345 = arith.mulf %340, %344 : vector<8x8x8xf32>
          %346 = vector.shape_cast %345 : vector<8x8x8xf32> to vector<1x8x8x8xf32>
          %347 = arith.addf %339, %346 : vector<1x8x8x8xf32>
          %c5_140 = arith.constant 5 : index
          %c4_141 = arith.constant 4 : index
          %c0_142 = arith.constant 0 : index
          %348 = vector.load %arg15[%c5_140, %c4_141, %c0_142] : memref<14x14x8xf32, #tpu.memory_space<vmem>>, vector<8x8x8xf32>
          %349 = vector.extract_strided_slice %33 {offsets = [0, 5, 4, 0], sizes = [1, 1, 1, 8], strides = [1, 1, 1, 1]} : vector<1x7x7x8xf32> to vector<1x1x1x8xf32>
          %350 = vector.shape_cast %349 : vector<1x1x1x8xf32> to vector<8xf32>
          %351 = vector.shape_cast %350 : vector<8xf32> to vector<1x1x8xf32>
          %352 = vector.broadcast %351 : vector<1x1x8xf32> to vector<8x8x8xf32>
          %353 = arith.mulf %348, %352 : vector<8x8x8xf32>
          %354 = vector.shape_cast %353 : vector<8x8x8xf32> to vector<1x8x8x8xf32>
          %355 = arith.addf %347, %354 : vector<1x8x8x8xf32>
          %c5_143 = arith.constant 5 : index
          %c5_144 = arith.constant 5 : index
          %c0_145 = arith.constant 0 : index
          %356 = vector.load %arg15[%c5_143, %c5_144, %c0_145] : memref<14x14x8xf32, #tpu.memory_space<vmem>>, vector<8x8x8xf32>
          %357 = vector.extract_strided_slice %33 {offsets = [0, 5, 5, 0], sizes = [1, 1, 1, 8], strides = [1, 1, 1, 1]} : vector<1x7x7x8xf32> to vector<1x1x1x8xf32>
          %358 = vector.shape_cast %357 : vector<1x1x1x8xf32> to vector<8xf32>
          %359 = vector.shape_cast %358 : vector<8xf32> to vector<1x1x8xf32>
          %360 = vector.broadcast %359 : vector<1x1x8xf32> to vector<8x8x8xf32>
          %361 = arith.mulf %356, %360 : vector<8x8x8xf32>
          %362 = vector.shape_cast %361 : vector<8x8x8xf32> to vector<1x8x8x8xf32>
          %363 = arith.addf %355, %362 : vector<1x8x8x8xf32>
          %c5_146 = arith.constant 5 : index
          %c6_147 = arith.constant 6 : index
          %c0_148 = arith.constant 0 : index
          %364 = vector.load %arg15[%c5_146, %c6_147, %c0_148] : memref<14x14x8xf32, #tpu.memory_space<vmem>>, vector<8x8x8xf32>
          %365 = vector.extract_strided_slice %33 {offsets = [0, 5, 6, 0], sizes = [1, 1, 1, 8], strides = [1, 1, 1, 1]} : vector<1x7x7x8xf32> to vector<1x1x1x8xf32>
          %366 = vector.shape_cast %365 : vector<1x1x1x8xf32> to vector<8xf32>
          %367 = vector.shape_cast %366 : vector<8xf32> to vector<1x1x8xf32>
          %368 = vector.broadcast %367 : vector<1x1x8xf32> to vector<8x8x8xf32>
          %369 = arith.mulf %364, %368 : vector<8x8x8xf32>
          %370 = vector.shape_cast %369 : vector<8x8x8xf32> to vector<1x8x8x8xf32>
          %371 = arith.addf %363, %370 : vector<1x8x8x8xf32>
          %c6_149 = arith.constant 6 : index
          %c0_150 = arith.constant 0 : index
          %c0_151 = arith.constant 0 : index
          %372 = vector.load %arg15[%c6_149, %c0_150, %c0_151] : memref<14x14x8xf32, #tpu.memory_space<vmem>>, vector<8x8x8xf32>
          %373 = vector.extract_strided_slice %33 {offsets = [0, 6, 0, 0], sizes = [1, 1, 1, 8], strides = [1, 1, 1, 1]} : vector<1x7x7x8xf32> to vector<1x1x1x8xf32>
          %374 = vector.shape_cast %373 : vector<1x1x1x8xf32> to vector<8xf32>
          %375 = vector.shape_cast %374 : vector<8xf32> to vector<1x1x8xf32>
          %376 = vector.broadcast %375 : vector<1x1x8xf32> to vector<8x8x8xf32>
          %377 = arith.mulf %372, %376 : vector<8x8x8xf32>
          %378 = vector.shape_cast %377 : vector<8x8x8xf32> to vector<1x8x8x8xf32>
          %379 = arith.addf %371, %378 : vector<1x8x8x8xf32>
          %c6_152 = arith.constant 6 : index
          %c1_153 = arith.constant 1 : index
          %c0_154 = arith.constant 0 : index
          %380 = vector.load %arg15[%c6_152, %c1_153, %c0_154] : memref<14x14x8xf32, #tpu.memory_space<vmem>>, vector<8x8x8xf32>
          %381 = vector.extract_strided_slice %33 {offsets = [0, 6, 1, 0], sizes = [1, 1, 1, 8], strides = [1, 1, 1, 1]} : vector<1x7x7x8xf32> to vector<1x1x1x8xf32>
          %382 = vector.shape_cast %381 : vector<1x1x1x8xf32> to vector<8xf32>
          %383 = vector.shape_cast %382 : vector<8xf32> to vector<1x1x8xf32>
          %384 = vector.broadcast %383 : vector<1x1x8xf32> to vector<8x8x8xf32>
          %385 = arith.mulf %380, %384 : vector<8x8x8xf32>
          %386 = vector.shape_cast %385 : vector<8x8x8xf32> to vector<1x8x8x8xf32>
          %387 = arith.addf %379, %386 : vector<1x8x8x8xf32>
          %c6_155 = arith.constant 6 : index
          %c2_156 = arith.constant 2 : index
          %c0_157 = arith.constant 0 : index
          %388 = vector.load %arg15[%c6_155, %c2_156, %c0_157] : memref<14x14x8xf32, #tpu.memory_space<vmem>>, vector<8x8x8xf32>
          %389 = vector.extract_strided_slice %33 {offsets = [0, 6, 2, 0], sizes = [1, 1, 1, 8], strides = [1, 1, 1, 1]} : vector<1x7x7x8xf32> to vector<1x1x1x8xf32>
          %390 = vector.shape_cast %389 : vector<1x1x1x8xf32> to vector<8xf32>
          %391 = vector.shape_cast %390 : vector<8xf32> to vector<1x1x8xf32>
          %392 = vector.broadcast %391 : vector<1x1x8xf32> to vector<8x8x8xf32>
          %393 = arith.mulf %388, %392 : vector<8x8x8xf32>
          %394 = vector.shape_cast %393 : vector<8x8x8xf32> to vector<1x8x8x8xf32>
          %395 = arith.addf %387, %394 : vector<1x8x8x8xf32>
          %c6_158 = arith.constant 6 : index
          %c3_159 = arith.constant 3 : index
          %c0_160 = arith.constant 0 : index
          %396 = vector.load %arg15[%c6_158, %c3_159, %c0_160] : memref<14x14x8xf32, #tpu.memory_space<vmem>>, vector<8x8x8xf32>
          %397 = vector.extract_strided_slice %33 {offsets = [0, 6, 3, 0], sizes = [1, 1, 1, 8], strides = [1, 1, 1, 1]} : vector<1x7x7x8xf32> to vector<1x1x1x8xf32>
          %398 = vector.shape_cast %397 : vector<1x1x1x8xf32> to vector<8xf32>
          %399 = vector.shape_cast %398 : vector<8xf32> to vector<1x1x8xf32>
          %400 = vector.broadcast %399 : vector<1x1x8xf32> to vector<8x8x8xf32>
          %401 = arith.mulf %396, %400 : vector<8x8x8xf32>
          %402 = vector.shape_cast %401 : vector<8x8x8xf32> to vector<1x8x8x8xf32>
          %403 = arith.addf %395, %402 : vector<1x8x8x8xf32>
          %c6_161 = arith.constant 6 : index
          %c4_162 = arith.constant 4 : index
          %c0_163 = arith.constant 0 : index
          %404 = vector.load %arg15[%c6_161, %c4_162, %c0_163] : memref<14x14x8xf32, #tpu.memory_space<vmem>>, vector<8x8x8xf32>
          %405 = vector.extract_strided_slice %33 {offsets = [0, 6, 4, 0], sizes = [1, 1, 1, 8], strides = [1, 1, 1, 1]} : vector<1x7x7x8xf32> to vector<1x1x1x8xf32>
          %406 = vector.shape_cast %405 : vector<1x1x1x8xf32> to vector<8xf32>
          %407 = vector.shape_cast %406 : vector<8xf32> to vector<1x1x8xf32>
          %408 = vector.broadcast %407 : vector<1x1x8xf32> to vector<8x8x8xf32>
          %409 = arith.mulf %404, %408 : vector<8x8x8xf32>
          %410 = vector.shape_cast %409 : vector<8x8x8xf32> to vector<1x8x8x8xf32>
          %411 = arith.addf %403, %410 : vector<1x8x8x8xf32>
          %c6_164 = arith.constant 6 : index
          %c5_165 = arith.constant 5 : index
          %c0_166 = arith.constant 0 : index
          %412 = vector.load %arg15[%c6_164, %c5_165, %c0_166] : memref<14x14x8xf32, #tpu.memory_space<vmem>>, vector<8x8x8xf32>
          %413 = vector.extract_strided_slice %33 {offsets = [0, 6, 5, 0], sizes = [1, 1, 1, 8], strides = [1, 1, 1, 1]} : vector<1x7x7x8xf32> to vector<1x1x1x8xf32>
          %414 = vector.shape_cast %413 : vector<1x1x1x8xf32> to vector<8xf32>
          %415 = vector.shape_cast %414 : vector<8xf32> to vector<1x1x8xf32>
          %416 = vector.broadcast %415 : vector<1x1x8xf32> to vector<8x8x8xf32>
          %417 = arith.mulf %412, %416 : vector<8x8x8xf32>
          %418 = vector.shape_cast %417 : vector<8x8x8xf32> to vector<1x8x8x8xf32>
          %419 = arith.addf %411, %418 : vector<1x8x8x8xf32>
          %c6_167 = arith.constant 6 : index
          %c6_168 = arith.constant 6 : index
          %c0_169 = arith.constant 0 : index
          %420 = vector.load %arg15[%c6_167, %c6_168, %c0_169] : memref<14x14x8xf32, #tpu.memory_space<vmem>>, vector<8x8x8xf32>
          %421 = vector.extract_strided_slice %33 {offsets = [0, 6, 6, 0], sizes = [1, 1, 1, 8], strides = [1, 1, 1, 1]} : vector<1x7x7x8xf32> to vector<1x1x1x8xf32>
          %422 = vector.shape_cast %421 : vector<1x1x1x8xf32> to vector<8xf32>
          %423 = vector.shape_cast %422 : vector<8xf32> to vector<1x1x8xf32>
          %424 = vector.broadcast %423 : vector<1x1x8xf32> to vector<8x8x8xf32>
          %425 = arith.mulf %420, %424 : vector<8x8x8xf32>
          %426 = vector.shape_cast %425 : vector<8x8x8xf32> to vector<1x8x8x8xf32>
          %427 = arith.addf %419, %426 : vector<1x8x8x8xf32>
          %428 = arith.index_cast %26 : i32 to index
          %c0_170 = arith.constant 0 : index
          %c0_171 = arith.constant 0 : index
          %c0_172 = arith.constant 0 : index
          %429 = vector.load %arg16[%428, %c0_170, %c0_171, %c0_172] : memref<8x8x8x8xf32, #tpu.memory_space<vmem>>, vector<1x8x8x8xf32>
          tpu.vector_store %arg16[%428, %c0_170, %c0_171, %c0_172], %427 {strides = array<i32>} : memref<8x8x8x8xf32, #tpu.memory_space<vmem>>, vector<1x8x8x8xf32>,
        } else {
        }
      }
      %c7_i32_16 = arith.constant 7 : i32
    } else {
    }
    %c13_i32 = arith.constant 13 : i32
    %11 = arith.cmpi eq, %arg2, %c13_i32 : i32
    %12 = arith.extui %11 : i1 to i32
    %c0_i32_4 = arith.constant 0 : i32
    %13 = arith.cmpi ne, %12, %c0_i32_4 : i32
    scf.if %13 {
      %c0 = arith.constant 0 : index
      %c0_5 = arith.constant 0 : index
      %c0_6 = arith.constant 0 : index
      %c0_7 = arith.constant 0 : index
      %14 = vector.load %arg16[%c0, %c0_5, %c0_6, %c0_7] : memref<8x8x8x8xf32, #tpu.memory_space<vmem>>, vector<8x8x8x8xf32>
      %15 = vector.shape_cast %14 : vector<8x8x8x8xf32> to vector<512x8xf32>
      %cst = arith.constant dense<0.000000e+00> : vector<512xf32>
      %16 = vector.multi_reduction <add>, %15, %cst [1] : vector<512x8xf32> to vector<512xf32>
      %17 = vector.shape_cast %16 : vector<512xf32> to vector<512x1xf32>
      %cst_8 = arith.constant 8.000000e+00 : f32
      %18 = vector.broadcast %cst_8 : f32 to vector<512x1xf32>
      %19 = arith.divf %17, %18 : vector<512x1xf32>
      %20 = arith.mulf %15, %15 : vector<512x8xf32>
      %cst_9 = arith.constant dense<0.000000e+00> : vector<512xf32>
      %21 = vector.multi_reduction <add>, %20, %cst_9 [1] : vector<512x8xf32> to vector<512xf32>
      %22 = vector.shape_cast %21 : vector<512xf32> to vector<512x1xf32>
      %cst_10 = arith.constant 8.000000e+00 : f32
      %23 = vector.broadcast %cst_10 : f32 to vector<512x1xf32>
      %24 = arith.divf %22, %23 : vector<512x1xf32>
      %25 = arith.mulf %19, %19 : vector<512x1xf32>
      %26 = arith.subf %24, %25 : vector<512x1xf32>
      %cst_11 = arith.constant 0.000000e+00 : f32
      %27 = vector.broadcast %cst_11 : f32 to vector<512x1xf32>
      %28 = arith.maximumf %26, %27 : vector<512x1xf32>
      %29 = vector.broadcast %19 : vector<512x1xf32> to vector<512x8xf32>
      %30 = arith.subf %15, %29 : vector<512x8xf32>
      %cst_12 = arith.constant 9.99999997E-7 : f32
      %31 = vector.broadcast %cst_12 : f32 to vector<512x1xf32>
      %32 = arith.addf %28, %31 : vector<512x1xf32>
      %33 = math.rsqrt %32 : vector<512x1xf32>
      %34 = vector.broadcast %33 : vector<512x1xf32> to vector<512x8xf32>
      %35 = arith.mulf %30, %34 : vector<512x8xf32>
      %c0_13 = arith.constant 0 : index
      %c0_14 = arith.constant 0 : index
      %36 = vector.load %arg7[%c0_13, %c0_14] : memref<1x8xf32, #tpu.memory_space<vmem>>, vector<1x8xf32>
      %37 = vector.broadcast %36 : vector<1x8xf32> to vector<512x8xf32>
      %38 = arith.mulf %35, %37 : vector<512x8xf32>
      %c0_15 = arith.constant 0 : index
      %c0_16 = arith.constant 0 : index
      %39 = vector.load %arg8[%c0_15, %c0_16] : memref<1x8xf32, #tpu.memory_space<vmem>>, vector<1x8xf32>
      %40 = vector.broadcast %39 : vector<1x8xf32> to vector<512x8xf32>
      %41 = arith.addf %38, %40 : vector<512x8xf32>
      %c0_17 = arith.constant 0 : index
      %c0_18 = arith.constant 0 : index
      %42 = vector.load %arg9[%c0_17, %c0_18] : memref<8x32xf32, #tpu.memory_space<vmem>>, vector<8x32xf32>
      %cst_19 = arith.constant dense<0.000000e+00> : vector<512x32xf32>
      %43 = tpu.matmul %41, %42, %cst_19 {dimension_numbers = #tpu.dot_dimension_numbers<[1], [0], [0], [1], [0, 0, 1, 1], [], []>} : vector<512x8xf32>, vector<8x32xf32>, vector<512x32xf32> -> vector<512x32xf32>
      %c0_20 = arith.constant 0 : index
      %c0_21 = arith.constant 0 : index
      %44 = vector.load %arg10[%c0_20, %c0_21] : memref<1x32xf32, #tpu.memory_space<vmem>>, vector<1x32xf32>
      %45 = vector.broadcast %44 : vector<1x32xf32> to vector<512x32xf32>
      %46 = arith.addf %43, %45 : vector<512x32xf32>
      %cst_22 = arith.constant 5.000000e-01 : f32
      %47 = vector.broadcast %cst_22 : f32 to vector<512x32xf32>
      %48 = arith.mulf %47, %46 : vector<512x32xf32>
      %cst_23 = arith.constant 0.707106769 : f32
      %49 = vector.broadcast %cst_23 : f32 to vector<512x32xf32>
      %50 = arith.mulf %46, %49 : vector<512x32xf32>
      %51 = math.absf %50 : vector<512x32xf32>
      %cst_24 = arith.constant 5.000000e-01 : f32
      %52 = vector.broadcast %cst_24 : f32 to vector<512x32xf32>
      %53 = arith.mulf %52, %51 : vector<512x32xf32>
      %cst_25 = arith.constant 1.000000e+00 : f32
      %54 = vector.broadcast %cst_25 : f32 to vector<512x32xf32>
      %55 = arith.addf %54, %53 : vector<512x32xf32>
      %56 = tpu.reciprocal %55 {approx = true} : vector<512x32xf32> -> vector<512x32xf32>
      %cst_26 = arith.constant 0.170872763 : f32
      %57 = vector.broadcast %cst_26 : f32 to vector<512x32xf32>
      %58 = arith.mulf %56, %57 : vector<512x32xf32>
      %cst_27 = arith.constant -0.822152256 : f32
      %59 = vector.broadcast %cst_27 : f32 to vector<512x32xf32>
      %60 = arith.addf %59, %58 : vector<512x32xf32>
      %61 = arith.mulf %56, %60 : vector<512x32xf32>
      %cst_28 = arith.constant 1.48851585 : f32
      %62 = vector.broadcast %cst_28 : f32 to vector<512x32xf32>
      %63 = arith.addf %62, %61 : vector<512x32xf32>
      %64 = arith.mulf %56, %63 : vector<512x32xf32>
      %cst_29 = arith.constant -1.13520396 : f32
      %65 = vector.broadcast %cst_29 : f32 to vector<512x32xf32>
      %66 = arith.addf %65, %64 : vector<512x32xf32>
      %67 = arith.mulf %56, %66 : vector<512x32xf32>
      %cst_30 = arith.constant 0.278868079 : f32
      %68 = vector.broadcast %cst_30 : f32 to vector<512x32xf32>
      %69 = arith.addf %68, %67 : vector<512x32xf32>
      %70 = arith.mulf %56, %69 : vector<512x32xf32>
      %cst_31 = arith.constant -0.186288059 : f32
      %71 = vector.broadcast %cst_31 : f32 to vector<512x32xf32>
      %72 = arith.addf %71, %70 : vector<512x32xf32>
      %73 = arith.mulf %56, %72 : vector<512x32xf32>
      %cst_32 = arith.constant 0.0967841818 : f32
      %74 = vector.broadcast %cst_32 : f32 to vector<512x32xf32>
      %75 = arith.addf %74, %73 : vector<512x32xf32>
      %76 = arith.mulf %56, %75 : vector<512x32xf32>
      %cst_33 = arith.constant 0.374091953 : f32
      %77 = vector.broadcast %cst_33 : f32 to vector<512x32xf32>
      %78 = arith.addf %77, %76 : vector<512x32xf32>
      %79 = arith.mulf %56, %78 : vector<512x32xf32>
      %cst_34 = arith.constant 1.00002372 : f32
      %80 = vector.broadcast %cst_34 : f32 to vector<512x32xf32>
      %81 = arith.addf %80, %79 : vector<512x32xf32>
      %82 = arith.mulf %56, %81 : vector<512x32xf32>
      %cst_35 = arith.constant -1.26551223 : f32
      %83 = vector.broadcast %cst_35 : f32 to vector<512x32xf32>
      %84 = arith.addf %83, %82 : vector<512x32xf32>
      %cst_36 = arith.constant 0.000000e+00 : f32
      %85 = vector.broadcast %cst_36 : f32 to vector<512x32xf32>
      %86 = arith.subf %85, %51 : vector<512x32xf32>
      %87 = arith.mulf %86, %51 : vector<512x32xf32>
      %88 = arith.addf %87, %84 : vector<512x32xf32>
      %89 = math.exp %88 : vector<512x32xf32>
      %90 = arith.mulf %56, %89 : vector<512x32xf32>
      %cst_37 = arith.constant 0.000000e+00 : f32
      %91 = vector.broadcast %cst_37 : f32 to vector<512x32xf32>
      %92 = arith.cmpf oge, %50, %91 : vector<512x32xf32>
      %cst_38 = arith.constant 1.000000e+00 : f32
      %93 = vector.broadcast %cst_38 : f32 to vector<512x32xf32>
      %94 = arith.subf %93, %90 : vector<512x32xf32>
      %cst_39 = arith.constant 1.000000e+00 : f32
      %95 = vector.broadcast %cst_39 : f32 to vector<512x32xf32>
      %96 = arith.subf %90, %95 : vector<512x32xf32>
      %97 = arith.select %92, %94, %96 : vector<512x32xi1>, vector<512x32xf32>
      %cst_40 = arith.constant 1.000000e+00 : f32
      %98 = vector.broadcast %cst_40 : f32 to vector<512x32xf32>
      %99 = arith.addf %98, %97 : vector<512x32xf32>
      %100 = arith.mulf %48, %99 : vector<512x32xf32>
      %c0_41 = arith.constant 0 : index
      %c0_42 = arith.constant 0 : index
      %101 = vector.load %arg11[%c0_41, %c0_42] : memref<32x8xf32, #tpu.memory_space<vmem>>, vector<32x8xf32>
      %cst_43 = arith.constant dense<0.000000e+00> : vector<512x8xf32>
      %102 = tpu.matmul %100, %101, %cst_43 {dimension_numbers = #tpu.dot_dimension_numbers<[1], [0], [0], [1], [0, 0, 1, 1], [], []>} : vector<512x32xf32>, vector<32x8xf32>, vector<512x8xf32> -> vector<512x8xf32>
      %c0_44 = arith.constant 0 : index
      %c0_45 = arith.constant 0 : index
      %103 = vector.load %arg12[%c0_44, %c0_45] : memref<1x8xf32, #tpu.memory_space<vmem>>, vector<1x8xf32>
      %104 = vector.broadcast %103 : vector<1x8xf32> to vector<512x8xf32>
      %105 = arith.addf %102, %104 : vector<512x8xf32>
      %c0_46 = arith.constant 0 : index
      %c0_47 = arith.constant 0 : index
      %c0_48 = arith.constant 0 : index
      %c0_49 = arith.constant 0 : index
      %106 = vector.load %arg17[%c0_46, %c0_47, %c0_48, %c0_49] : memref<8x8x8x8xf32, #tpu.memory_space<vmem>>, vector<8x8x8x8xf32>
      %107 = vector.shape_cast %106 : vector<8x8x8x8xf32> to vector<512x8xf32>
      %c0_50 = arith.constant 0 : index
      %c0_51 = arith.constant 0 : index
      %108 = vector.load %arg13[%c0_50, %c0_51] : memref<1x8xf32, #tpu.memory_space<vmem>>, vector<1x8xf32>
      %109 = vector.broadcast %108 : vector<1x8xf32> to vector<512x8xf32>
      %110 = arith.mulf %109, %105 : vector<512x8xf32>
      %111 = arith.addf %107, %110 : vector<512x8xf32>
      %c0_52 = arith.constant 0 : index
      %c0_53 = arith.constant 0 : index
      %112 = vector.load %arg4[%c0_52, %c0_53] : memref<8x8xf32, #tpu.memory_space<vmem>>, vector<8x8xf32>
      %cst_54 = arith.constant dense<0.000000e+00> : vector<8x512xf32>
      %113 = tpu.matmul %112, %111, %cst_54 {dimension_numbers = #tpu.dot_dimension_numbers<[1], [1], [0], [0], [0, 0, 1, 0], [], []>} : vector<8x8xf32>, vector<512x8xf32>, vector<8x512xf32> -> vector<8x512xf32>
      %c0_55 = arith.constant 0 : index
      %c0_56 = arith.constant 0 : index
      %c0_57 = arith.constant 0 : index
      %114 = vector.load %arg14[%c0_55, %c0_56, %c0_57] : memref<1x8x512xf32, #tpu.memory_space<vmem>>, vector<1x8x512xf32>
      %115 = vector.shape_cast %114 : vector<1x8x512xf32> to vector<8x512xf32>
      %116 = vector.shape_cast %113 : vector<8x512xf32> to vector<1x8x512xf32>
      tpu.vector_store %arg14[%c0_55, %c0_56, %c0_57], %116 {strides = array<i32>} : memref<1x8x512xf32, #tpu.memory_space<vmem>>, vector<1x8x512xf32>,
    } else {
    }
    return
  }
  func.func @transform_0(%arg0: i32, %arg1: i32, %arg2: i32) -> (i32, i32, i32, i32, i32) {
    %c8_i32 = arith.constant 8 : i32
    %0 = arith.muli %arg1, %c8_i32 : i32
    %1 = arith.addi %0, %arg2 : i32
    %c3_i32 = arith.constant 3 : i32
    %2 = arith.subi %1, %c3_i32 : i32
    %c0_i32 = arith.constant 0 : i32
    %c7_i32 = arith.constant 7 : i32
    %3 = arith.maxsi %c0_i32, %2 : i32
    %4 = arith.minsi %c7_i32, %3 : i32
    %c0_i32_0 = arith.constant 0 : i32
    %c0_i32_1 = arith.constant 0 : i32
    %c0_i32_2 = arith.constant 0 : i32
    %c0_i32_3 = arith.constant 0 : i32
    return %arg0, %4, %c0_i32_0, %c0_i32_1, %c0_i32_2 : i32, i32, i32, i32, i32
  }
  func.func @transform_1(%arg0: i32, %arg1: i32, %arg2: i32) -> (i32, i32) {
    %c0_i32 = arith.constant 0 : i32
    %c0_i32_0 = arith.constant 0 : i32
    %c0_i32_1 = arith.constant 0 : i32
    return %c0_i32, %c0_i32_0 : i32, i32
  }
  func.func @transform_2(%arg0: i32, %arg1: i32, %arg2: i32) -> (i32, i32, i32, i32) {
    %c0_i32 = arith.constant 0 : i32
    %c0_i32_0 = arith.constant 0 : i32
    %c0_i32_1 = arith.constant 0 : i32
    %c0_i32_2 = arith.constant 0 : i32
    %c0_i32_3 = arith.constant 0 : i32
    return %c0_i32, %c0_i32_0, %c0_i32_1, %c0_i32_2 : i32, i32, i32, i32
  }
  func.func @transform_3(%arg0: i32, %arg1: i32, %arg2: i32) -> (i32, i32) {
    %c0_i32 = arith.constant 0 : i32
    %c0_i32_0 = arith.constant 0 : i32
    %c0_i32_1 = arith.constant 0 : i32
    return %c0_i32, %c0_i32_0 : i32, i32
  }
  func.func @transform_4(%arg0: i32, %arg1: i32, %arg2: i32) -> (i32, i32) {
    %c0_i32 = arith.constant 0 : i32
    %c0_i32_0 = arith.constant 0 : i32
    %c0_i32_1 = arith.constant 0 : i32
    return %c0_i32, %c0_i32_0 : i32, i32
  }
  func.func @transform_5(%arg0: i32, %arg1: i32, %arg2: i32) -> (i32, i32) {
    %c0_i32 = arith.constant 0 : i32
    %c0_i32_0 = arith.constant 0 : i32
    %c0_i32_1 = arith.constant 0 : i32
    return %c0_i32, %c0_i32_0 : i32, i32
  }
  func.func @transform_6(%arg0: i32, %arg1: i32, %arg2: i32) -> (i32, i32) {
    %c0_i32 = arith.constant 0 : i32
    %c0_i32_0 = arith.constant 0 : i32
    %c0_i32_1 = arith.constant 0 : i32
    return %c0_i32, %c0_i32_0 : i32, i32
  }
  func.func @transform_7(%arg0: i32, %arg1: i32, %arg2: i32) -> (i32, i32) {
    %c0_i32 = arith.constant 0 : i32
    %c0_i32_0 = arith.constant 0 : i32
    %c0_i32_1 = arith.constant 0 : i32
    return %c0_i32, %c0_i32_0 : i32, i32
  }
  func.func @transform_8(%arg0: i32, %arg1: i32, %arg2: i32) -> (i32, i32) {
    %c0_i32 = arith.constant 0 : i32
    %c0_i32_0 = arith.constant 0 : i32
    %c0_i32_1 = arith.constant 0 : i32
    return %c0_i32, %c0_i32_0 : i32, i32
  }
  func.func @transform_9(%arg0: i32, %arg1: i32, %arg2: i32) -> (i32, i32) {
    %c0_i32 = arith.constant 0 : i32
    %c0_i32_0 = arith.constant 0 : i32
    %c0_i32_1 = arith.constant 0 : i32
    return %c0_i32, %c0_i32_0 : i32, i32
  }
  func.func @transform_10(%arg0: i32, %arg1: i32, %arg2: i32) -> (i32, i32) {
    %c0_i32 = arith.constant 0 : i32
    %c0_i32_0 = arith.constant 0 : i32
    %c0_i32_1 = arith.constant 0 : i32
    return %c0_i32, %c0_i32_0 : i32, i32
  }
  func.func @transform_11(%arg0: i32, %arg1: i32, %arg2: i32) -> (i32, i32, i32) {
    %c0_i32 = arith.constant 0 : i32
    %c0_i32_0 = arith.constant 0 : i32
    return %arg0, %c0_i32, %arg1 : i32, i32, i32
  }
}

</mosaic_0001>

<bundles_post_ra>
// kernel: block3d_forward.1
= control target key start
LH: loop header
LB: loop body
LE: loop exit
PB: predicated region body
PF: predicated region fallthrough
CT: control target
= control target key end

     0   :  { %s8341_s17 = smov 0   ;;  %s8343_s18 = smov 0   ;;  %s14738_s0 = inlined_call_operand.vmem [shape: f32[2,8,8,8,8], index: 0, kind: input, shape index: {}]   ;;  %s14739_s1 = inlined_call_operand.vmem [shape: f32[8,8], index: 1, kind: input, shape index: {}]   ;;  %s14740_s2 = inlined_call_operand.vmem [shape: f32[7,7,7,8], index: 2, kind: input, shape index: {}]   ;;  %s14741_s3 = inlined_call_operand.vmem [shape: f32[1,8], index: 3, kind: input, shape index: {}]   ;;  %s14742_s4 = inlined_call_operand.vmem [shape: f32[1,8], index: 4, kind: input, shape index: {}]   ;;  %s14743_s5 = inlined_call_operand.vmem [shape: f32[1,8], index: 5, kind: input, shape index: {}]   ;;  %s14744_s6 = inlined_call_operand.vmem [shape: f32[8,32], index: 6, kind: input, shape index: {}]   ;;  %s14745_s7 = inlined_call_operand.vmem [shape: f32[1,32], index: 7, kind: input, shape index: {}]   ;;  %s14746_s8 = inlined_call_operand.vmem [shape: f32[32,8], index: 8, kind: input, shape index: {}]   ;;  %s14747_s9 = inlined_call_operand.vmem [shape: f32[1,8], index: 9, kind: input, shape index: {}]   ;;  %s14748_s10 = inlined_call_operand.vmem [shape: f32[1,8], index: 10, kind: input, shape index: {}]   ;;  %s14749_s11 = inlined_call_operand.vmem [shape: f32[2,8,512], index: 11, kind: output, shape index: {}]  }
   0x1   :  { %s8345_s19 = smov 0   ;;  %s8347_s20 = smov 0  }
   0x2   :  { %s8349_s21 = smov 0  }
   0x3 LB: > { %14967 = sst [smem:[#allocation5_spill]] %s8269_s20  ;;  %s33_s22 = sadd.s32 1, %s8265_s19  ;;  %s8273_s21 = sphi %s8349_s21, %s21_s21   ;;  %s8269_s20 = sphi %s8347_s20, %s15541_s20   ;;  %s8265_s19 = sphi %s8345_s19, %s15543_s19   ;;  %s8261_s18 = sphi %s8343_s18, %s15539_s18   ;;  %s8257_s17 = sphi %s8341_s17, %s15542_s17  }
   0x4   : > { %s40_s23 = sadd.s32 1, %s8269_s20  ;;  %p34_p0 = scmp.ge.s32.totalorder %s33_s22, 14 }
   0x5   : > { %p7427_p1 = scmp.ge.s32.totalorder %s8273_s21, 1  ;;  %p392_p2 = scmp.lt.s32.totalorder %s8273_s21, 29 }
   0x6   : > { %s15545_s22 = smov (%p34_p0, %s33_s22), 0  ;;  %s15547_s23 = smov (!%p34_p0, %s40_s23), %s8269_s20 }
   0x7   : > { %14968 = sst [smem:[#allocation6_spill]] %s15545_s22  ;;  %p393_p3 = pnand %p7427_p1, %p392_p2 }
   0x8   : > { %p42_p4 = scmp.ge.s32.totalorder %s15547_s23, 2  ;;  %s8374_s24 = sadd.s32 (!%p393_p3), 4294967293, %s8257_s17 }
   0x9   : > { %396 = sbr.rel (%p393_p3) target bundleno = 1827 (0x723), region = 64  ;;  %p454_p5 = scmp.lt.s32.totalorder (!%p393_p3), %s8261_s18, 1 }
   0xa   : > { %s15549_s23 = smov (%p42_p4, %s15547_s23), 0  ;;  %p450_p6 = scmp.gt.s32.totalorder (!%p393_p3), %s8374_s24, 0 }
   0xb   : > { %14969 = sst [smem:[#allocation7_spill]] %s15549_s23  ;;  %p7429_p7 = scmp.lt.s32.totalorder (!%p393_p3), %s8374_s24, 7 }
   0xc   : > { %p7439_p9 = scmp.ne.s32.totalorder (!%p393_p3), %s8257_s17, 0 }
   0xe   : > { %s15551_s18 = smov (!%p454_p5, %s8261_s18), 1 }
   0xf   : > { %s451_s25 = scalar_select %p450_p6, %s8374_s24, 0 }
  0x10   : > { %s7713_s26 = sshll.u32 %s15551_s18, 5  ;;  %s7435_s30 = sshll.u32 %s15551_s18, 6 }
  0x11   : > { %s15553_s25 = smov (!%p7429_p7, %s451_s25), 7  ;;  %s8382_s29 = scalar_lea.vmem %s14749_s11, %s7713_s26 }
  0x12   : > { %p456_p8 = scmp.lt.s32.totalorder %s15553_s25, 7 }
  0x14   : > { %s15555_s25 = smov (!%p456_p8, %s15553_s25), 7  ;;  %483 = sbr.rel (%p7439_p9) target bundleno = 118 (0x76), region = 68 }
  0x15   : > { %s7434_s12 = sshll.u32 %s15555_s25, 3 }
  0x16   : > { %s460_s13 = sadd.s32 %s7435_s30, %s7434_s12 }
  0x17   : > { %s7436_s14 = sshll.u32 %s460_s13, 3 }
  0x18   : > { %s8387_s23 = scalar_lea.vmem %s14738_s0, %s7436_s14 }
  0x19   : > { %v8393_v0 = vld [vmem:[%s14741_s3] ss:$0 sm:$0xff]  ;;  %vm488_vm0 = vcmask 64512   ;;  %v8279_v1 = vmov 0.0   ;;  %vm554_vm1 = vcmask 62464  }
  0x1a   : > { %489 = vst.msk [vmem:[#allocation3] sm:$0xff] %vm488_vm0, %v8393_v0 }
  0x1b   : > { %490 = vst.msk [vmem:[#allocation3 + $0x8] sm:$0xff] %vm488_vm0, %v8393_v0 }
  0x1c   : > { %491 = vst.msk [vmem:[#allocation3 + $0x10] sm:$0xff] %vm488_vm0, %v8393_v0 }
  0x1d   : > { %492 = vst.msk [vmem:[#allocation3 + $0x18] sm:$0xff] %vm488_vm0, %v8393_v0 }
  0x1e   : > { %493 = vst.msk [vmem:[#allocation3 + $0x20] sm:$0xff] %vm488_vm0, %v8393_v0 }
  0x1f   : > { %494 = vst.msk [vmem:[#allocation3 + $0x28] sm:$0xff] %vm488_vm0, %v8393_v0 }
  0x20   : > { %495 = vst.msk [vmem:[#allocation3 + $0x30] sm:$0xff] %vm488_vm0, %v8393_v0 }
  0x21   : > { %496 = vst.msk [vmem:[#allocation3 + $0x38] sm:$0xff] %vm488_vm0, %v8393_v0 }
  0x22   : > { %497 = vst.msk [vmem:[#allocation3 + $0x40] sm:$0xff] %vm488_vm0, %v8393_v0 }
  0x23   : > { %498 = vst.msk [vmem:[#allocation3 + $0x48] sm:$0xff] %vm488_vm0, %v8393_v0 }
  0x24   : > { %499 = vst.msk [vmem:[#allocation3 + $0x50] sm:$0xff] %vm488_vm0, %v8393_v0 }
  0x25   : > { %500 = vst.msk [vmem:[#allocation3 + $0x58] sm:$0xff] %vm488_vm0, %v8393_v0 }
  0x26   : > { %501 = vst.msk [vmem:[#allocation3 + $0x60] sm:$0xff] %vm488_vm0, %v8393_v0 }
  0x27   : > { %502 = vst.msk [vmem:[#allocation3 + $0x68] sm:$0xff] %vm488_vm0, %v8393_v0 }
  0x28   : > { %503 = vst.msk [vmem:[#allocation3 + $0x70] sm:$0xff] %vm488_vm0, %v8393_v0 }
  0x29   : > { %504 = vst.msk [vmem:[#allocation3 + $0x78] sm:$0xff] %vm488_vm0, %v8393_v0 }
  0x2a   : > { %505 = vst.msk [vmem:[#allocation3 + $0x80] sm:$0xff] %vm488_vm0, %v8393_v0 }
  0x2b   : > { %506 = vst.msk [vmem:[#allocation3 + $0x88] sm:$0xff] %vm488_vm0, %v8393_v0 }
  0x2c   : > { %507 = vst.msk [vmem:[#allocation3 + $0x90] sm:$0xff] %vm488_vm0, %v8393_v0 }
  0x2d   : > { %508 = vst.msk [vmem:[#allocation3 + $0x98] sm:$0xff] %vm488_vm0, %v8393_v0 }
  0x2e   : > { %509 = vst.msk [vmem:[#allocation3 + $0xa0] sm:$0xff] %vm488_vm0, %v8393_v0 }
  0x2f   : > { %510 = vst.msk [vmem:[#allocation3 + $0xa8] sm:$0xff] %vm488_vm0, %v8393_v0 }
  0x30   : > { %511 = vst.msk [vmem:[#allocation3 + $0xb0] sm:$0xff] %vm488_vm0, %v8393_v0 }
  0x31   : > { %512 = vst.msk [vmem:[#allocation3 + $0xb8] sm:$0xff] %vm488_vm0, %v8393_v0 }
  0x32   : > { %513 = vst.msk [vmem:[#allocation3 + $0xc0] sm:$0xff] %vm488_vm0, %v8393_v0 }
  0x33   : > { %514 = vst.msk [vmem:[#allocation3 + $0xc8] sm:$0xff] %vm488_vm0, %v8393_v0 }
  0x34   : > { %515 = vst.msk [vmem:[#allocation3 + $0xd0] sm:$0xff] %vm488_vm0, %v8393_v0 }
  0x35   : > { %516 = vst.msk [vmem:[#allocation3 + $0xd8] sm:$0xff] %vm488_vm0, %v8393_v0 }
  0x36   : > { %517 = vst.msk [vmem:[#allocation3 + $0xe0] sm:$0xff] %vm488_vm0, %v8393_v0 }
  0x37   : > { %518 = vst.msk [vmem:[#allocation3 + $0xe8] sm:$0xff] %vm488_vm0, %v8393_v0 }
  0x38   : > { %519 = vst.msk [vmem:[#allocation3 + $0xf0] sm:$0xff] %vm488_vm0, %v8393_v0 }
  0x39   : > { %520 = vst.msk [vmem:[#allocation3 + $0xf8] sm:$0xff] %vm488_vm0, %v8393_v0 }
  0x3a   : > { %521 = vst.msk [vmem:[#allocation3 + $0x100] sm:$0xff] %vm488_vm0, %v8393_v0 }
  0x3b   : > { %522 = vst.msk [vmem:[#allocation3 + $0x108] sm:$0xff] %vm488_vm0, %v8393_v0 }
  0x3c   : > { %523 = vst.msk [vmem:[#allocation3 + $0x110] sm:$0xff] %vm488_vm0, %v8393_v0 }
  0x3d   : > { %524 = vst.msk [vmem:[#allocation3 + $0x118] sm:$0xff] %vm488_vm0, %v8393_v0 }
  0x3e   : > { %525 = vst.msk [vmem:[#allocation3 + $0x120] sm:$0xff] %vm488_vm0, %v8393_v0 }
  0x3f   : > { %526 = vst.msk [vmem:[#allocation3 + $0x128] sm:$0xff] %vm488_vm0, %v8393_v0 }
  0x40   : > { %527 = vst.msk [vmem:[#allocation3 + $0x130] sm:$0xff] %vm488_vm0, %v8393_v0 }
  0x41   : > { %528 = vst.msk [vmem:[#allocation3 + $0x138] sm:$0xff] %vm488_vm0, %v8393_v0 }
  0x42   : > { %529 = vst.msk [vmem:[#allocation3 + $0x140] sm:$0xff] %vm488_vm0, %v8393_v0 }
  0x43   : > { %530 = vst.msk [vmem:[#allocation3 + $0x148] sm:$0xff] %vm488_vm0, %v8393_v0 }
  0x44   : > { %531 = vst.msk [vmem:[#allocation3 + $0x150] sm:$0xff] %vm488_vm0, %v8393_v0 }
  0x45   : > { %532 = vst.msk [vmem:[#allocation3 + $0x158] sm:$0xff] %vm488_vm0, %v8393_v0 }
  0x46   : > { %533 = vst.msk [vmem:[#allocation3 + $0x160] sm:$0xff] %vm488_vm0, %v8393_v0 }
  0x47   : > { %534 = vst.msk [vmem:[#allocation3 + $0x168] sm:$0xff] %vm488_vm0, %v8393_v0 }
  0x48   : > { %535 = vst.msk [vmem:[#allocation3 + $0x170] sm:$0xff] %vm488_vm0, %v8393_v0 }
  0x49   : > { %536 = vst.msk [vmem:[#allocation3 + $0x178] sm:$0xff] %vm488_vm0, %v8393_v0 }
  0x4a   : > { %537 = vst.msk [vmem:[#allocation3 + $0x180] sm:$0xff] %vm488_vm0, %v8393_v0 }
  0x4b   : > { %538 = vst.msk [vmem:[#allocation3 + $0x188] sm:$0xff] %vm488_vm0, %v8393_v0 }
  0x4c   : > { %539 = vst.msk [vmem:[#allocation3 + $0x190] sm:$0xff] %vm488_vm0, %v8393_v0 }
  0x4d   : > { %540 = vst.msk [vmem:[#allocation3 + $0x198] sm:$0xff] %vm488_vm0, %v8393_v0 }
  0x4e   : > { %541 = vst.msk [vmem:[#allocation3 + $0x1a0] sm:$0xff] %vm488_vm0, %v8393_v0 }
  0x4f   : > { %542 = vst.msk [vmem:[#allocation3 + $0x1a8] sm:$0xff] %vm488_vm0, %v8393_v0 }
  0x50   : > { %543 = vst.msk [vmem:[#allocation3 + $0x1b0] sm:$0xff] %vm488_vm0, %v8393_v0 }
  0x51   : > { %544 = vst.msk [vmem:[#allocation3 + $0x1b8] sm:$0xff] %vm488_vm0, %v8393_v0 }
  0x52   : > { %545 = vst.msk [vmem:[#allocation3 + $0x1c0] sm:$0xff] %vm488_vm0, %v8393_v0 }
  0x53   : > { %546 = vst.msk [vmem:[#allocation3 + $0x1c8] sm:$0xff] %vm488_vm0, %v8393_v0 }
  0x54   : > { %547 = vst.msk [vmem:[#allocation3 + $0x1d0] sm:$0xff] %vm488_vm0, %v8393_v0 }
  0x55   : > { %548 = vst.msk [vmem:[#allocation3 + $0x1d8] sm:$0xff] %vm488_vm0, %v8393_v0 }
  0x56   : > { %549 = vst.msk [vmem:[#allocation3 + $0x1e0] sm:$0xff] %vm488_vm0, %v8393_v0 }
  0x57   : > { %550 = vst.msk [vmem:[#allocation3 + $0x1e8] sm:$0xff] %vm488_vm0, %v8393_v0 }
  0x58   : > { %551 = vst.msk [vmem:[#allocation3 + $0x1f0] sm:$0xff] %vm488_vm0, %v8393_v0 }
  0x59   : > { %552 = vst.msk [vmem:[#allocation3 + $0x1f8] sm:$0xff] %vm488_vm0, %v8393_v0 }
  0x5a   : > { %553 = vst.msk [vmem:[#allocation2] sm:$0xff] %vm488_vm0, %v8279_v1 }
  0x5b   : > { %556 = vst.msk [vmem:[#allocation2 + $0x10] sm:$0xff] %vm488_vm0, %v8279_v1 }
  0x5c   : > { %558 = vst.msk [vmem:[#allocation2 + $0x20] sm:$0xff] %vm488_vm0, %v8279_v1 }
  0x5d   : > { %560 = vst.msk [vmem:[#allocation2 + $0x30] sm:$0xff] %vm488_vm0, %v8279_v1 }
  0x5e   : > { %562 = vst.msk [vmem:[#allocation2 + $0x40] sm:$0xff] %vm488_vm0, %v8279_v1 }
  0x5f   : > { %564 = vst.msk [vmem:[#allocation2 + $0x50] sm:$0xff] %vm488_vm0, %v8279_v1 }
  0x60   : > { %566 = vst.msk [vmem:[#allocation2 + $0x60] sm:$0xff] %vm488_vm0, %v8279_v1 }
  0x61   : > { %568 = vst.msk [vmem:[#allocation2 + $0x70] sm:$0xff] %vm488_vm0, %v8279_v1 }
  0x62   : > { %570 = vst.msk [vmem:[#allocation2 + $0x80] sm:$0xff] %vm488_vm0, %v8279_v1 }
  0x63   : > { %572 = vst.msk [vmem:[#allocation2 + $0x90] sm:$0xff] %vm488_vm0, %v8279_v1 }
  0x64   : > { %574 = vst.msk [vmem:[#allocation2 + $0xa0] sm:$0xff] %vm488_vm0, %v8279_v1 }
  0x65   : > { %576 = vst.msk [vmem:[#allocation2 + $0xb0] sm:$0xff] %vm488_vm0, %v8279_v1 }
  0x66   : > { %578 = vst.msk [vmem:[#allocation2 + $0xc0] sm:$0xff] %vm488_vm0, %v8279_v1 }
  0x67   : > { %580 = vst.msk [vmem:[#allocation2 + $0xd0] sm:$0xff] %vm488_vm0, %v8279_v1 }
  0x68   : > { %555 = vst.msk [vmem:[#allocation2 + $0x8] sm:$0x3f] %vm554_vm1, %v8279_v1 }
  0x69   : > { %557 = vst.msk [vmem:[#allocation2 + $0x18] sm:$0x3f] %vm554_vm1, %v8279_v1 }
  0x6a   : > { %559 = vst.msk [vmem:[#allocation2 + $0x28] sm:$0x3f] %vm554_vm1, %v8279_v1 }
  0x6b   : > { %561 = vst.msk [vmem:[#allocation2 + $0x38] sm:$0x3f] %vm554_vm1, %v8279_v1 }
  0x6c   : > { %563 = vst.msk [vmem:[#allocation2 + $0x48] sm:$0x3f] %vm554_vm1, %v8279_v1 }
  0x6d   : > { %565 = vst.msk [vmem:[#allocation2 + $0x58] sm:$0x3f] %vm554_vm1, %v8279_v1 }
  0x6e   : > { %567 = vst.msk [vmem:[#allocation2 + $0x68] sm:$0x3f] %vm554_vm1, %v8279_v1 }
  0x6f   : > { %569 = vst.msk [vmem:[#allocation2 + $0x78] sm:$0x3f] %vm554_vm1, %v8279_v1 }
  0x70   : > { %571 = vst.msk [vmem:[#allocation2 + $0x88] sm:$0x3f] %vm554_vm1, %v8279_v1 }
  0x71   : > { %573 = vst.msk [vmem:[#allocation2 + $0x98] sm:$0x3f] %vm554_vm1, %v8279_v1 }
  0x72   : > { %575 = vst.msk [vmem:[#allocation2 + $0xa8] sm:$0x3f] %vm554_vm1, %v8279_v1 }
  0x73   : > { %577 = vst.msk [vmem:[#allocation2 + $0xb8] sm:$0x3f] %vm554_vm1, %v8279_v1 }
  0x74   : > { %579 = vst.msk [vmem:[#allocation2 + $0xc8] sm:$0x3f] %vm554_vm1, %v8279_v1 }
  0x75   : > { %581 = vst.msk [vmem:[#allocation2 + $0xd8] sm:$0x3f] %vm554_vm1, %v8279_v1 }
  0x76 PF: > { %p585_p10 = scmp.ge.s32.totalorder %s8374_s24, 0  ;;  %p586_p11 = scmp.lt.s32.totalorder %s8374_s24, 8 }
  0x78   : > { %p8553_p12 = pnand %p586_p11, %p585_p10 }
  0x7a   : > { %590 = sbr.rel (%p8553_p12) target bundleno = 384 (0x180), region = 72 }
  0x7f   : > { %v591_v2 = vld [vmem:[%s8387_s23] sm:$0xff]  ;;  %vm600_vm2 = vcmask 64512   ;;  %v592_v3 = vld [vmem:[%s8387_s23 + $0x8] sm:$0xff]  ;;  %v593_v4 = vld [vmem:[%s8387_s23 + $0x10] sm:$0xff]  ;;  %s7442_s20 = sshll.u32 (!%p8553_p12), %s8374_s24, 6 }
  0x80   : > { %601 = vst.msk [vmem:[#allocation2 + $0x33] sm:$0xff] %vm600_vm2, %v591_v2  ;;  %v594_v5 = vld [vmem:[%s8387_s23 + $0x18] sm:$0xff]  ;;  %v595_v6 = vld [vmem:[%s8387_s23 + $0x20] sm:$0xff]  ;;  %v596_v7 = vld [vmem:[%s8387_s23 + $0x28] sm:$0xff]  ;;  %s617_s22 = scalar_lea.vmem (!%p8553_p12), [#allocation4], %s7442_s20 }
  0x81   : > { %602 = vst.msk [vmem:[#allocation2 + $0x43] sm:$0xff] %vm600_vm2, %v592_v3  ;;  %v597_v8 = vld [vmem:[%s8387_s23 + $0x30] sm:$0xff]  ;;  %v598_v9 = vld [vmem:[%s8387_s23 + $0x38] sm:$0xff] }
  0x82   : > { %603 = vst.msk [vmem:[#allocation2 + $0x53] sm:$0xff] %vm600_vm2, %v593_v4 }
  0x83   : > { %604 = vst.msk [vmem:[#allocation2 + $0x63] sm:$0xff] %vm600_vm2, %v594_v5  ;;  %615 = sbr.rel (%p8553_p12) target bundleno = 144 (0x90), region = 76 }
  0x84   : > { %605 = vst.msk [vmem:[#allocation2 + $0x73] sm:$0xff] %vm600_vm2, %v595_v6 }
  0x85   : > { %606 = vst.msk [vmem:[#allocation2 + $0x83] sm:$0xff] %vm600_vm2, %v596_v7 }
  0x86   : > { %607 = vst.msk [vmem:[#allocation2 + $0x93] sm:$0xff] %vm600_vm2, %v597_v8 }
  0x87   : > { %608 = vst.msk [vmem:[#allocation2 + $0xa3] sm:$0xff] %vm600_vm2, %v598_v9 }
  0x88   : > { %618 = vst.msk [vmem:[%s617_s22] sm:$0xff] %vm600_vm2, %v591_v2 }
  0x89   : > { %619 = vst.msk [vmem:[%s617_s22 + $0x8] sm:$0xff] %vm600_vm2, %v592_v3 }
  0x8a   : > { %620 = vst.msk [vmem:[%s617_s22 + $0x10] sm:$0xff] %vm600_vm2, %v593_v4 }
  0x8b   : > { %621 = vst.msk [vmem:[%s617_s22 + $0x18] sm:$0xff] %vm600_vm2, %v594_v5 }
  0x8c   : > { %622 = vst.msk [vmem:[%s617_s22 + $0x20] sm:$0xff] %vm600_vm2, %v595_v6 }
  0x8d   : > { %623 = vst.msk [vmem:[%s617_s22 + $0x28] sm:$0xff] %vm600_vm2, %v596_v7 }
  0x8e   : > { %624 = vst.msk [vmem:[%s617_s22 + $0x30] sm:$0xff] %vm600_vm2, %v597_v8 }
  0x8f   : > { %625 = vst.msk [vmem:[%s617_s22 + $0x38] sm:$0xff] %vm600_vm2, %v598_v9 }
  0x90 PF: > { %s8586_s23 = smov 0  }
  0x91 LB: >> { %s632_s24 = ssub.s32 %s8257_s17, %s8277_s23  ;;  %s8277_s23 = sphi %s8586_s23, %s631_s23  }
  0x92   : >> { %p633_p13 = scmp.ge.s32.totalorder %s632_s24, 0  ;;  %p634_p0 = scmp.lt.s32.totalorder %s632_s24, 8 }
  0x94   : >> { %p635_p1 = pnand %p634_p0, %p633_p13 }
  0x96   : >> { %638 = sbr.rel (%p635_p1) target bundleno = 376 (0x178), region = 87 }
  0x9b   : >> { %s639_s25 = smul.u32 56, %s8277_s23  ;;  %s7443_s26 = sshll.u32 %s632_s24, 6  ;;  %v658_v10 = vld [vmem:[#allocation2] sm:$0xff]  ;;  %v8599_v11 = vld [vmem:[#allocation2 + $0x10] sm:$0xff] }
  0x9c   : >> { %v8601_v12 = vld [vmem:[#allocation2 + $0x20] sm:$0xff]  ;;  %v8606_v14 = vld [vmem:[#allocation2 + $0x30] sm:$0xff]  ;;  %s8610_s12 = scalar_lea.vmem [#allocation3], %s7443_s26 }
  0x9d   : >> { %s8597_s30 = scalar_lea.vmem %s14740_s2, %s639_s25  ;;  %v8608_v15 = vld [vmem:[#allocation2 + $0x40] sm:$0xff]  ;;  %v651_v17 = vld [vmem:[%s8610_s12 + $0x8] sm:$0xff]  ;;  %v8614_v18 = vld [vmem:[#allocation2 + $0x50] sm:$0xff] }
  0x9e   : >> { %v8604_v13 = vld [vmem:[%s8597_s30] sm:$0x7f]  ;;  %v652_v19 = vld [vmem:[%s8610_s12 + $0x10] sm:$0xff]  ;;  %v653_v20 = vld [vmem:[%s8610_s12 + $0x18] sm:$0xff] }
  0x9f   : >> { %v650_v16 = vld [vmem:[%s8610_s12] sm:$0xff]  ;;  %v666_v22 = vperm.slane %v8604_v13, 0  ;;  %v691_v23 = vperm.slane %v8604_v13, 1  ;;  %v655_v24 = vld [vmem:[%s8610_s12 + $0x28] sm:$0xff]  ;;  %v656_v25 = vld [vmem:[%s8610_s12 + $0x30] sm:$0xff]  ;;  %v716_v27 = vperm.slane %v8604_v13, 2 }
  0xa0   : >> { %v654_v21 = vld [vmem:[%s8610_s12 + $0x20] sm:$0xff]  ;;  %v657_v26 = vld [vmem:[%s8610_s12 + $0x38] sm:$0xff]  ;;  %v8626_v28 = vperm.slane %v8604_v13, 3  ;;  %v8629_v29 = vperm.slane %v8604_v13, 4  ;;  %v8633_v31 = vld [vmem:[#allocation2 + $0x70] sm:$0xff] }
  0xa1   : >> { %v8631_v30 = vld [vmem:[#allocation2 + $0x60] sm:$0xff]  ;;  %v667_v32 = vmul.f32 %v666_v22, %v658_v10  ;;  %v668_v33 = vmul.f32 %v666_v22, %v8599_v11  ;;  %v669_v34 = vmul.f32 %v666_v22, %v8601_v12  ;;  %v670_v35 = vmul.f32 %v666_v22, %v8606_v14  ;;  %v8642_v41 = vld [vmem:[#allocation2 + $0x11] sm:$0xff] }
  0xa2   : >> { %v683_v36 = vld [vmem:[#allocation2 + $0x1] sm:$0xff]  ;;  %v671_v37 = vmul.f32 %v666_v22, %v8608_v15  ;;  %v672_v38 = vmul.f32 %v666_v22, %v8614_v18  ;;  %v673_v39 = vmul.f32 %v666_v22, %v8631_v30  ;;  %v674_v40 = vmul.f32 %v666_v22, %v8633_v31  ;;  %v8646_v43 = vld [vmem:[#allocation2 + $0x31] sm:$0xff] }
  0xa3   : >> { %v8644_v42 = vld [vmem:[#allocation2 + $0x21] sm:$0xff]  ;;  %v675_v44 = vadd.f32 %v667_v32, %v650_v16  ;;  %v676_v45 = vadd.f32 %v668_v33, %v651_v17  ;;  %v677_v46 = vadd.f32 %v669_v34, %v652_v19  ;;  %v678_v47 = vadd.f32 %v670_v35, %v653_v20  ;;  %v8650_v49 = vld [vmem:[#allocation2 + $0x51] sm:$0xff] }
  0xa4   : >> { %v8648_v48 = vld [vmem:[#allocation2 + $0x41] sm:$0xff]  ;;  %v679_v51 = vadd.f32 %v671_v37, %v654_v21  ;;  %v680_v52 = vadd.f32 %v672_v38, %v655_v24  ;;  %v681_v53 = vadd.f32 %v673_v39, %v656_v25  ;;  %v682_v54 = vadd.f32 %v674_v40, %v657_v26  ;;  %v8654_v55 = vld [vmem:[#allocation2 + $0x71] sm:$0xff] }
  0xa5   : >> { %v8652_v50 = vld [vmem:[#allocation2 + $0x61] sm:$0xff]  ;;  %v692_v56 = vmul.f32 %v691_v23, %v683_v36  ;;  %v693_v57 = vmul.f32 %v691_v23, %v8642_v41  ;;  %v694_v58 = vmul.f32 %v691_v23, %v8644_v42  ;;  %v695_v59 = vmul.f32 %v691_v23, %v8646_v43  ;;  %v8659_v61 = vld [vmem:[#allocation2 + $0x12] sm:$0xff] }
  0xa6   : >> { %v708_v60 = vld [vmem:[#allocation2 + $0x2] sm:$0xff]  ;;  %v696_v62 = vmul.f32 %v691_v23, %v8648_v48  ;;  %v697_v63 = vmul.f32 %v691_v23, %v8650_v49  ;;  %v698_v0 = vmul.f32 %v691_v23, %v8652_v50  ;;  %v699_v1 = vmul.f32 %v691_v23, %v8654_v55  ;;  %v8667_v3 = vld [vmem:[#allocation2 + $0x32] sm:$0xff] }
  0xa7   : >> { %v8665_v2 = vld [vmem:[#allocation2 + $0x22] sm:$0xff]  ;;  %v700_v5 = vadd.f32 %v692_v56, %v675_v44  ;;  %v701_v6 = vadd.f32 %v693_v57, %v676_v45  ;;  %v702_v7 = vadd.f32 %v694_v58, %v677_v46  ;;  %v703_v8 = vadd.f32 %v695_v59, %v678_v47  ;;  %v8671_v9 = vld [vmem:[#allocation2 + $0x52] sm:$0xff] }
  0xa8   : >> { %v8669_v4 = vld [vmem:[#allocation2 + $0x42] sm:$0xff]  ;;  %v8675_v16 = vld [vmem:[#allocation2 + $0x72] sm:$0xff]  ;;  %v704_v17 = vadd.f32 %v696_v62, %v679_v51  ;;  %v705_v19 = vadd.f32 %v697_v63, %v680_v52  ;;  %v706_v20 = vadd.f32 %v698_v0, %v681_v53  ;;  %v707_v21 = vadd.f32 %v699_v1, %v682_v54 }
  0xa9   : >> { %v8673_v10 = vld [vmem:[#allocation2 + $0x62] sm:$0xff]  ;;  %v717_v22 = vmul.f32 %v716_v27, %v708_v60  ;;  %v718_v23 = vmul.f32 %v716_v27, %v8659_v61  ;;  %v719_v24 = vmul.f32 %v716_v27, %v8665_v2  ;;  %v720_v25 = vmul.f32 %v716_v27, %v8667_v3  ;;  %v8680_v32 = vld [vmem:[#allocation2 + $0x13] sm:$0xff] }
  0xaa   : >> { %v733_v26 = vld [vmem:[#allocation2 + $0x3] sm:$0xff]  ;;  %v721_v33 = vmul.f32 %v716_v27, %v8669_v4  ;;  %v722_v34 = vmul.f32 %v716_v27, %v8671_v9  ;;  %v723_v35 = vmul.f32 %v716_v27, %v8673_v10  ;;  %v724_v36 = vmul.f32 %v716_v27, %v8675_v16  ;;  %v8688_v38 = vld [vmem:[#allocation2 + $0x33] sm:$0xff] }
  0xab   : >> { %v8686_v37 = vld [vmem:[#allocation2 + $0x23] sm:$0xff]  ;;  %v725_v40 = vadd.f32 %v717_v22, %v700_v5  ;;  %v726_v44 = vadd.f32 %v718_v23, %v701_v6  ;;  %v727_v45 = vadd.f32 %v719_v24, %v702_v7  ;;  %v728_v46 = vadd.f32 %v720_v25, %v703_v8  ;;  %v8692_v47 = vld [vmem:[#allocation2 + $0x53] sm:$0xff] }
  0xac   : >> { %v8690_v39 = vld [vmem:[#allocation2 + $0x43] sm:$0xff]  ;;  %14972 = vst [vmem:[#allocation9_spill] sm:$0xff] %v8692_v47  ;;  %v8696_v52 = vld [vmem:[#allocation2 + $0x73] sm:$0xff]  ;;  %v729_v53 = vadd.f32 %v721_v33, %v704_v17  ;;  %v730_v54 = vadd.f32 %v722_v34, %v705_v19  ;;  %v731_v56 = vadd.f32 %v723_v35, %v706_v20  ;;  %v732_v27 = vadd.f32 %v724_v36, %v707_v21 }
  0xad   : >> { %14971 = vst [vmem:[#allocation8_spill] sm:$0xff] %v8690_v39  ;;  %v8694_v51 = vld [vmem:[#allocation2 + $0x63] sm:$0xff]  ;;  %v742_v57 = vmul.f32 %v8626_v28, %v733_v26  ;;  %v743_v58 = vmul.f32 %v8626_v28, %v8680_v32  ;;  %v744_v59 = vmul.f32 %v8626_v28, %v8686_v37  ;;  %v745_v60 = vmul.f32 %v8626_v28, %v8688_v38  ;;  %v8705_v63 = vld [vmem:[#allocation2 + $0x14] sm:$0xff] }
  0xae   : >> { %14973 = vst [vmem:[#allocation10_spill] sm:$0xff] %v8694_v51  ;;  %v758_v62 = vld [vmem:[#allocation2 + $0x4] sm:$0xff]  ;;  %v746_v0 = vmul.f32 %v8626_v28, %v8690_v39  ;;  %v747_v1 = vmul.f32 %v8626_v28, %v8692_v47  ;;  %v748_v5 = vmul.f32 %v8626_v28, %v8694_v51  ;;  %v749_v6 = vmul.f32 %v8626_v28, %v8696_v52  ;;  %v8717_v8 = vld [vmem:[#allocation2 + $0x34] sm:$0xff] }
  0xaf   : >> { %14974 = vst [vmem:[#allocation11_spill] sm:$0xff] %v8696_v52  ;;  %v8715_v7 = vld [vmem:[#allocation2 + $0x24] sm:$0xff]  ;;  %v750_v19 = vadd.f32 %v742_v57, %v725_v40  ;;  %v751_v20 = vadd.f32 %v743_v58, %v726_v44  ;;  %v752_v21 = vadd.f32 %v744_v59, %v727_v45  ;;  %v753_v22 = vadd.f32 %v745_v60, %v728_v46  ;;  %v8721_v23 = vld [vmem:[#allocation2 + $0x54] sm:$0xff] }
  0xb0   : >> { %14975 = vst [vmem:[#allocation12_spill] sm:$0xff] %v8705_v63  ;;  %v8719_v17 = vld [vmem:[#allocation2 + $0x44] sm:$0xff]  ;;  %v8725_v25 = vld [vmem:[#allocation2 + $0x74] sm:$0xff]  ;;  %v754_v26 = vadd.f32 %v746_v0, %v729_v53  ;;  %v755_v33 = vadd.f32 %v747_v1, %v730_v54  ;;  %v756_v28 = vadd.f32 %v748_v5, %v731_v56  ;;  %v757_v34 = vadd.f32 %v749_v6, %v732_v27 }
  0xb1   : >> { %14976 = vst [vmem:[#allocation13_spill] sm:$0xff] %v8715_v7  ;;  %v8723_v24 = vld [vmem:[#allocation2 + $0x64] sm:$0xff]  ;;  %v767_v35 = vmul.f32 %v8629_v29, %v758_v62  ;;  %v768_v36 = vmul.f32 %v8629_v29, %v8705_v63  ;;  %v769_v40 = vmul.f32 %v8629_v29, %v8715_v7  ;;  %v770_v44 = vmul.f32 %v8629_v29, %v8717_v8  ;;  %v8745_v62 = vld [vmem:[#allocation2 + $0x15] sm:$0xff] }
  0xb2   : >> { %14977 = vst [vmem:[#allocation14_spill] sm:$0xff] %v8717_v8  ;;  %v8735_v45 = vld [vmem:[%s8597_s30 + $0x8] sm:$0x7f]  ;;  %v771_v46 = vmul.f32 %v8629_v29, %v8719_v17  ;;  %v772_v53 = vmul.f32 %v8629_v29, %v8721_v23  ;;  %v773_v54 = vmul.f32 %v8629_v29, %v8723_v24  ;;  %v774_v56 = vmul.f32 %v8629_v29, %v8725_v25  ;;  %v8792_v63 = vld [vmem:[#allocation2 + $0x56] sm:$0xff] }
  0xb3   : >> { %14978 = vst [vmem:[#allocation15_spill] sm:$0xff] %v8719_v17  ;;  %v775_v27 = vadd.f32 %v767_v35, %v750_v19  ;;  %v776_v57 = vadd.f32 %v768_v36, %v751_v20  ;;  %v777_v58 = vadd.f32 %v769_v40, %v752_v21  ;;  %v778_v59 = vadd.f32 %v770_v44, %v753_v22  ;;  %v783_v60 = vld [vmem:[#allocation2 + $0x5] sm:$0xff]  ;;  %v8757_v19 = vld [vmem:[#allocation2 + $0x75] sm:$0xff] }
  0xb4   : >> { %14979 = vst [vmem:[#allocation16_spill] sm:$0xff] %v8721_v23  ;;  %v8747_v0 = vld [vmem:[#allocation2 + $0x25] sm:$0xff]  ;;  %v779_v1 = vadd.f32 %v771_v46, %v754_v26  ;;  %v780_v5 = vadd.f32 %v772_v53, %v755_v33  ;;  %v781_v6 = vadd.f32 %v773_v54, %v756_v28  ;;  %v782_v17 = vadd.f32 %v774_v56, %v757_v34  ;;  %v8749_v23 = vld [vmem:[#allocation2 + $0x35] sm:$0xff] }
  0xb5   : >> { %14980 = vst [vmem:[#allocation17_spill] sm:$0xff] %v8723_v24  ;;  %v8751_v8 = vld [vmem:[#allocation2 + $0x45] sm:$0xff]  ;;  %v8753_v24 = vld [vmem:[#allocation2 + $0x55] sm:$0xff]  ;;  %v791_v20 = vperm.slane %v8604_v13, 5  ;;  %v816_v21 = vperm.slane %v8604_v13, 6  ;;  %v842_v22 = vperm.slane %v8735_v45, 0 }
  0xb6   : >> { %14981 = vst [vmem:[#allocation18_spill] sm:$0xff] %v8725_v25  ;;  %v8755_v29 = vld [vmem:[#allocation2 + $0x65] sm:$0xff]  ;;  %v8763_v26 = vperm.slane %v8735_v45, 1  ;;  %v8766_v33 = vperm.slane %v8735_v45, 2  ;;  %v8769_v28 = vperm.slane %v8735_v45, 3  ;;  %v8772_v34 = vperm.slane %v8735_v45, 4 }
  0xb7   : >> { %14982 = vst [vmem:[#allocation19_spill] sm:$0xff] %v8735_v45  ;;  %v8775_v35 = vperm.slane %v8735_v45, 5  ;;  %v792_v36 = vmul.f32 %v791_v20, %v783_v60  ;;  %v793_v13 = vmul.f32 %v791_v20, %v8745_v62  ;;  %v794_v40 = vmul.f32 %v791_v20, %v8747_v0  ;;  %v808_v46 = vld [vmem:[#allocation2 + $0x6] sm:$0xff]  ;;  %v8780_v53 = vld [vmem:[#allocation2 + $0x16] sm:$0xff] }
  0xb8   : >> { %14983 = vst [vmem:[#allocation20_spill] sm:$0xff] %v8745_v62  ;;  %v795_v44 = vmul.f32 %v791_v20, %v8749_v23  ;;  %v796_v54 = vmul.f32 %v791_v20, %v8751_v8  ;;  %v797_v56 = vmul.f32 %v791_v20, %v8753_v24  ;;  %v798_v25 = vmul.f32 %v791_v20, %v8755_v29  ;;  %v8786_v45 = vld [vmem:[#allocation2 + $0x26] sm:$0xff]  ;;  %v8788_v60 = vld [vmem:[#allocation2 + $0x36] sm:$0xff] }
  0xb9   : >> { %14984 = vst [vmem:[#allocation21_spill] sm:$0xff] %v8747_v0  ;;  %v799_v7 = vmul.f32 %v791_v20, %v8757_v19  ;;  %v800_v0 = vadd.f32 %v792_v36, %v775_v27  ;;  %v801_v62 = vadd.f32 %v793_v13, %v776_v57  ;;  %v8794_v52 = vld [vmem:[#allocation2 + $0x66] sm:$0xff]  ;;  %v818_v47 = vmul.f32 %v816_v21, %v8780_v53 }
  0xba   : >> { %14985 = vst [vmem:[#allocation22_spill] sm:$0xff] %v8749_v23  ;;  %v802_v23 = vadd.f32 %v794_v40, %v777_v58  ;;  %v806_v51 = vadd.f32 %v798_v25, %v781_v6  ;;  %v819_v39 = vmul.f32 %v816_v21, %v8786_v45  ;;  %v820_v27 = vmul.f32 %v816_v21, %v8788_v60 }
  0xbb   : >> { %14986 = vst [vmem:[#allocation23_spill] sm:$0xff] %v8751_v8  ;;  %v8796_v8 = vld [vmem:[#allocation2 + $0x76] sm:$0xff]  ;;  %v807_v20 = vadd.f32 %v799_v7, %v782_v17  ;;  %v822_v58 = vmul.f32 %v816_v21, %v8792_v63  ;;  %v8805_v7 = vld [vmem:[#allocation2 + $0x80] sm:$0xff] }
  0xbc   : >> { %14987 = vst [vmem:[#allocation24_spill] sm:$0xff] %v8753_v24  ;;  %v804_v24 = vadd.f32 %v796_v54, %v779_v1  ;;  %v824_v36 = vmul.f32 %v816_v21, %v8796_v8  ;;  %v826_v1 = vadd.f32 %v818_v47, %v801_v62  ;;  %v844_v54 = vmul.f32 %v842_v22, %v8601_v12 }
  0xbd   : >> { %14988 = vst [vmem:[#allocation25_spill] sm:$0xff] %v8755_v29  ;;  %v805_v29 = vadd.f32 %v797_v56, %v780_v5  ;;  %v827_v5 = vadd.f32 %v819_v39, %v802_v23  ;;  %v845_v56 = vmul.f32 %v842_v22, %v8606_v14  ;;  %v848_v47 = vmul.f32 %v842_v22, %v8631_v30 }
  0xbe   : >> { %14989 = vst [vmem:[#allocation26_spill] sm:$0xff] %v8757_v19  ;;  %v817_v19 = vmul.f32 %v816_v21, %v808_v46  ;;  %v843_v46 = vmul.f32 %v842_v22, %v8599_v11  ;;  %v849_v39 = vmul.f32 %v842_v22, %v8633_v31  ;;  %v850_v23 = vmul.f32 %v842_v22, %v8805_v7 }
  0xbf   : >> { %14990 = vst [vmem:[#allocation27_spill] sm:$0xff] %v8772_v34  ;;  %v803_v34 = vadd.f32 %v795_v44, %v778_v59  ;;  %v823_v59 = vmul.f32 %v816_v21, %v8794_v52  ;;  %v830_v6 = vadd.f32 %v822_v58, %v805_v29  ;;  %v832_v44 = vadd.f32 %v824_v36, %v807_v20  ;;  %v8815_v29 = vld [vmem:[#allocation2 + $0x81] sm:$0xff] }
  0xc0   : >> { %14991 = vst [vmem:[#allocation28_spill] sm:$0xff] %v8775_v35  ;;  %v8790_v35 = vld [vmem:[#allocation2 + $0x46] sm:$0xff]  ;;  %v825_v13 = vadd.f32 %v817_v19, %v800_v0  ;;  %v852_v62 = vadd.f32 %v844_v54, %v826_v1  ;;  %v870_v58 = vmul.f32 %v8763_v26, %v8646_v43  ;;  %v874_v36 = vmul.f32 %v8763_v26, %v8654_v55 }
  0xc1   : >> { %14992 = vst [vmem:[#allocation29_spill] sm:$0xff] %v8790_v35  ;;  %v821_v57 = vmul.f32 %v816_v21, %v8790_v35  ;;  %v828_v25 = vadd.f32 %v820_v27, %v803_v34  ;;  %v831_v40 = vadd.f32 %v823_v59, %v806_v51  ;;  %v847_v21 = vmul.f32 %v842_v22, %v8614_v18 }
  0xc2   : >> { %14993 = vst [vmem:[#allocation30_spill] sm:$0xff] %v8792_v63  ;;  %v853_v51 = vadd.f32 %v845_v56, %v827_v5  ;;  %v856_v19 = vadd.f32 %v848_v47, %v830_v6  ;;  %v858_v20 = vadd.f32 %v850_v23, %v832_v44  ;;  %v868_v27 = vmul.f32 %v8763_v26, %v8642_v41 }
  0xc3   : >> { %14994 = vst [vmem:[#allocation31_spill] sm:$0xff] %v8794_v52  ;;  %v829_v17 = vadd.f32 %v821_v57, %v804_v24  ;;  %v846_v52 = vmul.f32 %v842_v22, %v8608_v15  ;;  %v851_v24 = vadd.f32 %v843_v46, %v825_v13  ;;  %v857_v34 = vadd.f32 %v849_v39, %v831_v40 }
  0xc4   : >> { %14995 = vst [vmem:[#allocation32_spill] sm:$0xff] %v8796_v8  ;;  %v869_v57 = vmul.f32 %v8763_v26, %v8644_v42  ;;  %v871_v22 = vmul.f32 %v8763_v26, %v8648_v48  ;;  %v873_v59 = vmul.f32 %v8763_v26, %v8652_v50  ;;  %v875_v41 = vmul.f32 %v8763_v26, %v8815_v29 }
  0xc5   : >> { %v854_v0 = vadd.f32 %v846_v52, %v828_v25  ;;  %v855_v11 = vadd.f32 %v847_v21, %v829_v17  ;;  %v872_v52 = vmul.f32 %v8763_v26, %v8650_v49  ;;  %v876_v13 = vadd.f32 %v868_v27, %v851_v24  ;;  %v8833_v17 = vld [vmem:[#allocation2 + $0x82] sm:$0xff] }
  0xc6   : >> { %v877_v1 = vadd.f32 %v869_v57, %v852_v62  ;;  %v878_v5 = vadd.f32 %v870_v58, %v853_v51  ;;  %v881_v40 = vadd.f32 %v873_v59, %v856_v19  ;;  %v882_v44 = vadd.f32 %v874_v36, %v857_v34  ;;  %v14998_v59 = vld [vmem:[#allocation9_spill] sm:$0xff] }
  0xc7   : >> { %v879_v25 = vadd.f32 %v871_v22, %v854_v0  ;;  %v880_v6 = vadd.f32 %v872_v52, %v855_v11  ;;  %v883_v46 = vadd.f32 %v875_v41, %v858_v20  ;;  %v893_v54 = vmul.f32 %v8766_v33, %v8659_v61  ;;  %v8851_v11 = vld [vmem:[#allocation2 + $0x83] sm:$0xff]  ;;  %v14999_v41 = vld [vmem:[#allocation10_spill] sm:$0xff] }
  0xc8   : >> { %v894_v56 = vmul.f32 %v8766_v33, %v8665_v2  ;;  %v895_v21 = vmul.f32 %v8766_v33, %v8667_v3  ;;  %v896_v26 = vmul.f32 %v8766_v33, %v8669_v4  ;;  %v897_v47 = vmul.f32 %v8766_v33, %v8671_v9  ;;  %14996 = vst [vmem:[#allocation33_spill] sm:$0xff] %v8851_v11 }
  0xc9   : >> { %v898_v39 = vmul.f32 %v8766_v33, %v8673_v10  ;;  %v899_v23 = vmul.f32 %v8766_v33, %v8675_v16  ;;  %v900_v61 = vmul.f32 %v8766_v33, %v8833_v17  ;;  %v901_v24 = vadd.f32 %v893_v54, %v876_v13  ;;  %v14997_v33 = vld [vmem:[#allocation8_spill] sm:$0xff] }
  0xca   : >> { %v902_v62 = vadd.f32 %v894_v56, %v877_v1  ;;  %v903_v51 = vadd.f32 %v895_v21, %v878_v5  ;;  %v904_v0 = vadd.f32 %v896_v26, %v879_v25  ;;  %v905_v19 = vadd.f32 %v897_v47, %v880_v6  ;;  %v15000_v1 = vld [vmem:[#allocation11_spill] sm:$0xff]  ;;  %v15002_v47 = vld [vmem:[#allocation12_spill] sm:$0xff] }
  0xcb   : >> { %v906_v34 = vadd.f32 %v898_v39, %v881_v40  ;;  %v907_v20 = vadd.f32 %v899_v23, %v882_v44  ;;  %v908_v27 = vadd.f32 %v900_v61, %v883_v46  ;;  %v918_v57 = vmul.f32 %v8769_v28, %v8680_v32  ;;  %v8869_v46 = vld [vmem:[#allocation2 + $0x84] sm:$0xff]  ;;  %v15003_v39 = vld [vmem:[#allocation27_spill] sm:$0xff] }
  0xcc   : >> { %v919_v58 = vmul.f32 %v8769_v28, %v8686_v37  ;;  %v920_v22 = vmul.f32 %v8769_v28, %v8688_v38  ;;  %v921_v52 = vmul.f32 %v8769_v28, %v14997_v33  ;;  %v922_v36 = vmul.f32 %v8769_v28, %v14998_v59  ;;  %15001 = vst [vmem:[#allocation34_spill] sm:$0xff] %v8869_v46  ;;  %v15004_v61 = vld [vmem:[#allocation13_spill] sm:$0xff] }
  0xcd   : >> { %v923_v13 = vmul.f32 %v8769_v28, %v14999_v41  ;;  %v924_v5 = vmul.f32 %v8769_v28, %v15000_v1  ;;  %v925_v32 = vmul.f32 %v8769_v28, %v8851_v11  ;;  %v926_v25 = vadd.f32 %v918_v57, %v901_v24  ;;  %v15005_v1 = vld [vmem:[#allocation14_spill] sm:$0xff]  ;;  %v15006_v28 = vld [vmem:[#allocation15_spill] sm:$0xff] }
  0xce   : >> { %v927_v6 = vadd.f32 %v919_v58, %v902_v62  ;;  %v928_v40 = vadd.f32 %v920_v22, %v903_v51  ;;  %v929_v44 = vadd.f32 %v921_v52, %v904_v0  ;;  %v930_v54 = vadd.f32 %v922_v36, %v905_v19  ;;  %v15007_v62 = vld [vmem:[#allocation16_spill] sm:$0xff]  ;;  %v15008_v0 = vld [vmem:[#allocation17_spill] sm:$0xff] }
  0xcf   : >> { %v931_v56 = vadd.f32 %v923_v13, %v906_v34  ;;  %v932_v21 = vadd.f32 %v924_v5, %v907_v20  ;;  %v933_v26 = vadd.f32 %v925_v32, %v908_v27  ;;  %v943_v23 = vmul.f32 %v15003_v39, %v15002_v47  ;;  %v15009_v34 = vld [vmem:[#allocation18_spill] sm:$0xff]  ;;  %v8887_v36 = vld [vmem:[#allocation2 + $0x85] sm:$0xff] }
  0xd0   : >> { %v944_v41 = vmul.f32 %v15003_v39, %v15004_v61  ;;  %v945_v59 = vmul.f32 %v15003_v39, %v15005_v1  ;;  %v946_v24 = vmul.f32 %v15003_v39, %v15006_v28  ;;  %v947_v51 = vmul.f32 %v15003_v39, %v15007_v62  ;;  %v15010_v62 = vld [vmem:[#allocation20_spill] sm:$0xff]  ;;  %v15012_v1 = vld [vmem:[#allocation21_spill] sm:$0xff] }
  0xd1   : >> { %v948_v19 = vmul.f32 %v15003_v39, %v15008_v0  ;;  %v949_v20 = vmul.f32 %v15003_v39, %v15009_v34  ;;  %v950_v27 = vmul.f32 %v15003_v39, %v8869_v46  ;;  %v951_v57 = vadd.f32 %v943_v23, %v926_v25  ;;  %v15011_v28 = vld [vmem:[#allocation28_spill] sm:$0xff]  ;;  %v15013_v34 = vld [vmem:[#allocation22_spill] sm:$0xff]  ;;  %v15014_v39 = vld [vmem:[#allocation23_spill] sm:$0xff] }
  0xd2   : >> { %v952_v58 = vadd.f32 %v944_v41, %v927_v6  ;;  %v953_v22 = vadd.f32 %v945_v59, %v928_v40  ;;  %v954_v52 = vadd.f32 %v946_v24, %v929_v44  ;;  %v955_v13 = vadd.f32 %v947_v51, %v930_v54  ;;  %v643_v59 = vld [vmem:[%s8597_s30 + $0x10] sm:$0x7f]  ;;  %v15015_v25 = vld [vmem:[#allocation24_spill] sm:$0xff]  ;;  %v15016_v40 = vld [vmem:[#allocation25_spill] sm:$0xff] }
  0xd3   : >> { %v956_v5 = vadd.f32 %v948_v19, %v931_v56  ;;  %v957_v32 = vadd.f32 %v949_v20, %v932_v21  ;;  %v958_v47 = vadd.f32 %v950_v27, %v933_v26  ;;  %v968_v0 = vmul.f32 %v15011_v28, %v15010_v62  ;;  %v15017_v54 = vld [vmem:[#allocation26_spill] sm:$0xff] }
  0xd4   : >> { %v969_v61 = vmul.f32 %v15011_v28, %v15012_v1  ;;  %v970_v11 = vmul.f32 %v15011_v28, %v15013_v34  ;;  %v971_v41 = vmul.f32 %v15011_v28, %v15014_v39  ;;  %v972_v6 = vmul.f32 %v15011_v28, %v15015_v25  ;;  %v8906_v39 = vld [vmem:[#allocation2 + $0x86] sm:$0xff]  ;;  %v15018_v25 = vld [vmem:[#allocation19_spill] sm:$0xff] }
  0xd5   : >> { %v973_v44 = vmul.f32 %v15011_v28, %v15016_v40  ;;  %v974_v56 = vmul.f32 %v15011_v28, %v15017_v54  ;;  %v975_v21 = vmul.f32 %v15011_v28, %v8887_v36  ;;  %v976_v26 = vadd.f32 %v968_v0, %v951_v57 }
  0xd6   : >> { %v977_v23 = vadd.f32 %v969_v61, %v952_v58  ;;  %v978_v24 = vadd.f32 %v970_v11, %v953_v22  ;;  %v979_v62 = vadd.f32 %v971_v41, %v954_v52  ;;  %v980_v51 = vadd.f32 %v972_v6, %v955_v13  ;;  %v15019_v52 = vld [vmem:[#allocation31_spill] sm:$0xff]  ;;  %v8927_v6 = vld [vmem:[#allocation2 + $0x90] sm:$0xff] }
  0xd7   : >> { %v981_v19 = vadd.f32 %v973_v44, %v956_v5  ;;  %v982_v20 = vadd.f32 %v974_v56, %v957_v32  ;;  %v983_v27 = vadd.f32 %v975_v21, %v958_v47  ;;  %v992_v34 = vperm.slane %v15018_v25, 6 }
  0xd8   : >> { %v1018_v1 = vperm.slane %v643_v59, 0  ;;  %v1043_v40 = vperm.slane %v643_v59, 1  ;;  %v8909_v46 = vperm.slane %v643_v59, 2  ;;  %v8911_v54 = vperm.slane %v643_v59, 3 }
  0xd9   : >> { %v8913_v33 = vperm.slane %v643_v59, 4  ;;  %v8915_v28 = vperm.slane %v643_v59, 5  ;;  %v8917_v11 = vperm.slane %v643_v59, 6  ;;  %v993_v61 = vmul.f32 %v992_v34, %v8780_v53 }
  0xda   : >> { %v994_v0 = vmul.f32 %v992_v34, %v8786_v45  ;;  %v995_v57 = vmul.f32 %v992_v34, %v8788_v60  ;;  %v996_v58 = vmul.f32 %v992_v34, %v8790_v35  ;;  %v997_v22 = vmul.f32 %v992_v34, %v8792_v63 }
  0xdb   : >> { %v998_v13 = vmul.f32 %v992_v34, %v15019_v52  ;;  %v999_v5 = vmul.f32 %v992_v34, %v8796_v8  ;;  %v1000_v32 = vmul.f32 %v992_v34, %v8906_v39  ;;  %v1001_v47 = vadd.f32 %v993_v61, %v976_v26 }
  0xdc   : >> { %v1002_v41 = vadd.f32 %v994_v0, %v977_v23  ;;  %v1003_v59 = vadd.f32 %v995_v57, %v978_v24  ;;  %v1004_v25 = vadd.f32 %v996_v58, %v979_v62  ;;  %v1005_v53 = vadd.f32 %v997_v22, %v980_v51 }
  0xdd   : >> { %v1006_v44 = vadd.f32 %v998_v13, %v981_v19  ;;  %v1007_v56 = vadd.f32 %v999_v5, %v982_v20  ;;  %v1008_v21 = vadd.f32 %v1000_v32, %v983_v27  ;;  %v1019_v35 = vmul.f32 %v1018_v1, %v8601_v12  ;;  %v8937_v27 = vld [vmem:[#allocation2 + $0x91] sm:$0xff] }
  0xde   : >> { %v1020_v63 = vmul.f32 %v1018_v1, %v8606_v14  ;;  %v1021_v52 = vmul.f32 %v1018_v1, %v8608_v15  ;;  %v1022_v8 = vmul.f32 %v1018_v1, %v8614_v18  ;;  %v1023_v34 = vmul.f32 %v1018_v1, %v8631_v30  ;;  %v8947_v13 = vld [vmem:[#allocation2 + $0x92] sm:$0xff] }
  0xdf   : >> { %v1024_v26 = vmul.f32 %v1018_v1, %v8633_v31  ;;  %v1025_v23 = vmul.f32 %v1018_v1, %v8805_v7  ;;  %v1026_v24 = vmul.f32 %v1018_v1, %v8927_v6  ;;  %v1027_v62 = vadd.f32 %v1019_v35, %v1001_v47 }
  0xe0   : >> { %v1028_v51 = vadd.f32 %v1020_v63, %v1002_v41  ;;  %v1029_v19 = vadd.f32 %v1021_v52, %v1003_v59  ;;  %v1030_v20 = vadd.f32 %v1022_v8, %v1004_v25  ;;  %v1031_v12 = vadd.f32 %v1023_v34, %v1005_v53  ;;  %v15021_v34 = vld [vmem:[#allocation8_spill] sm:$0xff] }
  0xe1   : >> { %v1032_v14 = vadd.f32 %v1024_v26, %v1006_v44  ;;  %v1033_v61 = vadd.f32 %v1025_v23, %v1007_v56  ;;  %v1034_v15 = vadd.f32 %v1026_v24, %v1008_v21  ;;  %v1044_v18 = vmul.f32 %v1043_v40, %v8644_v42  ;;  %v15023_v24 = vld [vmem:[#allocation10_spill] sm:$0xff] }
  0xe2   : >> { %v1045_v30 = vmul.f32 %v1043_v40, %v8646_v43  ;;  %v1046_v31 = vmul.f32 %v1043_v40, %v8648_v48  ;;  %v1047_v0 = vmul.f32 %v1043_v40, %v8650_v49  ;;  %v1048_v1 = vmul.f32 %v1043_v40, %v8652_v50 }
  0xe3   : >> { %v1049_v63 = vmul.f32 %v1043_v40, %v8654_v55  ;;  %v1050_v8 = vmul.f32 %v1043_v40, %v8815_v29  ;;  %v1051_v35 = vmul.f32 %v1043_v40, %v8937_v27  ;;  %v1052_v57 = vadd.f32 %v1044_v18, %v1027_v62  ;;  %v8983_v18 = vld [vmem:[#allocation2 + $0x94] sm:$0xff] }
  0xe4   : >> { %v1053_v58 = vadd.f32 %v1045_v30, %v1028_v51  ;;  %v1054_v22 = vadd.f32 %v1046_v31, %v1029_v19  ;;  %v1055_v52 = vadd.f32 %v1047_v0, %v1030_v20  ;;  %v1056_v42 = vadd.f32 %v1048_v1, %v1031_v12  ;;  %v15024_v51 = vld [vmem:[#allocation11_spill] sm:$0xff]  ;;  %v15025_v20 = vld [vmem:[#allocation33_spill] sm:$0xff]  ;;  %15026 = vst [vmem:[#allocation27_spill] sm:$0xff] %v8983_v18 }
  0xe5   : >> { %v1057_v43 = vadd.f32 %v1049_v63, %v1032_v14  ;;  %v1058_v5 = vadd.f32 %v1050_v8, %v1033_v61  ;;  %v1059_v48 = vadd.f32 %v1051_v35, %v1034_v15  ;;  %v1069_v49 = vmul.f32 %v8909_v46, %v8665_v2  ;;  %v15027_v63 = vld [vmem:[#allocation13_spill] sm:$0xff]  ;;  %v15028_v35 = vld [vmem:[#allocation14_spill] sm:$0xff] }
  0xe6   : >> { %v1070_v50 = vmul.f32 %v8909_v46, %v8667_v3  ;;  %v1071_v55 = vmul.f32 %v8909_v46, %v8669_v4  ;;  %v1072_v40 = vmul.f32 %v8909_v46, %v8671_v9  ;;  %v1073_v32 = vmul.f32 %v8909_v46, %v8673_v10  ;;  %v8965_v4 = vld [vmem:[#allocation2 + $0x93] sm:$0xff] }
  0xe7   : >> { %v1074_v47 = vmul.f32 %v8909_v46, %v8675_v16  ;;  %v1075_v41 = vmul.f32 %v8909_v46, %v8833_v17  ;;  %v1076_v2 = vmul.f32 %v8909_v46, %v8947_v13  ;;  %v1077_v59 = vadd.f32 %v1069_v49, %v1052_v57  ;;  %15020 = vst [vmem:[#allocation12_spill] sm:$0xff] %v8965_v4  ;;  %v15022_v46 = vld [vmem:[#allocation9_spill] sm:$0xff]  ;;  %v15033_v49 = vld [vmem:[#allocation34_spill] sm:$0xff] }
  0xe8   : >> { %v1078_v3 = vadd.f32 %v1070_v50, %v1053_v58  ;;  %v1079_v25 = vadd.f32 %v1071_v55, %v1054_v22  ;;  %v1080_v53 = vadd.f32 %v1072_v40, %v1055_v52  ;;  %v1081_v44 = vadd.f32 %v1073_v32, %v1056_v42  ;;  %v15029_v58 = vld [vmem:[#allocation15_spill] sm:$0xff]  ;;  %v15031_v42 = vld [vmem:[#allocation17_spill] sm:$0xff] }
  0xe9   : >> { %v1082_v9 = vadd.f32 %v1074_v47, %v1057_v43  ;;  %v1083_v56 = vadd.f32 %v1075_v41, %v1058_v5  ;;  %v1084_v21 = vadd.f32 %v1076_v2, %v1059_v48  ;;  %v1094_v10 = vmul.f32 %v8911_v54, %v8686_v37  ;;  %v15032_v5 = vld [vmem:[#allocation18_spill] sm:$0xff] }
  0xea   : >> { %v1095_v16 = vmul.f32 %v8911_v54, %v8688_v38  ;;  %v1096_v26 = vmul.f32 %v8911_v54, %v15021_v34  ;;  %v1097_v23 = vmul.f32 %v8911_v54, %v15022_v46  ;;  %v1098_v62 = vmul.f32 %v8911_v54, %v15023_v24  ;;  %v9001_v2 = vld [vmem:[#allocation2 + $0x95] sm:$0xff] }
  0xeb   : >> { %v1099_v19 = vmul.f32 %v8911_v54, %v15024_v51  ;;  %v1100_v12 = vmul.f32 %v8911_v54, %v15025_v20  ;;  %v1101_v37 = vmul.f32 %v8911_v54, %v8965_v4  ;;  %v1102_v14 = vadd.f32 %v1094_v10, %v1077_v59  ;;  %v15030_v54 = vld [vmem:[#allocation16_spill] sm:$0xff]  ;;  %15034 = vst [vmem:[#allocation20_spill] sm:$0xff] %v9001_v2  ;;  %v15037_v10 = vld [vmem:[#allocation23_spill] sm:$0xff] }
  0xec   : >> { %v1103_v38 = vadd.f32 %v1095_v16, %v1078_v3  ;;  %v1104_v61 = vadd.f32 %v1096_v26, %v1079_v25  ;;  %v1105_v15 = vadd.f32 %v1097_v23, %v1080_v53  ;;  %v1106_v30 = vadd.f32 %v1098_v62, %v1081_v44  ;;  %v15035_v44 = vld [vmem:[#allocation21_spill] sm:$0xff]  ;;  %v15040_v23 = vld [vmem:[#allocation26_spill] sm:$0xff] }
  0xed   : >> { %v1107_v31 = vadd.f32 %v1099_v19, %v1082_v9  ;;  %v1108_v0 = vadd.f32 %v1100_v12, %v1083_v56  ;;  %v1109_v1 = vadd.f32 %v1101_v37, %v1084_v21  ;;  %v1119_v8 = vmul.f32 %v8913_v33, %v15027_v63  ;;  %v15036_v56 = vld [vmem:[#allocation22_spill] sm:$0xff]  ;;  %v15039_v26 = vld [vmem:[#allocation25_spill] sm:$0xff] }
  0xee   : >> { %v1120_v57 = vmul.f32 %v8913_v33, %v15028_v35  ;;  %v1121_v22 = vmul.f32 %v8913_v33, %v15029_v58  ;;  %v1122_v52 = vmul.f32 %v8913_v33, %v15030_v54  ;;  %v1123_v43 = vmul.f32 %v8913_v33, %v15031_v42  ;;  %v15041_v63 = vld [vmem:[#allocation29_spill] sm:$0xff]  ;;  %v15043_v58 = vld [vmem:[#allocation31_spill] sm:$0xff]  ;;  %v15044_v54 = vld [vmem:[#allocation32_spill] sm:$0xff] }
  0xef   : >> { %v1124_v48 = vmul.f32 %v8913_v33, %v15032_v5  ;;  %v1125_v50 = vmul.f32 %v8913_v33, %v15033_v49  ;;  %v1126_v55 = vmul.f32 %v8913_v33, %v8983_v18  ;;  %v1127_v40 = vadd.f32 %v1119_v8, %v1102_v14  ;;  %v15038_v33 = vld [vmem:[#allocation24_spill] sm:$0xff]  ;;  %v15042_v8 = vld [vmem:[#allocation30_spill] sm:$0xff] }
  0xf0   : >> { %v1128_v32 = vadd.f32 %v1120_v57, %v1103_v38  ;;  %v1129_v47 = vadd.f32 %v1121_v22, %v1104_v61  ;;  %v1130_v41 = vadd.f32 %v1122_v52, %v1105_v15  ;;  %v1131_v59 = vadd.f32 %v1123_v43, %v1106_v30  ;;  %v9019_v38 = vld [vmem:[#allocation2 + $0x96] sm:$0xff] }
  0xf1   : >> { %v1132_v3 = vadd.f32 %v1124_v48, %v1107_v31  ;;  %v1133_v25 = vadd.f32 %v1125_v50, %v1108_v0  ;;  %v1134_v53 = vadd.f32 %v1126_v55, %v1109_v1  ;;  %v1144_v9 = vmul.f32 %v8915_v28, %v15035_v44  ;;  %v644_v57 = vld [vmem:[%s8597_s30 + $0x18] sm:$0x7f]  ;;  %v1185_v55 = vld [vmem:[#allocation2 + $0x30] sm:$0xff] }
  0xf2   : >> { %v1145_v21 = vmul.f32 %v8915_v28, %v15036_v56  ;;  %v1146_v16 = vmul.f32 %v8915_v28, %v15037_v10  ;;  %v1147_v34 = vmul.f32 %v8915_v28, %v15038_v33  ;;  %v1148_v46 = vmul.f32 %v8915_v28, %v15039_v26 }
  0xf3   : >> { %v1149_v24 = vmul.f32 %v8915_v28, %v15040_v23  ;;  %v1150_v62 = vmul.f32 %v8915_v28, %v8887_v36  ;;  %v1151_v51 = vmul.f32 %v8915_v28, %v9001_v2  ;;  %v1152_v19 = vadd.f32 %v1144_v9, %v1127_v40 }
  0xf4   : >> { %v1153_v12 = vadd.f32 %v1145_v21, %v1128_v32  ;;  %v1154_v37 = vadd.f32 %v1146_v16, %v1129_v47  ;;  %v1155_v14 = vadd.f32 %v1147_v34, %v1130_v41  ;;  %v1156_v61 = vadd.f32 %v1148_v46, %v1131_v59  ;;  %v9041_v59 = vld [vmem:[#allocation2 + $0x40] sm:$0xff] }
  0xf5   : >> { %v1157_v15 = vadd.f32 %v1149_v24, %v1132_v3  ;;  %v1158_v30 = vadd.f32 %v1150_v62, %v1133_v25  ;;  %v1159_v31 = vadd.f32 %v1151_v51, %v1134_v53  ;;  %v1169_v0 = vmul.f32 %v8917_v11, %v8786_v45  ;;  %v9043_v3 = vld [vmem:[#allocation2 + $0x50] sm:$0xff]  ;;  %v9045_v25 = vld [vmem:[#allocation2 + $0x60] sm:$0xff] }
  0xf6   : >> { %v1170_v1 = vmul.f32 %v8917_v11, %v8788_v60  ;;  %v1171_v28 = vmul.f32 %v8917_v11, %v15041_v63  ;;  %v1172_v35 = vmul.f32 %v8917_v11, %v15042_v8  ;;  %v1173_v22 = vmul.f32 %v8917_v11, %v15043_v58  ;;  %v9039_v60 = vld [vmem:[%s8597_s30 + $0x20] sm:$0x7f]  ;;  %v9047_v53 = vld [vmem:[#allocation2 + $0x70] sm:$0xff] }
  0xf7   : >> { %v1174_v52 = vmul.f32 %v8917_v11, %v15044_v54  ;;  %v1175_v42 = vmul.f32 %v8917_v11, %v8906_v39  ;;  %v1176_v45 = vmul.f32 %v8917_v11, %v9019_v38  ;;  %v1177_v43 = vadd.f32 %v1169_v0, %v1152_v19  ;;  %v9049_v11 = vld [vmem:[#allocation2 + $0xa0] sm:$0xff]  ;;  %v1210_v62 = vld [vmem:[#allocation2 + $0x31] sm:$0xff] }
  0xf8   : >> { %v1178_v5 = vadd.f32 %v1170_v1, %v1153_v12  ;;  %v1179_v48 = vadd.f32 %v1171_v28, %v1154_v37  ;;  %v1180_v50 = vadd.f32 %v1172_v35, %v1155_v14  ;;  %v1181_v40 = vadd.f32 %v1173_v22, %v1156_v61  ;;  %v9069_v14 = vld [vmem:[#allocation2 + $0x41] sm:$0xff]  ;;  %v9071_v61 = vld [vmem:[#allocation2 + $0x51] sm:$0xff] }
  0xf9   : >> { %v1182_v32 = vadd.f32 %v1174_v52, %v1157_v15  ;;  %v1183_v47 = vadd.f32 %v1175_v42, %v1158_v30  ;;  %v1184_v41 = vadd.f32 %v1176_v45, %v1159_v31  ;;  %v1193_v44 = vperm.slane %v644_v57, 0  ;;  %v9073_v15 = vld [vmem:[#allocation2 + $0x61] sm:$0xff]  ;;  %v9075_v63 = vld [vmem:[#allocation2 + $0x71] sm:$0xff] }
  0xfa   : >> { %v1218_v9 = vperm.slane %v644_v57, 1  ;;  %v1243_v56 = vperm.slane %v644_v57, 2  ;;  %v9051_v21 = vperm.slane %v644_v57, 3  ;;  %v9053_v10 = vperm.slane %v644_v57, 4  ;;  %15045 = vst [vmem:[#allocation28_spill] sm:$0xff] %v9073_v15  ;;  %v9077_v28 = vld [vmem:[#allocation2 + $0xa1] sm:$0xff] }
  0xfb   : >> { %v9055_v16 = vperm.slane %v644_v57, 5  ;;  %v9057_v33 = vperm.slane %v644_v57, 6  ;;  %v9060_v34 = vperm.slane %v9039_v60, 0  ;;  %v1194_v26 = vmul.f32 %v1193_v44, %v1185_v55  ;;  %15046 = vst [vmem:[#allocation19_spill] sm:$0xff] %v9075_v63  ;;  %v1235_v42 = vld [vmem:[#allocation2 + $0x32] sm:$0xff] }
  0xfc   : >> { %v1195_v46 = vmul.f32 %v1193_v44, %v9041_v59  ;;  %v1196_v23 = vmul.f32 %v1193_v44, %v9043_v3  ;;  %v1197_v24 = vmul.f32 %v1193_v44, %v9045_v25  ;;  %v1198_v51 = vmul.f32 %v1193_v44, %v9047_v53  ;;  %15047 = vst [vmem:[#allocation8_spill] sm:$0xff] %v9077_v28  ;;  %v9088_v55 = vld [vmem:[#allocation2 + $0x52] sm:$0xff] }
  0xfd   : >> { %v1199_v19 = vmul.f32 %v1193_v44, %v8805_v7  ;;  %v1200_v12 = vmul.f32 %v1193_v44, %v8927_v6  ;;  %v1201_v37 = vmul.f32 %v1193_v44, %v9049_v11  ;;  %v1202_v30 = vadd.f32 %v1194_v26, %v1177_v43  ;;  %v9092_v26 = vld [vmem:[#allocation2 + $0x72] sm:$0xff] }
  0xfe   : >> { %v1203_v31 = vadd.f32 %v1195_v46, %v1178_v5  ;;  %v1204_v0 = vadd.f32 %v1196_v23, %v1179_v48  ;;  %v1205_v1 = vadd.f32 %v1197_v24, %v1180_v50  ;;  %v1206_v8 = vadd.f32 %v1198_v51, %v1181_v40  ;;  %v9086_v50 = vld [vmem:[#allocation2 + $0x42] sm:$0xff] }
  0xff   : >> { %v1207_v7 = vadd.f32 %v1199_v19, %v1182_v32  ;;  %v1208_v35 = vadd.f32 %v1200_v12, %v1183_v47  ;;  %v1209_v57 = vadd.f32 %v1201_v37, %v1184_v41  ;;  %v1219_v58 = vmul.f32 %v1218_v9, %v1210_v62  ;;  %v9090_v40 = vld [vmem:[#allocation2 + $0x62] sm:$0xff]  ;;  %v1260_v37 = vld [vmem:[#allocation2 + $0x33] sm:$0xff] }
 0x100   : >> { %v1220_v22 = vmul.f32 %v1218_v9, %v9069_v14  ;;  %v1221_v54 = vmul.f32 %v1218_v9, %v9071_v61  ;;  %v1222_v52 = vmul.f32 %v1218_v9, %v9073_v15  ;;  %v1223_v45 = vmul.f32 %v1218_v9, %v9075_v63  ;;  %v9094_v46 = vld [vmem:[#allocation2 + $0xa2] sm:$0xff] }
 0x101   : >> { %v1224_v43 = vmul.f32 %v1218_v9, %v8815_v29  ;;  %v1225_v5 = vmul.f32 %v1218_v9, %v8937_v27  ;;  %v1226_v48 = vmul.f32 %v1218_v9, %v9077_v28  ;;  %v1227_v32 = vadd.f32 %v1219_v58, %v1202_v30  ;;  %15048 = vst [vmem:[#allocation9_spill] sm:$0xff] %v9094_v46 }
 0x102   : >> { %v1228_v47 = vadd.f32 %v1220_v22, %v1203_v31  ;;  %v1229_v41 = vadd.f32 %v1221_v54, %v1204_v0  ;;  %v1230_v44 = vadd.f32 %v1222_v52, %v1205_v1  ;;  %v1231_v23 = vadd.f32 %v1223_v45, %v1206_v8  ;;  %v9103_v8 = vld [vmem:[#allocation2 + $0x43] sm:$0xff]  ;;  %v9109_v52 = vld [vmem:[#allocation2 + $0x73] sm:$0xff] }
 0x103   : >> { %v1232_v29 = vadd.f32 %v1224_v43, %v1207_v7  ;;  %v1233_v24 = vadd.f32 %v1225_v5, %v1208_v35  ;;  %v1234_v62 = vadd.f32 %v1226_v48, %v1209_v57  ;;  %v1244_v51 = vmul.f32 %v1243_v56, %v1235_v42  ;;  %v9105_v7 = vld [vmem:[#allocation2 + $0x53] sm:$0xff]  ;;  %v9107_v35 = vld [vmem:[#allocation2 + $0x63] sm:$0xff]  ;;  %15049 = vst [vmem:[#allocation10_spill] sm:$0xff] %v9109_v52 }
 0x104   : >> { %v1245_v9 = vmul.f32 %v1243_v56, %v9086_v50  ;;  %v1246_v19 = vmul.f32 %v1243_v56, %v9088_v55  ;;  %v1247_v12 = vmul.f32 %v1243_v56, %v9090_v40  ;;  %v1248_v30 = vmul.f32 %v1243_v56, %v9092_v26  ;;  %v9111_v42 = vld [vmem:[#allocation2 + $0xa3] sm:$0xff] }
 0x105   : >> { %v1249_v31 = vmul.f32 %v1243_v56, %v8833_v17  ;;  %v1250_v0 = vmul.f32 %v1243_v56, %v8947_v13  ;;  %v1251_v1 = vmul.f32 %v1243_v56, %v9094_v46  ;;  %v1252_v57 = vadd.f32 %v1244_v51, %v1227_v32  ;;  %15050 = vst [vmem:[#allocation11_spill] sm:$0xff] %v9111_v42  ;;  %v9132_v51 = vld [vmem:[#allocation2 + $0x64] sm:$0xff] }
 0x106   : >> { %v1253_v58 = vadd.f32 %v1245_v9, %v1228_v47  ;;  %v1254_v22 = vadd.f32 %v1246_v19, %v1229_v41  ;;  %v1255_v54 = vadd.f32 %v1247_v12, %v1230_v44  ;;  %v1256_v45 = vadd.f32 %v1248_v30, %v1231_v23  ;;  %v1285_v47 = vld [vmem:[#allocation2 + $0x34] sm:$0xff] }
 0x107   : >> { %v1257_v17 = vadd.f32 %v1249_v31, %v1232_v29  ;;  %v1258_v43 = vadd.f32 %v1250_v0, %v1233_v24  ;;  %v1259_v5 = vadd.f32 %v1251_v1, %v1234_v62  ;;  %v1269_v56 = vmul.f32 %v9051_v21, %v1260_v37  ;;  %v9128_v24 = vld [vmem:[#allocation2 + $0x44] sm:$0xff]  ;;  %v9130_v62 = vld [vmem:[#allocation2 + $0x54] sm:$0xff] }
 0x108   : >> { %v1270_v48 = vmul.f32 %v9051_v21, %v9103_v8  ;;  %v1271_v46 = vmul.f32 %v9051_v21, %v9105_v7  ;;  %v1272_v32 = vmul.f32 %v9051_v21, %v9107_v35  ;;  %v1273_v41 = vmul.f32 %v9051_v21, %v9109_v52  ;;  %v9134_v30 = vld [vmem:[#allocation2 + $0x74] sm:$0xff]  ;;  %v9136_v31 = vld [vmem:[#allocation2 + $0xa4] sm:$0xff] }
 0x109   : >> { %v1274_v44 = vmul.f32 %v9051_v21, %v15025_v20  ;;  %v1275_v23 = vmul.f32 %v9051_v21, %v8965_v4  ;;  %v1276_v29 = vmul.f32 %v9051_v21, %v9111_v42  ;;  %v1277_v9 = vadd.f32 %v1269_v56, %v1252_v57  ;;  %15051 = vst [vmem:[#allocation33_spill] sm:$0xff] %v9134_v30  ;;  %v1310_v57 = vld [vmem:[#allocation2 + $0x35] sm:$0xff] }
 0x10a   : >> { %v1278_v19 = vadd.f32 %v1270_v48, %v1253_v58  ;;  %v1279_v12 = vadd.f32 %v1271_v46, %v1254_v22  ;;  %v1280_v37 = vadd.f32 %v1272_v32, %v1255_v54  ;;  %15052 = vst [vmem:[#allocation13_spill] sm:$0xff] %v9136_v31  ;;  %v1281_v20 = vadd.f32 %v1273_v41, %v1256_v45  ;;  %v9159_v41 = vld [vmem:[#allocation2 + $0x75] sm:$0xff] }
 0x10b   : >> { %v1282_v0 = vadd.f32 %v1274_v44, %v1257_v17  ;;  %v1283_v1 = vadd.f32 %v1275_v23, %v1258_v43  ;;  %v1284_v4 = vadd.f32 %v1276_v29, %v1259_v5  ;;  %v1294_v21 = vmul.f32 %v9053_v10, %v1285_v47  ;;  %v9153_v17 = vld [vmem:[#allocation2 + $0x45] sm:$0xff]  ;;  %v9155_v43 = vld [vmem:[#allocation2 + $0x55] sm:$0xff]  ;;  %15053 = vst [vmem:[#allocation14_spill] sm:$0xff] %v9159_v41 }
 0x10c   : >> { %v1295_v42 = vmul.f32 %v9053_v10, %v9128_v24  ;;  %v1296_v52 = vmul.f32 %v9053_v10, %v9130_v62  ;;  %v1297_v46 = vmul.f32 %v9053_v10, %v9132_v51  ;;  %v1298_v58 = vmul.f32 %v9053_v10, %v9134_v30  ;;  %v9157_v5 = vld [vmem:[#allocation2 + $0x65] sm:$0xff] }
 0x10d   : >> { %v1299_v22 = vmul.f32 %v9053_v10, %v15033_v49  ;;  %v1300_v54 = vmul.f32 %v9053_v10, %v8983_v18  ;;  %v1301_v45 = vmul.f32 %v9053_v10, %v9136_v31  ;;  %v1302_v56 = vadd.f32 %v1294_v21, %v1277_v9  ;;  %v9161_v44 = vld [vmem:[#allocation2 + $0xa5] sm:$0xff] }
 0x10e   : >> { %v1303_v48 = vadd.f32 %v1295_v42, %v1278_v19  ;;  %v1304_v32 = vadd.f32 %v1296_v52, %v1279_v12  ;;  %v1305_v47 = vadd.f32 %v1297_v46, %v1280_v37  ;;  %15054 = vst [vmem:[#allocation15_spill] sm:$0xff] %v9161_v44  ;;  %v1306_v49 = vadd.f32 %v1298_v58, %v1281_v20  ;;  %v1335_v42 = vld [vmem:[#allocation2 + $0x36] sm:$0xff]  ;;  %v9178_v37 = vld [vmem:[#allocation2 + $0x46] sm:$0xff] }
 0x10f   : >> { %v1307_v23 = vadd.f32 %v1299_v22, %v1282_v0  ;;  %v1308_v29 = vadd.f32 %v1300_v54, %v1283_v1  ;;  %v1309_v18 = vadd.f32 %v1301_v45, %v1284_v4  ;;  %v1319_v10 = vmul.f32 %v9055_v16, %v1310_v57  ;;  %v9180_v20 = vld [vmem:[#allocation2 + $0x56] sm:$0xff]  ;;  %v9182_v0 = vld [vmem:[#allocation2 + $0x66] sm:$0xff] }
 0x110   : >> { %v1320_v31 = vmul.f32 %v9055_v16, %v9153_v17  ;;  %v1321_v30 = vmul.f32 %v9055_v16, %v9155_v43  ;;  %v1322_v52 = vmul.f32 %v9055_v16, %v9157_v5  ;;  %v1323_v9 = vmul.f32 %v9055_v16, %v9159_v41  ;;  %v9184_v58 = vld [vmem:[#allocation2 + $0x76] sm:$0xff]  ;;  %v9186_v22 = vld [vmem:[#allocation2 + $0xa6] sm:$0xff] }
 0x111   : >> { %v1324_v19 = vmul.f32 %v9055_v16, %v8887_v36  ;;  %v1325_v4 = vmul.f32 %v9055_v16, %v9001_v2  ;;  %v1326_v12 = vmul.f32 %v9055_v16, %v9161_v44  ;;  %v1327_v1 = vadd.f32 %v1319_v10, %v1302_v56  ;;  %v9205_v10 = vld [vmem:[#allocation2 + $0xb0] sm:$0xff] }
 0x112   : >> { %v1328_v21 = vadd.f32 %v1320_v31, %v1303_v48  ;;  %v1329_v46 = vadd.f32 %v1321_v30, %v1304_v32  ;;  %v1330_v57 = vadd.f32 %v1322_v52, %v1305_v47  ;;  %v1331_v36 = vadd.f32 %v1323_v9, %v1306_v49 }
 0x113   : >> { %v1332_v54 = vadd.f32 %v1324_v19, %v1307_v23  ;;  %v1333_v45 = vadd.f32 %v1325_v4, %v1308_v29  ;;  %v1334_v2 = vadd.f32 %v1326_v12, %v1309_v18  ;;  %v1344_v16 = vmul.f32 %v9057_v33, %v1335_v42  ;;  %v9203_v29 = vld [vmem:[#allocation2 + $0x80] sm:$0xff] }
 0x114   : >> { %v1345_v44 = vmul.f32 %v9057_v33, %v9178_v37  ;;  %v1346_v41 = vmul.f32 %v9057_v33, %v9180_v20  ;;  %v1347_v30 = vmul.f32 %v9057_v33, %v9182_v0  ;;  %v1348_v31 = vmul.f32 %v9057_v33, %v9184_v58 }
 0x115   : >> { %v1349_v56 = vmul.f32 %v9057_v33, %v8906_v39  ;;  %v1350_v18 = vmul.f32 %v9057_v33, %v9019_v38  ;;  %v1351_v48 = vmul.f32 %v9057_v33, %v9186_v22  ;;  %v1352_v32 = vadd.f32 %v1344_v16, %v1327_v1  ;;  %v9224_v1 = vld [vmem:[%s8597_s30 + $0x28] sm:$0x7f] }
 0x116   : >> { %v1353_v47 = vadd.f32 %v1345_v44, %v1328_v21  ;;  %v1354_v49 = vadd.f32 %v1346_v41, %v1329_v46  ;;  %v1355_v23 = vadd.f32 %v1347_v30, %v1330_v57  ;;  %v1356_v52 = vadd.f32 %v1348_v31, %v1331_v36  ;;  %15055 = vst [vmem:[#allocation16_spill] sm:$0xff] %v9224_v1  ;;  %v9226_v31 = vld [vmem:[#allocation2 + $0x81] sm:$0xff] }
 0x117   : >> { %v1357_v42 = vadd.f32 %v1349_v56, %v1332_v54  ;;  %v1358_v9 = vadd.f32 %v1350_v18, %v1333_v45  ;;  %v1359_v19 = vadd.f32 %v1351_v48, %v1334_v2  ;;  %v1370_v39 = vmul.f32 %v9060_v34, %v9041_v59  ;;  %15056 = vst [vmem:[#allocation17_spill] sm:$0xff] %v9226_v31  ;;  %v9228_v56 = vld [vmem:[#allocation2 + $0xb1] sm:$0xff] }
 0x118   : >> { %v1371_v4 = vmul.f32 %v9060_v34, %v9043_v3  ;;  %v1372_v33 = vmul.f32 %v9060_v34, %v9045_v25  ;;  %v1373_v41 = vmul.f32 %v9060_v34, %v9047_v53  ;;  %v1374_v44 = vmul.f32 %v9060_v34, %v9203_v29 }
 0x119   : >> { %v1375_v12 = vmul.f32 %v9060_v34, %v8927_v6  ;;  %v1376_v2 = vmul.f32 %v9060_v34, %v9049_v11  ;;  %v1377_v59 = vmul.f32 %v9060_v34, %v9205_v10  ;;  %v1378_v21 = vadd.f32 %v1370_v39, %v1352_v32 }
 0x11a   : >> { %v1379_v46 = vadd.f32 %v1371_v4, %v1353_v47  ;;  %v1380_v57 = vadd.f32 %v1372_v33, %v1354_v49  ;;  %v1381_v36 = vadd.f32 %v1373_v41, %v1355_v23  ;;  %v1382_v54 = vadd.f32 %v1374_v44, %v1356_v52 }
 0x11b   : >> { %v1383_v45 = vadd.f32 %v1375_v12, %v1357_v42  ;;  %v1384_v16 = vadd.f32 %v1376_v2, %v1358_v9  ;;  %v1385_v30 = vadd.f32 %v1377_v59, %v1359_v19  ;;  %v1394_v6 = vperm.slane %v9039_v60, 1  ;;  %v9256_v59 = vld [vmem:[#allocation2 + $0x82] sm:$0xff] }
 0x11c   : >> { %v1419_v18 = vperm.slane %v9039_v60, 2  ;;  %v1444_v34 = vperm.slane %v9039_v60, 3  ;;  %v9234_v48 = vperm.slane %v9039_v60, 4  ;;  %v9237_v32 = vperm.slane %v9039_v60, 5  ;;  %15058 = vst [vmem:[#allocation34_spill] sm:$0xff] %v9256_v59 }
 0x11d   : >> { %v9240_v47 = vperm.slane %v9039_v60, 6  ;;  %v9243_v49 = vperm.slane %v9224_v1, 0  ;;  %v9246_v23 = vperm.slane %v9224_v1, 1  ;;  %v1395_v52 = vmul.f32 %v1394_v6, %v9069_v14  ;;  %v9258_v14 = vld [vmem:[#allocation2 + $0xb2] sm:$0xff] }
 0x11e   : >> { %v1396_v42 = vmul.f32 %v1394_v6, %v9071_v61  ;;  %v1397_v9 = vmul.f32 %v1394_v6, %v9073_v15  ;;  %v1398_v19 = vmul.f32 %v1394_v6, %v9075_v63  ;;  %v1399_v39 = vmul.f32 %v1394_v6, %v9226_v31  ;;  %15059 = vst [vmem:[#allocation21_spill] sm:$0xff] %v9258_v14 }
 0x11f   : >> { %15057 = vst [vmem:[#allocation18_spill] sm:$0xff] %v9246_v23  ;;  %v1400_v4 = vmul.f32 %v1394_v6, %v8937_v27  ;;  %v1401_v60 = vmul.f32 %v1394_v6, %v9077_v28  ;;  %v1402_v33 = vmul.f32 %v1394_v6, %v9228_v56  ;;  %v1403_v41 = vadd.f32 %v1395_v52, %v1378_v21 }
 0x120   : >> { %v1404_v44 = vadd.f32 %v1396_v42, %v1379_v46  ;;  %v1405_v12 = vadd.f32 %v1397_v9, %v1380_v57  ;;  %v1406_v2 = vadd.f32 %v1398_v19, %v1381_v36  ;;  %v1407_v1 = vadd.f32 %v1399_v39, %v1382_v54  ;;  %v15060_v57 = vld [vmem:[#allocation9_spill] sm:$0xff] }
 0x121   : >> { %v1408_v15 = vadd.f32 %v1400_v4, %v1383_v45  ;;  %v1409_v23 = vadd.f32 %v1401_v60, %v1384_v16  ;;  %v1410_v63 = vadd.f32 %v1402_v33, %v1385_v30  ;;  %v1420_v31 = vmul.f32 %v1419_v18, %v9086_v50  ;;  %v9268_v42 = vld [vmem:[#allocation2 + $0x83] sm:$0xff]  ;;  %v9270_v50 = vld [vmem:[#allocation2 + $0xb3] sm:$0xff] }
 0x122   : >> { %v1421_v27 = vmul.f32 %v1419_v18, %v9088_v55  ;;  %v1422_v28 = vmul.f32 %v1419_v18, %v9090_v40  ;;  %v1423_v6 = vmul.f32 %v1419_v18, %v9092_v26  ;;  %v1424_v21 = vmul.f32 %v1419_v18, %v9256_v59 }
 0x123   : >> { %v1425_v46 = vmul.f32 %v1419_v18, %v8947_v13  ;;  %v1426_v36 = vmul.f32 %v1419_v18, %v15060_v57  ;;  %v1427_v52 = vmul.f32 %v1419_v18, %v9258_v14  ;;  %v1428_v54 = vadd.f32 %v1420_v31, %v1403_v41  ;;  %v15061_v57 = vld [vmem:[#allocation10_spill] sm:$0xff] }
 0x124   : >> { %v1429_v45 = vadd.f32 %v1421_v27, %v1404_v44  ;;  %v1430_v16 = vadd.f32 %v1422_v28, %v1405_v12  ;;  %v1431_v30 = vadd.f32 %v1423_v6, %v1406_v2  ;;  %v1432_v9 = vadd.f32 %v1424_v21, %v1407_v1  ;;  %v15062_v28 = vld [vmem:[#allocation12_spill] sm:$0xff]  ;;  %v15063_v44 = vld [vmem:[#allocation11_spill] sm:$0xff] }
 0x125   : >> { %v1433_v19 = vadd.f32 %v1425_v46, %v1408_v15  ;;  %v1434_v39 = vadd.f32 %v1426_v36, %v1409_v23  ;;  %v1435_v4 = vadd.f32 %v1427_v52, %v1410_v63  ;;  %v1445_v60 = vmul.f32 %v1444_v34, %v9103_v8  ;;  %v9280_v27 = vld [vmem:[#allocation2 + $0x84] sm:$0xff]  ;;  %v9282_v8 = vld [vmem:[#allocation2 + $0xb4] sm:$0xff] }
 0x126   : >> { %v1446_v13 = vmul.f32 %v1444_v34, %v9105_v7  ;;  %v1447_v33 = vmul.f32 %v1444_v34, %v9107_v35  ;;  %v1448_v18 = vmul.f32 %v1444_v34, %v15061_v57  ;;  %v1449_v31 = vmul.f32 %v1444_v34, %v9268_v42  ;;  %15064 = vst [vmem:[#allocation22_spill] sm:$0xff] %v9280_v27 }
 0x127   : >> { %v1450_v41 = vmul.f32 %v1444_v34, %v15062_v28  ;;  %v1451_v12 = vmul.f32 %v1444_v34, %v15063_v44  ;;  %v1452_v2 = vmul.f32 %v1444_v34, %v9270_v50  ;;  %v1453_v1 = vadd.f32 %v1445_v60, %v1428_v54  ;;  %v15065_v54 = vld [vmem:[#allocation33_spill] sm:$0xff] }
 0x128   : >> { %v1454_v15 = vadd.f32 %v1446_v13, %v1429_v45  ;;  %v1455_v23 = vadd.f32 %v1447_v33, %v1430_v16  ;;  %v1456_v63 = vadd.f32 %v1448_v18, %v1431_v30  ;;  %v1457_v6 = vadd.f32 %v1449_v31, %v1432_v9  ;;  %v15066_v30 = vld [vmem:[#allocation27_spill] sm:$0xff]  ;;  %v9300_v18 = vld [vmem:[#allocation2 + $0x85] sm:$0xff] }
 0x129   : >> { %v1458_v21 = vadd.f32 %v1450_v41, %v1433_v19  ;;  %v1459_v46 = vadd.f32 %v1451_v12, %v1434_v39  ;;  %v1460_v36 = vadd.f32 %v1452_v2, %v1435_v4  ;;  %v1470_v52 = vmul.f32 %v9234_v48, %v9128_v24  ;;  %v15067_v19 = vld [vmem:[#allocation13_spill] sm:$0xff]  ;;  %15068 = vst [vmem:[#allocation23_spill] sm:$0xff] %v9300_v18  ;;  %v9302_v31 = vld [vmem:[#allocation2 + $0xb5] sm:$0xff] }
 0x12a   : >> { %v1471_v28 = vmul.f32 %v9234_v48, %v9130_v62  ;;  %v1472_v34 = vmul.f32 %v9234_v48, %v9132_v51  ;;  %v1473_v45 = vmul.f32 %v9234_v48, %v15065_v54  ;;  %v1474_v16 = vmul.f32 %v9234_v48, %v9280_v27 }
 0x12b   : >> { %v1475_v9 = vmul.f32 %v9234_v48, %v15066_v30  ;;  %v1476_v39 = vmul.f32 %v9234_v48, %v15067_v19  ;;  %v1477_v24 = vmul.f32 %v9234_v48, %v9282_v8  ;;  %v1478_v4 = vadd.f32 %v1470_v52, %v1453_v1  ;;  %v15069_v1 = vld [vmem:[#allocation14_spill] sm:$0xff] }
 0x12c   : >> { %v1479_v60 = vadd.f32 %v1471_v28, %v1454_v15  ;;  %v1480_v13 = vadd.f32 %v1472_v34, %v1455_v23  ;;  %v1481_v33 = vadd.f32 %v1473_v45, %v1456_v63  ;;  %v1482_v41 = vadd.f32 %v1474_v16, %v1457_v6  ;;  %v15070_v63 = vld [vmem:[#allocation20_spill] sm:$0xff]  ;;  %v9322_v16 = vld [vmem:[#allocation2 + $0xb6] sm:$0xff] }
 0x12d   : >> { %v1483_v12 = vadd.f32 %v1475_v9, %v1458_v21  ;;  %v1484_v2 = vadd.f32 %v1476_v39, %v1459_v46  ;;  %v1485_v27 = vadd.f32 %v1477_v24, %v1460_v36  ;;  %v1495_v30 = vmul.f32 %v9237_v32, %v9153_v17  ;;  %v15071_v21 = vld [vmem:[#allocation15_spill] sm:$0xff]  ;;  %v9320_v45 = vld [vmem:[#allocation2 + $0x86] sm:$0xff] }
 0x12e   : >> { %v1496_v19 = vmul.f32 %v9237_v32, %v9155_v43  ;;  %v1497_v48 = vmul.f32 %v9237_v32, %v9157_v5  ;;  %v1498_v15 = vmul.f32 %v9237_v32, %v15069_v1  ;;  %v1499_v23 = vmul.f32 %v9237_v32, %v9300_v18 }
 0x12f   : >> { %v1500_v6 = vmul.f32 %v9237_v32, %v15070_v63  ;;  %v1501_v46 = vmul.f32 %v9237_v32, %v15071_v21  ;;  %v1502_v17 = vmul.f32 %v9237_v32, %v9302_v31  ;;  %v1503_v36 = vadd.f32 %v1495_v30, %v1478_v4  ;;  %v9342_v30 = vld [vmem:[#allocation2 + $0xc0] sm:$0xff] }
 0x130   : >> { %v1504_v52 = vadd.f32 %v1496_v19, %v1479_v60  ;;  %v1505_v28 = vadd.f32 %v1497_v48, %v1480_v13  ;;  %v1506_v34 = vadd.f32 %v1498_v15, %v1481_v33  ;;  %v1507_v9 = vadd.f32 %v1499_v23, %v1482_v41 }
 0x131   : >> { %v1508_v39 = vadd.f32 %v1500_v6, %v1483_v12  ;;  %v1509_v24 = vadd.f32 %v1501_v46, %v1484_v2  ;;  %v1510_v18 = vadd.f32 %v1502_v17, %v1485_v27  ;;  %v1520_v63 = vmul.f32 %v9240_v47, %v9178_v37  ;;  %v9340_v2 = vld [vmem:[#allocation2 + $0x90] sm:$0xff] }
 0x132   : >> { %v1521_v21 = vmul.f32 %v9240_v47, %v9180_v20  ;;  %v1522_v32 = vmul.f32 %v9240_v47, %v9182_v0  ;;  %v1523_v19 = vmul.f32 %v9240_v47, %v9184_v58  ;;  %v1524_v4 = vmul.f32 %v9240_v47, %v9320_v45 }
 0x133   : >> { %v1525_v60 = vmul.f32 %v9240_v47, %v9019_v38  ;;  %v1526_v27 = vmul.f32 %v9240_v47, %v9186_v22  ;;  %v1527_v37 = vmul.f32 %v9240_v47, %v9322_v16  ;;  %v1528_v13 = vadd.f32 %v1520_v63, %v1503_v36 }
 0x134   : >> { %v1529_v33 = vadd.f32 %v1521_v21, %v1504_v52  ;;  %v1530_v41 = vadd.f32 %v1522_v32, %v1505_v28  ;;  %v1531_v12 = vadd.f32 %v1523_v19, %v1506_v34  ;;  %v1532_v48 = vadd.f32 %v1524_v4, %v1507_v9  ;;  %v9360_v34 = vld [vmem:[#allocation2 + $0x91] sm:$0xff]  ;;  %v9362_v9 = vld [vmem:[#allocation2 + $0xc1] sm:$0xff] }
 0x135   : >> { %v1533_v15 = vadd.f32 %v1525_v60, %v1508_v39  ;;  %v1534_v23 = vadd.f32 %v1526_v27, %v1509_v24  ;;  %v1535_v6 = vadd.f32 %v1527_v37, %v1510_v18  ;;  %v1546_v38 = vmul.f32 %v9243_v49, %v9043_v3  ;;  %15072 = vst [vmem:[#allocation24_spill] sm:$0xff] %v9362_v9  ;;  %v15074_v4 = vld [vmem:[#allocation28_spill] sm:$0xff]  ;;  %v15076_v37 = vld [vmem:[#allocation17_spill] sm:$0xff] }
 0x136   : >> { %v1547_v46 = vmul.f32 %v9243_v49, %v9045_v25  ;;  %v1548_v47 = vmul.f32 %v9243_v49, %v9047_v53  ;;  %v1549_v21 = vmul.f32 %v9243_v49, %v9203_v29  ;;  %v1550_v17 = vmul.f32 %v9243_v49, %v9340_v2 }
 0x137   : >> { %v1551_v36 = vmul.f32 %v9243_v49, %v9049_v11  ;;  %v1552_v18 = vmul.f32 %v9243_v49, %v9205_v10  ;;  %v1553_v3 = vmul.f32 %v9243_v49, %v9342_v30  ;;  %v1554_v52 = vadd.f32 %v1546_v38, %v1528_v13  ;;  %v15073_v11 = vld [vmem:[#allocation18_spill] sm:$0xff]  ;;  %v15075_v49 = vld [vmem:[#allocation19_spill] sm:$0xff] }
 0x138   : >> { %v1555_v25 = vadd.f32 %v1547_v46, %v1529_v33  ;;  %v1556_v28 = vadd.f32 %v1548_v47, %v1530_v41  ;;  %v1557_v53 = vadd.f32 %v1549_v21, %v1531_v12  ;;  %v1558_v39 = vadd.f32 %v1550_v17, %v1532_v48  ;;  %v15077_v41 = vld [vmem:[#allocation8_spill] sm:$0xff] }
 0x139   : >> { %v1559_v24 = vadd.f32 %v1551_v36, %v1533_v15  ;;  %v1560_v63 = vadd.f32 %v1552_v18, %v1534_v23  ;;  %v1561_v32 = vadd.f32 %v1553_v3, %v1535_v6  ;;  %v1571_v19 = vmul.f32 %v15073_v11, %v9071_v61  ;;  %v9381_v15 = vld [vmem:[%s8597_s30 + $0x30] sm:$0x7f]  ;;  %v9385_v3 = vld [vmem:[#allocation2 + $0xc2] sm:$0xff] }
 0x13a   : >> { %v1572_v60 = vmul.f32 %v15073_v11, %v15074_v4  ;;  %v1573_v27 = vmul.f32 %v15073_v11, %v15075_v49  ;;  %v1574_v13 = vmul.f32 %v15073_v11, %v15076_v37  ;;  %v1575_v33 = vmul.f32 %v15073_v11, %v9360_v34  ;;  %15078 = vst [vmem:[#allocation25_spill] sm:$0xff] %v9381_v15  ;;  %v9383_v18 = vld [vmem:[#allocation2 + $0x92] sm:$0xff]  ;;  %v15080_v4 = vld [vmem:[#allocation16_spill] sm:$0xff] }
 0x13b   : >> { %v1576_v12 = vmul.f32 %v15073_v11, %v15077_v41  ;;  %v1577_v48 = vmul.f32 %v15073_v11, %v9228_v56  ;;  %v1578_v61 = vmul.f32 %v15073_v11, %v9362_v9  ;;  %v1579_v23 = vadd.f32 %v1571_v19, %v1554_v52  ;;  %15079 = vst [vmem:[#allocation26_spill] sm:$0xff] %v9383_v18 }
 0x13c   : >> { %v1580_v6 = vadd.f32 %v1572_v60, %v1555_v25  ;;  %v1581_v38 = vadd.f32 %v1573_v27, %v1556_v28  ;;  %v1582_v46 = vadd.f32 %v1574_v13, %v1557_v53  ;;  %v1583_v47 = vadd.f32 %v1575_v33, %v1558_v39  ;;  %v15082_v60 = vld [vmem:[#allocation9_spill] sm:$0xff] }
 0x13d   : >> { %v1584_v21 = vadd.f32 %v1576_v12, %v1559_v24  ;;  %v1585_v17 = vadd.f32 %v1577_v48, %v1560_v63  ;;  %v1586_v36 = vadd.f32 %v1578_v61, %v1561_v32  ;;  %v1595_v49 = vperm.slane %v15080_v4, 2 }
 0x13e   : >> { %v1620_v41 = vperm.slane %v15080_v4, 3  ;;  %v1645_v11 = vperm.slane %v15080_v4, 4  ;;  %v9391_v9 = vperm.slane %v15080_v4, 5  ;;  %v9394_v52 = vperm.slane %v15080_v4, 6 }
 0x13f   : >> { %v9397_v25 = vperm.slane %v9381_v15, 0  ;;  %v9400_v28 = vperm.slane %v9381_v15, 1  ;;  %v9403_v53 = vperm.slane %v9381_v15, 2  ;;  %v1596_v39 = vmul.f32 %v1595_v49, %v9088_v55  ;;  %v9413_v15 = vld [vmem:[#allocation2 + $0x93] sm:$0xff]  ;;  %v9415_v55 = vld [vmem:[#allocation2 + $0xc3] sm:$0xff] }
 0x140   : >> { %v1597_v24 = vmul.f32 %v1595_v49, %v9090_v40  ;;  %v1598_v63 = vmul.f32 %v1595_v49, %v9092_v26  ;;  %v1599_v32 = vmul.f32 %v1595_v49, %v9256_v59  ;;  %v1600_v19 = vmul.f32 %v1595_v49, %v9383_v18 }
 0x141   : >> { %15081 = vst [vmem:[#allocation29_spill] sm:$0xff] %v9403_v53  ;;  %v1601_v27 = vmul.f32 %v1595_v49, %v15082_v60  ;;  %v1602_v13 = vmul.f32 %v1595_v49, %v9258_v14  ;;  %v1603_v33 = vmul.f32 %v1595_v49, %v9385_v3  ;;  %v1604_v12 = vadd.f32 %v1596_v39, %v1579_v23  ;;  %v9425_v39 = vld [vmem:[#allocation2 + $0x94] sm:$0xff] }
 0x142   : >> { %v1605_v48 = vadd.f32 %v1597_v24, %v1580_v6  ;;  %v1606_v61 = vadd.f32 %v1598_v63, %v1581_v38  ;;  %v1607_v4 = vadd.f32 %v1599_v32, %v1582_v46  ;;  %v1608_v40 = vadd.f32 %v1600_v19, %v1583_v47 }
 0x143   : >> { %v1609_v26 = vadd.f32 %v1601_v27, %v1584_v21  ;;  %v1610_v53 = vadd.f32 %v1602_v13, %v1585_v17  ;;  %v1611_v59 = vadd.f32 %v1603_v33, %v1586_v36  ;;  %v1621_v18 = vmul.f32 %v1620_v41, %v9105_v7  ;;  %v9427_v7 = vld [vmem:[#allocation2 + $0xc4] sm:$0xff]  ;;  %v15083_v27 = vld [vmem:[#allocation22_spill] sm:$0xff] }
 0x144   : >> { %v1622_v60 = vmul.f32 %v1620_v41, %v9107_v35  ;;  %v1623_v14 = vmul.f32 %v1620_v41, %v15061_v57  ;;  %v1624_v49 = vmul.f32 %v1620_v41, %v9268_v42  ;;  %v1625_v23 = vmul.f32 %v1620_v41, %v9413_v15 }
 0x145   : >> { %v1626_v6 = vmul.f32 %v1620_v41, %v15063_v44  ;;  %v1627_v38 = vmul.f32 %v1620_v41, %v9270_v50  ;;  %v1628_v46 = vmul.f32 %v1620_v41, %v9415_v55  ;;  %v1629_v47 = vadd.f32 %v1621_v18, %v1604_v12 }
 0x146   : >> { %v1630_v21 = vadd.f32 %v1622_v60, %v1605_v48  ;;  %v1631_v17 = vadd.f32 %v1623_v14, %v1606_v61  ;;  %v1632_v36 = vadd.f32 %v1624_v49, %v1607_v4  ;;  %v1633_v35 = vadd.f32 %v1625_v23, %v1608_v40  ;;  %v15084_v14 = vld [vmem:[#allocation13_spill] sm:$0xff]  ;;  %v9437_v4 = vld [vmem:[#allocation2 + $0x95] sm:$0xff] }
 0x147   : >> { %v1634_v57 = vadd.f32 %v1626_v6, %v1609_v26  ;;  %v1635_v24 = vadd.f32 %v1627_v38, %v1610_v53  ;;  %v1636_v63 = vadd.f32 %v1628_v46, %v1611_v59  ;;  %v1646_v32 = vmul.f32 %v1645_v11, %v9130_v62  ;;  %v9439_v62 = vld [vmem:[#allocation2 + $0xc5] sm:$0xff]  ;;  %v15085_v23 = vld [vmem:[#allocation23_spill] sm:$0xff] }
 0x148   : >> { %v1647_v44 = vmul.f32 %v1645_v11, %v9132_v51  ;;  %v1648_v19 = vmul.f32 %v1645_v11, %v15065_v54  ;;  %v1649_v41 = vmul.f32 %v1645_v11, %v15083_v27  ;;  %v1650_v18 = vmul.f32 %v1645_v11, %v9425_v39  ;;  %v15086_v46 = vld [vmem:[#allocation15_spill] sm:$0xff] }
 0x149   : >> { %v1651_v13 = vmul.f32 %v1645_v11, %v15084_v14  ;;  %v1652_v33 = vmul.f32 %v1645_v11, %v9282_v8  ;;  %v1653_v12 = vmul.f32 %v1645_v11, %v9427_v7  ;;  %v1654_v48 = vadd.f32 %v1646_v32, %v1629_v47 }
 0x14a   : >> { %v1655_v61 = vadd.f32 %v1647_v44, %v1630_v21  ;;  %v1656_v53 = vadd.f32 %v1648_v19, %v1631_v17  ;;  %v1657_v59 = vadd.f32 %v1649_v41, %v1632_v36  ;;  %v1658_v51 = vadd.f32 %v1650_v18, %v1633_v35 }
 0x14b   : >> { %v1659_v54 = vadd.f32 %v1651_v13, %v1634_v57  ;;  %v1660_v40 = vadd.f32 %v1652_v33, %v1635_v24  ;;  %v1661_v26 = vadd.f32 %v1653_v12, %v1636_v63  ;;  %v1671_v60 = vmul.f32 %v9391_v9, %v9155_v43  ;;  %v9459_v57 = vld [vmem:[#allocation2 + $0xc6] sm:$0xff] }
 0x14c   : >> { %v1672_v49 = vmul.f32 %v9391_v9, %v9157_v5  ;;  %v1673_v11 = vmul.f32 %v9391_v9, %v15069_v1  ;;  %v1674_v6 = vmul.f32 %v9391_v9, %v15085_v23  ;;  %v1675_v38 = vmul.f32 %v9391_v9, %v9437_v4  ;;  %v9457_v1 = vld [vmem:[#allocation2 + $0x96] sm:$0xff]  ;;  %v1713_v12 = vld [vmem:[#allocation2 + $0x60] sm:$0xff] }
 0x14d   : >> { %v1676_v47 = vmul.f32 %v9391_v9, %v15086_v46  ;;  %v1677_v21 = vmul.f32 %v9391_v9, %v9302_v31  ;;  %v1678_v43 = vmul.f32 %v9391_v9, %v9439_v62  ;;  %v1679_v17 = vadd.f32 %v1671_v60, %v1654_v48 }
 0x14e   : >> { %v1680_v5 = vadd.f32 %v1672_v49, %v1655_v61  ;;  %v1681_v36 = vadd.f32 %v1673_v11, %v1656_v53  ;;  %v1682_v35 = vadd.f32 %v1674_v6, %v1657_v59  ;;  %v1683_v24 = vadd.f32 %v1675_v38, %v1658_v51  ;;  %v1717_v59 = vld [vmem:[#allocation2 + $0xa0] sm:$0xff]  ;;  %v1720_v51 = vld [vmem:[#allocation2 + $0xd0] sm:$0xff] }
 0x14f   : >> { %v1684_v63 = vadd.f32 %v1676_v47, %v1659_v54  ;;  %v1685_v32 = vadd.f32 %v1677_v21, %v1660_v40  ;;  %v1686_v44 = vadd.f32 %v1678_v43, %v1661_v26  ;;  %v1696_v19 = vmul.f32 %v9394_v52, %v9180_v20  ;;  %v1738_v21 = vld [vmem:[#allocation2 + $0x61] sm:$0xff]  ;;  %v1739_v43 = vld [vmem:[#allocation2 + $0x71] sm:$0xff] }
 0x150   : >> { %v1697_v41 = vmul.f32 %v9394_v52, %v9182_v0  ;;  %v1698_v9 = vmul.f32 %v9394_v52, %v9184_v58  ;;  %v1699_v18 = vmul.f32 %v9394_v52, %v9320_v45  ;;  %v1700_v14 = vmul.f32 %v9394_v52, %v9457_v1  ;;  %v1714_v0 = vld [vmem:[#allocation2 + $0x70] sm:$0xff] }
 0x151   : >> { %v1701_v13 = vmul.f32 %v9394_v52, %v9186_v22  ;;  %v1702_v33 = vmul.f32 %v9394_v52, %v9322_v16  ;;  %v1703_v20 = vmul.f32 %v9394_v52, %v9459_v57  ;;  %v1704_v48 = vadd.f32 %v1696_v19, %v1679_v17 }
 0x152   : >> { %v1705_v61 = vadd.f32 %v1697_v41, %v1680_v5  ;;  %v1706_v58 = vadd.f32 %v1698_v9, %v1681_v36  ;;  %v1707_v53 = vadd.f32 %v1699_v18, %v1682_v35  ;;  %v1708_v54 = vadd.f32 %v1700_v14, %v1683_v24  ;;  %v1745_v24 = vld [vmem:[#allocation2 + $0xd1] sm:$0xff]  ;;  %v15087_v18 = vld [vmem:[#allocation24_spill] sm:$0xff] }
 0x153   : >> { %v1709_v40 = vadd.f32 %v1701_v13, %v1684_v63  ;;  %v1710_v26 = vadd.f32 %v1702_v33, %v1685_v32  ;;  %v1711_v60 = vadd.f32 %v1703_v20, %v1686_v44  ;;  %v1722_v22 = vmul.f32 %v9397_v25, %v1713_v12  ;;  %v1763_v33 = vld [vmem:[#allocation2 + $0x62] sm:$0xff]  ;;  %v1764_v20 = vld [vmem:[#allocation2 + $0x72] sm:$0xff] }
 0x154   : >> { %v1723_v49 = vmul.f32 %v9397_v25, %v1714_v0  ;;  %v1724_v11 = vmul.f32 %v9397_v25, %v9203_v29  ;;  %v1725_v52 = vmul.f32 %v9397_v25, %v9340_v2  ;;  %v1726_v6 = vmul.f32 %v9397_v25, %v1717_v59  ;;  %v1742_v29 = vld [vmem:[#allocation2 + $0xa1] sm:$0xff] }
 0x155   : >> { %v1727_v38 = vmul.f32 %v9397_v25, %v9205_v10  ;;  %v1728_v46 = vmul.f32 %v9397_v25, %v9342_v30  ;;  %v1729_v47 = vmul.f32 %v9397_v25, %v1720_v51  ;;  %v1730_v17 = vadd.f32 %v1722_v22, %v1704_v48 }
 0x156   : >> { %v1731_v5 = vadd.f32 %v1723_v49, %v1705_v61  ;;  %v1732_v36 = vadd.f32 %v1724_v11, %v1706_v58  ;;  %v1733_v35 = vadd.f32 %v1725_v52, %v1707_v53  ;;  %v1734_v63 = vadd.f32 %v1726_v6, %v1708_v54  ;;  %v1770_v58 = vld [vmem:[#allocation2 + $0xd2] sm:$0xff]  ;;  %v15088_v54 = vld [vmem:[#allocation29_spill] sm:$0xff] }
 0x157   : >> { %v1735_v2 = vadd.f32 %v1727_v38, %v1709_v40  ;;  %v1736_v32 = vadd.f32 %v1728_v46, %v1710_v26  ;;  %v1737_v44 = vadd.f32 %v1729_v47, %v1711_v60  ;;  %v1747_v19 = vmul.f32 %v9400_v28, %v1738_v21  ;;  %v15089_v26 = vld [vmem:[#allocation34_spill] sm:$0xff]  ;;  %v15091_v11 = vld [vmem:[#allocation21_spill] sm:$0xff] }
 0x158   : >> { %v1748_v10 = vmul.f32 %v9400_v28, %v1739_v43  ;;  %v1749_v30 = vmul.f32 %v9400_v28, %v15076_v37  ;;  %v1750_v25 = vmul.f32 %v9400_v28, %v9360_v34  ;;  %v1751_v41 = vmul.f32 %v9400_v28, %v1742_v29  ;;  %v1767_v37 = vld [vmem:[#allocation2 + $0xa2] sm:$0xff]  ;;  %v1789_v43 = vld [vmem:[#allocation2 + $0x73] sm:$0xff] }
 0x159   : >> { %v1752_v9 = vmul.f32 %v9400_v28, %v9228_v56  ;;  %v1753_v14 = vmul.f32 %v9400_v28, %v15087_v18  ;;  %v1754_v13 = vmul.f32 %v9400_v28, %v1745_v24  ;;  %v1755_v12 = vadd.f32 %v1747_v19, %v1730_v17  ;;  %v15090_v28 = vld [vmem:[#allocation26_spill] sm:$0xff]  ;;  %v1788_v21 = vld [vmem:[#allocation2 + $0x63] sm:$0xff] }
 0x15a   : >> { %v1756_v0 = vadd.f32 %v1748_v10, %v1731_v5  ;;  %v1757_v48 = vadd.f32 %v1749_v30, %v1732_v36  ;;  %v1758_v61 = vadd.f32 %v1750_v25, %v1733_v35  ;;  %v1759_v53 = vadd.f32 %v1751_v41, %v1734_v63  ;;  %v1792_v35 = vld [vmem:[#allocation2 + $0xa3] sm:$0xff] }
 0x15b   : >> { %v1760_v34 = vadd.f32 %v1752_v9, %v1735_v2  ;;  %v1761_v59 = vadd.f32 %v1753_v14, %v1736_v32  ;;  %v1762_v51 = vadd.f32 %v1754_v13, %v1737_v44  ;;  %v1772_v40 = vmul.f32 %v15088_v54, %v1763_v33  ;;  %v15092_v29 = vld [vmem:[#allocation25_spill] sm:$0xff]  ;;  %v1795_v44 = vld [vmem:[#allocation2 + $0xd3] sm:$0xff] }
 0x15c   : >> { %v1773_v56 = vmul.f32 %v15088_v54, %v1764_v20  ;;  %v1774_v60 = vmul.f32 %v15088_v54, %v15089_v26  ;;  %v1775_v22 = vmul.f32 %v15088_v54, %v15090_v28  ;;  %v1776_v49 = vmul.f32 %v15088_v54, %v1767_v37  ;;  %v1813_v14 = vld [vmem:[#allocation2 + $0x64] sm:$0xff]  ;;  %v1814_v13 = vld [vmem:[#allocation2 + $0x74] sm:$0xff] }
 0x15d   : >> { %v1777_v52 = vmul.f32 %v15088_v54, %v15091_v11  ;;  %v1778_v6 = vmul.f32 %v15088_v54, %v9385_v3  ;;  %v1779_v38 = vmul.f32 %v15088_v54, %v1770_v58  ;;  %v1780_v46 = vadd.f32 %v1772_v40, %v1755_v12  ;;  %v1838_v26 = vld [vmem:[#allocation2 + $0x65] sm:$0xff] }
 0x15e   : >> { %v1781_v47 = vadd.f32 %v1773_v56, %v1756_v0  ;;  %v1782_v17 = vadd.f32 %v1774_v60, %v1757_v48  ;;  %v1783_v5 = vadd.f32 %v1775_v22, %v1758_v61  ;;  %v1784_v36 = vadd.f32 %v1776_v49, %v1759_v53  ;;  %v1817_v61 = vld [vmem:[#allocation2 + $0xa4] sm:$0xff]  ;;  %v1839_v60 = vld [vmem:[#allocation2 + $0x75] sm:$0xff] }
 0x15f   : >> { %v1796_v24 = vperm.slane %v15092_v29, 3  ;;  %v1785_v63 = vadd.f32 %v1777_v52, %v1760_v34  ;;  %v1786_v2 = vadd.f32 %v1778_v6, %v1761_v59  ;;  %v1787_v32 = vadd.f32 %v1779_v38, %v1762_v51  ;;  %v1842_v52 = vld [vmem:[#allocation2 + $0xa5] sm:$0xff] }
 0x160   : >> { %v1821_v19 = vperm.slane %v15092_v29, 4  ;;  %v1846_v33 = vperm.slane %v15092_v29, 5 }
 0x161   : >> { %v1797_v10 = vmul.f32 %v1796_v24, %v1788_v21  ;;  %v1798_v3 = vmul.f32 %v1796_v24, %v1789_v43  ;;  %v1799_v30 = vmul.f32 %v1796_v24, %v9268_v42  ;;  %v1800_v25 = vmul.f32 %v1796_v24, %v9413_v15  ;;  %v1820_v15 = vld [vmem:[#allocation2 + $0xd4] sm:$0xff] }
 0x162   : >> { %v1801_v41 = vmul.f32 %v1796_v24, %v1792_v35  ;;  %v1802_v9 = vmul.f32 %v1796_v24, %v9270_v50  ;;  %v1803_v18 = vmul.f32 %v1796_v24, %v9415_v55  ;;  %v1804_v20 = vmul.f32 %v1796_v24, %v1795_v44  ;;  %v1863_v35 = vld [vmem:[#allocation2 + $0x66] sm:$0xff] }
 0x163   : >> { %v1805_v12 = vadd.f32 %v1797_v10, %v1780_v46  ;;  %v1806_v0 = vadd.f32 %v1798_v3, %v1781_v47  ;;  %v1807_v48 = vadd.f32 %v1799_v30, %v1782_v17  ;;  %v1808_v37 = vadd.f32 %v1800_v25, %v1783_v5  ;;  %v1870_v30 = vld [vmem:[#allocation2 + $0xd6] sm:$0xff] }
 0x164   : >> { %v1809_v58 = vadd.f32 %v1801_v41, %v1784_v36  ;;  %v1810_v53 = vadd.f32 %v1802_v9, %v1785_v63  ;;  %v1871_v42 = vperm.slane %v15092_v29, 6  ;;  %v1822_v34 = vmul.f32 %v1821_v19, %v1813_v14  ;;  %v1864_v29 = vld [vmem:[#allocation2 + $0x76] sm:$0xff] }
 0x165   : >> { %v1823_v59 = vmul.f32 %v1821_v19, %v1814_v13  ;;  %v1824_v50 = vmul.f32 %v1821_v19, %v15083_v27  ;;  %v1825_v55 = vmul.f32 %v1821_v19, %v9425_v39  ;;  %v1811_v51 = vadd.f32 %v1803_v18, %v1786_v2  ;;  %v1845_v27 = vld [vmem:[#allocation2 + $0xd5] sm:$0xff] }
 0x166   : >> { %v1826_v54 = vmul.f32 %v1821_v19, %v1817_v61  ;;  %v1827_v40 = vmul.f32 %v1821_v19, %v9282_v8  ;;  %v1828_v56 = vmul.f32 %v1821_v19, %v9427_v7  ;;  %v1812_v28 = vadd.f32 %v1804_v20, %v1787_v32  ;;  %v1867_v32 = vld [vmem:[#allocation2 + $0xa6] sm:$0xff] }
 0x167   : >> { %v1830_v22 = vadd.f32 %v1822_v34, %v1805_v12  ;;  %v1831_v49 = vadd.f32 %v1823_v59, %v1806_v0  ;;  %v1832_v11 = vadd.f32 %v1824_v50, %v1807_v48  ;;  %v1829_v6 = vmul.f32 %v1821_v19, %v1820_v15 }
 0x168   : >> { %v1833_v38 = vadd.f32 %v1825_v55, %v1808_v37  ;;  %v1834_v46 = vadd.f32 %v1826_v54, %v1809_v58  ;;  %v1835_v47 = vadd.f32 %v1827_v40, %v1810_v53  ;;  %v1847_v21 = vmul.f32 %v1846_v33, %v1838_v26 }
 0x169   : >> { %v1848_v39 = vmul.f32 %v1846_v33, %v1839_v60  ;;  %v1849_v43 = vmul.f32 %v1846_v33, %v15085_v23  ;;  %v1850_v8 = vmul.f32 %v1846_v33, %v9437_v4  ;;  %v1836_v17 = vadd.f32 %v1828_v56, %v1811_v51 }
 0x16a   : >> { %v1851_v7 = vmul.f32 %v1846_v33, %v1842_v52  ;;  %v1852_v5 = vmul.f32 %v1846_v33, %v9302_v31  ;;  %v1853_v36 = vmul.f32 %v1846_v33, %v9439_v62  ;;  %v1855_v24 = vadd.f32 %v1847_v21, %v1830_v22 }
 0x16b   : >> { %v1856_v63 = vadd.f32 %v1848_v39, %v1831_v49  ;;  %v1857_v2 = vadd.f32 %v1849_v43, %v1832_v11  ;;  %v1837_v44 = vadd.f32 %v1829_v6, %v1812_v28  ;;  %v1854_v19 = vmul.f32 %v1846_v33, %v1845_v27 }
 0x16c   : >> { %v1858_v10 = vadd.f32 %v1850_v8, %v1833_v38  ;;  %v1859_v3 = vadd.f32 %v1851_v7, %v1834_v46  ;;  %v1872_v23 = vmul.f32 %v1871_v42, %v1863_v35  ;;  %v1873_v4 = vmul.f32 %v1871_v42, %v1864_v29 }
 0x16d   : >> { %v1874_v25 = vmul.f32 %v1871_v42, %v9320_v45  ;;  %v1875_v31 = vmul.f32 %v1871_v42, %v9457_v1  ;;  %v1860_v62 = vadd.f32 %v1852_v5, %v1835_v47  ;;  %v1861_v41 = vadd.f32 %v1853_v36, %v1836_v17 }
 0x16e   : >> { %v1876_v9 = vmul.f32 %v1871_v42, %v1867_v32  ;;  %v1877_v18 = vmul.f32 %v1871_v42, %v9322_v16  ;;  %v1878_v14 = vmul.f32 %v1871_v42, %v9459_v57  ;;  %v1880_v13 = vadd.f32 %v1872_v23, %v1855_v24 }
 0x16f   : >> { %v1881_v33 = vadd.f32 %v1873_v4, %v1856_v63  ;;  %v1882_v20 = vadd.f32 %v1874_v25, %v1857_v2  ;;  %v1862_v45 = vadd.f32 %v1854_v19, %v1837_v44  ;;  %v1879_v12 = vmul.f32 %v1871_v42, %v1870_v30 }
 0x170   : >> { %v1883_v0 = vadd.f32 %v1875_v31, %v1858_v10  ;;  %v1884_v1 = vadd.f32 %v1876_v9, %v1859_v3  ;;  %1888 = vst.msk [vmem:[%s8610_s12] sm:$0xff] %vm600_vm2, %v1880_v13  ;;  %v1885_v48 = vadd.f32 %v1877_v18, %v1860_v62  ;;  %v1886_v61 = vadd.f32 %v1878_v14, %v1861_v41 }
 0x171   : >> { %1889 = vst.msk [vmem:[%s8610_s12 + $0x8] sm:$0xff] %vm600_vm2, %v1881_v33  ;;  %v1887_v16 = vadd.f32 %v1879_v12, %v1862_v45 }
 0x172   : >> { %1890 = vst.msk [vmem:[%s8610_s12 + $0x10] sm:$0xff] %vm600_vm2, %v1882_v20 }
 0x173   : >> { %1891 = vst.msk [vmem:[%s8610_s12 + $0x18] sm:$0xff] %vm600_vm2, %v1883_v0 }
 0x174   : >> { %1892 = vst.msk [vmem:[%s8610_s12 + $0x20] sm:$0xff] %vm600_vm2, %v1884_v1 }
 0x175   : >> { %1893 = vst.msk [vmem:[%s8610_s12 + $0x28] sm:$0xff] %vm600_vm2, %v1885_v48 }
 0x176   : >> { %1894 = vst.msk [vmem:[%s8610_s12 + $0x30] sm:$0xff] %vm600_vm2, %v1886_v61 }
 0x177   : >> { %1895 = vst.msk [vmem:[%s8610_s12 + $0x38] sm:$0xff] %vm600_vm2, %v1887_v16 }
 0x178 PF: >> { %s631_s23 = sadd.s32 1, %s8277_s23  }
 0x179   : >> { %p628_p2 = scmp.ge.s32.totalorder %s631_s23, 7  }
 0x17b   : > { %630 = sbr.rel (!%p628_p2) target bundleno = 145 (0x91), region = 130 }
 0x180 PF: > { %p7444_p3 = scmp.ne.s32.totalorder %s8257_s17, 13 }
 0x182   : > { %1899 = sbr.rel (%p7444_p3) target bundleno = 1827 (0x723), region = 91 }
 0x187   : > { %v9553_v57 = vld [vmem:[#allocation3 + $0x10] sm:$0xff]  ;;  %vm1964_vm3 = vcmask 64512   ;;  %v9555_v37 = vld [vmem:[#allocation3 + $0x8] sm:$0xff]  ;;  %v9557_v58 = vld [vmem:[#allocation3] sm:$0xff] }
 0x188   : > { %v1971_v53 = vsel %vm1964_vm3, %v9553_v57, 0.0  ;;  %v1968_v42 = vsel %vm1964_vm3, %v9555_v37, 0.0  ;;  %v1965_v15 = vsel %vm1964_vm3, %v9557_v58, 0.0  ;;  %v2230_v34 = vmul.f32 %v9553_v57, %v9553_v57  ;;  %v9574_v40 = vld [vmem:[#allocation3 + $0x18] sm:$0xff]  ;;  %v9578_v26 = vld [vmem:[#allocation3 + $0x20] sm:$0xff]  ;;  %v9585_v49 = vld [vmem:[#allocation3 + $0x128] sm:$0xff] }
 0x189   : > { %1972 = vadd.xlane.f32.xlu2 %v1971_v53  ;;  %1969 = vadd.xlane.f32.xlu1 %v1968_v42  ;;  %v2229_v59 = vmul.f32 %v9555_v37, %v9555_v37  ;;  %v2228_v50 = vmul.f32 %v9557_v58, %v9557_v58  ;;  %v2231_v56 = vmul.f32 %v9574_v40, %v9574_v40  ;;  %v1977_v28 = vsel %vm1964_vm3, %v9578_v26, 0.0  ;;  %v9595_v47 = vld [vmem:[#allocation3 + $0x28] sm:$0xff]  ;;  %v9599_v21 = vld [vmem:[#allocation3 + $0x130] sm:$0xff]  ;;  %v9616_v24 = vld [vmem:[#allocation3 + $0x138] sm:$0xff] }
 0x18a   : > { %1966 = vadd.xlane.f32.xlu0 %v1965_v15  ;;  %v2298_v55 = vsel %vm1964_vm3, %v2230_v34, 0.0  ;;  %v1974_v22 = vsel %vm1964_vm3, %v9574_v40, 0.0  ;;  %v2265_v11 = vmul.f32 %v9585_v49, %v9585_v49  ;;  %v2232_v52 = vmul.f32 %v9578_v26, %v9578_v26  ;;  %v9606_v17 = vld [vmem:[#allocation3 + $0x30] sm:$0xff]  ;;  %v9620_v2 = vld [vmem:[#allocation3 + $0x38] sm:$0xff]  ;;  %v9627_v10 = vld [vmem:[#allocation3 + $0x140] sm:$0xff] }
 0x18b   : > { %v2295_v51 = vsel %vm1964_vm3, %v2229_v59, 0.0  ;;  %v2292_v54 = vsel %vm1964_vm3, %v2228_v50, 0.0  ;;  %v2301_v60 = vsel %vm1964_vm3, %v2231_v56, 0.0  ;;  %v2076_v6 = vsel %vm1964_vm3, %v9585_v49, 0.0  ;;  %v1908_v31 = vld [vmem:[#allocation3 + $0x40] sm:$0xff]  ;;  %v1941_v41 = vld [vmem:[#allocation3 + $0x148] sm:$0xff] }
 0x18c   : > { %v2403_v38 = vsel %vm1964_vm3, %v2265_v11, 0.0  ;;  %v2304_v46 = vsel %vm1964_vm3, %v2232_v52, 0.0  ;;  %v2233_v27 = vmul.f32 %v9595_v47, %v9595_v47  ;;  %v2079_v43 = vsel %vm1964_vm3, %v9599_v21, 0.0  ;;  %v1909_v13 = vld [vmem:[#allocation3 + $0x48] sm:$0xff]  ;;  %v1942_v1 = vld [vmem:[#allocation3 + $0x150] sm:$0xff]  ;;  %v1943_v15 = vld [vmem:[#allocation3 + $0x158] sm:$0xff] }
 0x18d   : > { %v1980_v8 = vsel %vm1964_vm3, %v9595_v47, 0.0  ;;  %v2234_v7 = vmul.f32 %v9606_v17, %v9606_v17  ;;  %v2266_v5 = vmul.f32 %v9599_v21, %v9599_v21  ;;  %v1983_v36 = vsel %vm1964_vm3, %v9606_v17, 0.0  ;;  %v1910_v61 = vld [vmem:[#allocation3 + $0x50] sm:$0xff] }
 0x18e   : > { %v2307_v39 = vsel %vm1964_vm3, %v2233_v27, 0.0  ;;  %v2267_v63 = vmul.f32 %v9616_v24, %v9616_v24  ;;  %v1986_v44 = vsel %vm1964_vm3, %v9620_v2, 0.0  ;;  %v2082_v19 = vsel %vm1964_vm3, %v9616_v24, 0.0 }
 0x18f   : > { %v2310_v35 = vsel %vm1964_vm3, %v2234_v7, 0.0  ;;  %v2406_v29 = vsel %vm1964_vm3, %v2266_v5, 0.0  ;;  %v2268_v3 = vmul.f32 %v9627_v10, %v9627_v10  ;;  %v2235_v30 = vmul.f32 %v9620_v2, %v9620_v2  ;;  %v1945_v5 = vld [vmem:[#allocation3 + $0x168] sm:$0xff] }
 0x190   : > { %v2409_v32 = vsel %vm1964_vm3, %v2267_v63, 0.0  ;;  %v2085_v23 = vsel %vm1964_vm3, %v9627_v10, 0.0  ;;  %v2236_v62 = vmul.f32 %v1908_v31, %v1908_v31  ;;  %v2088_v18 = vsel %vm1964_vm3, %v1941_v41, 0.0 }
 0x191   : > { %2299 = vadd.xlane.f32.xlu2 %v2298_v55  ;;  %2296 = vadd.xlane.f32.xlu1 %v2295_v51  ;;  %v2412_v4 = vsel %vm1964_vm3, %v2268_v3, 0.0  ;;  %v2313_v25 = vsel %vm1964_vm3, %v2235_v30, 0.0  ;;  %v1989_v14 = vsel %vm1964_vm3, %v1908_v31, 0.0  ;;  %v2237_v33 = vmul.f32 %v1909_v13, %v1909_v13  ;;  %v1946_v3 = vld [vmem:[#allocation3 + $0x170] sm:$0xff] }
 0x192   : > { %2293 = vadd.xlane.f32.xlu0 %v2292_v54  ;;  %v2316_v9 = vsel %vm1964_vm3, %v2236_v62, 0.0  ;;  %v2269_v20 = vmul.f32 %v1941_v41, %v1941_v41  ;;  %v1992_v45 = vsel %vm1964_vm3, %v1909_v13, 0.0  ;;  %v2270_v48 = vmul.f32 %v1942_v1, %v1942_v1  ;;  %v1911_v54 = vld [vmem:[#allocation3 + $0x58] sm:$0xff] }
 0x193   : > { %v2319_v12 = vsel %vm1964_vm3, %v2237_v33, 0.0  ;;  %v1995_v53 = vsel %vm1964_vm3, %v1910_v61, 0.0  ;;  %v2091_v42 = vsel %vm1964_vm3, %v1942_v1, 0.0  ;;  %v2271_v34 = vmul.f32 %v1943_v15, %v1943_v15 }
 0x194   : > { %v2415_v0 = vsel %vm1964_vm3, %v2269_v20, 0.0  ;;  %v2418_v16 = vsel %vm1964_vm3, %v2270_v48, 0.0  ;;  %v2238_v59 = vmul.f32 %v1910_v61, %v1910_v61  ;;  %v2094_v50 = vsel %vm1964_vm3, %v1943_v15, 0.0  ;;  %v1914_v20 = vld [vmem:[#allocation3 + $0x70] sm:$0xff]  ;;  %v1947_v48 = vld [vmem:[#allocation3 + $0x178] sm:$0xff] }
 0x195   : > { %v2421_v55 = vsel %vm1964_vm3, %v2271_v34, 0.0  ;;  %v2239_v56 = vmul.f32 %v1911_v54, %v1911_v54  ;;  %v1998_v52 = vsel %vm1964_vm3, %v1911_v54, 0.0  ;;  %v3708_v34 = vld [vmem:[%s14744_s6] sm:$0xff] }
 0x196   : > { %v2322_v51 = vsel %vm1964_vm3, %v2238_v59, 0.0  ;;  %3920 = vmatpush.msra.mxu0 %v3708_v34  ;;  %7714 = vmatpush.msra.mxu3 %v3708_v34  ;;  %v1917_v34 = vld [vmem:[#allocation3 + $0x88] sm:$0xff] }
 0x199   : > { %2302 = vadd.xlane.f32.xlu1 %v2301_v60  ;;  %1978 = vadd.xlane.f32.xlu2 %v1977_v28  ;;  %v1944_v60 = vld [vmem:[#allocation3 + $0x160] sm:$0xff]  ;;  %v8280_v28 = vmov 8.0  }
 0x19a   : > { %1975 = vadd.xlane.f32.xlu0 %v1974_v22  ;;  %7775 = vrcp.f32 %v8280_v28  ;;  %v2325_v22 = vsel %vm1964_vm3, %v2239_v56, 0.0  ;;  %v2097_v11 = vsel %vm1964_vm3, %v1944_v60, 0.0  ;;  %v2272_v27 = vmul.f32 %v1944_v60, %v1944_v60  ;;  %v1915_v28 = vld [vmem:[#allocation3 + $0x78] sm:$0xff] }
 0x19b   : > { %v2007_v60 = vsel %vm1964_vm3, %v1914_v20, 0.0 }
 0x19c   : > { %v2424_v7 = vsel %vm1964_vm3, %v2272_v27, 0.0 }
 0x1a1   : > { %2077 = vadd.xlane.f32.xlu1 %v2076_v6  ;;  %2404 = vadd.xlane.f32.xlu2 %v2403_v38  ;;  %v1912_v6 = vld [vmem:[#allocation3 + $0x60] sm:$0xff] }
 0x1a2   : > { %2305 = vadd.xlane.f32.xlu0 %v2304_v46  ;;  %v2240_v38 = vmul.f32 %v1912_v6, %v1912_v6  ;;  %v7776_v46 = vpop.eup %7775 }
 0x1a3   : > { %vm2162_vm4 = vweird.f32 %v7776_v46 }
 0x1a9   : > { %2308 = vadd.xlane.f32.xlu1 %v2307_v39  ;;  %2080 = vadd.xlane.f32.xlu2 %v2079_v43  ;;  %v2001_v39 = vsel %vm1964_vm3, %v1912_v6, 0.0  ;;  %v2328_v43 = vsel %vm1964_vm3, %v2240_v38, 0.0  ;;  %v2243_v38 = vmul.f32 %v1915_v28, %v1915_v28 }
 0x1aa   : > { %1981 = vadd.xlane.f32.xlu0 %v1980_v8  ;;  %v2158_v8 = vmul.f32 8.0, %v7776_v46 }
 0x1b1   : > { %1984 = vadd.xlane.f32.xlu1 %v1983_v36  ;;  %2311 = vadd.xlane.f32.xlu2 %v2310_v35  ;;  %v2273_v36 = vmul.f32 %v1945_v5, %v1945_v5  ;;  %v2159_v35 = vsub.f32 1.0, %v2158_v8 }
 0x1b2   : > { %2407 = vadd.xlane.f32.xlu0 %v2406_v29  ;;  %v1913_v29 = vld [vmem:[#allocation3 + $0x68] sm:$0xff] }
 0x1b3   : > { %v2427_v63 = vsel %vm1964_vm3, %v2273_v36, 0.0 }
 0x1b9   : > { %2410 = vadd.xlane.f32.xlu1 %v2409_v32  ;;  %1987 = vadd.xlane.f32.xlu2 %v1986_v44  ;;  %v2004_v32 = vsel %vm1964_vm3, %v1913_v29, 0.0  ;;  %v2160_v44 = vmul.f32 %v7776_v46, %v2159_v35  ;;  %v2010_v35 = vsel %vm1964_vm3, %v1915_v28, 0.0 }
 0x1ba   : > { %2083 = vadd.xlane.f32.xlu0 %v2082_v19  ;;  %v2100_v19 = vsel %vm1964_vm3, %v1945_v5, 0.0  ;;  %v1948_v5 = vld [vmem:[#allocation3 + $0x180] sm:$0xff] }
 0x1bb   : > { %v2161_v30 = vadd.f32 %v7776_v46, %v2160_v44 }
 0x1bd   : > { %v9658_v41 = vsel %vm2162_vm4, %v7776_v46, %v2161_v30 }
 0x1c1   : > { %2086 = vadd.xlane.f32.xlu1 %v2085_v23  ;;  %2413 = vadd.xlane.f32.xlu2 %v2412_v4  ;;  %v2274_v23 = vmul.f32 %v1946_v3, %v1946_v3  ;;  %v2241_v4 = vmul.f32 %v1913_v29, %v1913_v29 }
 0x1c2   : > { %2314 = vadd.xlane.f32.xlu0 %v2313_v25 }
 0x1c3   : > { %v2331_v33 = vsel %vm1964_vm3, %v2241_v4, 0.0 }
 0x1c9   : > { %2317 = vadd.xlane.f32.xlu1 %v2316_v9  ;;  %2089 = vadd.xlane.f32.xlu2 %v2088_v18  ;;  %v2103_v9 = vsel %vm1964_vm3, %v1946_v3, 0.0  ;;  %v2430_v18 = vsel %vm1964_vm3, %v2274_v23, 0.0  ;;  %v1916_v23 = vld [vmem:[#allocation3 + $0x80] sm:$0xff] }
 0x1ca   : > { %1990 = vadd.xlane.f32.xlu0 %v1989_v14 }
 0x1d1   : > { %1993 = vadd.xlane.f32.xlu1 %v1992_v45  ;;  %2320 = vadd.xlane.f32.xlu2 %v2319_v12  ;;  %v2242_v12 = vmul.f32 %v1914_v20, %v1914_v20 }
 0x1d2   : > { %2416 = vadd.xlane.f32.xlu0 %v2415_v0 }
 0x1d9   : > { %2419 = vadd.xlane.f32.xlu1 %v2418_v16  ;;  %1996 = vadd.xlane.f32.xlu2 %v1995_v53 }
 0x1da   : > { %2092 = vadd.xlane.f32.xlu0 %v2091_v42 }
 0x1e1   : > { %2095 = vadd.xlane.f32.xlu1 %v2094_v50  ;;  %2422 = vadd.xlane.f32.xlu2 %v2421_v55  ;;  %v2334_v55 = vsel %vm1964_vm3, %v2242_v12, 0.0 }
 0x1e2   : > { %2323 = vadd.xlane.f32.xlu0 %v2322_v51  ;;  %v2106_v51 = vsel %vm1964_vm3, %v1947_v48, 0.0 }
 0x1e9   : > { %2326 = vadd.xlane.f32.xlu1 %v2325_v22  ;;  %2098 = vadd.xlane.f32.xlu2 %v2097_v11 }
 0x1ea   : > { %1999 = vadd.xlane.f32.xlu0 %v1998_v52 }
 0x1f1   : > { %2002 = vadd.xlane.f32.xlu1 %v2001_v39  ;;  %2329 = vadd.xlane.f32.xlu2 %v2328_v43  ;;  %v2275_v39 = vmul.f32 %v1947_v48, %v1947_v48 }
 0x1f2   : > { %2425 = vadd.xlane.f32.xlu0 %v2424_v7 }
 0x1f3   : > { %v2433_v44 = vsel %vm1964_vm3, %v2275_v39, 0.0 }
 0x1f9   : > { %2428 = vadd.xlane.f32.xlu1 %v2427_v63  ;;  %2005 = vadd.xlane.f32.xlu2 %v2004_v32  ;;  %v2337_v32 = vsel %vm1964_vm3, %v2243_v38, 0.0 }
 0x1fa   : > { %2101 = vadd.xlane.f32.xlu0 %v2100_v19  ;;  %v2276_v19 = vmul.f32 %v1948_v5, %v1948_v5 }
 0x1fc   : > { %v1973_v25 = vpop.xlane.xlu2 %1972  ;;  %v1970_v31 = vpop.xlane.xlu1 %1969 }
 0x1fd   : > { %v1967_v62 = vpop.xlane.xlu0 %1966  ;;  %v9663_v14 = vmul.f32 %v9658_v41, %v1973_v25  ;;  %v9666_v13 = vmul.f32 %v9658_v41, %v1970_v31  ;;  %v2436_v31 = vsel %vm1964_vm3, %v2276_v19, 0.0 }
 0x1fe   : > { %v9670_v45 = vmul.f32 %v9658_v41, %v1967_v62  ;;  %v1949_v62 = vld [vmem:[#allocation3 + $0x188] sm:$0xff] }
 0x1ff   : > { %v2550_v0 = vmul.f32 %v9663_v14, %v9663_v14  ;;  %v2549_v1 = vmul.f32 %v9666_v13, %v9666_v13 }
 0x200   : > { %v2548_v59 = vmul.f32 %v9670_v45, %v9670_v45 }
 0x201   : > { %2104 = vadd.xlane.f32.xlu1 %v2103_v9  ;;  %2431 = vadd.xlane.f32.xlu2 %v2430_v18 }
 0x202   : > { %2332 = vadd.xlane.f32.xlu0 %v2331_v33 }
 0x204   : > { %v2300_v61 = vpop.xlane.xlu2 %2299  ;;  %v2297_v16 = vpop.xlane.xlu1 %2296 }
 0x205   : > { %v2486_v53 = vmul.f32 %v2300_v61, %v9658_v41  ;;  %v2485_v42 = vmul.f32 %v2297_v16, %v9658_v41  ;;  %v2294_v15 = vpop.xlane.xlu0 %2293 }
 0x206   : > { %v2484_v50 = vmul.f32 %v2294_v15, %v9658_v41 }
 0x207   : > { %v2614_v54 = vsub.f32 %v2486_v53, %v2550_v0  ;;  %v2613_v56 = vsub.f32 %v2485_v42, %v2549_v1  ;;  %v2109_v0 = vsel %vm1964_vm3, %v1948_v5, 0.0  ;;  %v2013_v1 = vsel %vm1964_vm3, %v1916_v23, 0.0 }
 0x208   : > { %v2612_v22 = vsub.f32 %v2484_v50, %v2548_v59 }
 0x209   : > { %v2678_v11 = vmax.f32 %v2614_v54, 0.0  ;;  %v2677_v52 = vmax.f32 %v2613_v56, 0.0  ;;  %2335 = vadd.xlane.f32.xlu1 %v2334_v55  ;;  %2107 = vadd.xlane.f32.xlu2 %v2106_v51  ;;  %v2244_v55 = vmul.f32 %v1916_v23, %v1916_v23  ;;  %v2277_v51 = vmul.f32 %v1949_v62, %v1949_v62 }
 0x20a   : > { %v2676_v6 = vmax.f32 %v2612_v22, 0.0  ;;  %2008 = vadd.xlane.f32.xlu0 %v2007_v60  ;;  %v2742_v22 = vsub.f32 %v9553_v57, %v9663_v14 }
 0x20b   : > { %v9687_v46 = vadd.f32 1e-06, %v2678_v11  ;;  %v9689_v27 = vadd.f32 1e-06, %v2677_v52  ;;  %v2245_v52 = vmul.f32 %v1917_v34, %v1917_v34  ;;  %v2439_v19 = vsel %vm1964_vm3, %v2277_v51, 0.0 }
 0x20c   : > { %v9691_v43 = vadd.f32 1e-06, %v2676_v6  ;;  %v2303_v8 = vpop.xlane.xlu1 %2302  ;;  %v1979_v7 = vpop.xlane.xlu2 %1978  ;;  %v2741_v6 = vsub.f32 %v9555_v37, %v9666_v13 }
 0x20d   : > { %7777 = vrsqrt.f32 %v9687_v46  ;;  %v1976_v36 = vpop.xlane.xlu0 %1975  ;;  %v2487_v29 = vmul.f32 %v2303_v8, %v9658_v41  ;;  %v9706_v30 = vmul.f32 %v9658_v41, %v1979_v7  ;;  %v2740_v7 = vsub.f32 %v9557_v58, %v9670_v45 }
 0x20e   : > { %7779 = vrsqrt.f32 %v9689_v27  ;;  %v9698_v63 = vmul.f32 %v9658_v41, %v1976_v36  ;;  %v2112_v36 = vsel %vm1964_vm3, %v1949_v62, 0.0  ;;  %vm2884_vm5 = vweird.f32 %v9689_v27 }
 0x20f   : > { %7781 = vrsqrt.f32 %v9691_v43  ;;  %v2552_v16 = vmul.f32 %v9706_v30, %v9706_v30  ;;  %vm2874_vm6 = vweird.f32 %v9691_v43  ;;  %v9750_v58 = vsel %vm1964_vm3, %v2245_v52, 0.0 }
 0x210   : > { %v2551_v3 = vmul.f32 %v9698_v63, %v9698_v63  ;;  %vm2894_vm7 = vweird.f32 %v9687_v46 }
 0x211   : > { %2011 = vadd.xlane.f32.xlu1 %v2010_v35  ;;  %2338 = vadd.xlane.f32.xlu2 %v2337_v32  ;;  %v2340_v35 = vsel %vm1964_vm3, %v2244_v55, 0.0 }
 0x212   : > { %v2615_v4 = vsub.f32 %v2487_v29, %v2551_v3  ;;  %2434 = vadd.xlane.f32.xlu0 %v2433_v44 }
 0x213   : > { %v9708_v25 = vpop.eup %7777 }
 0x214   : > { %v9711_v9 = vpop.eup %7779  ;;  %v2889_v18 = vmul.f32 %v9708_v25, %v9687_v46  ;;  %v2679_v33 = vmax.f32 %v2615_v4, 0.0  ;;  %v2078_v20 = vpop.xlane.xlu1 %2077  ;;  %vm2895_vm11 = vweird.f32 %v9708_v25 }
 0x215   : > { %v2405_v12 = vpop.xlane.xlu2 %2404  ;;  %v9717_v48 = vpop.eup %7781  ;;  %v2879_v61 = vmul.f32 %v9711_v9, %v9689_v27  ;;  %v9724_v53 = vmul.f32 %v9658_v41, %v2078_v20  ;;  %vm2885_vm9 = vweird.f32 %v9711_v9  ;;  %vm9828_vm14 = vmor %vm2894_vm7, %vm2895_vm11 }
 0x216   : > { %v2306_v42 = vpop.xlane.xlu0 %2305  ;;  %v2521_v15 = vmul.f32 %v2405_v12, %v9658_v41  ;;  %v2869_v59 = vmul.f32 %v9717_v48, %v9691_v43  ;;  %v9729_v50 = vadd.f32 1e-06, %v2679_v33  ;;  %v2890_v54 = vmul.f32 %v9708_v25, %v2889_v18  ;;  %vm9802_vm13 = vmor %vm2884_vm5, %vm2885_vm9 }
 0x217   : > { %v2880_v56 = vmul.f32 %v9711_v9, %v2879_v61  ;;  %v2585_v60 = vmul.f32 %v9724_v53, %v9724_v53  ;;  %v2488_v28 = vmul.f32 %v2306_v42, %v9658_v41  ;;  %v9758_v33 = vsel %vm1964_vm3, %v1917_v34, 0.0  ;;  %v1950_v61 = vld [vmem:[#allocation3 + $0x190] sm:$0xff] }
 0x218   : > { %v2870_v11 = vmul.f32 %v9717_v48, %v2869_v59  ;;  %7783 = vrsqrt.f32 %v9729_v50  ;;  %v2891_v29 = vmul.f32 0.5, %v2890_v54  ;;  %vm2875_vm8 = vweird.f32 %v9717_v48 }
 0x219   : > { %v2881_v38 = vmul.f32 0.5, %v2880_v56  ;;  %v2616_v39 = vsub.f32 %v2488_v28, %v2552_v16  ;;  %v2649_v8 = vsub.f32 %v2521_v15, %v2585_v60  ;;  %2437 = vadd.xlane.f32.xlu1 %v2436_v31  ;;  %2014 = vadd.xlane.f32.xlu2 %v2013_v1  ;;  %v2743_v42 = vsub.f32 %v9574_v40, %v9698_v63  ;;  %vm2876_vm10 = vmor %vm2874_vm6, %vm2875_vm8  ;;  %v9789_v56 = vld [vmem:[%s14742_s4] ss:$0 sm:$0xff]  ;;  %v1918_v28 = vld [vmem:[#allocation3 + $0x90] sm:$0xff] }
 0x21a   : > { %v2871_v5 = vmul.f32 0.5, %v2870_v11  ;;  %2110 = vadd.xlane.f32.xlu0 %v2109_v0  ;;  %v2892_v16 = vsub.f32 1.5, %v2891_v29  ;;  %v2744_v34 = vsub.f32 %v9578_v26, %v9706_v30  ;;  %v2115_v60 = vsel %vm1964_vm3, %v1950_v61, 0.0 }
 0x21b   : > { %v2680_v32 = vmax.f32 %v2616_v39, 0.0  ;;  %v2713_v44 = vmax.f32 %v2649_v8, 0.0  ;;  %v2882_v45 = vsub.f32 1.5, %v2881_v38  ;;  %v2777_v11 = vsub.f32 %v9585_v49, %v9724_v53 }
 0x21c   : > { %v2872_v3 = vsub.f32 1.5, %v2871_v5  ;;  %v2309_v23 = vpop.xlane.xlu1 %2308  ;;  %v2893_v38 = vmul.f32 %v9708_v25, %v2892_v16  ;;  %vm2904_vm12 = vweird.f32 %v9729_v50  ;;  %v2019_v46 = vsel %vm1964_vm3, %v1918_v28, 0.0 }
 0x21d   : > { %v2081_v4 = vpop.xlane.xlu2 %2080  ;;  %v9753_v31 = vadd.f32 1e-06, %v2680_v32  ;;  %v9755_v62 = vadd.f32 1e-06, %v2713_v44  ;;  %v2489_v0 = vmul.f32 %v2309_v23, %v9658_v41  ;;  %v2883_v51 = vmul.f32 %v9711_v9, %v2882_v45 }
 0x21e   : > { %v1982_v18 = vpop.xlane.xlu0 %1981  ;;  %v9760_v20 = vpop.eup %7783  ;;  %v2873_v12 = vmul.f32 %v9717_v48, %v2872_v3  ;;  %v9779_v55 = vmul.f32 %v9658_v41, %v2081_v4  ;;  %v2278_v32 = vmul.f32 %v1950_v61, %v1950_v61  ;;  %v2246_v44 = vmul.f32 %v1918_v28, %v1918_v28  ;;  %v9817_v4 = vld [vmem:[%s14743_s5] ss:$0 sm:$0xff] }
 0x21f   : > { %v9766_v1 = vmul.f32 %v9658_v41, %v1982_v18  ;;  %v2899_v15 = vmul.f32 %v9760_v20, %v9729_v50  ;;  %7785 = vrsqrt.f32 %v9753_v31  ;;  %v2887_v45 = vsel %vm9802_vm13, %v9711_v9, %v2883_v51 }
 0x220   : > { %7787 = vrsqrt.f32 %v9755_v62  ;;  %v2877_v43 = vsel %vm2876_vm10, %v9717_v48, %v2873_v12  ;;  %v2897_v51 = vsel %vm9828_vm14, %v9708_v25, %v2893_v38  ;;  %vm2905_vm15 = vweird.f32 %v9760_v20 }
 0x221   : > { %v2553_v59 = vmul.f32 %v9766_v1, %v9766_v1  ;;  %v2900_v54 = vmul.f32 %v9760_v20, %v2899_v15  ;;  %2113 = vadd.xlane.f32.xlu1 %v2112_v36  ;;  %2440 = vadd.xlane.f32.xlu2 %v2439_v19  ;;  %v3508_v8 = vmul.f32 %v2877_v43, %v2740_v7  ;;  %vm3244_vm0 = vweird.f32 %v9755_v62  ;;  %vm9864_vm1 = vmor %vm2904_vm12, %vm2905_vm15 }
 0x222   : > { %2341 = vadd.xlane.f32.xlu0 %v2340_v35  ;;  %v2586_v35 = vmul.f32 %v9779_v55, %v9779_v55  ;;  %v3509_v28 = vmul.f32 %v2887_v45, %v2741_v6  ;;  %v2442_v38 = vsel %vm1964_vm3, %v2278_v32, 0.0  ;;  %v2346_v5 = vsel %vm1964_vm3, %v2246_v44, 0.0 }
 0x223   : > { %v2617_v52 = vsub.f32 %v2489_v0, %v2553_v59  ;;  %v2901_v39 = vmul.f32 0.5, %v2900_v54  ;;  %v3576_v27 = vmul.f32 %v9789_v56, %v3508_v8  ;;  %v2745_v13 = vsub.f32 %v9595_v47, %v9766_v1 }
 0x224   : > { %v1985_v29 = vpop.xlane.xlu1 %1984  ;;  %v2778_v6 = vsub.f32 %v9599_v21, %v9779_v55  ;;  %v3510_v32 = vmul.f32 %v2897_v51, %v2742_v22  ;;  %vm2914_vm4 = vweird.f32 %v9753_v31 }
 0x225   : > { %v2681_v36 = vmax.f32 %v2617_v52, 0.0  ;;  %v2312_v48 = vpop.xlane.xlu2 %2311  ;;  %v9808_v19 = vpop.eup %7785  ;;  %v2902_v3 = vsub.f32 1.5, %v2901_v39  ;;  %v9811_v7 = vmul.f32 %v9658_v41, %v1985_v29  ;;  %v3644_v8 = vadd.f32 %v9817_v4, %v3576_v27 }
 0x226   : > { %v2408_v23 = vpop.xlane.xlu0 %2407  ;;  %v9822_v18 = vpop.eup %7787  ;;  %v2909_v0 = vmul.f32 %v9808_v19, %v9753_v31  ;;  %v2490_v15 = vmul.f32 %v2312_v48, %v9658_v41  ;;  %v3577_v27 = vmul.f32 %v9789_v56, %v3509_v28  ;;  %v3578_v51 = vmul.f32 %v9789_v56, %v3510_v32 }
 0x227   : > { %v9834_v61 = vadd.f32 1e-06, %v2681_v36  ;;  %v2522_v16 = vmul.f32 %v2408_v23, %v9658_v41  ;;  %v3239_v9 = vmul.f32 %v9822_v18, %v9755_v62  ;;  %v2554_v59 = vmul.f32 %v9811_v7, %v9811_v7  ;;  %v1951_v36 = vld [vmem:[#allocation3 + $0x198] sm:$0xff]  ;;  %7445 = vmatmul.msk.f32.vlgmr.msra.gmra.mxu0 %vm1964_vm3, %v3644_v8 }
 0x228   : > { %v2903_v54 = vmul.f32 %v9760_v20, %v2902_v3  ;;  %v2910_v52 = vmul.f32 %v9808_v19, %v2909_v0  ;;  %v2279_v45 = vmul.f32 %v1951_v36, %v1951_v36  ;;  %vm3245_vm2 = vweird.f32 %v9822_v18 }
 0x229   : > { %7789 = vrsqrt.f32 %v9834_v61  ;;  %v3240_v43 = vmul.f32 %v9822_v18, %v3239_v9  ;;  %v2650_v39 = vsub.f32 %v2522_v16, %v2586_v35  ;;  %2344 = vadd.xlane.f32.xlu1 %v9750_v58  ;;  %v2618_v25 = vsub.f32 %v2490_v15, %v2554_v59  ;;  %2116 = vadd.xlane.f32.xlu2 %v2115_v60  ;;  %v1919_v15 = vld [vmem:[#allocation3 + $0x98] sm:$0xff]  ;;  %vm3246_vm5 = vmor %vm3244_vm0, %vm3245_vm2 }
 0x22a   : > { %2017 = vadd.xlane.f32.xlu0 %v9758_v33  ;;  %v2907_v60 = vsel %vm9864_vm1, %v9760_v20, %v2903_v54  ;;  %v2911_v35 = vmul.f32 0.5, %v2910_v52  ;;  %v3645_v63 = vadd.f32 %v9817_v4, %v3577_v27  ;;  %v2118_v54 = vsel %vm1964_vm3, %v1951_v36, 0.0 }
 0x22b   : > { %v3241_v37 = vmul.f32 0.5, %v3240_v43  ;;  %v2714_v33 = vmax.f32 %v2650_v39, 0.0  ;;  %v2682_v50 = vmax.f32 %v2618_v25, 0.0  ;;  %v3511_v57 = vmul.f32 %v2907_v60, %v2743_v42 }
 0x22c   : > { %v2411_v29 = vpop.xlane.xlu1 %2410  ;;  %v2912_v9 = vsub.f32 1.5, %v2911_v35  ;;  %vm2915_vm6 = vweird.f32 %v9808_v19  ;;  %v2022_v62 = vsel %vm1964_vm3, %v1919_v15, 0.0  ;;  %v2746_v8 = vsub.f32 %v9606_v17, %v9811_v7 }
 0x22d   : > { %v1988_v48 = vpop.xlane.xlu2 %1987  ;;  %v3242_v44 = vsub.f32 1.5, %v3241_v37  ;;  %v9879_v3 = vadd.f32 1e-06, %v2714_v33  ;;  %v9885_v20 = vadd.f32 1e-06, %v2682_v50  ;;  %v2523_v0 = vmul.f32 %v2411_v29, %v9658_v41  ;;  %vm9953_vm9 = vmor %vm2914_vm4, %vm2915_vm6 }
 0x22e   : > { %v2084_v23 = vpop.xlane.xlu0 %2083  ;;  %v9908_v42 = vmul.f32 %v9658_v41, %v1988_v48  ;;  %v3579_v28 = vmul.f32 %v9789_v56, %v3511_v57  ;;  %v2913_v25 = vmul.f32 %v9808_v19, %v2912_v9  ;;  %vm2924_vm7 = vweird.f32 %v9834_v61  ;;  %v1952_v57 = vld [vmem:[#allocation3 + $0x1a0] sm:$0xff] }
 0x22f   : > { %v9882_v12 = vpop.eup %7789  ;;  %v9889_v16 = vmul.f32 %v9658_v41, %v2084_v23  ;;  %v3243_v14 = vmul.f32 %v9822_v18, %v3242_v44  ;;  %7791 = vrsqrt.f32 %v9879_v3  ;;  %7446 = vmatmul.msk.f32.gmra.mxu0 %vm1964_vm3, %v3645_v63  ;;  %v2445_v58 = vsel %vm1964_vm3, %v2279_v45, 0.0 }
 0x230   : > { %v2919_v22 = vmul.f32 %v9882_v12, %v9834_v61  ;;  %7793 = vrsqrt.f32 %v9885_v20  ;;  %v2555_v49 = vmul.f32 %v9908_v42, %v9908_v42  ;;  %vm2925_vm8 = vweird.f32 %v9882_v12 }
 0x231   : > { %v2587_v59 = vmul.f32 %v9889_v16, %v9889_v16  ;;  %2020 = vadd.xlane.f32.xlu1 %v2019_v46  ;;  %2347 = vadd.xlane.f32.xlu2 %v2346_v5  ;;  %v3247_v43 = vsel %vm3246_vm5, %v9822_v18, %v3243_v14  ;;  %v3646_v5 = vadd.f32 %v9817_v4, %v3578_v51  ;;  %vm3254_vm10 = vweird.f32 %v9879_v3  ;;  %vm9981_vm11 = vmor %vm2924_vm7, %vm2925_vm8 }
 0x232   : > { %v2920_v40 = vmul.f32 %v9882_v12, %v2919_v22  ;;  %2443 = vadd.xlane.f32.xlu0 %v2442_v38  ;;  %v3545_v46 = vmul.f32 %v3247_v43, %v2777_v11  ;;  %v9947_v27 = vadd.f32 %v9817_v4, %v3579_v28  ;;  %v2247_v14 = vmul.f32 %v1919_v15, %v1919_v15  ;;  %v1920_v15 = vld [vmem:[#allocation3 + $0xa0] sm:$0xff] }
 0x233   : > { %v2651_v52 = vsub.f32 %v2523_v0, %v2587_v59  ;;  %v2779_v22 = vsub.f32 %v9616_v24, %v9889_v16  ;;  %v2917_v31 = vsel %vm9953_vm9, %v9808_v19, %v2913_v25  ;;  %v2747_v63 = vsub.f32 %v9620_v2, %v9908_v42 }
 0x234   : > { %v2921_v39 = vmul.f32 0.5, %v2920_v40  ;;  %v2087_v18 = vpop.xlane.xlu1 %2086  ;;  %v3613_v32 = vmul.f32 %v9789_v56, %v3545_v46  ;;  %v2280_v28 = vmul.f32 %v1952_v57, %v1952_v57  ;;  %vm2934_vm15 = vweird.f32 %v9885_v20 }
 0x235   : > { %v2715_v38 = vmax.f32 %v2651_v52, 0.0  ;;  %v2414_v36 = vpop.xlane.xlu2 %2413  ;;  %v9925_v37 = vpop.eup %7791  ;;  %v9930_v53 = vmul.f32 %v9658_v41, %v2087_v18  ;;  %v2121_v18 = vsel %vm1964_vm3, %v1952_v57, 0.0  ;;  %v1953_v57 = vld [vmem:[#allocation3 + $0x1a8] sm:$0xff]  ;;  %v2025_v47 = vsel %vm1964_vm3, %v1920_v15, 0.0 }
 0x236   : > { %v2922_v33 = vsub.f32 1.5, %v2921_v39  ;;  %v2315_v11 = vpop.xlane.xlu0 %2314  ;;  %v2524_v60 = vmul.f32 %v2414_v36, %v9658_v41  ;;  %v9933_v35 = vpop.eup %7793  ;;  %v3249_v50 = vmul.f32 %v9925_v37, %v9879_v3  ;;  %v3681_v52 = vadd.f32 %v9817_v4, %v3613_v32 }
 0x237   : > { %v9937_v29 = vadd.f32 1e-06, %v2715_v38  ;;  %v2491_v48 = vmul.f32 %v2315_v11, %v9658_v41  ;;  %v2929_v44 = vmul.f32 %v9933_v35, %v9885_v20  ;;  %v2588_v23 = vmul.f32 %v9930_v53, %v9930_v53  ;;  %7447 = vmatmul.msk.f32.gmra.mxu0 %vm1964_vm3, %v3646_v5 }
 0x238   : > { %v3250_v0 = vmul.f32 %v9925_v37, %v3249_v50  ;;  %v2923_v51 = vmul.f32 %v9882_v12, %v2922_v33  ;;  %7482 = vmatmul.msk.f32.vlgmr.msra.gmra.mxu3 %vm1964_vm3, %v3681_v52  ;;  %v2349_v36 = vsel %vm1964_vm3, %v2247_v14, 0.0  ;;  %vm3255_vm12 = vweird.f32 %v9925_v37 }
 0x239   : > { %7795 = vrsqrt.f32 %v9937_v29  ;;  %v2619_v9 = vsub.f32 %v2491_v48, %v2555_v49  ;;  %v2652_v59 = vsub.f32 %v2524_v60, %v2588_v23  ;;  %2446 = vadd.xlane.f32.xlu1 %v2445_v58  ;;  %2023 = vadd.xlane.f32.xlu2 %v2022_v62  ;;  %v2930_v43 = vmul.f32 %v9933_v35, %v2929_v44  ;;  %vm10013_vm14 = vmor %vm3254_vm10, %vm3255_vm12 }
 0x23a   : > { %v3251_v40 = vmul.f32 0.5, %v3250_v0  ;;  %2119 = vadd.xlane.f32.xlu0 %v2118_v54  ;;  %v3512_v54 = vmul.f32 %v2917_v31, %v2744_v34  ;;  %v2248_v49 = vmul.f32 %v1920_v15, %v1920_v15  ;;  %v2927_v26 = vsel %vm9981_vm11, %v9882_v12, %v2923_v51  ;;  %v1921_v15 = vld [vmem:[#allocation3 + $0xa8] sm:$0xff] }
 0x23b   : > { %v2683_v39 = vmax.f32 %v2619_v9, 0.0  ;;  %v2716_v46 = vmax.f32 %v2652_v59, 0.0  ;;  %v2931_v60 = vmul.f32 0.5, %v2930_v43  ;;  %v2448_v48 = vsel %vm1964_vm3, %v2280_v28, 0.0 }
 0x23c   : > { %v3252_v38 = vsub.f32 1.5, %v3251_v40  ;;  %v2318_v19 = vpop.xlane.xlu1 %2317  ;;  %vm2935_vm13 = vweird.f32 %v9933_v35  ;;  %v3580_v32 = vmul.f32 %v9789_v56, %v3512_v54  ;;  %vm3264_vm0 = vweird.f32 %v9937_v29 }
 0x23d   : > { %v2090_v25 = vpop.xlane.xlu2 %2089  ;;  %v9986_v5 = vadd.f32 1e-06, %v2683_v39  ;;  %v9988_v58 = vadd.f32 1e-06, %v2716_v46  ;;  %v2492_v34 = vmul.f32 %v2318_v19, %v9658_v41  ;;  %v2780_v45 = vsub.f32 %v9627_v10, %v9930_v53  ;;  %vm10077_vm5 = vmor %vm2934_vm15, %vm2935_vm13 }
 0x23e   : > { %v1991_v33 = vpop.xlane.xlu0 %1990  ;;  %v3253_v30 = vmul.f32 %v9925_v37, %v3252_v38  ;;  %v10023_v0 = vmul.f32 %v9658_v41, %v2090_v25  ;;  %v3513_v3 = vmul.f32 %v2927_v26, %v2745_v13  ;;  %v2352_v59 = vsel %vm1964_vm3, %v2248_v49, 0.0 }
 0x23f   : > { %v9990_v11 = vpop.eup %7795  ;;  %v9998_v61 = vmul.f32 %v9658_v41, %v1991_v33  ;;  %7797 = vrsqrt.f32 %v9986_v5  ;;  %v2932_v31 = vsub.f32 1.5, %v2931_v60  ;;  %7448 = vmatmul.msk.f32.gmra.mxu0 %vm1964_vm3, %v9947_v27  ;;  %v3648_v52 = vadd.f32 %v9817_v4, %v3580_v32 }
 0x240   : > { %v3259_v50 = vmul.f32 %v9990_v11, %v9937_v29  ;;  %7799 = vrsqrt.f32 %v9988_v58  ;;  %v3257_v9 = vsel %vm10013_vm14, %v9925_v37, %v3253_v30  ;;  %vm3265_vm1 = vweird.f32 %v9990_v11 }
 0x241   : > { %v2556_v12 = vmul.f32 %v9998_v61, %v9998_v61  ;;  %2122 = vadd.xlane.f32.xlu1 %v2121_v18  ;;  %2449 = vadd.xlane.f32.xlu2 %v2448_v48  ;;  %v3546_v40 = vmul.f32 %v3257_v9, %v2778_v6  ;;  %v2124_v43 = vsel %vm1964_vm3, %v1953_v57, 0.0  ;;  %v2589_v27 = vmul.f32 %v10023_v0, %v10023_v0  ;;  %vm3266_vm2 = vmor %vm3264_vm0, %vm3265_vm1 }
 0x242   : > { %v3260_v23 = vmul.f32 %v9990_v11, %v3259_v50  ;;  %2350 = vadd.xlane.f32.xlu0 %v2349_v36  ;;  %v2933_v36 = vmul.f32 %v9933_v35, %v2932_v31  ;;  %vm3274_vm4 = vweird.f32 %v9988_v58  ;;  %v2281_v26 = vmul.f32 %v1953_v57, %v1953_v57 }
 0x243   : > { %v2620_v14 = vsub.f32 %v2492_v34, %v2556_v12  ;;  %v3614_v6 = vmul.f32 %v9789_v56, %v3546_v40  ;;  %v2249_v30 = vmul.f32 %v1921_v15, %v1921_v15  ;;  %v3581_v44 = vmul.f32 %v9789_v56, %v3513_v3 }
 0x244   : > { %v3261_v51 = vmul.f32 0.5, %v3260_v23  ;;  %v1994_v13 = vpop.xlane.xlu1 %1993  ;;  %v2028_v20 = vsel %vm1964_vm3, %v1921_v15, 0.0  ;;  %v2451_v3 = vsel %vm1964_vm3, %v2281_v26, 0.0  ;;  %vm2944_vm7 = vweird.f32 %v9986_v5 }
 0x245   : > { %v2684_v1 = vmax.f32 %v2620_v14, 0.0  ;;  %v2321_v37 = vpop.xlane.xlu2 %2320  ;;  %v10041_v39 = vpop.eup %7797  ;;  %v10046_v21 = vmul.f32 %v9658_v41, %v1994_v13  ;;  %v3682_v48 = vadd.f32 %v9817_v4, %v3614_v6  ;;  %v2937_v14 = vsel %vm10077_vm5, %v9933_v35, %v2933_v36 }
 0x246   : > { %v3262_v46 = vsub.f32 1.5, %v3261_v51  ;;  %v2417_v55 = vpop.xlane.xlu0 %2416  ;;  %v10049_v28 = vpop.eup %7799  ;;  %v2939_v38 = vmul.f32 %v10041_v39, %v9986_v5  ;;  %v2493_v18 = vmul.f32 %v2321_v37, %v9658_v41  ;;  %v3514_v15 = vmul.f32 %v2937_v14, %v2746_v8 }
 0x247   : > { %v10053_v19 = vadd.f32 1e-06, %v2684_v1  ;;  %v2525_v25 = vmul.f32 %v2417_v55, %v9658_v41  ;;  %v3269_v62 = vmul.f32 %v10049_v28, %v9988_v58  ;;  %v2557_v33 = vmul.f32 %v10046_v21, %v10046_v21  ;;  %7449 = vmatmul.msk.f32.gmra.mxu0 %vm1964_vm3, %v3648_v52  ;;  %7483 = vmatmul.msk.f32.gmra.mxu3 %vm1964_vm3, %v3682_v48  ;;  %v1954_v1 = vld [vmem:[#allocation3 + $0x1b0] sm:$0xff] }
 0x248   : > { %v3263_v54 = vmul.f32 %v9990_v11, %v3262_v46  ;;  %v2940_v49 = vmul.f32 %v10041_v39, %v2939_v38  ;;  %vm3275_vm6 = vweird.f32 %v10049_v28  ;;  %v2282_v38 = vmul.f32 %v1954_v1, %v1954_v1  ;;  %v10136_v58 = vld [vmem:[#allocation3 + $0xb0] sm:$0xff] }
 0x249   : > { %7801 = vrsqrt.f32 %v10053_v19  ;;  %v3270_v60 = vmul.f32 %v10049_v28, %v3269_v62  ;;  %v2653_v50 = vsub.f32 %v2525_v25, %v2589_v27  ;;  %2353 = vadd.xlane.f32.xlu1 %v2352_v59  ;;  %2125 = vadd.xlane.f32.xlu2 %v2124_v43  ;;  %vm2945_vm8 = vweird.f32 %v10041_v39  ;;  %vm10125_vm9 = vmor %vm3274_vm4, %vm3275_vm6 }
 0x24a   : > { %v3267_v34 = vsel %vm3266_vm2, %v9990_v11, %v3263_v54  ;;  %v2941_v32 = vmul.f32 0.5, %v2940_v49  ;;  %v2621_v11 = vsub.f32 %v2493_v18, %v2557_v33  ;;  %2026 = vadd.xlane.f32.xlu0 %v2025_v47  ;;  %v2355_v47 = vsel %vm1964_vm3, %v2249_v30, 0.0  ;;  %vm10163_vm12 = vmor %vm2944_vm7, %vm2945_vm8 }
 0x24b   : > { %v3547_v12 = vmul.f32 %v3267_v34, %v2779_v22  ;;  %v3271_v23 = vmul.f32 0.5, %v3270_v60  ;;  %v2717_v57 = vmax.f32 %v2653_v50, 0.0  ;;  %v3649_v36 = vadd.f32 %v9817_v4, %v3581_v44 }
 0x24c   : > { %v2685_v24 = vmax.f32 %v2621_v11, 0.0  ;;  %v2420_v16 = vpop.xlane.xlu1 %2419  ;;  %v2942_v59 = vsub.f32 1.5, %v2941_v32  ;;  %vm2954_vm10 = vweird.f32 %v10053_v19  ;;  %v2454_v34 = vsel %vm1964_vm3, %v2282_v38, 0.0 }
 0x24d   : > { %v1997_v22 = vpop.xlane.xlu2 %1996  ;;  %v3615_v9 = vmul.f32 %v9789_v56, %v3547_v12  ;;  %v3272_v31 = vsub.f32 1.5, %v3271_v23  ;;  %v10094_v51 = vadd.f32 1e-06, %v2717_v57  ;;  %v2526_v52 = vmul.f32 %v2420_v16, %v9658_v41  ;;  %v8161_v16 = vld [vmem:[#allocation3 + $0x40] sm:$0xff] }
 0x24e   : > { %v2093_v40 = vpop.xlane.xlu0 %2092  ;;  %v10099_v35 = vadd.f32 1e-06, %v2685_v24  ;;  %v10106_v43 = vmul.f32 %v9658_v41, %v1997_v22  ;;  %v2943_v17 = vmul.f32 %v10041_v39, %v2942_v59  ;;  %v2127_v60 = vsel %vm1964_vm3, %v1954_v1, 0.0 }
 0x24f   : > { %v10097_v13 = vpop.eup %7801  ;;  %v10103_v37 = vmul.f32 %v9658_v41, %v2093_v40  ;;  %v3273_v46 = vmul.f32 %v10049_v28, %v3272_v31  ;;  %7803 = vrsqrt.f32 %v10094_v51  ;;  %v3683_v55 = vadd.f32 %v9817_v4, %v3615_v9  ;;  %7450 = vmatmul.msk.f32.gmra.mxu0 %vm1964_vm3, %v3649_v36 }
 0x250   : > { %v2949_v27 = vmul.f32 %v10097_v13, %v10053_v19  ;;  %7805 = vrsqrt.f32 %v10099_v35  ;;  %vm2955_vm11 = vweird.f32 %v10097_v13  ;;  %v2558_v62 = vmul.f32 %v10106_v43, %v10106_v43  ;;  %v1955_v19 = vld [vmem:[#allocation3 + $0x1b8] sm:$0xff] }
 0x251   : > { %v2590_v6 = vmul.f32 %v10103_v37, %v10103_v37  ;;  %2029 = vadd.xlane.f32.xlu1 %v2028_v20  ;;  %2356 = vadd.xlane.f32.xlu2 %v2355_v47  ;;  %v3277_v8 = vsel %vm10125_vm9, %v10049_v28, %v3273_v46  ;;  %v3582_v28 = vmul.f32 %v9789_v56, %v3514_v15  ;;  %v2031_v10 = vsel %vm1964_vm3, %v10136_v58, 0.0  ;;  %vm10186_vm13 = vmor %vm2954_vm10, %vm2955_vm11  ;;  %v10197_v47 = vld [vmem:[#allocation3 + $0x148] sm:$0xff] }
 0x252   : > { %v2950_v18 = vmul.f32 %v10097_v13, %v2949_v27  ;;  %2452 = vadd.xlane.f32.xlu0 %v2451_v3  ;;  %7484 = vmatmul.msk.f32.gmra.mxu3 %vm1964_vm3, %v3683_v55  ;;  %v3548_v33 = vmul.f32 %v3277_v8, %v2780_v45  ;;  %v2947_v24 = vsel %vm10163_vm12, %v10041_v39, %v2943_v17  ;;  %v10205_v27 = vld [vmem:[#allocation3 + $0x48] sm:$0xff]  ;;  %vm3284_vm14 = vweird.f32 %v10094_v51 }
 0x253   : > { %v2654_v7 = vsub.f32 %v2526_v52, %v2590_v6  ;;  %v2748_v22 = vsub.f32 %v8161_v16, %v9998_v61  ;;  %v3650_v59 = vadd.f32 %v9817_v4, %v3582_v28  ;;  %v2781_v1 = vsub.f32 %v10197_v47, %v10023_v0 }
 0x254   : > { %v2951_v54 = vmul.f32 0.5, %v2950_v18  ;;  %v2096_v26 = vpop.xlane.xlu1 %2095  ;;  %v3616_v57 = vmul.f32 %v9789_v56, %v3548_v33  ;;  %v2749_v55 = vsub.f32 %v10205_v27, %v10046_v21  ;;  %v2130_v2 = vsel %vm1964_vm3, %v1955_v19, 0.0 }
 0x255   : > { %v2718_v49 = vmax.f32 %v2654_v7, 0.0  ;;  %v2423_v30 = vpop.xlane.xlu2 %2422  ;;  %v10149_v50 = vpop.eup %7803  ;;  %v10152_v29 = vmul.f32 %v9658_v41, %v2096_v26  ;;  %vm2964_vm0 = vweird.f32 %v10099_v35  ;;  %v2283_v26 = vmul.f32 %v1955_v19, %v1955_v19 }
 0x256   : > { %v2952_v48 = vsub.f32 1.5, %v2951_v54  ;;  %v2324_v12 = vpop.xlane.xlu0 %2323  ;;  %v2527_v32 = vmul.f32 %v2423_v30, %v9658_v41  ;;  %v10157_v53 = vpop.eup %7805  ;;  %v3279_v11 = vmul.f32 %v10149_v50, %v10094_v51  ;;  %v3684_v46 = vadd.f32 %v9817_v4, %v3616_v57 }
 0x257   : > { %v10169_v44 = vadd.f32 1e-06, %v2718_v49  ;;  %v2494_v23 = vmul.f32 %v2324_v12, %v9658_v41  ;;  %v2959_v14 = vmul.f32 %v10157_v53, %v10099_v35  ;;  %v2591_v5 = vmul.f32 %v10152_v29, %v10152_v29  ;;  %7451 = vmatmul.msk.f32.gmra.mxu0 %vm1964_vm3, %v3650_v59 }
 0x258   : > { %v2953_v20 = vmul.f32 %v10097_v13, %v2952_v48  ;;  %v3280_v3 = vmul.f32 %v10149_v50, %v3279_v11  ;;  %vm3285_vm15 = vweird.f32 %v10149_v50  ;;  %v2250_v49 = vmul.f32 %v10136_v58, %v10136_v58  ;;  %v1923_v58 = vld [vmem:[#allocation3 + $0xb8] sm:$0xff] }
 0x259   : > { %7807 = vrsqrt.f32 %v10169_v44  ;;  %v2960_v61 = vmul.f32 %v10157_v53, %v2959_v14  ;;  %v2622_v31 = vsub.f32 %v2494_v23, %v2558_v62  ;;  %v2655_v40 = vsub.f32 %v2527_v32, %v2591_v5  ;;  %2455 = vadd.xlane.f32.xlu1 %v2454_v34  ;;  %2032 = vadd.xlane.f32.xlu2 %v2031_v10  ;;  %v8164_v32 = vld [vmem:[#allocation3 + $0x150] sm:$0xff]  ;;  %vm10247_vm2 = vmor %vm3284_vm14, %vm3285_vm15 }
 0x25a   : > { %v2957_v39 = vsel %vm10186_vm13, %v10097_v13, %v2953_v20  ;;  %v3281_v52 = vmul.f32 0.5, %v3280_v3  ;;  %2128 = vadd.xlane.f32.xlu0 %v2127_v60  ;;  %v3515_v13 = vmul.f32 %v2947_v24, %v2747_v63  ;;  %7485 = vmatmul.msk.f32.gmra.mxu3 %vm1964_vm3, %v3684_v46  ;;  %vm2965_vm1 = vweird.f32 %v10157_v53 }
 0x25b   : > { %v2961_v6 = vmul.f32 0.5, %v2960_v61  ;;  %v2686_v15 = vmax.f32 %v2622_v31, 0.0  ;;  %v2719_v38 = vmax.f32 %v2655_v40, 0.0  ;;  %v3516_v25 = vmul.f32 %v2957_v39, %v2748_v22  ;;  %vm10280_vm6 = vmor %vm2964_vm0, %vm2965_vm1 }
 0x25c   : > { %v3282_v18 = vsub.f32 1.5, %v3281_v52  ;;  %v2327_v36 = vpop.xlane.xlu1 %2326  ;;  %v3583_v8 = vmul.f32 %v9789_v56, %v3515_v13  ;;  %v2782_v10 = vsub.f32 %v8164_v32, %v10103_v37  ;;  %vm3294_vm4 = vweird.f32 %v10169_v44  ;;  %v10272_v52 = vld [vmem:[#allocation3 + $0x1c0] sm:$0xff] }
 0x25d   : > { %v2099_v17 = vpop.xlane.xlu2 %2098  ;;  %v10215_v42 = vadd.f32 1e-06, %v2686_v15  ;;  %v10217_v63 = vadd.f32 1e-06, %v2719_v38  ;;  %v2495_v62 = vmul.f32 %v2327_v36, %v9658_v41  ;;  %v2962_v30 = vsub.f32 1.5, %v2961_v6 }
 0x25e   : > { %v2000_v7 = vpop.xlane.xlu0 %1999  ;;  %v3283_v28 = vmul.f32 %v10149_v50, %v3282_v18  ;;  %v10236_v48 = vmul.f32 %v9658_v41, %v2099_v17  ;;  %v3584_v12 = vmul.f32 %v9789_v56, %v3516_v25  ;;  %v3651_v11 = vadd.f32 %v9817_v4, %v3583_v8 }
 0x25f   : > { %v10220_v54 = vpop.eup %7807  ;;  %v10224_v33 = vmul.f32 %v9658_v41, %v2000_v7  ;;  %7809 = vrsqrt.f32 %v10215_v42  ;;  %v2358_v20 = vsel %vm1964_vm3, %v2250_v49, 0.0  ;;  %v2457_v37 = vsel %vm1964_vm3, %v2283_v26, 0.0 }
 0x260   : > { %v3289_v34 = vmul.f32 %v10220_v54, %v10169_v44  ;;  %7811 = vrsqrt.f32 %v10217_v63  ;;  %v2963_v14 = vmul.f32 %v10157_v53, %v2962_v30  ;;  %7452 = vmatmul.msk.f32.gmra.mxu0 %vm1964_vm3, %v3651_v11  ;;  %v3287_v51 = vsel %vm10247_vm2, %v10149_v50, %v3283_v28  ;;  %v1924_v28 = vld [vmem:[#allocation3 + $0xc0] sm:$0xff]  ;;  %v10313_v30 = vld [vmem:[#allocation3 + $0x50] sm:$0xff] }
 0x261   : > { %v2559_v60 = vmul.f32 %v10224_v33, %v10224_v33  ;;  %2131 = vadd.xlane.f32.xlu1 %v2130_v2  ;;  %v2251_v24 = vmul.f32 %v1923_v58, %v1923_v58  ;;  %vm3295_vm5 = vweird.f32 %v10220_v54  ;;  %v2592_v22 = vmul.f32 %v10236_v48, %v10236_v48  ;;  %2458 = vadd.xlane.f32.xlu2 %v2457_v37 }
 0x262   : > { %v3290_v45 = vmul.f32 %v10220_v54, %v3289_v34  ;;  %2359 = vadd.xlane.f32.xlu0 %v2358_v20  ;;  %v3652_v3 = vadd.f32 %v9817_v4, %v3584_v12  ;;  %v3549_v50 = vmul.f32 %v3287_v51, %v2781_v1  ;;  %v2967_v25 = vsel %vm10280_vm6, %v10157_v53, %v2963_v14  ;;  %vm3296_vm7 = vmor %vm3294_vm4, %vm3295_vm5 }
 0x263   : > { %v2623_v57 = vsub.f32 %v2495_v62, %v2559_v60  ;;  %v2361_v47 = vsel %vm1964_vm3, %v2251_v24, 0.0  ;;  %v2034_v36 = vsel %vm1964_vm3, %v1923_v58, 0.0  ;;  %v2133_v17 = vsel %vm1964_vm3, %v10272_v52, 0.0 }
 0x264   : > { %v3291_v5 = vmul.f32 0.5, %v3290_v45  ;;  %v2003_v9 = vpop.xlane.xlu1 %2002  ;;  %v3617_v53 = vmul.f32 %v9789_v56, %v3549_v50  ;;  %v3517_v26 = vmul.f32 %v2967_v25, %v2749_v55  ;;  %v2750_v34 = vsub.f32 %v10313_v30, %v10106_v43 }
 0x265   : > { %v2687_v16 = vmax.f32 %v2623_v57, 0.0  ;;  %v2330_v59 = vpop.xlane.xlu2 %2329  ;;  %v10263_v39 = vpop.eup %7809  ;;  %v10266_v31 = vmul.f32 %v9658_v41, %v2003_v9  ;;  %v2037_v11 = vsel %vm1964_vm3, %v1924_v28, 0.0  ;;  %vm2974_vm10 = vweird.f32 %v10215_v42  ;;  %v8166_v9 = vld [vmem:[#allocation3 + $0x158] sm:$0xff] }
 0x266   : > { %v3292_v61 = vsub.f32 1.5, %v3291_v5  ;;  %v2426_v40 = vpop.xlane.xlu0 %2425  ;;  %v2496_v19 = vmul.f32 %v2330_v59, %v9658_v41  ;;  %v10274_v46 = vpop.eup %7811  ;;  %v2969_v6 = vmul.f32 %v10263_v39, %v10215_v42  ;;  %v3685_v12 = vadd.f32 %v9817_v4, %v3617_v53  ;;  %v8168_v59 = vld [vmem:[#allocation3 + $0x160] sm:$0xff] }
 0x267   : > { %v10286_v15 = vadd.f32 1e-06, %v2687_v16  ;;  %v2528_v0 = vmul.f32 %v2426_v40, %v9658_v41  ;;  %v3299_v38 = vmul.f32 %v10274_v46, %v10217_v63  ;;  %v2560_v35 = vmul.f32 %v10266_v31, %v10266_v31 }
 0x268   : > { %v3293_v1 = vmul.f32 %v10220_v54, %v3292_v61  ;;  %v2970_v18 = vmul.f32 %v10263_v39, %v2969_v6  ;;  %7453 = vmatmul.msk.f32.gmra.mxu0 %vm1964_vm3, %v3652_v3  ;;  %vm2975_vm8 = vweird.f32 %v10263_v39  ;;  %vm3305_vm9 = vweird.f32 %v10274_v46  ;;  %7486 = vmatmul.msk.f32.gmra.mxu3 %vm1964_vm3, %v3685_v12 }
 0x269   : > { %7813 = vrsqrt.f32 %v10286_v15  ;;  %v3300_v7 = vmul.f32 %v10274_v46, %v3299_v38  ;;  %v2656_v8 = vsub.f32 %v2528_v0, %v2592_v22  ;;  %2362 = vadd.xlane.f32.xlu1 %v2361_v47  ;;  %v2624_v49 = vsub.f32 %v2496_v19, %v2560_v35  ;;  %2134 = vadd.xlane.f32.xlu2 %v2133_v17  ;;  %vm10350_vm11 = vmor %vm2974_vm10, %vm2975_vm8 }
 0x26a   : > { %v3297_v2 = vsel %vm3296_vm7, %v10220_v54, %v3293_v1  ;;  %v2971_v44 = vmul.f32 0.5, %v2970_v18  ;;  %2035 = vadd.xlane.f32.xlu0 %v2034_v36  ;;  %v3585_v45 = vmul.f32 %v9789_v56, %v3517_v26  ;;  %v2783_v3 = vsub.f32 %v8166_v9, %v10152_v29  ;;  %v1957_v18 = vld [vmem:[#allocation3 + $0x1c8] sm:$0xff] }
 0x26b   : > { %v3550_v62 = vmul.f32 %v3297_v2, %v2782_v10  ;;  %v3301_v54 = vmul.f32 0.5, %v3300_v7  ;;  %v2720_v60 = vmax.f32 %v2656_v8, 0.0  ;;  %v2688_v21 = vmax.f32 %v2624_v49, 0.0 }
 0x26c   : > { %v2972_v58 = vsub.f32 1.5, %v2971_v44  ;;  %v2429_v27 = vpop.xlane.xlu1 %2428  ;;  %vm3304_vm12 = vweird.f32 %v10217_v63  ;;  %v3653_v61 = vadd.f32 %v9817_v4, %v3585_v45  ;;  %v2284_v19 = vmul.f32 %v10272_v52, %v10272_v52 }
 0x26d   : > { %v2006_v55 = vpop.xlane.xlu2 %2005  ;;  %v3302_v32 = vsub.f32 1.5, %v3301_v54  ;;  %v10321_v10 = vadd.f32 1e-06, %v2720_v60  ;;  %v10328_v57 = vadd.f32 1e-06, %v2688_v21  ;;  %v2529_v20 = vmul.f32 %v2429_v27, %v9658_v41  ;;  %vm10359_vm13 = vmor %vm3304_vm12, %vm3305_vm9  ;;  %v8167_v60 = vld [vmem:[#allocation3 + $0x58] sm:$0xff] }
 0x26e   : > { %v2102_v43 = vpop.xlane.xlu0 %2101  ;;  %v3618_v14 = vmul.f32 %v9789_v56, %v3550_v62  ;;  %v2973_v5 = vmul.f32 %v10263_v39, %v2972_v58  ;;  %v10345_v22 = vmul.f32 %v9658_v41, %v2006_v55  ;;  %v2252_v13 = vmul.f32 %v1924_v28, %v1924_v28 }
 0x26f   : > { %v10326_v23 = vpop.eup %7813  ;;  %v10332_v37 = vmul.f32 %v9658_v41, %v2102_v43  ;;  %v3303_v51 = vmul.f32 %v10274_v46, %v3302_v32  ;;  %7815 = vrsqrt.f32 %v10321_v10  ;;  %v2460_v52 = vsel %vm1964_vm3, %v2284_v19, 0.0 }
 0x270   : > { %v2979_v24 = vmul.f32 %v10326_v23, %v10286_v15  ;;  %7817 = vrsqrt.f32 %v10328_v57  ;;  %v3686_v50 = vadd.f32 %v9817_v4, %v3618_v14  ;;  %vm2985_vm14 = vweird.f32 %v10326_v23  ;;  %7454 = vmatmul.msk.f32.gmra.mxu0 %vm1964_vm3, %v3653_v61 }
 0x271   : > { %v2593_v16 = vmul.f32 %v10332_v37, %v10332_v37  ;;  %2038 = vadd.xlane.f32.xlu1 %v2037_v11  ;;  %v2977_v63 = vsel %vm10350_vm11, %v10263_v39, %v2973_v5  ;;  %v3307_v0 = vsel %vm10359_vm13, %v10274_v46, %v3303_v51  ;;  %v2561_v1 = vmul.f32 %v10345_v22, %v10345_v22 }
 0x272   : > { %v2980_v42 = vmul.f32 %v10326_v23, %v2979_v24  ;;  %v2364_v38 = vsel %vm1964_vm3, %v2252_v13, 0.0  ;;  %7487 = vmatmul.msk.f32.gmra.mxu3 %vm1964_vm3, %v3686_v50  ;;  %2461 = vadd.xlane.f32.xlu0 %v2460_v52  ;;  %v3518_v2 = vmul.f32 %v2977_v63, %v2750_v34  ;;  %v3551_v49 = vmul.f32 %v3307_v0, %v2783_v3  ;;  %v1958_v0 = vld [vmem:[#allocation3 + $0x1d0] sm:$0xff] }
 0x273   : > { %v2657_v29 = vsub.f32 %v2529_v20, %v2593_v16  ;;  %2365 = vadd.xlane.f32.xlu2 %v2364_v38  ;;  %v2285_v34 = vmul.f32 %v1957_v18, %v1957_v18  ;;  %vm2984_vm15 = vweird.f32 %v10286_v15  ;;  %v2751_v12 = vsub.f32 %v8167_v60, %v10224_v33  ;;  %v1925_v33 = vld [vmem:[#allocation3 + $0xc8] sm:$0xff] }
 0x274   : > { %v2981_v6 = vmul.f32 0.5, %v2980_v42  ;;  %v2105_v35 = vpop.xlane.xlu1 %2104  ;;  %vm10403_vm0 = vmor %vm2984_vm15, %vm2985_vm14  ;;  %v3586_v55 = vmul.f32 %v9789_v56, %v3518_v2  ;;  %v3619_v45 = vmul.f32 %v9789_v56, %v3551_v49  ;;  %v2136_v9 = vsel %vm1964_vm3, %v1957_v18, 0.0 }
 0x275   : > { %v2721_v47 = vmax.f32 %v2657_v29, 0.0  ;;  %v2432_v25 = vpop.xlane.xlu2 %2431  ;;  %v10378_v36 = vpop.eup %7815  ;;  %v10382_v39 = vmul.f32 %v9658_v41, %v2105_v35  ;;  %v2463_v5 = vsel %vm1964_vm3, %v2285_v34, 0.0  ;;  %v2784_v42 = vsub.f32 %v8168_v59, %v10236_v48 }
 0x276   : > { %v2982_v17 = vsub.f32 1.5, %v2981_v6  ;;  %v2333_v46 = vpop.xlane.xlu0 %2332  ;;  %v2530_v7 = vmul.f32 %v2432_v25, %v9658_v41  ;;  %v10385_v8 = vpop.eup %7817  ;;  %v3309_v53 = vmul.f32 %v10378_v36, %v10321_v10  ;;  %v3654_v14 = vadd.f32 %v9817_v4, %v3586_v55  ;;  %v10454_v25 = vld [vmem:[%s14742_s4] ss:$0 sm:$0xff] }
 0x277   : > { %v10389_v62 = vadd.f32 1e-06, %v2721_v47  ;;  %v2497_v44 = vmul.f32 %v2333_v46, %v9658_v41  ;;  %v2989_v28 = vmul.f32 %v10385_v8, %v10328_v57  ;;  %v2594_v30 = vmul.f32 %v10382_v39, %v10382_v39 }
 0x278   : > { %v2983_v26 = vmul.f32 %v10326_v23, %v2982_v17  ;;  %v3310_v54 = vmul.f32 %v10378_v36, %v3309_v53  ;;  %v3687_v16 = vadd.f32 %v9817_v4, %v3619_v45  ;;  %7455 = vmatmul.msk.f32.gmra.mxu0 %vm1964_vm3, %v3654_v14  ;;  %v2040_v40 = vsel %vm1964_vm3, %v1925_v33, 0.0 }
 0x279   : > { %7819 = vrsqrt.f32 %v10389_v62  ;;  %v2990_v21 = vmul.f32 %v10385_v8, %v2989_v28  ;;  %v2625_v27 = vsub.f32 %v2497_v44, %v2561_v1  ;;  %v2658_v43 = vsub.f32 %v2530_v7, %v2594_v30  ;;  %2464 = vadd.xlane.f32.xlu1 %v2463_v5  ;;  %v8171_v5 = vld [vmem:[#allocation3 + $0x60] sm:$0xff] }
 0x27a   : > { %v2987_v15 = vsel %vm10403_vm0, %v10326_v23, %v2983_v26  ;;  %v3311_v32 = vmul.f32 0.5, %v3310_v54  ;;  %2137 = vadd.xlane.f32.xlu0 %v2136_v9  ;;  %7488 = vmatmul.msk.f32.gmra.mxu3 %vm1964_vm3, %v3687_v16  ;;  %vm3315_vm1 = vweird.f32 %v10378_v36  ;;  %vm3314_vm2 = vweird.f32 %v10321_v10  ;;  %v10467_v26 = vld [vmem:[%s14743_s5] ss:$0 sm:$0xff]  ;;  %v1926_v16 = vld [vmem:[#allocation3 + $0xd0] sm:$0xff]  ;;  %v8172_v9 = vld [vmem:[#allocation3 + $0x168] sm:$0xff] }
 0x27b   : > { %v2991_v11 = vmul.f32 0.5, %v2990_v21  ;;  %v2689_v20 = vmax.f32 %v2625_v27, 0.0  ;;  %v2722_v24 = vmax.f32 %v2658_v43, 0.0  ;;  %v3519_v4 = vmul.f32 %v2987_v15, %v2751_v12  ;;  %2041 = vadd.xlane.f32.xlu2 %v2040_v40  ;;  %vm10447_vm6 = vmor %vm3314_vm2, %vm3315_vm1  ;;  %v1959_v40 = vld [vmem:[#allocation3 + $0x1d8] sm:$0xff] }
 0x27c   : > { %v3312_v51 = vsub.f32 1.5, %v3311_v32  ;;  %v2336_v3 = vpop.xlane.xlu1 %2335  ;;  %vm2994_vm4 = vweird.f32 %v10328_v57  ;;  %vm2995_vm5 = vweird.f32 %v10385_v8  ;;  %v2139_v17 = vsel %vm1964_vm3, %v1958_v0, 0.0 }
 0x27d   : > { %v2108_v23 = vpop.xlane.xlu2 %2107  ;;  %v2992_v56 = vsub.f32 1.5, %v2991_v11  ;;  %v10418_v61 = vadd.f32 1e-06, %v2689_v20  ;;  %v10424_v19 = vadd.f32 1e-06, %v2722_v24  ;;  %v2498_v13 = vmul.f32 %v2336_v3, %v9658_v41  ;;  %vm10483_vm8 = vmor %vm2994_vm4, %vm2995_vm5 }
 0x27e   : > { %v2009_v29 = vpop.xlane.xlu0 %2008  ;;  %v3313_v6 = vmul.f32 %v10378_v36, %v3312_v51  ;;  %v10441_v1 = vmul.f32 %v9658_v41, %v2108_v23  ;;  %v3587_v18 = vmul.f32 %v10454_v25, %v3519_v4  ;;  %v2253_v46 = vmul.f32 %v1925_v33, %v1925_v33 }
 0x27f   : > { %v10422_v50 = vpop.eup %7819  ;;  %v10429_v48 = vmul.f32 %v9658_v41, %v2009_v29  ;;  %7821 = vrsqrt.f32 %v10418_v61  ;;  %v2993_v52 = vmul.f32 %v10385_v8, %v2992_v56  ;;  %v2286_v7 = vmul.f32 %v1958_v0, %v1958_v0 }
 0x280   : > { %v3319_v63 = vmul.f32 %v10422_v50, %v10389_v62  ;;  %7823 = vrsqrt.f32 %v10424_v19  ;;  %vm3325_vm7 = vweird.f32 %v10422_v50  ;;  %v3317_v53 = vsel %vm10447_vm6, %v10378_v36, %v3313_v6 }
 0x281   : > { %v2562_v47 = vmul.f32 %v10429_v48, %v10429_v48  ;;  %v2595_v49 = vmul.f32 %v10441_v1, %v10441_v1  ;;  %v3655_v28 = vadd.f32 %v10467_v26, %v3587_v18  ;;  %2140 = vadd.xlane.f32.xlu1 %v2139_v17  ;;  %v2367_v30 = vsel %vm1964_vm3, %v2253_v46, 0.0 }
 0x282   : > { %v3320_v38 = vmul.f32 %v10422_v50, %v3319_v63  ;;  %2368 = vadd.xlane.f32.xlu0 %v2367_v30  ;;  %v2466_v36 = vsel %vm1964_vm3, %v2286_v7, 0.0  ;;  %v3552_v27 = vmul.f32 %v3317_v53, %v2784_v42  ;;  %v2997_v14 = vsel %vm10483_vm8, %v10385_v8, %v2993_v52 }
 0x283   : > { %v2626_v10 = vsub.f32 %v2498_v13, %v2562_v47  ;;  %7456 = vmatmul.msk.f32.gmra.mxu0 %vm1964_vm3, %v3655_v28  ;;  %2467 = vadd.xlane.f32.xlu2 %v2466_v36  ;;  %v2752_v51 = vsub.f32 %v8171_v5, %v10266_v31  ;;  %vm3324_vm9 = vweird.f32 %v10389_v62  ;;  %v2785_v3 = vsub.f32 %v8172_v9, %v10332_v37 }
 0x284   : > { %v3321_v2 = vmul.f32 0.5, %v3320_v38  ;;  %v2012_v34 = vpop.xlane.xlu1 %2011  ;;  %vm10509_vm10 = vmor %vm3324_vm9, %vm3325_vm7  ;;  %v3620_v59 = vmul.f32 %v10454_v25, %v3552_v27  ;;  %v2254_v13 = vmul.f32 %v1926_v16, %v1926_v16  ;;  %v2043_v47 = vsel %vm1964_vm3, %v1926_v16, 0.0 }
 0x285   : > { %v2690_v44 = vmax.f32 %v2626_v10, 0.0  ;;  %v2339_v54 = vpop.xlane.xlu2 %2338  ;;  %v10471_v60 = vpop.eup %7821  ;;  %v10475_v58 = vmul.f32 %v9658_v41, %v2012_v34  ;;  %v3520_v56 = vmul.f32 %v2997_v14, %v2752_v51  ;;  %v2142_v18 = vsel %vm1964_vm3, %v1959_v40, 0.0 }
 0x286   : > { %v3322_v12 = vsub.f32 1.5, %v3321_v2  ;;  %v2435_v21 = vpop.xlane.xlu0 %2434  ;;  %v10477_v55 = vpop.eup %7823  ;;  %v2999_v32 = vmul.f32 %v10471_v60, %v10418_v61  ;;  %v2499_v33 = vmul.f32 %v2339_v54, %v9658_v41  ;;  %v3688_v4 = vadd.f32 %v10467_v26, %v3620_v59  ;;  %v8173_v54 = vld [vmem:[#allocation3 + $0x68] sm:$0xff] }
 0x287   : > { %v10489_v43 = vadd.f32 1e-06, %v2690_v44  ;;  %v2531_v45 = vmul.f32 %v2435_v21, %v9658_v41  ;;  %v3329_v57 = vmul.f32 %v10477_v55, %v10424_v19  ;;  %v2563_v20 = vmul.f32 %v10475_v58, %v10475_v58 }
 0x288   : > { %v3323_v11 = vmul.f32 %v10422_v50, %v3322_v12  ;;  %v3000_v24 = vmul.f32 %v10471_v60, %v2999_v32  ;;  %v3588_v0 = vmul.f32 %v10454_v25, %v3520_v56  ;;  %7489 = vmatmul.msk.f32.gmra.mxu3 %vm1964_vm3, %v3688_v4  ;;  %v2370_v10 = vsel %vm1964_vm3, %v2254_v13, 0.0 }
 0x289   : > { %7825 = vrsqrt.f32 %v10489_v43  ;;  %v2659_v8 = vsub.f32 %v2531_v45, %v2595_v49  ;;  %v2627_v42 = vsub.f32 %v2499_v33, %v2563_v20  ;;  %v3330_v29 = vmul.f32 %v10477_v55, %v3329_v57  ;;  %2371 = vadd.xlane.f32.xlu1 %v2370_v10  ;;  %v1927_v49 = vld [vmem:[#allocation3 + $0xd8] sm:$0xff] }
 0x28a   : > { %v3327_v31 = vsel %vm10509_vm10, %v10422_v50, %v3323_v11  ;;  %v3001_v62 = vmul.f32 0.5, %v3000_v24  ;;  %2044 = vadd.xlane.f32.xlu0 %v2043_v47  ;;  %v3656_v7 = vadd.f32 %v10467_v26, %v3588_v0  ;;  %vm3005_vm11 = vweird.f32 %v10471_v60 }
 0x28b   : > { %v2723_v37 = vmax.f32 %v2659_v8, 0.0  ;;  %v2691_v63 = vmax.f32 %v2627_v42, 0.0  ;;  %v3553_v35 = vmul.f32 %v3327_v31, %v2785_v3  ;;  %2143 = vadd.xlane.f32.xlu2 %v2142_v18  ;;  %v3331_v53 = vmul.f32 0.5, %v3330_v29  ;;  %v8175_v18 = vld [vmem:[#allocation3 + $0x70] sm:$0xff] }
 0x28c   : > { %v3002_v6 = vsub.f32 1.5, %v3001_v62  ;;  %v2438_v52 = vpop.xlane.xlu1 %2437  ;;  %7457 = vmatmul.msk.f32.gmra.mxu0 %vm1964_vm3, %v3656_v7  ;;  %v2753_v12 = vsub.f32 %v8173_v54, %v10345_v22  ;;  %vm3004_vm12 = vweird.f32 %v10418_v61  ;;  %v2287_v32 = vmul.f32 %v1959_v40, %v1959_v40 }
 0x28d   : > { %v2015_v38 = vpop.xlane.xlu2 %2014  ;;  %v10521_v50 = vadd.f32 1e-06, %v2723_v37  ;;  %v10528_v2 = vadd.f32 1e-06, %v2691_v63  ;;  %v2532_v30 = vmul.f32 %v2438_v52, %v9658_v41  ;;  %v3621_v27 = vmul.f32 %v10454_v25, %v3553_v35  ;;  %vm10553_vm13 = vmor %vm3004_vm12, %vm3005_vm11  ;;  %v1960_v52 = vld [vmem:[#allocation3 + $0x1e0] sm:$0xff]  ;;  %v8174_v35 = vld [vmem:[#allocation3 + $0x170] sm:$0xff] }
 0x28e   : > { %v2111_v17 = vpop.xlane.xlu0 %2110  ;;  %v3003_v28 = vmul.f32 %v10471_v60, %v3002_v6  ;;  %v10545_v21 = vmul.f32 %v9658_v41, %v2015_v38  ;;  %v2255_v45 = vmul.f32 %v1927_v49, %v1927_v49  ;;  %v3332_v22 = vsub.f32 1.5, %v3331_v53 }
 0x28f   : > { %v10526_v46 = vpop.eup %7825  ;;  %7827 = vrsqrt.f32 %v10521_v50  ;;  %v10540_v34 = vmul.f32 %v9658_v41, %v2111_v17  ;;  %v3689_v57 = vadd.f32 %v10467_v26, %v3621_v27  ;;  %v2046_v20 = vsel %vm1964_vm3, %v1927_v49, 0.0 }
 0x290   : > { %v3009_v44 = vmul.f32 %v10526_v46, %v10489_v43  ;;  %7829 = vrsqrt.f32 %v10528_v2  ;;  %v2469_v61 = vsel %vm1964_vm3, %v2287_v32, 0.0  ;;  %v2373_v5 = vsel %vm1964_vm3, %v2255_v45, 0.0 }
 0x291   : > { %v2596_v15 = vmul.f32 %v10540_v34, %v10540_v34  ;;  %v3007_v24 = vsel %vm10553_vm13, %v10471_v60, %v3003_v28  ;;  %vm3015_vm14 = vweird.f32 %v10526_v46  ;;  %v2564_v3 = vmul.f32 %v10545_v21, %v10545_v21  ;;  %7490 = vmatmul.msk.f32.gmra.mxu3 %vm1964_vm3, %v3689_v57  ;;  %2047 = vadd.xlane.f32.xlu1 %v2046_v20  ;;  %v1961_v57 = vld [vmem:[#allocation3 + $0x1e8] sm:$0xff]  ;;  %v8176_v20 = vld [vmem:[#allocation3 + $0x178] sm:$0xff] }
 0x292   : > { %v3010_v36 = vmul.f32 %v10526_v46, %v3009_v44  ;;  %2470 = vadd.xlane.f32.xlu0 %v2469_v61  ;;  %v3521_v8 = vmul.f32 %v3007_v24, %v2753_v12  ;;  %vm3335_vm15 = vweird.f32 %v10477_v55  ;;  %v3333_v37 = vmul.f32 %v10477_v55, %v3332_v22 }
 0x293   : > { %v2660_v14 = vsub.f32 %v2532_v30, %v2596_v15  ;;  %2374 = vadd.xlane.f32.xlu2 %v2373_v5  ;;  %vm3014_vm0 = vweird.f32 %v10489_v43  ;;  %vm3334_vm1 = vweird.f32 %v10424_v19  ;;  %v2786_v10 = vsub.f32 %v8174_v35, %v10382_v39 }
 0x294   : > { %v3011_v11 = vmul.f32 0.5, %v3010_v36  ;;  %v2114_v51 = vpop.xlane.xlu1 %2113  ;;  %vm10590_vm2 = vmor %vm3014_vm0, %vm3015_vm14  ;;  %v3589_v0 = vmul.f32 %v10454_v25, %v3521_v8  ;;  %v2754_v17 = vsub.f32 %v8175_v18, %v10429_v48  ;;  %v2288_v28 = vmul.f32 %v1960_v52, %v1960_v52 }
 0x295   : > { %v10564_v16 = vpop.eup %7827  ;;  %v2724_v62 = vmax.f32 %v2660_v14, 0.0  ;;  %v10575_v60 = vmul.f32 %v9658_v41, %v2114_v51  ;;  %v2441_v56 = vpop.xlane.xlu2 %2440  ;;  %vm3336_vm4 = vmor %vm3334_vm1, %vm3335_vm15  ;;  %v2145_v30 = vsel %vm1964_vm3, %v1960_v52, 0.0  ;;  %v2787_v14 = vsub.f32 %v8176_v20, %v10441_v1 }
 0x296   : > { %v3012_v9 = vsub.f32 1.5, %v3011_v11  ;;  %v2342_v23 = vpop.xlane.xlu0 %2341  ;;  %v10570_v59 = vpop.eup %7829  ;;  %v3339_v31 = vmul.f32 %v10564_v16, %v10521_v50  ;;  %v2533_v47 = vmul.f32 %v2441_v56, %v9658_v41  ;;  %v3657_v53 = vadd.f32 %v10467_v26, %v3589_v0 }
 0x297   : > { %v2500_v42 = vmul.f32 %v2342_v23, %v9658_v41  ;;  %v3019_v29 = vmul.f32 %v10570_v59, %v10528_v2  ;;  %v10585_v13 = vadd.f32 1e-06, %v2724_v62  ;;  %v2597_v19 = vmul.f32 %v10575_v60, %v10575_v60 }
 0x298   : > { %v3013_v40 = vmul.f32 %v10526_v46, %v3012_v9  ;;  %v3340_v4 = vmul.f32 %v10564_v16, %v3339_v31  ;;  %v3337_v49 = vsel %vm3336_vm4, %v10477_v55, %v3333_v37  ;;  %7458 = vmatmul.msk.f32.gmra.mxu0 %vm1964_vm3, %v3657_v53  ;;  %v2472_v48 = vsel %vm1964_vm3, %v2288_v28, 0.0 }
 0x299   : > { %v2628_v63 = vsub.f32 %v2500_v42, %v2564_v3  ;;  %7831 = vrsqrt.f32 %v10585_v13  ;;  %v3020_v7 = vmul.f32 %v10570_v59, %v3019_v29  ;;  %v3554_v39 = vmul.f32 %v3337_v49, %v2786_v10  ;;  %2473 = vadd.xlane.f32.xlu1 %v2472_v48  ;;  %v8178_v49 = vld [vmem:[#allocation3 + $0x180] sm:$0xff] }
 0x29a   : > { %v3017_v43 = vsel %vm10590_vm2, %v10526_v46, %v3013_v40  ;;  %v3341_v38 = vmul.f32 0.5, %v3340_v4  ;;  %v1928_v46 = vld [vmem:[#allocation3 + $0xe0] sm:$0xff]  ;;  %2146 = vadd.xlane.f32.xlu0 %v2145_v30  ;;  %v2661_v36 = vsub.f32 %v2533_v47, %v2597_v19  ;;  %vm3345_vm5 = vweird.f32 %v10564_v16  ;;  %v8177_v19 = vld [vmem:[#allocation3 + $0x78] sm:$0xff]  ;;  %v1962_v30 = vld [vmem:[#allocation3 + $0x1f0] sm:$0xff] }
 0x29b   : > { %v3522_v54 = vmul.f32 %v3017_v43, %v2754_v17  ;;  %v2692_v12 = vmax.f32 %v2628_v63, 0.0  ;;  %v2049_v27 = vsel %vm1964_vm3, %v1928_v46, 0.0  ;;  %v3021_v15 = vmul.f32 0.5, %v3020_v7 }
 0x29c   : > { %v3342_v44 = vsub.f32 1.5, %v3341_v38  ;;  %2050 = vadd.xlane.f32.xlu2 %v2049_v27  ;;  %v3622_v45 = vmul.f32 %v10454_v25, %v3554_v39  ;;  %vm3344_vm6 = vweird.f32 %v10521_v50  ;;  %v2725_v61 = vmax.f32 %v2661_v36, 0.0  ;;  %v2345_v4 = vpop.xlane.xlu1 %2344  ;;  %v1929_v38 = vld [vmem:[#allocation3 + $0xe8] sm:$0xff] }
 0x29d   : > { %v10620_v22 = vadd.f32 1e-06, %v2692_v12  ;;  %v3590_v11 = vmul.f32 %v10454_v25, %v3522_v54  ;;  %vm3346_vm7 = vmor %vm3344_vm6, %vm3345_vm5  ;;  %v3022_v51 = vsub.f32 1.5, %v3021_v15  ;;  %v2256_v3 = vmul.f32 %v1928_v46, %v1928_v46  ;;  %v1930_v15 = vld [vmem:[#allocation3 + $0xf0] sm:$0xff]  ;;  %v2117_v20 = vpop.xlane.xlu2 %2116 }
 0x29e   : > { %v3343_v55 = vmul.f32 %v10564_v16, %v3342_v44  ;;  %v3690_v5 = vadd.f32 %v10467_v26, %v3622_v45  ;;  %v2018_v23 = vpop.xlane.xlu0 %2017  ;;  %v2148_v8 = vsel %vm1964_vm3, %v1961_v57, 0.0  ;;  %v2289_v31 = vmul.f32 %v1961_v57, %v1961_v57 }
 0x29f   : > { %v10613_v32 = vpop.eup %7831  ;;  %v3658_v9 = vadd.f32 %v10467_v26, %v3590_v11  ;;  %7833 = vrsqrt.f32 %v10620_v22  ;;  %v2376_v50 = vsel %vm1964_vm3, %v2256_v3, 0.0  ;;  %v10634_v56 = vadd.f32 1e-06, %v2725_v61 }
 0x2a0   : > { %v3349_v33 = vmul.f32 %v10613_v32, %v10585_v13  ;;  %7491 = vmatmul.msk.f32.gmra.mxu3 %vm1964_vm3, %v3690_v5  ;;  %v3347_v1 = vsel %vm3346_vm7, %v10564_v16, %v3343_v55  ;;  %v2475_v40 = vsel %vm1964_vm3, %v2289_v31, 0.0  ;;  %v3023_v29 = vmul.f32 %v10570_v59, %v3022_v51  ;;  %v10681_v55 = vld [vmem:[%s14745_s7] ss:$0 sm:$0xff] }
 0x2a1   : > { %7459 = vmatmul.msk.f32.gmra.mxu0 %vm1964_vm3, %v3658_v9  ;;  %v3555_v42 = vmul.f32 %v3347_v1, %v2787_v14  ;;  %vm3025_vm8 = vweird.f32 %v10570_v59  ;;  %v10640_v16 = vmul.f32 %v9658_v41, %v2018_v23  ;;  %2149 = vadd.xlane.f32.xlu1 %v2148_v8  ;;  %vm3024_vm9 = vweird.f32 %v10528_v2 }
 0x2a2   : > { %v3350_v24 = vmul.f32 %v10613_v32, %v3349_v33  ;;  %2377 = vadd.xlane.f32.xlu0 %v2376_v50  ;;  %vm10644_vm10 = vmor %vm3024_vm9, %vm3025_vm8  ;;  %7835 = vrsqrt.f32 %v10634_v56  ;;  %v2501_v0 = vmul.f32 %v2345_v4, %v9658_v41  ;;  %vm3355_vm11 = vweird.f32 %v10613_v32 }
 0x2a3   : > { %v3623_v6 = vmul.f32 %v10454_v25, %v3555_v42  ;;  %v2565_v2 = vmul.f32 %v10640_v16, %v10640_v16  ;;  %v3027_v43 = vsel %vm10644_vm10, %v10570_v59, %v3023_v29  ;;  %v2755_v35 = vsub.f32 %v8177_v19, %v10475_v58  ;;  %v8179_v19 = vld [vmem:[#allocation3 + $0x80] sm:$0xff] }
 0x2a4   : > { %v3351_v62 = vmul.f32 0.5, %v3350_v24  ;;  %2476 = vadd.xlane.f32.xlu2 %v2475_v40  ;;  %vm3354_vm12 = vweird.f32 %v10585_v13  ;;  %v3922_v17 = vpop.f32.mrf.mxu0  ;;  %v2257_v53 = vmul.f32 %v1929_v38, %v1929_v38  ;;  %v2788_v58 = vsub.f32 %v8178_v49, %v10540_v34  ;;  %v2021_v42 = vpop.xlane.xlu1 %2020 }
 0x2a5   : > { %v10650_v47 = vpop.eup %7833  ;;  %v3691_v10 = vadd.f32 %v10467_v26, %v3623_v6  ;;  %vm3356_vm13 = vmor %vm3354_vm12, %vm3355_vm11  ;;  %v3523_v7 = vmul.f32 %v3027_v43, %v2755_v35  ;;  %v2629_v59 = vsub.f32 %v2501_v0, %v2565_v2  ;;  %v2052_v36 = vsel %vm1964_vm3, %v1929_v38, 0.0  ;;  %v2348_v43 = vpop.xlane.xlu2 %2347 }
 0x2a6   : > { %v3352_v37 = vsub.f32 1.5, %v3351_v62  ;;  %v3029_v18 = vmul.f32 %v10650_v47, %v10620_v22  ;;  %v2379_v13 = vsel %vm1964_vm3, %v2257_v53, 0.0  ;;  %v2151_v27 = vsel %vm1964_vm3, %v1962_v30, 0.0  ;;  %v2444_v24 = vpop.xlane.xlu0 %2443 }
 0x2a7   : > { %v3591_v28 = vmul.f32 %v10454_v25, %v3523_v7  ;;  %v2693_v48 = vmax.f32 %v2629_v59, 0.0  ;;  %v2055_v33 = vsel %vm1964_vm3, %v1930_v15, 0.0  ;;  %v10689_v61 = vmul.f32 %v9658_v41, %v2117_v20  ;;  %v1963_v59 = vld [vmem:[#allocation3 + $0x1f8] sm:$0xff] }
 0x2a8   : > { %v3353_v52 = vmul.f32 %v10613_v32, %v3352_v37  ;;  %7492 = vmatmul.msk.f32.gmra.mxu3 %vm1964_vm3, %v3691_v10  ;;  %v10666_v44 = vpop.eup %7835  ;;  %v3030_v12 = vmul.f32 %v10650_v47, %v3029_v18  ;;  %v10692_v51 = vadd.f32 %v10681_v55, %v3922_v17  ;;  %v2290_v23 = vmul.f32 %v1962_v30, %v1962_v30 }
 0x2a9   : > { %2380 = vadd.xlane.f32.xlu1 %v2379_v13  ;;  %v3659_v39 = vadd.f32 %v10467_v26, %v3591_v28  ;;  %v3359_v34 = vmul.f32 %v10666_v44, %v10634_v56  ;;  %v10685_v11 = vadd.f32 1e-06, %v2693_v48  ;;  %v2598_v31 = vmul.f32 %v10689_v61, %v10689_v61  ;;  %v8180_v13 = vld [vmem:[#allocation3 + $0x188] sm:$0xff] }
 0x2aa   : > { %v3357_v46 = vsel %vm3356_vm13, %v10613_v32, %v3353_v52  ;;  %2053 = vadd.xlane.f32.xlu0 %v2052_v36  ;;  %v3031_v32 = vmul.f32 0.5, %v3030_v12  ;;  %v2534_v1 = vmul.f32 %v2444_v24, %v9658_v41  ;;  %vm3035_vm14 = vweird.f32 %v10650_v47 }
 0x2ab   : > { %v3556_v54 = vmul.f32 %v3357_v46, %v2788_v58  ;;  %7460 = vmatmul.msk.f32.gmra.mxu0 %vm1964_vm3, %v3659_v39  ;;  %v3360_v57 = vmul.f32 %v10666_v44, %v3359_v34  ;;  %7837 = vrsqrt.f32 %v10685_v11  ;;  %v10706_v50 = vmul.f32 0.70710677, %v10692_v51 }
 0x2ac   : > { %2152 = vadd.xlane.f32.xlu2 %v2151_v27  ;;  %v3925_v14 = vpop.f32.mrf.mxu0  ;;  %v3032_v5 = vsub.f32 1.5, %v3031_v32  ;;  %v2478_v40 = vsel %vm1964_vm3, %v2290_v23, 0.0  ;;  %vm3034_vm15 = vweird.f32 %v10620_v22  ;;  %v2258_v4 = vmul.f32 %v1930_v15, %v1930_v15 }
 0x2ad   : > { %v3624_v45 = vmul.f32 %v10454_v25, %v3556_v54  ;;  %v10697_v3 = vadd.f32 %v10681_v55, %v3925_v14  ;;  %v3361_v8 = vmul.f32 0.5, %v3360_v57  ;;  %vm10715_vm0 = vmor %vm3034_vm15, %vm3035_vm14  ;;  %v10720_v0 = vmul.f32 %v9658_v41, %v2021_v42 }
 0x2ae   : > { %v3033_v62 = vmul.f32 %v10650_v47, %v3032_v5  ;;  %v2662_v52 = vsub.f32 %v2534_v1, %v2598_v31  ;;  %v10723_v2 = vand.u32 2147483647, %v10706_v50  ;;  %v2382_v38 = vsel %vm1964_vm3, %v2258_v4, 0.0  ;;  %v2120_v14 = vpop.xlane.xlu0 %2119 }
 0x2af   : > { %v3692_v9 = vadd.f32 %v10467_v26, %v3624_v45  ;;  %v10710_v29 = vmul.f32 0.70710677, %v10697_v3  ;;  %v3362_v37 = vsub.f32 1.5, %v3361_v8  ;;  %v2756_v35 = vsub.f32 %v8179_v19, %v10545_v21 }
 0x2b0   : > { %v3037_v22 = vsel %vm10715_vm0, %v10650_v47, %v3033_v62  ;;  %vm3365_vm1 = vweird.f32 %v10666_v44  ;;  %v2566_v7 = vmul.f32 %v10720_v0, %v10720_v0  ;;  %v2726_v53 = vmax.f32 %v2662_v52, 0.0 }
 0x2b1   : > { %2056 = vadd.xlane.f32.xlu1 %v2055_v33  ;;  %7493 = vmatmul.msk.f32.gmra.mxu3 %vm1964_vm3, %v3692_v9  ;;  %15135 = vst [vmem:[#allocation35_spill] sm:$0xff] %v10710_v29  ;;  %v10713_v6 = vpop.eup %7837  ;;  %v10731_v10 = vand.u32 2147483647, %v10710_v29  ;;  %v3363_v18 = vmul.f32 %v10666_v44, %v3362_v37  ;;  %v2502_v47 = vmul.f32 %v2348_v43, %v9658_v41  ;;  %vm3364_vm2 = vweird.f32 %v10634_v56 }
 0x2b2   : > { %2479 = vadd.xlane.f32.xlu0 %v2478_v40  ;;  %v3039_v17 = vmul.f32 %v10713_v6, %v10685_v11  ;;  %v3524_v46 = vmul.f32 %v3037_v22, %v2756_v35  ;;  %v4306_v21 = vmul.f32 0.5, %v10723_v2  ;;  %vm3366_vm4 = vmor %vm3364_vm2, %vm3365_vm1  ;;  %v2789_v30 = vsub.f32 %v8180_v13, %v10575_v60  ;;  %v2447_v40 = vpop.xlane.xlu1 %2446  ;;  %v1931_v13 = vld [vmem:[#allocation3 + $0xf8] sm:$0xff] }
 0x2b3   : > { %v4307_v49 = vmul.f32 0.5, %v10731_v10  ;;  %v3367_v12 = vsel %vm3366_vm4, %v10666_v44, %v3363_v18  ;;  %v2154_v39 = vsel %vm1964_vm3, %v1963_v59, 0.0  ;;  %v10748_v36 = vadd.f32 1e-06, %v2726_v53 }
 0x2b4   : > { %2383 = vadd.xlane.f32.xlu2 %v2382_v38  ;;  %v3928_v58 = vpop.f32.mrf.mxu0  ;;  %v3592_v28 = vmul.f32 %v10454_v25, %v3524_v46  ;;  %v3040_v54 = vmul.f32 %v10713_v6, %v3039_v17  ;;  %v2630_v56 = vsub.f32 %v2502_v47, %v2566_v7  ;;  %v4370_v27 = vadd.f32 1.0, %v4306_v21  ;;  %v8181_v47 = vld [vmem:[#allocation3 + $0x88] sm:$0xff] }
 0x2b5   : > { %v10752_v15 = vadd.f32 %v10681_v55, %v3928_v58  ;;  %v3557_v34 = vmul.f32 %v3367_v12, %v2789_v30  ;;  %v4371_v32 = vadd.f32 1.0, %v4307_v49  ;;  %7839 = vrsqrt.f32 %v10748_v36 }
 0x2b6   : > { %v3660_v48 = vadd.f32 %v10467_v26, %v3592_v28  ;;  %v3041_v60 = vmul.f32 0.5, %v3040_v54  ;;  %v2694_v33 = vmax.f32 %v2630_v56, 0.0  ;;  %7841 = vrcp.f32 %v4370_v27 }
 0x2b7   : > { %v3625_v45 = vmul.f32 %v10454_v25, %v3557_v34  ;;  %v10758_v57 = vmul.f32 0.70710677, %v10752_v15  ;;  %7843 = vrcp.f32 %v4371_v32  ;;  %v10768_v23 = vmul.f32 %v9658_v41, %v2120_v14 }
 0x2b8   : > { %7461 = vmatmul.msk.f32.gmra.mxu0 %vm1964_vm3, %v3660_v48  ;;  %v3042_v24 = vsub.f32 1.5, %v3041_v60  ;;  %v10765_v9 = vadd.f32 1e-06, %v2694_v33  ;;  %vm3045_vm5 = vweird.f32 %v10713_v6  ;;  %vm3044_vm6 = vweird.f32 %v10685_v11 }
 0x2b9   : > { %15138 = vst [vmem:[#allocation36_spill] sm:$0xff] %v10758_v57  ;;  %v3693_v20 = vadd.f32 %v10467_v26, %v3625_v45  ;;  %v10771_v8 = vand.u32 2147483647, %v10758_v57  ;;  %v2535_v4 = vmul.f32 %v2447_v40, %v9658_v41  ;;  %v2291_v52 = vmul.f32 %v1963_v59, %v1963_v59  ;;  %vm10795_vm7 = vmor %vm3044_vm6, %vm3045_vm5 }
 0x2ba   : > { %2155 = vadd.xlane.f32.xlu0 %v2154_v39  ;;  %v3043_v42 = vmul.f32 %v10713_v6, %v3042_v24  ;;  %7845 = vrsqrt.f32 %v10765_v9  ;;  %v2599_v38 = vmul.f32 %v10768_v23, %v10768_v23  ;;  %v2757_v46 = vsub.f32 %v8181_v47, %v10640_v16  ;;  %v2351_v47 = vpop.xlane.xlu0 %2350 }
 0x2bb   : > { %v4033_v44 = vpop.f32.mrf.mxu3  ;;  %7494 = vmatmul.msk.f32.gmra.mxu3 %vm1964_vm3, %v3693_v20  ;;  %v10773_v31 = vpop.eup %7839  ;;  %v4308_v22 = vmul.f32 0.5, %v10771_v8  ;;  %v2481_v59 = vsel %vm1964_vm3, %v2291_v52, 0.0  ;;  %v2058_v16 = vsel %vm1964_vm3, %v1931_v13, 0.0  ;;  %vm3374_vm9 = vweird.f32 %v10748_v36 }
 0x2bc   : > { %v10762_v5 = vadd.f32 %v10681_v55, %v4033_v44  ;;  %v10778_v62 = vpop.eup %7841  ;;  %v3931_v63 = vpop.f32.mrf.mxu0  ;;  %v3369_v43 = vmul.f32 %v10773_v31, %v10748_v36  ;;  %v3047_v18 = vsel %vm10795_vm7, %v10713_v6, %v3043_v42  ;;  %v2663_v49 = vsub.f32 %v2535_v4, %v2599_v38  ;;  %2482 = vadd.xlane.f32.xlu1 %v2481_v59 }
 0x2bd   : > { %v10782_v37 = vpop.eup %7843  ;;  %v4498_v11 = vmul.f32 0.17087276, %v10778_v62  ;;  %v10805_v7 = vadd.f32 %v10681_v55, %v3931_v63  ;;  %v4372_v58 = vadd.f32 1.0, %v4308_v22  ;;  %v3525_v30 = vmul.f32 %v3047_v18, %v2757_v46  ;;  %2059 = vadd.xlane.f32.xlu2 %v2058_v16  ;;  %v2024_v38 = vpop.xlane.xlu2 %2023 }
 0x2be   : > { %v10776_v1 = vmul.f32 0.70710677, %v10762_v5  ;;  %15139 = vst [vmem:[#allocation37_spill] sm:$0xff] %v10782_v37  ;;  %v4499_v17 = vmul.f32 0.17087276, %v10782_v37  ;;  %v3370_v21 = vmul.f32 %v10773_v31, %v3369_v43  ;;  %v2727_v27 = vmax.f32 %v2663_v49, 0.0  ;;  %v2123_v16 = vpop.xlane.xlu1 %2122 }
 0x2bf   : > { %v4562_v54 = vadd.f32 -0.82215226, %v4498_v11  ;;  %v10814_v39 = vmul.f32 0.70710677, %v10805_v7  ;;  %v3593_v45 = vmul.f32 %v10454_v25, %v3525_v30  ;;  %v2259_v44 = vmul.f32 %v1931_v13, %v1931_v13 }
 0x2c0   : > { %v10793_v19 = vand.u32 2147483647, %v10776_v1  ;;  %v10811_v6 = vpop.eup %7845  ;;  %v4563_v12 = vadd.f32 -0.82215226, %v4499_v17  ;;  %v3371_v56 = vmul.f32 0.5, %v3370_v21  ;;  %v10838_v35 = vmul.f32 %v9658_v41, %v2024_v38 }
 0x2c1   : > { %15142 = vst [vmem:[#allocation38_spill] sm:$0xff] %v10814_v39  ;;  %v3049_v48 = vmul.f32 %v10811_v6, %v10765_v9  ;;  %v4626_v34 = vmul.f32 %v10778_v62, %v4562_v54  ;;  %v10822_v60 = vand.u32 2147483647, %v10814_v39  ;;  %v10828_v24 = vadd.f32 1e-06, %v2727_v27 }
 0x2c2   : > { %v4343_v53 = vmul.f32 0.5, %v10793_v19  ;;  %v4627_v32 = vmul.f32 %v10782_v37, %v4563_v12  ;;  %v3372_v20 = vsub.f32 1.5, %v3371_v56  ;;  %v3661_v42 = vadd.f32 %v10467_v26, %v3593_v45 }
 0x2c3   : > { %v3050_v14 = vmul.f32 %v10811_v6, %v3049_v48  ;;  %v2385_v4 = vsel %vm1964_vm3, %v2259_v44, 0.0  ;;  %v4690_v52 = vadd.f32 1.4885159, %v4626_v34  ;;  %v4309_v22 = vmul.f32 0.5, %v10822_v60 }
 0x2c4   : > { %v4407_v28 = vadd.f32 1.0, %v4343_v53  ;;  %v4691_v43 = vadd.f32 1.4885159, %v4627_v32  ;;  %7462 = vmatmul.msk.f32.gmra.mxu0 %vm1964_vm3, %v3661_v42  ;;  %2386 = vadd.xlane.f32.xlu0 %v2385_v4  ;;  %v3373_v18 = vmul.f32 %v10773_v31, %v3372_v20  ;;  %vm3375_vm8 = vweird.f32 %v10773_v31 }
 0x2c5   : > { %v3051_v17 = vmul.f32 0.5, %v3050_v14  ;;  %v4754_v59 = vmul.f32 %v10778_v62, %v4690_v52  ;;  %v4373_v49 = vadd.f32 1.0, %v4309_v22  ;;  %vm3376_vm10 = vmor %vm3374_vm9, %vm3375_vm8  ;;  %v2567_v12 = vmul.f32 %v10838_v35, %v10838_v35 }
 0x2c6   : > { %7847 = vrcp.f32 %v4407_v28  ;;  %v4755_v21 = vmul.f32 %v10782_v37, %v4691_v43  ;;  %v8182_v28 = vld [vmem:[#allocation3 + $0x190] sm:$0xff]  ;;  %v2503_v56 = vmul.f32 %v2351_v47, %v9658_v41  ;;  %v3377_v48 = vsel %vm3376_vm10, %v10773_v31, %v3373_v18 }
 0x2c7   : > { %7849 = vrcp.f32 %v4372_v58  ;;  %v3934_v58 = vpop.f32.mrf.mxu0  ;;  %v2790_v13 = vsub.f32 %v8182_v28, %v10689_v61  ;;  %v3052_v54 = vsub.f32 1.5, %v3051_v17  ;;  %v4818_v61 = vadd.f32 -1.135204, %v4754_v59 }
 0x2c8   : > { %7851 = vrsqrt.f32 %v10828_v24  ;;  %v10855_v34 = vadd.f32 %v10681_v55, %v3934_v58  ;;  %v4819_v45 = vadd.f32 -1.135204, %v4755_v21  ;;  %v10860_v20 = vmul.f32 %v9658_v41, %v2123_v16 }
 0x2c9   : > { %7853 = vrcp.f32 %v4373_v49  ;;  %v3558_v44 = vmul.f32 %v3377_v48, %v2790_v13  ;;  %v3053_v42 = vmul.f32 %v10811_v6, %v3052_v54  ;;  %vm3055_vm11 = vweird.f32 %v10811_v6 }
 0x2ca   : > { %v2631_v31 = vsub.f32 %v2503_v56, %v2567_v12  ;;  %v10870_v22 = vmul.f32 0.70710677, %v10855_v34  ;;  %v4036_v18 = vpop.f32.mrf.mxu3  ;;  %v4882_v17 = vmul.f32 %v10778_v62, %v4818_v61  ;;  %vm3054_vm12 = vweird.f32 %v10765_v9 }
 0x2cb   : > { %v3626_v4 = vmul.f32 %v10454_v25, %v3558_v44  ;;  %vm10879_vm13 = vmor %vm3054_vm12, %vm3055_vm11  ;;  %v2600_v49 = vmul.f32 %v10860_v20, %v10860_v20  ;;  %v10894_v54 = vadd.f32 %v10681_v55, %v4036_v18  ;;  %vm3384_vm14 = vweird.f32 %v10828_v24 }
 0x2cc   : > { %v10825_v33 = vpop.eup %7847  ;;  %15144 = vst [vmem:[#allocation40_spill] sm:$0xff] %v10870_v22  ;;  %v2695_v13 = vmax.f32 %v2631_v31, 0.0  ;;  %v10899_v48 = vand.u32 2147483647, %v10870_v22  ;;  %vm6071_vm4 = vcmp.ge.f32.partialorder %v10776_v1, 0.0 }
 0x2cd   : > { %v4535_v40 = vmul.f32 0.17087276, %v10825_v33  ;;  %v10833_v63 = vpop.eup %7849  ;;  %v3694_v47 = vadd.f32 %v10467_v26, %v3626_v4 }
 0x2ce   : > { %15143 = vst [vmem:[#allocation39_spill] sm:$0xff] %v10833_v63  ;;  %v4500_v53 = vmul.f32 0.17087276, %v10833_v63  ;;  %v10857_v32 = vpop.eup %7851 }
 0x2cf   : > { %v4599_v11 = vadd.f32 -0.82215226, %v4535_v40  ;;  %v2450_v40 = vpop.xlane.xlu2 %2449  ;;  %v3379_v52 = vmul.f32 %v10857_v32, %v10828_v24  ;;  %v10886_v9 = vpop.eup %7853  ;;  %7495 = vmatmul.msk.f32.gmra.mxu3 %vm1964_vm3, %v3694_v47  ;;  %vm3385_vm15 = vweird.f32 %v10857_v32 }
 0x2d0   : > { %v4564_v27 = vadd.f32 -0.82215226, %v4500_v53  ;;  %v4883_v53 = vmul.f32 %v10782_v37, %v4819_v45  ;;  %v2536_v58 = vmul.f32 %v2450_v40, %v9658_v41  ;;  %15147 = vst [vmem:[#allocation41_spill] sm:$0xff] %v10886_v9  ;;  %v4501_v45 = vmul.f32 0.17087276, %v10886_v9  ;;  %vm10954_vm0 = vmor %vm3384_vm14, %vm3385_vm15 }
 0x2d1   : > { %v4663_v46 = vmul.f32 %v10825_v33, %v4599_v11  ;;  %v1932_v11 = vld [vmem:[#allocation3 + $0x100] sm:$0xff]  ;;  %v3380_v12 = vmul.f32 %v10857_v32, %v3379_v52 }
 0x2d2   : > { %v4628_v43 = vmul.f32 %v10833_v63, %v4564_v27  ;;  %v4946_v27 = vadd.f32 0.27886808, %v4882_v17  ;;  %v4565_v17 = vadd.f32 -0.82215226, %v4501_v45 }
 0x2d3   : > { %v4727_v30 = vadd.f32 1.4885159, %v4663_v46  ;;  %v8183_v46 = vld [vmem:[#allocation3 + $0x90] sm:$0xff]  ;;  %v3381_v40 = vmul.f32 0.5, %v3380_v12 }
 0x2d4   : > { %v2758_v59 = vsub.f32 %v8183_v46, %v10720_v0  ;;  %v3057_v0 = vsel %vm10879_vm13, %v10811_v6, %v3053_v42  ;;  %v4692_v16 = vadd.f32 1.4885159, %v4628_v43  ;;  %v10903_v6 = vmul.f32 0.70710677, %v10894_v54 }
 0x2d5   : > { %v4791_v36 = vmul.f32 %v10825_v33, %v4727_v30  ;;  %v2061_v30 = vsel %vm1964_vm3, %v1932_v11, 0.0  ;;  %v2664_v42 = vsub.f32 %v2536_v58, %v2600_v49  ;;  %v4310_v43 = vmul.f32 0.5, %v10899_v48 }
 0x2d6   : > { %2062 = vadd.xlane.f32.xlu1 %v2061_v30  ;;  %v3526_v61 = vmul.f32 %v3057_v0, %v2758_v59  ;;  %15148 = vst [vmem:[#allocation42_spill] sm:$0xff] %v10903_v6  ;;  %v4756_v4 = vmul.f32 %v10833_v63, %v4692_v16  ;;  %v10914_v47 = vand.u32 2147483647, %v10903_v6  ;;  %v10917_v46 = vmul.f32 0.5, %v10692_v51  ;;  %v2027_v59 = vpop.xlane.xlu0 %2026  ;;  %v4039_v6 = vpop.f32.mrf.mxu3 }
 0x2d7   : > { %v4855_v14 = vadd.f32 -1.135204, %v4791_v36  ;;  %v4947_v36 = vadd.f32 0.27886808, %v4883_v53  ;;  %v3382_v49 = vsub.f32 1.5, %v3381_v40  ;;  %v5650_v0 = vsub.f32 0.0, %v10723_v2 }
 0x2d8   : > { %v3594_v31 = vmul.f32 %v10454_v25, %v3526_v61  ;;  %15149 = vst [vmem:[#allocation43_spill] sm:$0xff] %v10917_v46  ;;  %v2728_v25 = vmax.f32 %v2664_v42, 0.0  ;;  %v4820_v58 = vadd.f32 -1.135204, %v4756_v4  ;;  %v2260_v16 = vmul.f32 %v1932_v11, %v1932_v11  ;;  %v2354_v42 = vpop.xlane.xlu1 %2353 }
 0x2d9   : > { %v4919_v38 = vmul.f32 %v10825_v33, %v4855_v14  ;;  %v10905_v14 = vadd.f32 1e-06, %v2695_v13  ;;  %v5011_v18 = vmul.f32 %v10782_v37, %v4947_v36  ;;  %v4374_v13 = vadd.f32 1.0, %v4310_v43 }
 0x2da   : > { %v3662_v21 = vadd.f32 %v10467_v26, %v3594_v31  ;;  %v4629_v51 = vmul.f32 %v10886_v9, %v4565_v17  ;;  %v4344_v26 = vmul.f32 0.5, %v10914_v47  ;;  %v10931_v36 = vadd.f32 1e-06, %v2728_v25  ;;  %v3937_v31 = vpop.f32.mrf.mxu0 }
 0x2db   : > { %v4983_v28 = vadd.f32 0.27886808, %v4919_v38  ;;  %v5010_v38 = vmul.f32 %v10778_v62, %v4946_v27  ;;  %7855 = vrsqrt.f32 %v10905_v14  ;;  %v5075_v12 = vadd.f32 -0.18628806, %v5011_v18 }
 0x2dc   : > { %7463 = vmatmul.msk.f32.gmra.mxu0 %vm1964_vm3, %v3662_v21  ;;  %v10926_v27 = vmul.f32 %v9658_v41, %v2027_v59  ;;  %v2388_v61 = vsel %vm1964_vm3, %v2260_v16, 0.0  ;;  %v3383_v45 = vmul.f32 %v10857_v32, %v3382_v49  ;;  %v4884_v11 = vmul.f32 %v10833_v63, %v4820_v58  ;;  %v8184_v49 = vld [vmem:[#allocation3 + $0x198] sm:$0xff] }
 0x2dd   : > { %v5047_v56 = vmul.f32 %v10825_v33, %v4983_v28  ;;  %v5074_v30 = vadd.f32 -0.18628806, %v5010_v38  ;;  %7857 = vrcp.f32 %v4374_v13  ;;  %2389 = vadd.xlane.f32.xlu2 %v2388_v61  ;;  %v5687_v43 = vsub.f32 0.0, %v10793_v19 }
 0x2de   : > { %v2504_v38 = vmul.f32 %v2354_v42, %v9658_v41  ;;  %v4693_v18 = vadd.f32 1.4885159, %v4629_v51  ;;  %v4408_v25 = vadd.f32 1.0, %v4344_v26  ;;  %v10946_v59 = vmul.f32 %v5650_v0, %v10723_v2 }
 0x2df   : > { %v5111_v44 = vadd.f32 -0.18628806, %v5047_v56  ;;  %v5138_v4 = vmul.f32 %v10778_v62, %v5074_v30  ;;  %v5651_v21 = vsub.f32 0.0, %v10731_v10  ;;  %v2791_v58 = vsub.f32 %v8184_v49, %v10768_v23 }
 0x2e0   : > { %v10959_v13 = vadd.f32 %v10681_v55, %v3937_v31  ;;  %v3387_v2 = vsel %vm10954_vm0, %v10857_v32, %v3383_v45  ;;  %v4948_v30 = vadd.f32 0.27886808, %v4884_v11  ;;  %7859 = vrsqrt.f32 %v10931_v36  ;;  %v10975_v11 = vld [vmem:[#allocation3 + $0x98] sm:$0xff] }
 0x2e1   : > { %v5175_v52 = vmul.f32 %v10825_v33, %v5111_v44  ;;  %v10937_v40 = vpop.eup %7855  ;;  %v5751_v24 = vmul.f32 %v5687_v43, %v10793_v19  ;;  %7861 = vrcp.f32 %v4408_v25  ;;  %v10973_v32 = vmul.f32 0.5, %v10697_v3  ;;  %v1933_v19 = vld [vmem:[#allocation3 + $0x108] sm:$0xff] }
 0x2e2   : > { %v3059_v0 = vmul.f32 %v10937_v40, %v10905_v14  ;;  %v3559_v45 = vmul.f32 %v3387_v2, %v2791_v58  ;;  %v10980_v42 = vmul.f32 0.70710677, %v10959_v13  ;;  %v10983_v31 = vmul.f32 %v5651_v21, %v10731_v10 }
 0x2e3   : > { %v5239_v53 = vadd.f32 0.09678418, %v5175_v52  ;;  %v5139_v52 = vmul.f32 %v10782_v37, %v5075_v12  ;;  %v5202_v12 = vadd.f32 0.09678418, %v5138_v4  ;;  %v10969_v51 = vpop.eup %7857  ;;  %15153 = vst [vmem:[#allocation45_spill] sm:$0xff] %v10973_v32  ;;  %v5012_v4 = vmul.f32 %v10833_v63, %v4948_v30 }
 0x2e4   : > { %15152 = vst [vmem:[#allocation44_spill] sm:$0xff] %v10969_v51  ;;  %v2064_v10 = vsel %vm1964_vm3, %v1933_v19, 0.0  ;;  %v10998_v2 = vand.u32 2147483647, %v10980_v42  ;;  %vm3064_vm1 = vweird.f32 %v10905_v14  ;;  %vm3065_vm2 = vweird.f32 %v10937_v40 }
 0x2e5   : > { %v5303_v28 = vmul.f32 %v10825_v33, %v5239_v53  ;;  %v2568_v53 = vmul.f32 %v10926_v27, %v10926_v27  ;;  %v5203_v16 = vadd.f32 0.09678418, %v5139_v52  ;;  %15154 = vst [vmem:[#allocation46_spill] sm:$0xff] %v10980_v42  ;;  %v3060_v52 = vmul.f32 %v10937_v40, %v3059_v0  ;;  %2065 = vadd.xlane.f32.xlu0 %v2064_v10  ;;  %vm11056_vm5 = vmor %vm3064_vm1, %vm3065_vm2 }
 0x2e6   : > { %v5266_v3 = vmul.f32 %v10778_v62, %v5202_v12  ;;  %v10994_v21 = vpop.eup %7859  ;;  %v2261_v0 = vmul.f32 %v1933_v19, %v1933_v19  ;;  %v5076_v12 = vadd.f32 -0.18628806, %v5012_v4  ;;  %vm3394_vm6 = vweird.f32 %v10931_v36 }
 0x2e7   : > { %v5367_v56 = vadd.f32 0.37409195, %v5303_v28  ;;  %v2632_v61 = vsub.f32 %v2504_v38, %v2568_v53  ;;  %v5267_v38 = vmul.f32 %v10782_v37, %v5203_v16  ;;  %v2126_v28 = vpop.xlane.xlu2 %2125  ;;  %v3061_v16 = vmul.f32 0.5, %v3060_v52 }
 0x2e8   : > { %v3389_v4 = vmul.f32 %v10994_v21, %v10931_v36  ;;  %vm3395_vm7 = vweird.f32 %v10994_v21 }
 0x2e9   : > { %v5431_v44 = vmul.f32 %v10825_v33, %v5367_v56  ;;  %v4757_v56 = vmul.f32 %v10886_v9, %v4693_v18  ;;  %v10990_v18 = vmul.f32 0.5, %v10752_v15  ;;  %v2696_v49 = vmax.f32 %v2632_v61, 0.0  ;;  %v11003_v15 = vld [vmem:[%s14742_s4] ss:$0 sm:$0xff]  ;;  %v2453_v61 = vpop.xlane.xlu0 %2452  ;;  %vm3396_vm8 = vmor %vm3394_vm6, %vm3395_vm7 }
 0x2ea   : > { %v3627_v30 = vmul.f32 %v11003_v15, %v3559_v45  ;;  %v2391_v45 = vsel %vm1964_vm3, %v2261_v0, 0.0  ;;  %v5331_v19 = vadd.f32 0.37409195, %v5267_v38  ;;  %v5140_v38 = vmul.f32 %v10833_v63, %v5076_v12 }
 0x2eb   : > { %v5495_v17 = vadd.f32 1.0000237, %v5431_v44  ;;  %15155 = vst [vmem:[#allocation47_spill] sm:$0xff] %v10990_v18  ;;  %v4821_v53 = vadd.f32 -1.135204, %v4757_v56  ;;  %2392 = vadd.xlane.f32.xlu1 %v2391_v45  ;;  %v3062_v0 = vsub.f32 1.5, %v3061_v16  ;;  %v3940_v45 = vpop.f32.mrf.mxu0  ;;  %v3390_v12 = vmul.f32 %v10994_v21, %v3389_v4 }
 0x2ec   : > { %v5330_v56 = vadd.f32 0.37409195, %v5266_v3  ;;  %v11023_v3 = vld [vmem:[#allocation3 + $0x1a0] sm:$0xff]  ;;  %v5204_v39 = vadd.f32 0.09678418, %v5140_v38  ;;  %vm6426_vm7 = vcmask 261120  }
 0x2ed   : > { %v5559_v23 = vmul.f32 %v10825_v33, %v5495_v17  ;;  %v4502_v17 = vmul.f32 0.17087276, %v10969_v51  ;;  %v4885_v52 = vmul.f32 %v10886_v9, %v4821_v53  ;;  %v15165_v36 = vsub.f32 %v11023_v3, %v10860_v20 }
 0x2ee   : > { %v5394_v58 = vmul.f32 %v10778_v62, %v5330_v56  ;;  %v11044_v56 = vadd.f32 %v10681_v55, %v3940_v45  ;;  %v5268_v38 = vmul.f32 %v10833_v63, %v5204_v39 }
 0x2ef   : > { %v5623_v26 = vadd.f32 -1.2655122, %v5559_v23  ;;  %v11006_v23 = vpop.eup %7861  ;;  %v4949_v16 = vadd.f32 0.27886808, %v4885_v52  ;;  %v11049_v52 = vadd.f32 %v10681_v55, %v4039_v6 }
 0x2f0   : > { %15156 = vst [vmem:[#allocation48_spill] sm:$0xff] %v11006_v23  ;;  %v5458_v32 = vadd.f32 1.0000237, %v5394_v58  ;;  %v11062_v6 = vmul.f32 0.70710677, %v11044_v56 }
 0x2f1   : > { %v5815_v43 = vadd.f32 %v5751_v24, %v5623_v26  ;;  %v11009_v24 = vmul.f32 %v9658_v41, %v2126_v28  ;;  %v4566_v26 = vadd.f32 -0.82215226, %v4502_v17  ;;  %v4536_v28 = vmul.f32 0.17087276, %v11006_v23 }
 0x2f2   : > { %v4151_v17 = vmul.f32 0.5, %v10762_v5  ;;  %v3063_v5 = vmul.f32 %v10937_v40, %v3062_v0  ;;  %15159 = vst [vmem:[#allocation49_spill] sm:$0xff] %v11062_v6 }
 0x2f3   : > { %v5916_v25 = vmul.f32 1.442695, %v5815_v43  ;;  %v11014_v43 = vld [vmem:[%s14743_s5] ss:$0 sm:$0xff]  ;;  %v2601_v53 = vmul.f32 %v11009_v24, %v11009_v24  ;;  %v4630_v44 = vmul.f32 %v10969_v51, %v4566_v26  ;;  %v4600_v22 = vadd.f32 -0.82215226, %v4536_v28 }
 0x2f4   : > { %v3695_v10 = vadd.f32 %v11014_v43, %v3627_v30  ;;  %v4311_v30 = vmul.f32 0.5, %v10998_v2  ;;  %v3067_v14 = vsel %vm11056_vm5, %v10937_v40, %v3063_v5  ;;  %v2357_v40 = vpop.xlane.xlu2 %2356  ;;  %v15162_v5 = vsub.f32 %v10975_v11, %v10838_v35 }
 0x2f5   : > { %7863 = vpow2.f32 %v5916_v25  ;;  %v11021_v25 = vadd.f32 1e-06, %v2696_v49  ;;  %v2537_v49 = vmul.f32 %v2453_v61, %v9658_v41  ;;  %v4694_v4 = vadd.f32 1.4885159, %v4630_v44 }
 0x2f6   : > { %7496 = vmatmul.msk.f32.gmra.mxu3 %vm1964_vm3, %v3695_v10  ;;  %v5395_v10 = vmul.f32 %v10782_v37, %v5331_v19  ;;  %v4375_v18 = vadd.f32 1.0, %v4311_v30  ;;  %v2030_v30 = vpop.xlane.xlu1 %2029  ;;  %v4664_v44 = vmul.f32 %v11006_v23, %v4600_v22  ;;  %v11074_v22 = vmul.f32 0.70710677, %v11049_v52 }
 0x2f7   : > { %7865 = vrsqrt.f32 %v11021_v25  ;;  %v2665_v26 = vsub.f32 %v2537_v49, %v2601_v53  ;;  %v11079_v39 = vmul.f32 %v9658_v41, %v2030_v30  ;;  %vm3074_vm10 = vweird.f32 %v11021_v25 }
 0x2f8   : > { %v5459_v29 = vadd.f32 1.0000237, %v5395_v10  ;;  %7867 = vrcp.f32 %v4375_v18  ;;  %15160 = vst [vmem:[#allocation50_spill] sm:$0xff] %v11074_v22  ;;  %v1934_v10 = vld [vmem:[#allocation3 + $0x110] sm:$0xff]  ;;  %v11096_v28 = vand.u32 2147483647, %v11074_v22 }
 0x2f9   : > { %v2729_v53 = vmax.f32 %v2665_v26, 0.0  ;;  %v3527_v26 = vmul.f32 %v3067_v14, %v15162_v5  ;;  %v2067_v30 = vsel %vm1964_vm3, %v1934_v10, 0.0  ;;  %v2569_v11 = vmul.f32 %v11079_v39, %v11079_v39 }
 0x2fa   : > { %15164 = vst [vmem:[#allocation53_spill] sm:$0xff] %v11096_v28  ;;  %2068 = vadd.xlane.f32.xlu2 %v2067_v30  ;;  %vm6034_vm5 = vcmp.ge.f32.partialorder %v10706_v50, 0.0  ;;  %v15195_v50 = vld [vmem:[#allocation43_spill] sm:$0xff] }
 0x2fb   : > { %v7864_v42 = vpop.eup %7863 }
 0x2fc   : > { %v6007_v61 = vmul.f32 %v7864_v42, %v10825_v33  ;;  %v3391_v33 = vmul.f32 0.5, %v3390_v12  ;;  %v5013_v42 = vmul.f32 %v10886_v9, %v4949_v16  ;;  %v5522_v12 = vmul.f32 %v10778_v62, %v5458_v32 }
 0x2fd   : > { %v11064_v58 = vpop.eup %7865  ;;  %v4728_v16 = vadd.f32 1.4885159, %v4664_v44  ;;  %v2505_v44 = vmul.f32 %v2357_v40, %v9658_v41 }
 0x2fe   : > { %v6135_v19 = vsub.f32 1.0, %v6007_v61  ;;  %v7546_v57 = vadd.f32 -1.0, %v6007_v61  ;;  %v3392_v18 = vsub.f32 1.5, %v3391_v33  ;;  %v5077_v49 = vadd.f32 -0.18628806, %v5013_v42  ;;  %v11093_v42 = vpop.eup %7867 }
 0x2ff   : > { %v11083_v61 = vand.u32 2147483647, %v11062_v6  ;;  %v11091_v33 = vadd.f32 1e-06, %v2729_v53  ;;  %15163 = vst [vmem:[#allocation52_spill] sm:$0xff] %v11093_v42  ;;  %v2129_v53 = vpop.xlane.xlu0 %2128  ;;  %v2262_v6 = vmul.f32 %v1934_v10, %v1934_v10  ;;  %vm3075_vm9 = vweird.f32 %v11064_v58 }
 0x300   : > { %v6263_v1 = vsel %vm6071_vm4, %v6135_v19, %v7546_v57  ;;  %v4758_v57 = vmul.f32 %v10969_v51, %v4694_v4  ;;  %v5523_v19 = vmul.f32 %v10782_v37, %v5459_v29  ;;  %v5332_v4 = vadd.f32 0.37409195, %v5268_v38  ;;  %vm11198_vm11 = vmor %vm3074_vm10, %vm3075_vm9 }
 0x301   : > { %v6327_v0 = vadd.f32 1.0, %v6263_v1  ;;  %v3595_v1 = vmul.f32 %v11003_v15, %v3527_v26  ;;  %v3393_v35 = vmul.f32 %v10994_v21, %v3392_v18  ;;  %v5141_v29 = vmul.f32 %v10886_v9, %v5077_v49 }
 0x302   : > { %v4822_v32 = vadd.f32 -1.135204, %v4758_v57  ;;  %v5653_v38 = vsub.f32 0.0, %v10822_v60  ;;  %v4312_v14 = vmul.f32 0.5, %v11083_v61  ;;  %v5586_v5 = vadd.f32 -1.2655122, %v5522_v12 }
 0x303   : > { %v11076_v45 = vmul.f32 %v6327_v0, %v4151_v17  ;;  %v3069_v17 = vmul.f32 %v11064_v58, %v11021_v25  ;;  %v4792_v0 = vmul.f32 %v11006_v23, %v4728_v16  ;;  %v3663_v57 = vadd.f32 %v11014_v43, %v3595_v1  ;;  %v3943_v1 = vpop.f32.mrf.mxu0 }
 0x304   : > { %v5396_v18 = vmul.f32 %v10833_v63, %v5332_v4  ;;  %v4503_v26 = vmul.f32 0.17087276, %v11093_v42  ;;  %v4886_v40 = vmul.f32 %v10969_v51, %v4822_v32  ;;  %7869 = vrsqrt.f32 %v11091_v33 }
 0x305   : > { %15161 = vst [vmem:[#allocation51_spill] sm:$0xff] %v11076_v45  ;;  %v3070_v49 = vmul.f32 %v11064_v58, %v3069_v17  ;;  %v5587_v45 = vadd.f32 -1.2655122, %v5523_v19  ;;  %v4345_v16 = vmul.f32 0.5, %v11096_v28  ;;  %7464 = vmatmul.msk.f32.gmra.mxu0 %vm1964_vm3, %v3663_v57  ;;  %v5205_v12 = vadd.f32 0.09678418, %v5141_v29 }
 0x306   : > { %v2633_v4 = vsub.f32 %v2505_v44, %v2569_v11  ;;  %v11121_v17 = vmul.f32 %v9658_v41, %v2129_v53  ;;  %v3397_v19 = vsel %vm3396_vm8, %v10994_v21, %v3393_v35  ;;  %v4856_v30 = vadd.f32 -1.135204, %v4792_v0  ;;  %v2456_v11 = vpop.xlane.xlu1 %2455 }
 0x307   : > { %v4376_v22 = vadd.f32 1.0, %v4312_v14  ;;  %v3560_v32 = vmul.f32 %v3397_v19, %v15165_v36  ;;  %v5778_v37 = vadd.f32 %v10946_v59, %v5586_v5  ;;  %v5460_v46 = vadd.f32 1.0000237, %v5396_v18 }
 0x308   : > { %v3071_v28 = vmul.f32 0.5, %v3070_v49  ;;  %v4567_v57 = vadd.f32 -0.82215226, %v4503_v26  ;;  %v4950_v29 = vadd.f32 0.27886808, %v4886_v40  ;;  %v4409_v44 = vadd.f32 1.0, %v4345_v16 }
 0x309   : > { %v3628_v53 = vmul.f32 %v11003_v15, %v3560_v32  ;;  %v11130_v21 = vadd.f32 %v10681_v55, %v3943_v1  ;;  %v5269_v35 = vmul.f32 %v10886_v9, %v5205_v12  ;;  %v2697_v0 = vmax.f32 %v2633_v4, 0.0  ;;  %v6420_v32 = vld [vmem:[%s14746_s8 + $0x10] sm:$0xff] }
 0x30a   : > { %v2538_v20 = vmul.f32 %v2456_v11, %v9658_v41  ;;  %v2394_v3 = vsel %vm1964_vm3, %v2262_v6, 0.0  ;;  %v11135_v10 = vpop.eup %7869  ;;  %v4920_v59 = vmul.f32 %v11006_v23, %v4856_v30  ;;  %v2602_v14 = vmul.f32 %v11121_v17, %v11121_v17 }
 0x30b   : > { %7871 = vrcp.f32 %v4376_v22  ;;  %v3696_v5 = vadd.f32 %v11014_v43, %v3628_v53  ;;  %2395 = vadd.xlane.f32.xlu0 %v2394_v3  ;;  %v5842_v18 = vmul.f32 1.442695, %v5778_v37  ;;  %v15166_v49 = vsub.f32 0.0, %v10771_v8  ;;  %v6421_v37 = vld [vmem:[%s14746_s8 + $0x18] sm:$0xff] }
 0x30c   : > { %v11145_v40 = vmul.f32 0.5, %v10805_v7  ;;  %v4631_v6 = vmul.f32 %v11093_v42, %v4567_v57  ;;  %v5524_v16 = vmul.f32 %v10833_v63, %v5460_v46  ;;  %v5014_v12 = vmul.f32 %v10969_v51, %v4950_v29  ;;  %6631 = vmatpush.msra.mxu1 %v6421_v37  ;;  %7715 = vmatpush.msra.mxu2 %v6421_v37  ;;  %v8189_v57 = vld [vmem:[#allocation3 + $0xa0] sm:$0xff] }
 0x30d   : > { %v5716_v26 = vmul.f32 %v15166_v49, %v10771_v8  ;;  %7873 = vrcp.f32 %v4409_v44  ;;  %7497 = vmatmul.msk.f32.gmra.mxu3 %vm1964_vm3, %v3696_v5  ;;  %v11152_v22 = vmul.f32 0.70710677, %v11130_v21  ;;  %v5779_v8 = vadd.f32 %v10983_v31, %v5587_v45  ;;  %v11169_v45 = vld [vmem:[#allocation3 + $0x1a8] sm:$0xff] }
 0x30e   : > { %15167 = vst [vmem:[#allocation54_spill] sm:$0xff] %v11145_v40  ;;  %v5333_v7 = vadd.f32 0.37409195, %v5269_v35  ;;  %v3399_v4 = vmul.f32 %v11135_v10, %v11091_v33  ;;  %v11160_v19 = vadd.f32 1e-06, %v2697_v0  ;;  %v11163_v46 = vmul.f32 %v5653_v38, %v10822_v60  ;;  %6632 = vmatpush.msra.mxu1 %v6420_v32  ;;  %7716 = vmatpush.msra.mxu2 %v6420_v32 }
 0x30f   : > { %15168 = vst [vmem:[#allocation55_spill] sm:$0xff] %v11152_v22  ;;  %v3072_v1 = vsub.f32 1.5, %v3071_v28  ;;  %v4984_v30 = vadd.f32 0.27886808, %v4920_v59  ;;  %v2666_v36 = vsub.f32 %v2538_v20, %v2602_v14  ;;  %v2760_v31 = vsub.f32 %v8189_v57, %v10926_v27  ;;  %v4042_v27 = vpop.f32.mrf.mxu3 }
 0x310   : > { %v11174_v11 = vmul.f32 0.5, %v10855_v34  ;;  %v4695_v60 = vadd.f32 1.4885159, %v4631_v6  ;;  %7875 = vpow2.f32 %v5842_v18  ;;  %v5588_v38 = vadd.f32 -1.2655122, %v5524_v16 }
 0x311   : > { %v11176_v28 = vpop.eup %7871  ;;  %v5078_v44 = vadd.f32 -0.18628806, %v5014_v12  ;;  %v11179_v53 = vand.u32 2147483647, %v11152_v22  ;;  %v5844_v35 = vmul.f32 1.442695, %v5779_v8  ;;  %v5397_v0 = vmul.f32 %v10886_v9, %v5333_v7 }
 0x312   : > { %15169 = vst [vmem:[#allocation56_spill] sm:$0xff] %v11174_v11  ;;  %v3400_v20 = vmul.f32 %v11135_v10, %v3399_v4  ;;  %7877 = vrsqrt.f32 %v11160_v19  ;;  %v3073_v3 = vmul.f32 %v11064_v58, %v3072_v1  ;;  %v5048_v59 = vmul.f32 %v11006_v23, %v4984_v30  ;;  %v11202_v4 = vld [vmem:[#allocation3 + $0xa8] sm:$0xff]  ;;  %v2360_v1 = vpop.xlane.xlu0 %2359 }
 0x313   : > { %15170 = vst [vmem:[#allocation57_spill] sm:$0xff] %v11176_v28  ;;  %v11184_v34 = vpop.eup %7873  ;;  %v2730_v14 = vmax.f32 %v2666_v36, 0.0  ;;  %v5654_v5 = vsub.f32 0.0, %v10899_v48  ;;  %v4759_v18 = vmul.f32 %v11093_v42, %v4695_v60  ;;  %v4504_v49 = vmul.f32 0.17087276, %v11176_v28 }
 0x314   : > { %15171 = vst [vmem:[#allocation58_spill] sm:$0xff] %v11184_v34  ;;  %v11193_v6 = vadd.f32 %v10681_v55, %v4042_v27  ;;  %v5780_v16 = vadd.f32 %v5716_v26, %v5588_v38  ;;  %v5142_v12 = vmul.f32 %v10969_v51, %v5078_v44  ;;  %v4313_v37 = vmul.f32 0.5, %v11179_v53 }
 0x315   : > { %v5461_v8 = vadd.f32 1.0000237, %v5397_v0  ;;  %v3401_v30 = vmul.f32 0.5, %v3400_v20  ;;  %v4537_v55 = vmul.f32 0.17087276, %v11184_v34  ;;  %7879 = vpow2.f32 %v5844_v35  ;;  %v2033_v35 = vpop.xlane.xlu2 %2032 }
 0x316   : > { %v11207_v26 = vpop.eup %7875  ;;  %v3077_v25 = vsel %vm11198_vm11, %v11064_v58, %v3073_v3  ;;  %v5112_v36 = vadd.f32 -0.18628806, %v5048_v59  ;;  %v11212_v32 = vadd.f32 1e-06, %v2730_v14  ;;  %v11217_v60 = vmul.f32 %v5654_v5, %v10899_v48  ;;  %v6419_v58 = vld [vmem:[%s14746_s8 + $0x8] sm:$0xff]  ;;  %v1935_v5 = vld [vmem:[#allocation3 + $0x118] sm:$0xff] }
 0x317   : > { %v4823_v38 = vadd.f32 -1.135204, %v4759_v18  ;;  %v4568_v44 = vadd.f32 -0.82215226, %v4504_v49  ;;  %v11220_v27 = vmul.f32 0.70710677, %v11193_v6  ;;  %vm3404_vm12 = vweird.f32 %v11091_v33  ;;  %6633 = vmatpush.msra.mxu1 %v6419_v58  ;;  %7717 = vmatpush.msra.mxu2 %v6419_v58 }
 0x318   : > { %v11214_v57 = vpop.eup %7877  ;;  %v5846_v0 = vmul.f32 1.442695, %v5780_v16  ;;  %v5206_v20 = vadd.f32 0.09678418, %v5142_v12  ;;  %v4377_v7 = vadd.f32 1.0, %v4313_v37  ;;  %v5525_v3 = vmul.f32 %v10886_v9, %v5461_v8  ;;  %v6418_v12 = vld [vmem:[%s14746_s8] sm:$0xff] }
 0x319   : > { %15174 = vst [vmem:[#allocation59_spill] sm:$0xff] %v11220_v27  ;;  %v3528_v59 = vmul.f32 %v3077_v25, %v2760_v31  ;;  %v3402_v48 = vsub.f32 1.5, %v3401_v30  ;;  %v4601_v14 = vadd.f32 -0.82215226, %v4537_v55  ;;  %vm3405_vm13 = vweird.f32 %v11135_v10  ;;  %6634 = vmatpush.msra.mxu1 %v6418_v12  ;;  %7718 = vmatpush.msra.mxu2 %v6418_v12 }
 0x31a   : > { %v3079_v18 = vmul.f32 %v11214_v57, %v11160_v19  ;;  %v5176_v49 = vmul.f32 %v11006_v23, %v5112_v36  ;;  %v11232_v16 = vmul.f32 %v9658_v41, %v2033_v35  ;;  %v4887_v31 = vmul.f32 %v11093_v42, %v4823_v38  ;;  %v2132_v36 = vpop.xlane.xlu1 %2131  ;;  %vm11267_vm14 = vmor %vm3404_vm12, %vm3405_vm13 }
 0x31b   : > { %7881 = vrsqrt.f32 %v11212_v32  ;;  %v4632_v37 = vmul.f32 %v11176_v28, %v4568_v44  ;;  %v11241_v8 = vand.u32 2147483647, %v11220_v27  ;;  %v11243_v30 = vpop.eup %7879  ;;  %v5270_v55 = vmul.f32 %v10969_v51, %v5206_v20 }
 0x31c   : > { %v5688_v25 = vsub.f32 0.0, %v10914_v47  ;;  %7883 = vrcp.f32 %v4377_v7  ;;  %v2070_v35 = vsel %vm1964_vm3, %v1935_v5, 0.0  ;;  %v5589_v38 = vadd.f32 -1.2655122, %v5525_v3 }
 0x31d   : > { %v3403_v58 = vmul.f32 %v11135_v10, %v3402_v48  ;;  %v4665_v44 = vmul.f32 %v11184_v34, %v4601_v14  ;;  %2071 = vadd.xlane.f32.xlu1 %v2070_v35  ;;  %v3596_v29 = vmul.f32 %v11003_v15, %v3528_v59  ;;  %v3080_v12 = vmul.f32 %v11214_v57, %v3079_v18  ;;  %v2459_v33 = vpop.xlane.xlu2 %2458 }
 0x31e   : > { %v5240_v27 = vadd.f32 0.09678418, %v5176_v49  ;;  %v2570_v20 = vmul.f32 %v11232_v16, %v11232_v16  ;;  %v2263_v22 = vmul.f32 %v1935_v5, %v1935_v5  ;;  %v4951_v11 = vadd.f32 0.27886808, %v4887_v31 }
 0x31f   : > { %v4696_v7 = vadd.f32 1.4885159, %v4632_v37  ;;  %v11255_v40 = vmul.f32 %v9658_v41, %v2132_v36  ;;  %v4346_v3 = vmul.f32 0.5, %v11241_v8  ;;  %v5334_v48 = vadd.f32 0.37409195, %v5270_v55  ;;  %v3946_v36 = vpop.f32.mrf.mxu0 }
 0x320   : > { %v2506_v14 = vmul.f32 %v2360_v1, %v9658_v41  ;;  %v3664_v35 = vadd.f32 %v11014_v43, %v3596_v29  ;;  %v2397_v59 = vsel %vm1964_vm3, %v2263_v22, 0.0  ;;  %7885 = vpow2.f32 %v5846_v0 }
 0x321   : > { %v11261_v18 = vpop.eup %7881  ;;  %v11272_v49 = vmul.f32 0.5, %v10894_v54  ;;  %v11275_v1 = vmul.f32 %v5688_v25, %v10914_v47  ;;  %v4729_v29 = vadd.f32 1.4885159, %v4665_v44  ;;  %2398 = vadd.xlane.f32.xlu2 %v2397_v59  ;;  %v5781_v0 = vadd.f32 %v11163_v46, %v5589_v38 }
 0x322   : > { %v11277_v22 = vpop.eup %7883  ;;  %v3081_v31 = vmul.f32 0.5, %v3080_v12  ;;  %v5304_v37 = vmul.f32 %v11006_v23, %v5240_v27  ;;  %7465 = vmatmul.msk.f32.gmra.mxu0 %vm1964_vm3, %v3664_v35  ;;  %v3407_v54 = vsel %vm11267_vm14, %v11135_v10, %v3403_v58  ;;  %v5015_v55 = vmul.f32 %v11093_v42, %v4951_v11 }
 0x323   : > { %15177 = vst [vmem:[#allocation60_spill] sm:$0xff] %v11272_v49  ;;  %v4760_v47 = vmul.f32 %v11176_v28, %v4696_v7  ;;  %v4410_v25 = vadd.f32 1.0, %v4346_v3  ;;  %v15179_v44 = vsub.f32 %v11169_v45, %v11009_v24  ;;  %v5398_v38 = vmul.f32 %v10969_v51, %v5334_v48  ;;  %v11303_v48 = vld [vmem:[%s14745_s7] ss:$0 sm:$0xff] }
 0x324   : > { %15178 = vst [vmem:[#allocation61_spill] sm:$0xff] %v11277_v22  ;;  %vm3084_vm15 = vweird.f32 %v11160_v19  ;;  %vm3085_vm0 = vweird.f32 %v11214_v57  ;;  %v2603_v27 = vmul.f32 %v11255_v40, %v11255_v40  ;;  %v2634_v10 = vsub.f32 %v2506_v14, %v2570_v20  ;;  %v1936_v49 = vld [vmem:[#allocation3 + $0x120] sm:$0xff] }
 0x325   : > { %v3561_v46 = vmul.f32 %v3407_v54, %v15179_v44  ;;  %v3409_v11 = vmul.f32 %v11261_v18, %v11212_v32  ;;  %v4793_v58 = vmul.f32 %v11184_v34, %v4729_v29  ;;  %v2539_v12 = vmul.f32 %v2459_v33, %v9658_v41  ;;  %vm3086_vm1 = vmor %vm3084_vm15, %vm3085_vm0 }
 0x326   : > { %v4505_v24 = vmul.f32 0.17087276, %v11277_v22  ;;  %v5848_v45 = vmul.f32 1.442695, %v5781_v0  ;;  %v3082_v7 = vsub.f32 1.5, %v3081_v31  ;;  %v11306_v35 = vadd.f32 %v11303_v48, %v3946_v36  ;;  %v11308_v20 = vpop.eup %7885 }
 0x327   : > { %v5368_v3 = vadd.f32 0.37409195, %v5304_v37  ;;  %15180 = vst [vmem:[#allocation62_spill] sm:$0xff] %v11308_v20  ;;  %v5079_v14 = vadd.f32 -0.18628806, %v5015_v55  ;;  %7887 = vrcp.f32 %v4410_v25  ;;  %v3629_v5 = vmul.f32 %v11003_v15, %v3561_v46 }
 0x328   : > { %v4824_v59 = vadd.f32 -1.135204, %v4760_v47  ;;  %v5462_v29 = vadd.f32 1.0000237, %v5398_v38  ;;  %v11312_v0 = vmul.f32 0.5, %v10959_v13  ;;  %v5655_v31 = vsub.f32 0.0, %v10998_v2 }
 0x329   : > { %v2698_v37 = vmax.f32 %v2634_v10, 0.0  ;;  %v3410_v33 = vmul.f32 %v11261_v18, %v3409_v11  ;;  %v4857_v54 = vadd.f32 -1.135204, %v4793_v58  ;;  %v2667_v44 = vsub.f32 %v2539_v12, %v2603_v27  ;;  %v11317_v47 = vld [vmem:[#allocation3 + $0x1b0] sm:$0xff]  ;;  %v4045_v11 = vpop.f32.mrf.mxu3 }
 0x32a   : > { %15181 = vst [vmem:[#allocation63_spill] sm:$0xff] %v11312_v0  ;;  %v4569_v36 = vadd.f32 -0.82215226, %v4505_v24  ;;  %7889 = vpow2.f32 %v5848_v45  ;;  %v3083_v55 = vmul.f32 %v11214_v57, %v3082_v7  ;;  %v11322_v13 = vmul.f32 0.70710677, %v11306_v35  ;;  %v2363_v0 = vpop.xlane.xlu1 %2362 }
 0x32b   : > { %v5432_v46 = vmul.f32 %v11006_v23, %v5368_v3  ;;  %v5143_v38 = vmul.f32 %v11093_v42, %v5079_v14  ;;  %v4888_v10 = vmul.f32 %v11176_v28, %v4824_v59  ;;  %v3697_v27 = vadd.f32 %v11014_v43, %v3629_v5 }
 0x32c   : > { %15182 = vst [vmem:[#allocation64_spill] sm:$0xff] %v11322_v13  ;;  %v5526_v58 = vmul.f32 %v10969_v51, %v5462_v29  ;;  %v11330_v12 = vmul.f32 %v5655_v31, %v10998_v2  ;;  %v11332_v24 = vadd.f32 1e-06, %v2698_v37  ;;  %v2073_v45 = vsel %vm1964_vm3, %v1936_v49, 0.0 }
 0x32d   : > { %v11335_v7 = vpop.eup %7887  ;;  %v3411_v3 = vmul.f32 0.5, %v3410_v33  ;;  %v4921_v14 = vmul.f32 %v11184_v34, %v4857_v54  ;;  %v2731_v59 = vmax.f32 %v2667_v44, 0.0  ;;  %v4633_v5 = vmul.f32 %v11277_v22, %v4569_v36  ;;  %7498 = vmatmul.msk.f32.gmra.mxu3 %vm1964_vm3, %v3697_v27  ;;  %2074 = vadd.xlane.f32.xlu0 %v2073_v45 }
 0x32e   : > { %15183 = vst [vmem:[#allocation65_spill] sm:$0xff] %v11335_v7  ;;  %v11345_v2 = vand.u32 2147483647, %v11322_v13  ;;  %v3087_v29 = vsel %vm3086_vm1, %v11214_v57, %v3083_v55  ;;  %v11349_v31 = vadd.f32 %v11303_v48, %v4045_v11  ;;  %v2264_v37 = vmul.f32 %v1936_v49, %v1936_v49  ;;  %v3949_v55 = vpop.f32.mrf.mxu0  ;;  %v11362_v49 = vld [vmem:[#allocation3 + $0xb0] sm:$0xff] }
 0x32f   : > { %v5496_v19 = vadd.f32 1.0000237, %v5432_v46  ;;  %v5207_v25 = vadd.f32 0.09678418, %v5143_v38  ;;  %v4952_v33 = vadd.f32 0.27886808, %v4888_v10  ;;  %v15184_v54 = vsub.f32 %v11202_v4, %v11079_v39 }
 0x330   : > { %v11354_v36 = vpop.eup %7889  ;;  %7891 = vrsqrt.f32 %v11332_v24  ;;  %v4538_v27 = vmul.f32 0.17087276, %v11335_v7  ;;  %v11359_v45 = vmul.f32 0.70710677, %v11349_v31  ;;  %v2400_v57 = vsel %vm1964_vm3, %v2264_v37, 0.0 }
 0x331   : > { %v3529_v44 = vmul.f32 %v3087_v29, %v15184_v54  ;;  %15185 = vst [vmem:[#allocation66_spill] sm:$0xff] %v11354_v36  ;;  %v11367_v39 = vmul.f32 0.5, %v11044_v56  ;;  %v11370_v4 = vmul.f32 0.5, %v11049_v52  ;;  %v4985_v38 = vadd.f32 0.27886808, %v4921_v14  ;;  %2401 = vadd.xlane.f32.xlu1 %v2400_v57  ;;  %v2036_v56 = vpop.xlane.xlu0 %2035 }
 0x332   : > { %15186 = vst [vmem:[#allocation67_spill] sm:$0xff] %v11359_v45  ;;  %vm3414_vm2 = vweird.f32 %v11212_v32  ;;  %v11373_v10 = vadd.f32 1e-06, %v2731_v59  ;;  %v4697_v11 = vadd.f32 1.4885159, %v4633_v5  ;;  %v4314_v29 = vmul.f32 0.5, %v11345_v2 }
 0x333   : > { %15187 = vst [vmem:[#allocation68_spill] sm:$0xff] %v11367_v39  ;;  %v3597_v37 = vmul.f32 %v11003_v15, %v3529_v44  ;;  %v5590_v54 = vadd.f32 -1.2655122, %v5526_v58  ;;  %v5271_v46 = vmul.f32 %v11093_v42, %v5207_v25  ;;  %v3412_v13 = vsub.f32 1.5, %v3411_v3 }
 0x334   : > { %15188 = vst [vmem:[#allocation69_spill] sm:$0xff] %v11370_v4  ;;  %v11379_v39 = vadd.f32 %v11303_v48, %v3949_v55  ;;  %v5560_v52 = vmul.f32 %v11006_v23, %v5496_v19  ;;  %v5016_v14 = vmul.f32 %v11176_v28, %v4952_v33  ;;  %v4602_v57 = vadd.f32 -0.82215226, %v4538_v27 }
 0x335   : > { %v11384_v59 = vand.u32 2147483647, %v11359_v45  ;;  %vm3415_vm4 = vweird.f32 %v11261_v18  ;;  %v5656_v5 = vsub.f32 0.0, %v11083_v61  ;;  %v5049_v58 = vmul.f32 %v11184_v34, %v4985_v38 }
 0x336   : > { %v3665_v25 = vadd.f32 %v11014_v43, %v3597_v37  ;;  %v11390_v3 = vpop.eup %7891  ;;  %7893 = vrsqrt.f32 %v11373_v10  ;;  %v4761_v19 = vmul.f32 %v11277_v22, %v4697_v11  ;;  %v11395_v33 = vmul.f32 %v9658_v41, %v2036_v56  ;;  %vm11421_vm6 = vmor %vm3414_vm2, %vm3415_vm4 }
 0x337   : > { %v4378_v44 = vadd.f32 1.0, %v4314_v29  ;;  %v5782_v27 = vadd.f32 %v11217_v60, %v5590_v54  ;;  %v5335_v55 = vadd.f32 0.37409195, %v5271_v46  ;;  %v3413_v45 = vmul.f32 %v11261_v18, %v3412_v13 }
 0x338   : > { %7466 = vmatmul.msk.f32.gmra.mxu0 %vm1964_vm3, %v3665_v25  ;;  %v11402_v38 = vmul.f32 0.70710677, %v11379_v39  ;;  %v5624_v37 = vadd.f32 -1.2655122, %v5560_v52  ;;  %v5080_v4 = vadd.f32 -0.18628806, %v5016_v14  ;;  %v4666_v11 = vmul.f32 %v11335_v7, %v4602_v57 }
 0x339   : > { %v4347_v56 = vmul.f32 0.5, %v11384_v59  ;;  %v5113_v29 = vadd.f32 -0.18628806, %v5049_v58  ;;  %v3089_v23 = vmul.f32 %v11390_v3, %v11332_v24  ;;  %v2507_v60 = vmul.f32 %v2363_v0, %v9658_v41  ;;  %v15192_v25 = vld [vmem:[#allocation53_spill] sm:$0xff] }
 0x33a   : > { %15189 = vst [vmem:[#allocation70_spill] sm:$0xff] %v11402_v38  ;;  %v11410_v13 = vand.u32 2147483647, %v11402_v38  ;;  %v4825_v46 = vadd.f32 -1.135204, %v4761_v19  ;;  %v2571_v54 = vmul.f32 %v11395_v33, %v11395_v33  ;;  %7895 = vrcp.f32 %v4378_v44 }
 0x33b   : > { %v5970_v52 = vmul.f32 %v11207_v26, %v10778_v62  ;;  %v5850_v14 = vmul.f32 1.442695, %v5782_v27  ;;  %v5399_v57 = vmul.f32 %v11093_v42, %v5335_v55  ;;  %v11426_v58 = vmul.f32 %v5656_v5, %v11083_v61 }
 0x33c   : > { %v5689_v19 = vsub.f32 0.0, %v15192_v25  ;;  %v11429_v44 = vpop.eup %7893  ;;  %v3417_v62 = vsel %vm11421_vm6, %v11261_v18, %v3413_v45  ;;  %v5144_v26 = vmul.f32 %v11176_v28, %v5080_v4  ;;  %v4730_v27 = vadd.f32 1.4885159, %v4666_v11  ;;  %v11443_v4 = vld [vmem:[#allocation3 + $0x1b8] sm:$0xff] }
 0x33d   : > { %v4411_v55 = vadd.f32 1.0, %v4347_v56  ;;  %v5816_v32 = vadd.f32 %v11275_v1, %v5624_v37  ;;  %v5177_v38 = vmul.f32 %v11184_v34, %v5113_v29  ;;  %v3090_v51 = vmul.f32 %v11390_v3, %v3089_v23  ;;  %v2135_v29 = vpop.xlane.xlu2 %2134 }
 0x33e   : > { %v4315_v61 = vmul.f32 0.5, %v11410_v13  ;;  %v4889_v5 = vmul.f32 %v11277_v22, %v4825_v46  ;;  %v2635_v36 = vsub.f32 %v2507_v60, %v2571_v54  ;;  %v6098_v9 = vsub.f32 1.0, %v5970_v52 }
 0x33f   : > { %v7509_v20 = vadd.f32 -1.0, %v5970_v52  ;;  %v5463_v63 = vadd.f32 1.0000237, %v5399_v57  ;;  %v15193_v18 = vsub.f32 %v11317_v47, %v11121_v17  ;;  %v3419_v23 = vmul.f32 %v11429_v44, %v11373_v10 }
 0x340   : > { %v11449_v37 = vpop.eup %7895  ;;  %v5208_v11 = vadd.f32 0.09678418, %v5144_v26  ;;  %v4794_v56 = vmul.f32 %v11335_v7, %v4730_v27  ;;  %7897 = vrcp.f32 %v4411_v55  ;;  %v5918_v17 = vmul.f32 1.442695, %v5816_v32 }
 0x341   : > { %v3562_v45 = vmul.f32 %v3417_v62, %v15193_v18  ;;  %15194 = vst [vmem:[#allocation53_spill] sm:$0xff] %v11449_v37  ;;  %v6226_v60 = vsel %vm6034_vm5, %v6098_v9, %v7509_v20  ;;  %7899 = vpow2.f32 %v5850_v14  ;;  %v5241_v47 = vadd.f32 0.09678418, %v5177_v38 }
 0x342   : > { %v4379_v46 = vadd.f32 1.0, %v4315_v61  ;;  %v3091_v54 = vmul.f32 0.5, %v3090_v51  ;;  %v4953_v52 = vadd.f32 0.27886808, %v4889_v5  ;;  %v2699_v57 = vmax.f32 %v2635_v36, 0.0  ;;  %v2039_v5 = vpop.xlane.xlu1 %2038 }
 0x343   : > { %v6290_v0 = vadd.f32 1.0, %v6226_v60  ;;  %v5527_v62 = vmul.f32 %v11093_v42, %v5463_v63  ;;  %v3420_v18 = vmul.f32 %v11429_v44, %v3419_v23  ;;  %v4506_v26 = vmul.f32 0.17087276, %v11449_v37 }
 0x344   : > { %v5272_v27 = vmul.f32 %v11176_v28, %v5208_v11  ;;  %v4858_v55 = vadd.f32 -1.135204, %v4794_v56  ;;  %v3630_v20 = vmul.f32 %v11003_v15, %v3562_v45  ;;  %v5305_v38 = vmul.f32 %v11184_v34, %v5241_v47 }
 0x345   : > { %v6354_v9 = vmul.f32 %v6290_v0, %v15195_v50  ;;  %v11462_v51 = vmul.f32 %v5689_v19, %v15192_v25  ;;  %v5657_v36 = vsub.f32 0.0, %v11179_v53  ;;  %7901 = vrcp.f32 %v4379_v46  ;;  %v3952_v46 = vpop.f32.mrf.mxu0  ;;  %v4048_v50 = vpop.f32.mrf.mxu3 }
 0x346   : > { %v11465_v63 = vpop.eup %7897  ;;  %v3092_v14 = vsub.f32 1.5, %v3091_v54  ;;  %v5017_v32 = vmul.f32 %v11277_v22, %v4953_v52  ;;  %v11468_v61 = vadd.f32 1e-06, %v2699_v57  ;;  %v3698_v15 = vadd.f32 %v11014_v43, %v3630_v20 }
 0x347   : > { %15196 = vst [vmem:[#allocation43_spill] sm:$0xff] %v11465_v63  ;;  %7573 = vmatmul.msk.f32.vlgmr.msra.gmra.mxu1 %vm6426_vm7, %v6354_v9  ;;  %v11472_v45 = vpop.eup %7899  ;;  %v5591_v23 = vadd.f32 -1.2655122, %v5527_v62  ;;  %v3421_v25 = vmul.f32 0.5, %v3420_v18  ;;  %v11475_v19 = vmul.f32 0.5, %v11130_v21  ;;  %7903 = vpow2.f32 %v5918_v17  ;;  %v2462_v21 = vpop.xlane.xlu0 %2461  ;;  %v15202_v9 = vld [vmem:[#allocation35_spill] sm:$0xff] }
 0x348   : > { %15197 = vst [vmem:[#allocation71_spill] sm:$0xff] %v11472_v45  ;;  %v4570_v11 = vadd.f32 -0.82215226, %v4506_v26  ;;  %v5336_v56 = vadd.f32 0.37409195, %v5272_v27  ;;  %v4922_v60 = vmul.f32 %v11335_v7, %v4858_v55  ;;  %v11479_v47 = vmul.f32 %v9658_v41, %v2135_v29  ;;  %7499 = vmatmul.msk.f32.gmra.mxu3 %vm1964_vm3, %v3698_v15  ;;  %v2366_v62 = vpop.xlane.xlu2 %2365 }
 0x349   : > { %15198 = vst [vmem:[#allocation72_spill] sm:$0xff] %v11475_v19  ;;  %v5369_v54 = vadd.f32 0.37409195, %v5305_v38  ;;  %v11483_v43 = vmul.f32 %v5657_v36, %v11179_v53  ;;  %v11486_v52 = vmul.f32 %v9658_v41, %v2039_v5  ;;  %v4539_v57 = vmul.f32 0.17087276, %v11465_v63 }
 0x34a   : > { %v11490_v17 = vmul.f32 %v11390_v3, %v3092_v14  ;;  %v5081_v0 = vadd.f32 -0.18628806, %v5017_v32  ;;  %v11493_v29 = vmul.f32 0.5, %v11193_v6  ;;  %7905 = vrsqrt.f32 %v11468_v61 }
 0x34b   : > { %v11496_v18 = vpop.eup %7901  ;;  %v5783_v53 = vadd.f32 %v11330_v12, %v5591_v23  ;;  %vm3095_vm8 = vweird.f32 %v11390_v3  ;;  %v3422_v26 = vsub.f32 1.5, %v3421_v25  ;;  %v4634_v27 = vmul.f32 %v11449_v37, %v4570_v11 }
 0x34c   : > { %15199 = vst [vmem:[#allocation73_spill] sm:$0xff] %v11493_v29  ;;  %v11502_v55 = vadd.f32 %v11303_v48, %v3952_v46  ;;  %vm6035_vm9 = vcmp.ge.f32.partialorder %v15202_v9, 0.0  ;;  %v5400_v6 = vmul.f32 %v11176_v28, %v5336_v56  ;;  %v4986_v20 = vadd.f32 0.27886808, %v4922_v60  ;;  %v15204_v56 = vld [vmem:[#allocation37_spill] sm:$0xff] }
 0x34d   : > { %15200 = vst [vmem:[#allocation74_spill] sm:$0xff] %v11496_v18  ;;  %v2604_v38 = vmul.f32 %v11479_v47, %v11479_v47  ;;  %v2540_v36 = vmul.f32 %v2462_v21, %v9658_v41  ;;  %v5433_v12 = vmul.f32 %v11184_v34, %v5369_v54  ;;  %vm3094_vm10 = vweird.f32 %v11332_v24  ;;  %v11514_v15 = vpop.eup %7903  ;;  %v11525_v54 = vld [vmem:[#allocation3 + $0xb8] sm:$0xff] }
 0x34e   : > { %15201 = vst [vmem:[#allocation75_spill] sm:$0xff] %v11502_v55  ;;  %v2572_v14 = vmul.f32 %v11486_v52, %v11486_v52  ;;  %v2508_v32 = vmul.f32 %v2366_v62, %v9658_v41  ;;  %v4603_v5 = vadd.f32 -0.82215226, %v4539_v57  ;;  %v5145_v23 = vmul.f32 %v11277_v22, %v5081_v0  ;;  %vm3096_vm13 = vmor %vm3094_vm10, %vm3095_vm8 }
 0x34f   : > { %15203 = vst [vmem:[#allocation35_spill] sm:$0xff] %v11514_v15  ;;  %v4507_v25 = vmul.f32 0.17087276, %v11496_v18  ;;  %v11519_v11 = vadd.f32 %v11303_v48, %v4048_v50  ;;  %v5971_v60 = vmul.f32 %v11243_v30, %v15204_v56  ;;  %vm3425_vm11 = vweird.f32 %v11429_v44 }
 0x350   : > { %v5690_v46 = vsub.f32 0.0, %v11241_v8  ;;  %v4698_v57 = vadd.f32 1.4885159, %v4634_v27  ;;  %v11530_v0 = vmul.f32 0.70710677, %v11502_v55  ;;  %v11532_v62 = vpop.eup %7905  ;;  %v5050_v29 = vmul.f32 %v11335_v7, %v4986_v20 }
 0x351   : > { %v5852_v50 = vmul.f32 1.442695, %v5783_v53  ;;  %v5464_v1 = vadd.f32 1.0000237, %v5400_v6  ;;  %v2668_v30 = vsub.f32 %v2540_v36, %v2604_v38  ;;  %v5497_v56 = vadd.f32 1.0000237, %v5433_v12 }
 0x352   : > { %15205 = vst [vmem:[#allocation37_spill] sm:$0xff] %v11530_v0  ;;  %vm3424_vm12 = vweird.f32 %v11373_v10  ;;  %v2636_v19 = vsub.f32 %v2508_v32, %v2572_v14  ;;  %v4667_v42 = vmul.f32 %v11465_v63, %v4603_v5  ;;  %v6099_v15 = vsub.f32 1.0, %v5971_v60 }
 0x353   : > { %v3423_v21 = vmul.f32 %v11429_v44, %v3422_v26  ;;  %v5209_v27 = vadd.f32 0.09678418, %v5145_v23  ;;  %v4571_v45 = vadd.f32 -0.82215226, %v4507_v25  ;;  %v11539_v55 = vmul.f32 0.70710677, %v11519_v11  ;;  %vm11580_vm14 = vmor %vm3424_vm12, %vm3425_vm11 }
 0x354   : > { %v3099_v53 = vmul.f32 %v11532_v62, %v11468_v61  ;;  %v4762_v6 = vmul.f32 %v11449_v37, %v4698_v57  ;;  %v11545_v20 = vand.u32 2147483647, %v11530_v0  ;;  %v7510_v38 = vadd.f32 -1.0, %v5971_v60 }
 0x355   : > { %15206 = vst [vmem:[#allocation76_spill] sm:$0xff] %v11539_v55  ;;  %7907 = vpow2.f32 %v5852_v50  ;;  %v5528_v36 = vmul.f32 %v11176_v28, %v5464_v1  ;;  %v5114_v12 = vadd.f32 -0.18628806, %v5050_v29  ;;  %v2732_v14 = vmax.f32 %v2668_v30, 0.0  ;;  %v15207_v50 = vld [vmem:[#allocation45_spill] sm:$0xff] }
 0x356   : > { %v5561_v26 = vmul.f32 %v11184_v34, %v5497_v56  ;;  %v2700_v32 = vmax.f32 %v2636_v19, 0.0  ;;  %v4731_v5 = vadd.f32 1.4885159, %v4667_v42  ;;  %v6227_v23 = vsel %vm6035_vm9, %v6099_v15, %v7510_v38 }
 0x357   : > { %v5273_v25 = vmul.f32 %v11277_v22, %v5209_v27  ;;  %v4635_v60 = vmul.f32 %v11496_v18, %v4571_v45  ;;  %v11558_v1 = vand.u32 2147483647, %v11539_v55  ;;  %v6291_v29 = vadd.f32 1.0, %v6227_v23 }
 0x358   : > { %v3100_v57 = vmul.f32 %v11532_v62, %v3099_v53  ;;  %v4826_v19 = vadd.f32 -1.135204, %v4762_v6  ;;  %v4316_v42 = vmul.f32 0.5, %v11545_v20  ;;  %v3097_v9 = vsel %vm3096_vm13, %v11390_v3, %v11490_v17 }
 0x359   : > { %v5178_v15 = vmul.f32 %v11335_v7, %v5114_v12  ;;  %v11565_v24 = vadd.f32 1e-06, %v2732_v14  ;;  %v6355_v30 = vmul.f32 %v6291_v29, %v15207_v50  ;;  %v15208_v45 = vsub.f32 %v11362_v49, %v11232_v16  ;;  %v11589_v49 = vld [vmem:[%s14742_s4] ss:$0 sm:$0xff]  ;;  %v4051_v50 = vpop.f32.mrf.mxu3 }
 0x35a   : > { %v5592_v27 = vadd.f32 -1.2655122, %v5528_v36  ;;  %v5625_v38 = vadd.f32 -1.2655122, %v5561_v26  ;;  %v11571_v23 = vadd.f32 1e-06, %v2700_v32  ;;  %v4795_v53 = vmul.f32 %v11465_v63, %v4731_v5 }
 0x35b   : > { %v3530_v56 = vmul.f32 %v3097_v9, %v15208_v45  ;;  %v11574_v6 = vpop.eup %7907  ;;  %v5337_v17 = vadd.f32 0.37409195, %v5273_v25  ;;  %v4699_v12 = vadd.f32 1.4885159, %v4635_v60  ;;  %v4348_v16 = vmul.f32 0.5, %v11558_v1  ;;  %7574 = vmatmul.msk.f32.gmra.mxu1 %vm6426_vm7, %v6355_v30  ;;  %v11599_v60 = vld [vmem:[#allocation3 + $0x1c0] sm:$0xff] }
 0x35c   : > { %15209 = vst [vmem:[#allocation45_spill] sm:$0xff] %v11574_v6  ;;  %v3101_v14 = vmul.f32 0.5, %v3100_v57  ;;  %v4890_v10 = vmul.f32 %v11449_v37, %v4826_v19  ;;  %v4380_v26 = vadd.f32 1.0, %v4316_v42  ;;  %v3427_v32 = vsel %vm11580_vm14, %v11429_v44, %v3423_v21  ;;  %v2138_v42 = vpop.xlane.xlu0 %2137 }
 0x35d   : > { %v3598_v36 = vmul.f32 %v11589_v49, %v3530_v56  ;;  %v5242_v5 = vadd.f32 0.09678418, %v5178_v15  ;;  %v11597_v25 = vmul.f32 %v5690_v46, %v11241_v8  ;;  %7909 = vrsqrt.f32 %v11565_v24  ;;  %v11610_v8 = vld [vmem:[%s14743_s5] ss:$0 sm:$0xff] }
 0x35e   : > { %v5784_v57 = vadd.f32 %v11426_v58, %v5592_v27  ;;  %vm3104_vm15 = vweird.f32 %v11468_v61  ;;  %7911 = vrsqrt.f32 %v11571_v23  ;;  %v4859_v19 = vadd.f32 -1.135204, %v4795_v53 }
 0x35f   : > { %v3666_v44 = vadd.f32 %v11610_v8, %v3598_v36  ;;  %v5401_v46 = vmul.f32 %v11277_v22, %v5337_v17  ;;  %v4763_v21 = vmul.f32 %v11496_v18, %v4699_v12  ;;  %v4412_v9 = vadd.f32 1.0, %v4348_v16  ;;  %v3955_v12 = vpop.f32.mrf.mxu0 }
 0x360   : > { %v15212_v58 = vsub.f32 %v11443_v4, %v11255_v40  ;;  %v5817_v30 = vadd.f32 %v11462_v51, %v5625_v38  ;;  %v3102_v45 = vsub.f32 1.5, %v3101_v14  ;;  %v4954_v56 = vadd.f32 0.27886808, %v4890_v10 }
 0x361   : > { %7913 = vrcp.f32 %v4380_v26  ;;  %7467 = vmatmul.msk.f32.gmra.mxu0 %vm1964_vm3, %v3666_v44  ;;  %v5306_v27 = vmul.f32 %v11335_v7, %v5242_v5  ;;  %v11622_v53 = vmul.f32 0.5, %v11306_v35  ;;  %v11625_v3 = vmul.f32 %v9658_v41, %v2138_v42 }
 0x362   : > { %v3563_v15 = vmul.f32 %v3427_v32, %v15212_v58  ;;  %v5854_v40 = vmul.f32 1.442695, %v5784_v57  ;;  %v5658_v4 = vsub.f32 0.0, %v11345_v2  ;;  %v4923_v51 = vmul.f32 %v11465_v63, %v4859_v19  ;;  %v2465_v57 = vpop.xlane.xlu1 %2464 }
 0x363   : > { %15213 = vst [vmem:[#allocation77_spill] sm:$0xff] %v11622_v53  ;;  %v11631_v38 = vadd.f32 %v11303_v48, %v4051_v50  ;;  %v11633_v16 = vpop.eup %7909  ;;  %v5465_v36 = vadd.f32 1.0000237, %v5401_v46  ;;  %v4827_v14 = vadd.f32 -1.135204, %v4763_v21  ;;  %7915 = vrcp.f32 %v4412_v9  ;;  %v11650_v9 = vld [vmem:[#allocation3 + $0xc0] sm:$0xff] }
 0x364   : > { %v3631_v17 = vmul.f32 %v11589_v49, %v3563_v15  ;;  %v11636_v10 = vpop.eup %7911  ;;  %v5920_v26 = vmul.f32 1.442695, %v5817_v30  ;;  %v3103_v32 = vmul.f32 %v11532_v62, %v3102_v45  ;;  %vm3105_vm0 = vweird.f32 %v11532_v62  ;;  %v2369_v0 = vpop.xlane.xlu0 %2368 }
 0x365   : > { %v5018_v5 = vmul.f32 %v11449_v37, %v4954_v56  ;;  %v5370_v19 = vadd.f32 0.37409195, %v5306_v27  ;;  %v2541_v42 = vmul.f32 %v2465_v57, %v9658_v41  ;;  %v2605_v44 = vmul.f32 %v11625_v3, %v11625_v3  ;;  %vm11664_vm1 = vmor %vm3104_vm15, %vm3105_vm0 }
 0x366   : > { %v3699_v35 = vadd.f32 %v11610_v8, %v3631_v17  ;;  %v11646_v46 = vadd.f32 %v11303_v48, %v3955_v12  ;;  %v3429_v15 = vmul.f32 %v11633_v16, %v11565_v24  ;;  %v4987_v50 = vadd.f32 0.27886808, %v4923_v51 }
 0x367   : > { %v11648_v21 = vpop.eup %7913  ;;  %v11657_v30 = vmul.f32 0.70710677, %v11631_v38  ;;  %7917 = vpow2.f32 %v5854_v40  ;;  %v5529_v45 = vmul.f32 %v11277_v22, %v5465_v36  ;;  %v11669_v27 = vmul.f32 %v5658_v4, %v11345_v2 }
 0x368   : > { %7500 = vmatmul.msk.f32.gmra.mxu3 %vm1964_vm3, %v3699_v35  ;;  %v4891_v17 = vmul.f32 %v11496_v18, %v4827_v14  ;;  %7919 = vpow2.f32 %v5920_v26  ;;  %v3107_v40 = vsel %vm11664_vm1, %v11532_v62, %v3103_v32  ;;  %v5082_v51 = vadd.f32 -0.18628806, %v5018_v5  ;;  %v2042_v26 = vpop.xlane.xlu2 %2041  ;;  %v15219_v5 = vld [vmem:[#allocation36_spill] sm:$0xff] }
 0x369   : > { %15214 = vst [vmem:[#allocation78_spill] sm:$0xff] %v11657_v30  ;;  %v3109_v12 = vmul.f32 %v11636_v10, %v11571_v23  ;;  %v11677_v36 = vpop.eup %7915  ;;  %v5434_v61 = vmul.f32 %v11335_v7, %v5370_v19  ;;  %v2669_v35 = vsub.f32 %v2541_v42, %v2605_v44  ;;  %v4508_v57 = vmul.f32 0.17087276, %v11648_v21 }
 0x36a   : > { %v11682_v2 = vmul.f32 0.70710677, %v11646_v46  ;;  %v3430_v4 = vmul.f32 %v11633_v16, %v3429_v15  ;;  %v11686_v14 = vmul.f32 0.5, %v11349_v31  ;;  %v5051_v62 = vmul.f32 %v11465_v63, %v4987_v50 }
 0x36b   : > { %v11690_v32 = vand.u32 2147483647, %v11657_v30  ;;  %vm6036_vm2 = vcmp.ge.f32.partialorder %v15219_v5, 0.0  ;;  %v5593_v19 = vadd.f32 -1.2655122, %v5529_v45  ;;  %v11694_v44 = vmul.f32 %v9658_v41, %v2042_v26 }
 0x36c   : > { %15217 = vst [vmem:[#allocation79_spill] sm:$0xff] %v11682_v2  ;;  %v4955_v42 = vadd.f32 0.27886808, %v4891_v17  ;;  %v11697_v56 = vand.u32 2147483647, %v11682_v2  ;;  %v15220_v31 = vsub.f32 %v11525_v54, %v11395_v33  ;;  %v5146_v50 = vmul.f32 %v11449_v37, %v5082_v51 }
 0x36d   : > { %15218 = vst [vmem:[#allocation80_spill] sm:$0xff] %v11686_v14  ;;  %v5691_v58 = vsub.f32 0.0, %v11384_v59  ;;  %v4540_v29 = vmul.f32 0.17087276, %v11677_v36  ;;  %v11705_v30 = vpop.eup %7917  ;;  %v5498_v45 = vadd.f32 1.0000237, %v5434_v61  ;;  %v3110_v17 = vmul.f32 %v11636_v10, %v3109_v12 }
 0x36e   : > { %v3531_v15 = vmul.f32 %v3107_v40, %v15220_v31  ;;  %15221 = vst [vmem:[#allocation36_spill] sm:$0xff] %v11705_v30  ;;  %v2733_v26 = vmax.f32 %v2669_v35, 0.0  ;;  %v4572_v55 = vadd.f32 -0.82215226, %v4508_v57  ;;  %v11708_v2 = vpop.eup %7919  ;;  %v3431_v14 = vmul.f32 0.5, %v3430_v4  ;;  %v15224_v4 = vld [vmem:[#allocation39_spill] sm:$0xff] }
 0x36f   : > { %15222 = vst [vmem:[#allocation81_spill] sm:$0xff] %v11708_v2  ;;  %v5115_v53 = vadd.f32 -0.18628806, %v5051_v62  ;;  %v11711_v33 = vmul.f32 0.5, %v11379_v39  ;;  %v4349_v54 = vmul.f32 0.5, %v11690_v32  ;;  %v5785_v40 = vadd.f32 %v11483_v43, %v5593_v19  ;;  %v15225_v62 = vld [vmem:[#allocation62_spill] sm:$0xff] }
 0x370   : > { %v5019_v51 = vmul.f32 %v11496_v18, %v4955_v42  ;;  %v2573_v61 = vmul.f32 %v11694_v44, %v11694_v44  ;;  %v4317_v12 = vmul.f32 0.5, %v11697_v56  ;;  %v5210_v35 = vadd.f32 0.09678418, %v5146_v50 }
 0x371   : > { %15223 = vst [vmem:[#allocation82_spill] sm:$0xff] %v11711_v33  ;;  %v4604_v57 = vadd.f32 -0.82215226, %v4540_v29  ;;  %v2509_v31 = vmul.f32 %v2369_v0, %v9658_v41  ;;  %v5972_v22 = vmul.f32 %v15225_v62, %v15224_v4  ;;  %v5562_v39 = vmul.f32 %v11335_v7, %v5498_v45  ;;  %v15270_v7 = vld [vmem:[#allocation45_spill] sm:$0xff] }
 0x372   : > { %v3111_v33 = vmul.f32 0.5, %v3110_v17  ;;  %v11723_v2 = vadd.f32 1e-06, %v2733_v26  ;;  %v4636_v43 = vmul.f32 %v11648_v21, %v4572_v55  ;;  %v5179_v19 = vmul.f32 %v11465_v63, %v5115_v53  ;;  %v2141_v53 = vpop.xlane.xlu1 %2140 }
 0x373   : > { %v4413_v42 = vadd.f32 1.0, %v4349_v54  ;;  %v6100_v34 = vsub.f32 1.0, %v5972_v22  ;;  %v7511_v30 = vadd.f32 -1.0, %v5972_v22  ;;  %v3432_v28 = vsub.f32 1.5, %v3431_v14  ;;  %v15226_v22 = vld [vmem:[#allocation38_spill] sm:$0xff] }
 0x374   : > { %v5083_v50 = vadd.f32 -0.18628806, %v5019_v51  ;;  %v5659_v29 = vsub.f32 0.0, %v11410_v13  ;;  %v4381_v0 = vadd.f32 1.0, %v4317_v12  ;;  %v5274_v6 = vmul.f32 %v11449_v37, %v5210_v35 }
 0x375   : > { %v4668_v4 = vmul.f32 %v11677_v36, %v4604_v57  ;;  %v2637_v45 = vsub.f32 %v2509_v31, %v2573_v61  ;;  %v6228_v17 = vsel %vm6036_vm2, %v6100_v34, %v7511_v30  ;;  %v5856_v26 = vmul.f32 1.442695, %v5785_v40  ;;  %v15227_v61 = vld [vmem:[#allocation47_spill] sm:$0xff] }
 0x376   : > { %7921 = vrsqrt.f32 %v11723_v2  ;;  %v4700_v55 = vadd.f32 1.4885159, %v4636_v43  ;;  %v6292_v54 = vadd.f32 1.0, %v6228_v17  ;;  %vm6037_vm4 = vcmp.ge.f32.partialorder %v15226_v22, 0.0 }
 0x377   : > { %v5626_v14 = vadd.f32 -1.2655122, %v5562_v39  ;;  %v3112_v51 = vsub.f32 1.5, %v3111_v33  ;;  %vm3114_vm5 = vweird.f32 %v11571_v23  ;;  %v5243_v12 = vadd.f32 0.09678418, %v5179_v19 }
 0x378   : > { %7923 = vrcp.f32 %v4413_v42  ;;  %v5147_v35 = vmul.f32 %v11496_v18, %v5083_v50  ;;  %v6356_v5 = vmul.f32 %v6292_v54, %v15227_v61  ;;  %v3599_v34 = vmul.f32 %v11589_v49, %v3531_v15  ;;  %v3958_v50 = vpop.f32.mrf.mxu0  ;;  %v2045_v61 = vpop.xlane.xlu0 %2044 }
 0x379   : > { %7925 = vrcp.f32 %v4381_v0  ;;  %v5338_v30 = vadd.f32 0.37409195, %v5274_v6  ;;  %v4732_v40 = vadd.f32 1.4885159, %v4668_v4  ;;  %v11739_v57 = vmul.f32 %v9658_v41, %v2141_v53  ;;  %v15229_v0 = vld [vmem:[#allocation66_spill] sm:$0xff] }
 0x37a   : > { %v2701_v31 = vmax.f32 %v2637_v45, 0.0  ;;  %v11742_v62 = vmul.f32 %v11633_v16, %v3432_v28  ;;  %vm3435_vm6 = vweird.f32 %v11633_v16  ;;  %v11746_v33 = vmul.f32 %v5691_v58, %v11384_v59  ;;  %7575 = vmatmul.msk.f32.gmra.mxu1 %vm6426_vm7, %v6356_v5  ;;  %v2468_v28 = vpop.xlane.xlu2 %2467 }
 0x37b   : > { %v4764_v39 = vmul.f32 %v11648_v21, %v4700_v55  ;;  %v3667_v15 = vadd.f32 %v11610_v8, %v3599_v34  ;;  %7927 = vpow2.f32 %v5856_v26  ;;  %v5818_v6 = vadd.f32 %v11597_v25, %v5626_v14  ;;  %v15228_v25 = vld [vmem:[#allocation41_spill] sm:$0xff] }
 0x37c   : > { %vm3115_vm8 = vweird.f32 %v11636_v10  ;;  %v11754_v43 = vmul.f32 %v5659_v29, %v11410_v13  ;;  %v11756_v19 = vpop.eup %7921  ;;  %vm3434_vm9 = vweird.f32 %v11565_v24  ;;  %v11760_v59 = vmul.f32 %v11636_v10, %v3112_v51 }
 0x37d   : > { %v5307_v58 = vmul.f32 %v11465_v63, %v5243_v12  ;;  %v5211_v42 = vadd.f32 0.09678418, %v5147_v35  ;;  %7468 = vmatmul.msk.f32.gmra.mxu0 %vm1964_vm3, %v3667_v15  ;;  %v5973_v4 = vmul.f32 %v15229_v0, %v15228_v25  ;;  %v5402_v13 = vmul.f32 %v11449_v37, %v5338_v30  ;;  %v11777_v35 = vld [vmem:[#allocation3 + $0x1c8] sm:$0xff]  ;;  %vm11790_vm10 = vmor %vm3114_vm5, %vm3115_vm8  ;;  %v15238_v30 = vld [vmem:[#allocation54_spill] sm:$0xff] }
 0x37e   : > { %v11766_v45 = vpop.eup %7923  ;;  %v4796_v29 = vmul.f32 %v11677_v36, %v4732_v40  ;;  %v2606_v17 = vmul.f32 %v11739_v57, %v11739_v57  ;;  %v11772_v26 = vadd.f32 1e-06, %v2701_v31  ;;  %v4828_v53 = vadd.f32 -1.135204, %v4764_v39  ;;  %vm3436_vm11 = vmor %vm3434_vm9, %vm3435_vm6 }
 0x37f   : > { %v11774_v55 = vpop.eup %7925  ;;  %v2542_v54 = vmul.f32 %v2468_v28, %v9658_v41  ;;  %v6101_v14 = vsub.f32 1.0, %v5973_v4  ;;  %v7512_v51 = vadd.f32 -1.0, %v5973_v4  ;;  %v5922_v12 = vmul.f32 1.442695, %v5818_v6  ;;  %v11808_v4 = vld [vmem:[#allocation3 + $0xc8] sm:$0xff] }
 0x380   : > { %15230 = vst [vmem:[#allocation39_spill] sm:$0xff] %v11774_v55  ;;  %v3439_v5 = vmul.f32 %v11756_v19, %v11723_v2  ;;  %v11784_v34 = vadd.f32 %v11303_v48, %v3958_v50  ;;  %v5371_v40 = vadd.f32 0.37409195, %v5307_v58  ;;  %v5275_v31 = vmul.f32 %v11496_v18, %v5211_v42 }
 0x381   : > { %v4541_v39 = vmul.f32 0.17087276, %v11766_v45  ;;  %v6229_v15 = vsel %vm6037_vm4, %v6101_v14, %v7512_v51  ;;  %v11798_v6 = vpop.eup %7927  ;;  %v5466_v28 = vadd.f32 1.0000237, %v5402_v13  ;;  %v3117_v23 = vsel %vm11790_vm10, %v11636_v10, %v11760_v59  ;;  %v15234_v14 = vld [vmem:[#allocation75_spill] sm:$0xff] }
 0x382   : > { %15233 = vst [vmem:[#allocation62_spill] sm:$0xff] %v11798_v6  ;;  %v4860_v50 = vadd.f32 -1.135204, %v4796_v29  ;;  %v4509_v25 = vmul.f32 0.17087276, %v11774_v55  ;;  %v4892_v58 = vmul.f32 %v11648_v21, %v4828_v53  ;;  %7929 = vrsqrt.f32 %v11772_v26 }
 0x383   : > { %v2670_v42 = vsub.f32 %v2542_v54, %v2606_v17  ;;  %v6293_v0 = vadd.f32 1.0, %v6229_v15  ;;  %v3440_v22 = vmul.f32 %v11756_v19, %v3439_v5  ;;  %v11813_v51 = vmul.f32 0.5, %v15234_v14 }
 0x384   : > { %v11816_v10 = vmul.f32 0.70710677, %v11784_v34  ;;  %7931 = vpow2.f32 %v5922_v12  ;;  %v5435_v59 = vmul.f32 %v11465_v63, %v5371_v40  ;;  %v5339_v29 = vadd.f32 0.37409195, %v5275_v31  ;;  %v4054_v31 = vpop.f32.mrf.mxu3 }
 0x385   : > { %15235 = vst [vmem:[#allocation38_spill] sm:$0xff] %v11813_v51  ;;  %v4605_v53 = vadd.f32 -0.82215226, %v4541_v39  ;;  %v11824_v17 = vmul.f32 0.5, %v11519_v11  ;;  %v4924_v54 = vmul.f32 %v11677_v36, %v4860_v50  ;;  %v4573_v5 = vadd.f32 -0.82215226, %v4509_v25 }
 0x386   : > { %15236 = vst [vmem:[#allocation47_spill] sm:$0xff] %v11816_v10  ;;  %v6357_v15 = vmul.f32 %v6293_v0, %v15238_v30  ;;  %v5530_v14 = vmul.f32 %v11449_v37, %v5466_v28  ;;  %v4956_v12 = vadd.f32 0.27886808, %v4892_v58  ;;  %v2734_v13 = vmax.f32 %v2670_v42, 0.0 }
 0x387   : > { %15237 = vst [vmem:[#allocation41_spill] sm:$0xff] %v11824_v17  ;;  %v3437_v40 = vsel %vm3436_vm11, %v11633_v16, %v11742_v62  ;;  %v3441_v39 = vmul.f32 0.5, %v3440_v22  ;;  %v5660_v24 = vsub.f32 0.0, %v11545_v20  ;;  %v11833_v11 = vand.u32 2147483647, %v11816_v10 }
 0x388   : > { %7576 = vmatmul.msk.f32.gmra.mxu1 %vm6426_vm7, %v6357_v15  ;;  %v15239_v50 = vsub.f32 %v11599_v60, %v11479_v47  ;;  %v11839_v28 = vpop.eup %7929  ;;  %v5499_v58 = vadd.f32 1.0000237, %v5435_v59  ;;  %v5403_v42 = vmul.f32 %v11496_v18, %v5339_v29  ;;  %v4669_v16 = vmul.f32 %v11766_v45, %v4605_v53 }
 0x389   : > { %v15240_v62 = vsub.f32 %v11650_v9, %v11486_v52  ;;  %v4988_v22 = vadd.f32 0.27886808, %v4924_v54  ;;  %v4637_v30 = vmul.f32 %v11774_v55, %v4573_v5  ;;  %v11849_v10 = vadd.f32 %v11303_v48, %v4054_v31 }
 0x38a   : > { %v3564_v25 = vmul.f32 %v3437_v40, %v15239_v50  ;;  %v11851_v47 = vpop.eup %7931  ;;  %v5594_v60 = vadd.f32 -1.2655122, %v5530_v14  ;;  %vm3444_vm12 = vweird.f32 %v11723_v2  ;;  %v5020_v59 = vmul.f32 %v11648_v21, %v4956_v12  ;;  %v2372_v40 = vpop.xlane.xlu1 %2371 }
 0x38b   : > { %v3532_v0 = vmul.f32 %v3117_v23, %v15240_v62  ;;  %15241 = vst [vmem:[#allocation66_spill] sm:$0xff] %v11851_v47  ;;  %v11855_v29 = vadd.f32 1e-06, %v2734_v13  ;;  %v11858_v52 = vmul.f32 %v9658_v41, %v2045_v61  ;;  %v3119_v9 = vmul.f32 %v11839_v28, %v11772_v26  ;;  %v15269_v47 = vld [vmem:[#allocation52_spill] sm:$0xff] }
 0x38c   : > { %v3632_v15 = vmul.f32 %v11589_v49, %v3564_v25  ;;  %v4318_v23 = vmul.f32 0.5, %v11833_v11  ;;  %v5563_v54 = vmul.f32 %v11465_v63, %v5499_v58  ;;  %v3442_v5 = vsub.f32 1.5, %v3441_v39 }
 0x38d   : > { %v3600_v53 = vmul.f32 %v11589_v49, %v3532_v0  ;;  %v4733_v14 = vadd.f32 1.4885159, %v4669_v16  ;;  %v11867_v12 = vmul.f32 0.70710677, %v11849_v10  ;;  %v5467_v13 = vadd.f32 1.0000237, %v5403_v42 }
 0x38e   : > { %v3700_v48 = vadd.f32 %v11610_v8, %v3632_v15  ;;  %v5052_v61 = vmul.f32 %v11677_v36, %v4988_v22  ;;  %v4701_v31 = vadd.f32 1.4885159, %v4637_v30  ;;  %v5084_v25 = vadd.f32 -0.18628806, %v5020_v59  ;;  %v15243_v16 = vld [vmem:[#allocation40_spill] sm:$0xff] }
 0x38f   : > { %15242 = vst [vmem:[#allocation75_spill] sm:$0xff] %v11867_v12  ;;  %v3668_v50 = vadd.f32 %v11610_v8, %v3600_v53  ;;  %v2510_v62 = vmul.f32 %v2372_v40, %v9658_v41  ;;  %v2574_v58 = vmul.f32 %v11858_v52, %v11858_v52  ;;  %v11876_v39 = vand.u32 2147483647, %v11867_v12 }
 0x390   : > { %7501 = vmatmul.msk.f32.gmra.mxu3 %vm1964_vm3, %v3700_v48  ;;  %vm6038_vm13 = vcmp.ge.f32.partialorder %v15243_v16, 0.0  ;;  %v5786_v42 = vadd.f32 %v11669_v27, %v5594_v60  ;;  %v3120_v0 = vmul.f32 %v11839_v28, %v3119_v9  ;;  %7933 = vrsqrt.f32 %v11855_v29 }
 0x391   : > { %v4382_v22 = vadd.f32 1.0, %v4318_v23  ;;  %7469 = vmatmul.msk.f32.gmra.mxu0 %vm1964_vm3, %v3668_v50  ;;  %v5627_v30 = vadd.f32 -1.2655122, %v5563_v54  ;;  %v3443_v15 = vmul.f32 %v11756_v19, %v3442_v5  ;;  %vm3445_vm14 = vweird.f32 %v11756_v19  ;;  %v11893_v23 = vld [vmem:[#allocation3 + $0x1d0] sm:$0xff] }
 0x392   : > { %v4797_v59 = vmul.f32 %v11766_v45, %v4733_v14  ;;  %v5531_v48 = vmul.f32 %v11496_v18, %v5467_v13  ;;  %v5116_v53 = vadd.f32 -0.18628806, %v5052_v61  ;;  %v4765_v40 = vmul.f32 %v11774_v55, %v4701_v31  ;;  %vm11899_vm15 = vmor %vm3444_vm12, %vm3445_vm14  ;;  %v2144_v14 = vpop.xlane.xlu2 %2143 }
 0x393   : > { %v4350_v27 = vmul.f32 0.5, %v11876_v39  ;;  %v5148_v60 = vmul.f32 %v11648_v21, %v5084_v25  ;;  %v11891_v9 = vmul.f32 %v5660_v24, %v11545_v20  ;;  %v2638_v5 = vsub.f32 %v2510_v62, %v2574_v58  ;;  %v15246_v25 = vld [vmem:[#allocation44_spill] sm:$0xff]  ;;  %v15247_v62 = vld [vmem:[#allocation71_spill] sm:$0xff] }
 0x394   : > { %v5858_v50 = vmul.f32 1.442695, %v5786_v42  ;;  %v5692_v13 = vsub.f32 0.0, %v11558_v1  ;;  %v3121_v61 = vmul.f32 0.5, %v3120_v0  ;;  %7935 = vrcp.f32 %v4382_v22 }
 0x395   : > { %v5819_v20 = vadd.f32 %v11746_v33, %v5627_v30  ;;  %v3447_v24 = vsel %vm11899_vm15, %v11756_v19, %v3443_v15  ;;  %v4861_v31 = vadd.f32 -1.135204, %v4797_v59  ;;  %v5974_v58 = vmul.f32 %v15247_v62, %v15246_v25 }
 0x396   : > { %v11910_v42 = vpop.eup %7933  ;;  %v5595_v2 = vadd.f32 -1.2655122, %v5531_v48  ;;  %v5180_v54 = vmul.f32 %v11677_v36, %v5116_v53  ;;  %v4829_v12 = vadd.f32 -1.135204, %v4765_v40  ;;  %v4414_v17 = vadd.f32 1.0, %v4350_v27 }
 0x397   : > { %v5212_v51 = vadd.f32 0.09678418, %v5148_v60  ;;  %v2702_v0 = vmax.f32 %v2638_v5, 0.0  ;;  %v6102_v22 = vsub.f32 1.0, %v5974_v58  ;;  %v7513_v18 = vadd.f32 -1.0, %v5974_v58 }
 0x398   : > { %7937 = vpow2.f32 %v5858_v50  ;;  %v15248_v33 = vsub.f32 %v11777_v35, %v11625_v3  ;;  %v11917_v30 = vmul.f32 %v5692_v13, %v11558_v1  ;;  %v3122_v15 = vsub.f32 1.5, %v3121_v61 }
 0x399   : > { %v5924_v59 = vmul.f32 1.442695, %v5819_v20  ;;  %v3449_v48 = vmul.f32 %v11910_v42, %v11855_v29  ;;  %v4925_v53 = vmul.f32 %v11766_v45, %v4861_v31  ;;  %v6230_v40 = vsel %vm6038_vm13, %v6102_v22, %v7513_v18 }
 0x39a   : > { %v3565_v19 = vmul.f32 %v3447_v24, %v15248_v33  ;;  %v11924_v27 = vpop.eup %7935  ;;  %v5244_v60 = vadd.f32 0.09678418, %v5180_v54  ;;  %v5693_v5 = vsub.f32 0.0, %v11690_v32  ;;  %v4893_v3 = vmul.f32 %v11774_v55, %v4829_v12  ;;  %v3961_v54 = vpop.f32.mrf.mxu0 }
 0x39b   : > { %15249 = vst [vmem:[#allocation54_spill] sm:$0xff] %v11924_v27  ;;  %7939 = vrcp.f32 %v4414_v17  ;;  %v5787_v1 = vadd.f32 %v11754_v43, %v5595_v2  ;;  %v5276_v35 = vmul.f32 %v11648_v21, %v5212_v51  ;;  %v11930_v50 = vadd.f32 1e-06, %v2702_v0  ;;  %v15251_v51 = vld [vmem:[#allocation56_spill] sm:$0xff]  ;;  %v4057_v0 = vpop.f32.mrf.mxu3 }
 0x39c   : > { %v6294_v13 = vadd.f32 1.0, %v6230_v40  ;;  %v11933_v61 = vmul.f32 %v11839_v28, %v3122_v15  ;;  %vm3124_vm0 = vweird.f32 %v11772_v26  ;;  %vm3125_vm1 = vweird.f32 %v11839_v28  ;;  %v11974_v15 = vld [vmem:[%s14745_s7] ss:$0 sm:$0xff]  ;;  %v2048_v40 = vpop.xlane.xlu1 %2047 }
 0x39d   : > { %v11938_v18 = vmul.f32 0.5, %v11631_v38  ;;  %v3450_v17 = vmul.f32 %v11910_v42, %v3449_v48  ;;  %v4989_v12 = vadd.f32 0.27886808, %v4925_v53  ;;  %v4510_v43 = vmul.f32 0.17087276, %v11924_v27  ;;  %vm11951_vm2 = vmor %vm3124_vm0, %vm3125_vm1 }
 0x39e   : > { %v6358_v16 = vmul.f32 %v6294_v13, %v15251_v51  ;;  %v11943_v20 = vpop.eup %7937  ;;  %7941 = vpow2.f32 %v5924_v59  ;;  %v5308_v24 = vmul.f32 %v11677_v36, %v5244_v60  ;;  %v11947_v31 = vmul.f32 0.5, %v11646_v46  ;;  %v15257_v46 = vld [vmem:[#allocation42_spill] sm:$0xff] }
 0x39f   : > { %15250 = vst [vmem:[#allocation40_spill] sm:$0xff] %v11938_v18  ;;  %v4957_v25 = vadd.f32 0.27886808, %v4893_v3  ;;  %v5860_v62 = vmul.f32 1.442695, %v5787_v1  ;;  %v11956_v2 = vmul.f32 %v5693_v5, %v11690_v32  ;;  %7943 = vrsqrt.f32 %v11930_v50  ;;  %v2471_v5 = vpop.xlane.xlu0 %2470  ;;  %v15259_v3 = vld [vmem:[#allocation48_spill] sm:$0xff] }
 0x3a0   : > { %15252 = vst [vmem:[#allocation44_spill] sm:$0xff] %v11943_v20  ;;  %v5340_v38 = vadd.f32 0.37409195, %v5276_v35  ;;  %7577 = vmatmul.msk.f32.gmra.mxu1 %vm6426_vm7, %v6358_v16  ;;  %vm6072_vm4 = vcmp.ge.f32.partialorder %v15257_v46, 0.0  ;;  %v11968_v33 = vmul.f32 %v9658_v41, %v2144_v14  ;;  %v3633_v32 = vmul.f32 %v11589_v49, %v3565_v19  ;;  %v15260_v1 = vld [vmem:[#allocation35_spill] sm:$0xff] }
 0x3a1   : > { %15253 = vst [vmem:[#allocation71_spill] sm:$0xff] %v11947_v31  ;;  %v11960_v22 = vpop.eup %7939  ;;  %v11977_v59 = vadd.f32 %v11974_v15, %v3961_v54  ;;  %v3451_v48 = vmul.f32 0.5, %v3450_v17  ;;  %v5053_v53 = vmul.f32 %v11766_v45, %v4989_v12  ;;  %v4574_v60 = vadd.f32 -0.82215226, %v4510_v43 }
 0x3a2   : > { %15256 = vst [vmem:[#allocation56_spill] sm:$0xff] %v11960_v22  ;;  %v6008_v35 = vmul.f32 %v15260_v1, %v15259_v3  ;;  %v5372_v14 = vadd.f32 0.37409195, %v5308_v24  ;;  %v5021_v19 = vmul.f32 %v11774_v55, %v4957_v25  ;;  %v3701_v13 = vadd.f32 %v11610_v8, %v3633_v32  ;;  %v2375_v1 = vpop.xlane.xlu2 %2374 }
 0x3a3   : > { %15258 = vst [vmem:[#allocation42_spill] sm:$0xff] %v11977_v59  ;;  %v11985_v51 = vadd.f32 %v11974_v15, %v4057_v0  ;;  %v5404_v16 = vmul.f32 %v11648_v21, %v5340_v38  ;;  %v5661_v17 = vsub.f32 0.0, %v11697_v56  ;;  %v4542_v12 = vmul.f32 0.17087276, %v11960_v22 }
 0x3a4   : > { %v11991_v43 = vmul.f32 0.70710677, %v11977_v59  ;;  %v11993_v54 = vpop.eup %7941  ;;  %7945 = vpow2.f32 %v5860_v62  ;;  %v2607_v24 = vmul.f32 %v11968_v33, %v11968_v33  ;;  %v11998_v25 = vmul.f32 %v9658_v41, %v2048_v40  ;;  %7502 = vmatmul.msk.f32.gmra.mxu3 %vm1964_vm3, %v3701_v13 }
 0x3a5   : > { %15261 = vst [vmem:[#allocation48_spill] sm:$0xff] %v11985_v51  ;;  %v2543_v0 = vmul.f32 %v2471_v5, %v9658_v41  ;;  %v12002_v38 = vpop.eup %7943  ;;  %v5117_v32 = vadd.f32 -0.18628806, %v5053_v53  ;;  %v4638_v3 = vmul.f32 %v11924_v27, %v4574_v60  ;;  %v6136_v26 = vsub.f32 1.0, %v6008_v35  ;;  %v15266_v60 = vld [vmem:[#allocation46_spill] sm:$0xff] }
 0x3a6   : > { %15262 = vst [vmem:[#allocation35_spill] sm:$0xff] %v11991_v43  ;;  %v7547_v31 = vadd.f32 -1.0, %v6008_v35  ;;  %v5436_v62 = vmul.f32 %v11677_v36, %v5372_v14  ;;  %v3452_v18 = vsub.f32 1.5, %v3451_v48  ;;  %v12007_v63 = vmul.f32 0.70710677, %v11985_v51 }
 0x3a7   : > { %15263 = vst [vmem:[#allocation83_spill] sm:$0xff] %v11993_v54  ;;  %v5085_v54 = vadd.f32 -0.18628806, %v5021_v19  ;;  %v5468_v40 = vadd.f32 1.0000237, %v5404_v16  ;;  %vm3455_vm5 = vweird.f32 %v11910_v42  ;;  %v12011_v5 = vmul.f32 %v5661_v17, %v11697_v56  ;;  %v12024_v16 = vld [vmem:[#allocation3 + $0xd0] sm:$0xff] }
 0x3a8   : > { %15264 = vst [vmem:[#allocation84_spill] sm:$0xff] %v12007_v63  ;;  %v4606_v13 = vadd.f32 -0.82215226, %v4542_v12  ;;  %v12014_v53 = vand.u32 2147483647, %v11991_v43  ;;  %vm6039_vm6 = vcmp.ge.f32.partialorder %v15266_v60, 0.0  ;;  %v3129_v35 = vmul.f32 %v12002_v38, %v11930_v50 }
 0x3a9   : > { %v2575_v48 = vmul.f32 %v11998_v25, %v11998_v25  ;;  %v2671_v14 = vsub.f32 %v2543_v0, %v2607_v24  ;;  %v2511_v19 = vmul.f32 %v2375_v1, %v9658_v41  ;;  %vm3454_vm8 = vweird.f32 %v11855_v29 }
 0x3aa   : > { %15265 = vst [vmem:[#allocation85_spill] sm:$0xff] %v12014_v53  ;;  %v5181_v56 = vmul.f32 %v11766_v45, %v5117_v32  ;;  %v4702_v12 = vadd.f32 1.4885159, %v4638_v3  ;;  %v6264_v43 = vsel %vm6072_vm4, %v6136_v26, %v7547_v31  ;;  %v12030_v20 = vpop.eup %7945  ;;  %v5500_v37 = vadd.f32 1.0000237, %v5436_v62  ;;  %v12037_v32 = vld [vmem:[#allocation3 + $0x1d8] sm:$0xff]  ;;  %vm12070_vm9 = vmor %vm3454_vm8, %vm3455_vm5 }
 0x3ab   : > { %15267 = vst [vmem:[#allocation46_spill] sm:$0xff] %v12030_v20  ;;  %v3453_v24 = vmul.f32 %v11910_v42, %v3452_v18  ;;  %v5149_v0 = vmul.f32 %v11774_v55, %v5085_v54  ;;  %v12035_v1 = vand.u32 2147483647, %v12007_v63  ;;  %v4670_v3 = vmul.f32 %v11960_v22, %v4606_v13  ;;  %v15268_v20 = vld [vmem:[#allocation60_spill] sm:$0xff] }
 0x3ac   : > { %v4319_v46 = vmul.f32 0.5, %v12014_v53  ;;  %v6328_v31 = vadd.f32 1.0, %v6264_v43  ;;  %v5532_v26 = vmul.f32 %v11648_v21, %v5468_v40  ;;  %v3130_v62 = vmul.f32 %v12002_v38, %v3129_v35 }
 0x3ad   : > { %v2735_v18 = vmax.f32 %v2671_v14, 0.0  ;;  %v2639_v17 = vsub.f32 %v2511_v19, %v2575_v48  ;;  %v5245_v54 = vadd.f32 0.09678418, %v5181_v56  ;;  %v4766_v63 = vmul.f32 %v11924_v27, %v4702_v12  ;;  %v2147_v12 = vpop.xlane.xlu0 %2146 }
 0x3ae   : > { %v6392_v59 = vmul.f32 %v6328_v31, %v15268_v20  ;;  %v5975_v6 = vmul.f32 %v15270_v7, %v15269_v47  ;;  %v5564_v51 = vmul.f32 %v11677_v36, %v5500_v37  ;;  %v5213_v13 = vadd.f32 0.09678418, %v5149_v0  ;;  %v15275_v31 = vld [vmem:[#allocation63_spill] sm:$0xff] }
 0x3af   : > { %v4351_v53 = vmul.f32 0.5, %v12035_v1  ;;  %v15271_v43 = vsub.f32 %v11808_v4, %v11694_v44  ;;  %v15272_v40 = vsel %vm11951_vm2, %v11839_v28, %v11933_v61  ;;  %v4734_v48 = vadd.f32 1.4885159, %v4670_v3 }
 0x3b0   : > { %v4383_v14 = vadd.f32 1.0, %v4319_v46  ;;  %7611 = vmatmul.msk.f32.vlgmr.msra.gmra.mxu2 %vm6426_vm7, %v6392_v59  ;;  %v6103_v20 = vsub.f32 1.0, %v5975_v6  ;;  %v7514_v7 = vadd.f32 -1.0, %v5975_v6  ;;  %v5596_v47 = vadd.f32 -1.2655122, %v5532_v26 }
 0x3b1   : > { %v3533_v35 = vmul.f32 %v15272_v40, %v15271_v43  ;;  %v3131_v37 = vmul.f32 0.5, %v3130_v62  ;;  %v12060_v19 = vadd.f32 1e-06, %v2735_v18  ;;  %v5309_v44 = vmul.f32 %v11766_v45, %v5245_v54 }
 0x3b2   : > { %v4830_v4 = vadd.f32 -1.135204, %v4766_v63  ;;  %v2703_v58 = vmax.f32 %v2639_v17, 0.0  ;;  %v6231_v28 = vsel %vm6039_vm6, %v6103_v20, %v7514_v7  ;;  %v5277_v61 = vmul.f32 %v11774_v55, %v5213_v13 }
 0x3b3   : > { %v3601_v56 = vmul.f32 %v11589_v49, %v3533_v35  ;;  %v4415_v59 = vadd.f32 1.0, %v4351_v53  ;;  %v6295_v0 = vadd.f32 1.0, %v6231_v28  ;;  %v5628_v63 = vadd.f32 -1.2655122, %v5564_v51  ;;  %v4060_v53 = vpop.f32.mrf.mxu3  ;;  %v12086_v51 = vld [vmem:[#allocation3 + $0xd8] sm:$0xff]  ;;  %v3964_v28 = vpop.f32.mrf.mxu0 }
 0x3b4   : > { %v4798_v17 = vmul.f32 %v11960_v22, %v4734_v48  ;;  %7947 = vrcp.f32 %v4383_v14  ;;  %v3457_v60 = vsel %vm12070_vm9, %v11910_v42, %v3453_v24  ;;  %v3132_v46 = vsub.f32 1.5, %v3131_v37  ;;  %v2474_v14 = vpop.xlane.xlu1 %2473 }
 0x3b5   : > { %v3669_v3 = vadd.f32 %v11610_v8, %v3601_v56  ;;  %7949 = vrsqrt.f32 %v12060_v19  ;;  %v12082_v29 = vmul.f32 %v9658_v41, %v2147_v12  ;;  %v6359_v26 = vmul.f32 %v6295_v0, %v15275_v31 }
 0x3b6   : > { %v5373_v62 = vadd.f32 0.37409195, %v5309_v44  ;;  %v4894_v54 = vmul.f32 %v11924_v27, %v4830_v4  ;;  %v12091_v42 = vadd.f32 1e-06, %v2703_v58  ;;  %v5788_v24 = vadd.f32 %v11891_v9, %v5596_v47 }
 0x3b7   : > { %7470 = vmatmul.msk.f32.gmra.mxu0 %vm1964_vm3, %v3669_v3  ;;  %v5341_v13 = vadd.f32 0.37409195, %v5277_v61  ;;  %7951 = vrcp.f32 %v4415_v59  ;;  %7578 = vmatmul.msk.f32.gmra.mxu1 %vm6426_vm7, %v6359_v26  ;;  %v15276_v43 = vsub.f32 %v11893_v23, %v11739_v57  ;;  %v5820_v35 = vadd.f32 %v11917_v30, %v5628_v63 }
 0x3b8   : > { %vm3135_vm10 = vweird.f32 %v12002_v38  ;;  %v4862_v48 = vadd.f32 -1.135204, %v4798_v17  ;;  %v12101_v20 = vadd.f32 %v11974_v15, %v4060_v53  ;;  %v3133_v7 = vmul.f32 %v12002_v38, %v3132_v46  ;;  %v15281_v46 = vld [vmem:[#allocation49_spill] sm:$0xff] }
 0x3b9   : > { %v3566_v40 = vmul.f32 %v3457_v60, %v15276_v43  ;;  %v2544_v9 = vmul.f32 %v2474_v14, %v9658_v41  ;;  %v2608_v47 = vmul.f32 %v12082_v29, %v12082_v29  ;;  %v5437_v23 = vmul.f32 %v11766_v45, %v5373_v62 }
 0x3ba   : > { %v12108_v57 = vpop.eup %7947  ;;  %v4958_v30 = vadd.f32 0.27886808, %v4894_v54  ;;  %7953 = vrsqrt.f32 %v12091_v42  ;;  %v12113_v56 = vmul.f32 0.70710677, %v12101_v20  ;;  %v5862_v4 = vmul.f32 1.442695, %v5788_v24 }
 0x3bb   : > { %v3634_v37 = vmul.f32 %v11589_v49, %v3566_v40  ;;  %v12115_v44 = vpop.eup %7949  ;;  %v5405_v58 = vmul.f32 %v11774_v55, %v5341_v13  ;;  %vm3134_vm11 = vweird.f32 %v11930_v50  ;;  %v5926_v6 = vmul.f32 1.442695, %v5820_v35  ;;  %v15282_v54 = vld [vmem:[#allocation57_spill] sm:$0xff]  ;;  %v15283_v24 = vld [vmem:[#allocation36_spill] sm:$0xff] }
 0x3bc   : > { %15277 = vst [vmem:[#allocation60_spill] sm:$0xff] %v12113_v56  ;;  %vm12122_vm12 = vmor %vm3134_vm11, %vm3135_vm10  ;;  %v5662_v59 = vsub.f32 0.0, %v11833_v11  ;;  %v4926_v0 = vmul.f32 %v11960_v22, %v4862_v48  ;;  %v12129_v3 = vand.u32 2147483647, %v12113_v56  ;;  %v12137_v50 = vmul.f32 0.5, %v11784_v34  ;;  %v15297_v56 = vld [vmem:[#allocation65_spill] sm:$0xff] }
 0x3bd   : > { %v3702_v12 = vadd.f32 %v11610_v8, %v3634_v37  ;;  %v12131_v63 = vpop.eup %7951  ;;  %v3137_v8 = vsel %vm12122_vm12, %v12002_v38, %v3133_v7  ;;  %v2672_v17 = vsub.f32 %v2544_v9, %v2608_v47  ;;  %v4511_v60 = vmul.f32 0.17087276, %v12108_v57 }
 0x3be   : > { %15280 = vst [vmem:[#allocation52_spill] sm:$0xff] %v12137_v50  ;;  %vm6040_vm13 = vcmp.ge.f32.partialorder %v15281_v46, 0.0  ;;  %v5501_v31 = vadd.f32 1.0000237, %v5437_v23  ;;  %v5022_v26 = vmul.f32 %v11924_v27, %v4958_v30  ;;  %v3459_v53 = vmul.f32 %v12115_v44, %v12060_v19  ;;  %v15300_v50 = vld [vmem:[#allocation42_spill] sm:$0xff] }
 0x3bf   : > { %7503 = vmatmul.msk.f32.gmra.mxu3 %vm1964_vm3, %v3702_v12  ;;  %v12146_v62 = vadd.f32 %v11974_v15, %v3964_v28  ;;  %7955 = vpow2.f32 %v5862_v4  ;;  %v5469_v38 = vadd.f32 1.0000237, %v5405_v58  ;;  %v4352_v34 = vmul.f32 0.5, %v12129_v3  ;;  %v2051_v58 = vpop.xlane.xlu2 %2050 }
 0x3c0   : > { %v5976_v13 = vmul.f32 %v15283_v24, %v15282_v54  ;;  %v12151_v43 = vpop.eup %7953  ;;  %7957 = vpow2.f32 %v5926_v6  ;;  %v12154_v40 = vmul.f32 %v5662_v59, %v11833_v11  ;;  %v4990_v35 = vadd.f32 0.27886808, %v4926_v0  ;;  %v2378_v24 = vpop.xlane.xlu0 %2377 }
 0x3c1   : > { %v4543_v48 = vmul.f32 0.17087276, %v12131_v63  ;;  %v15284_v14 = vsub.f32 %v12024_v16, %v11858_v52  ;;  %v12161_v9 = vmul.f32 0.5, %v11849_v10  ;;  %v2736_v47 = vmax.f32 %v2672_v17, 0.0  ;;  %v15287_v10 = vld [vmem:[#allocation50_spill] sm:$0xff] }
 0x3c2   : > { %v4575_v37 = vadd.f32 -0.82215226, %v4511_v60  ;;  %v5565_v23 = vmul.f32 %v11766_v45, %v5501_v31  ;;  %v5086_v30 = vadd.f32 -0.18628806, %v5022_v26  ;;  %v3460_v4 = vmul.f32 %v12115_v44, %v3459_v53 }
 0x3c3   : > { %v3534_v7 = vmul.f32 %v3137_v8, %v15284_v14  ;;  %15285 = vst [vmem:[#allocation45_spill] sm:$0xff] %v12161_v9  ;;  %v12166_v11 = vmul.f32 0.70710677, %v12146_v62  ;;  %v5533_v12 = vmul.f32 %v11774_v55, %v5469_v38  ;;  %v3139_v52 = vmul.f32 %v12151_v43, %v12091_v42 }
 0x3c4   : > { %v4416_v16 = vadd.f32 1.0, %v4352_v34  ;;  %v6104_v28 = vsub.f32 1.0, %v5976_v13  ;;  %vm6073_vm14 = vcmp.ge.f32.partialorder %v15287_v10, 0.0  ;;  %v5054_v6 = vmul.f32 %v11960_v22, %v4990_v35 }
 0x3c5   : > { %15286 = vst [vmem:[#allocation63_spill] sm:$0xff] %v12166_v11  ;;  %v5694_v61 = vsub.f32 0.0, %v11876_v39  ;;  %v12175_v59 = vmul.f32 %v9658_v41, %v2051_v58  ;;  %v4607_v0 = vadd.f32 -0.82215226, %v4543_v48  ;;  %v12177_v8 = vpop.eup %7955  ;;  %v3602_v17 = vmul.f32 %v11589_v49, %v3534_v7  ;;  %v15288_v58 = vld [vmem:[#allocation58_spill] sm:$0xff] }
 0x3c6   : > { %v12180_v60 = vadd.f32 1e-06, %v2736_v47  ;;  %v4639_v31 = vmul.f32 %v12108_v57, %v4575_v37  ;;  %v7515_v26 = vadd.f32 -1.0, %v5976_v13  ;;  %v12183_v53 = vpop.eup %7957  ;;  %v5629_v38 = vadd.f32 -1.2655122, %v5565_v23  ;;  %v2150_v37 = vpop.xlane.xlu1 %2149 }
 0x3c7   : > { %v5150_v34 = vmul.f32 %v11924_v27, %v5086_v30  ;;  %v12186_v54 = vmul.f32 0.5, %v3460_v4  ;;  %v12189_v35 = vand.u32 2147483647, %v12166_v11  ;;  %v5597_v48 = vadd.f32 -1.2655122, %v5533_v12  ;;  %v15289_v12 = vld [vmem:[#allocation81_spill] sm:$0xff] }
 0x3c8   : > { %v3140_v14 = vmul.f32 %v12151_v43, %v3139_v52  ;;  %7959 = vrcp.f32 %v4416_v16  ;;  %v6232_v49 = vsel %vm6040_vm13, %v6104_v28, %v7515_v26  ;;  %v5118_v7 = vadd.f32 -0.18628806, %v5054_v6  ;;  %v15290_v6 = vld [vmem:[#allocation68_spill] sm:$0xff] }
 0x3c9   : > { %v2576_v13 = vmul.f32 %v12175_v59, %v12175_v59  ;;  %v4671_v47 = vmul.f32 %v12131_v63, %v4607_v0  ;;  %v6296_v23 = vadd.f32 1.0, %v6232_v49  ;;  %7961 = vrsqrt.f32 %v12180_v60 }
 0x3ca   : > { %v4703_v30 = vadd.f32 1.4885159, %v4639_v31  ;;  %v2512_v4 = vmul.f32 %v2378_v24, %v9658_v41  ;;  %v6009_v52 = vmul.f32 %v15289_v12, %v15288_v58  ;;  %v5214_v16 = vadd.f32 0.09678418, %v5150_v34  ;;  %v2477_v12 = vpop.xlane.xlu2 %2476 }
 0x3cb   : > { %v12202_v46 = vmul.f32 %v5694_v61, %v11876_v39  ;;  %v4320_v28 = vmul.f32 0.5, %v12189_v35  ;;  %v6360_v26 = vmul.f32 %v6296_v23, %v15290_v6  ;;  %v5821_v0 = vadd.f32 %v11956_v2, %v5629_v38 }
 0x3cc   : > { %v12208_v49 = vmul.f32 %v9658_v41, %v2150_v37  ;;  %v6137_v18 = vsub.f32 1.0, %v6009_v52  ;;  %v7548_v31 = vadd.f32 -1.0, %v6009_v52  ;;  %v3462_v24 = vsub.f32 1.5, %v12186_v54 }
 0x3cd   : > { %v3141_v11 = vmul.f32 0.5, %v3140_v14  ;;  %v5182_v58 = vmul.f32 %v11960_v22, %v5118_v7  ;;  %v4735_v34 = vadd.f32 1.4885159, %v4671_v47  ;;  %7579 = vmatmul.msk.f32.gmra.mxu1 %vm6426_vm7, %v6360_v26  ;;  %v5789_v61 = vadd.f32 %v12011_v5, %v5597_v48  ;;  %v12223_v7 = vld [vmem:[%s14743_s5] ss:$0 sm:$0xff]  ;;  %v3967_v48 = vpop.f32.mrf.mxu0 }
 0x3ce   : > { %v12213_v39 = vpop.eup %7959  ;;  %v4767_v2 = vmul.f32 %v12108_v57, %v4703_v30  ;;  %v2640_v38 = vsub.f32 %v2512_v4, %v2576_v13  ;;  %v6265_v37 = vsel %vm6073_vm14, %v6137_v18, %v7548_v31  ;;  %v5278_v23 = vmul.f32 %v11924_v27, %v5214_v16  ;;  %v15291_v13 = vld [vmem:[#allocation55_spill] sm:$0xff]  ;;  %v15292_v16 = vld [vmem:[#allocation69_spill] sm:$0xff] }
 0x3cf   : > { %v4384_v54 = vadd.f32 1.0, %v4320_v28  ;;  %v6329_v14 = vadd.f32 1.0, %v6265_v37  ;;  %v3670_v47 = vadd.f32 %v12223_v7, %v3602_v17  ;;  %v12226_v52 = vpop.eup %7961  ;;  %v5928_v5 = vmul.f32 1.442695, %v5821_v0 }
 0x3d0   : > { %vm3145_vm15 = vweird.f32 %v12151_v43  ;;  %v2609_v10 = vmul.f32 %v12208_v49, %v12208_v49  ;;  %v2545_v18 = vmul.f32 %v2477_v12, %v9658_v41  ;;  %vm6041_vm0 = vcmp.ge.f32.partialorder %v15291_v13, 0.0 }
 0x3d1   : > { %vm3144_vm1 = vweird.f32 %v12091_v42  ;;  %v5246_v30 = vadd.f32 0.09678418, %v5182_v58  ;;  %v4799_v4 = vmul.f32 %v12131_v63, %v4735_v34  ;;  %v4544_v17 = vmul.f32 0.17087276, %v12213_v39  ;;  %7471 = vmatmul.msk.f32.gmra.mxu0 %vm1964_vm3, %v3670_v47  ;;  %v15294_v47 = vld [vmem:[#allocation62_spill] sm:$0xff]  ;;  %v15305_v42 = vld [vmem:[#allocation48_spill] sm:$0xff] }
 0x3d2   : > { %v6393_v28 = vmul.f32 %v6329_v14, %v15292_v16  ;;  %v5864_v6 = vmul.f32 1.442695, %v5789_v61  ;;  %v3142_v26 = vsub.f32 1.5, %v3141_v11  ;;  %v4831_v0 = vadd.f32 -1.135204, %v4767_v2  ;;  %v12248_v61 = vld [vmem:[#allocation3 + $0x1e0] sm:$0xff]  ;;  %vm12287_vm6 = vmor %vm3144_vm1, %vm3145_vm15 }
 0x3d3   : > { %v2704_v31 = vmax.f32 %v2640_v38, 0.0  ;;  %v5342_v37 = vadd.f32 0.37409195, %v5278_v23  ;;  %vm3465_vm2 = vweird.f32 %v12115_v44  ;;  %v3469_v12 = vmul.f32 %v12226_v52, %v12180_v60  ;;  %v15293_v14 = vld [vmem:[#allocation61_spill] sm:$0xff]  ;;  %v15298_v16 = vld [vmem:[#allocation66_spill] sm:$0xff] }
 0x3d4   : > { %7963 = vrcp.f32 %v4384_v54  ;;  %7612 = vmatmul.msk.f32.gmra.mxu2 %vm6426_vm7, %v6393_v28  ;;  %v12243_v58 = vadd.f32 %v11974_v15, %v3967_v48  ;;  %v12246_v34 = vmul.f32 %v12115_v44, %v3462_v24  ;;  %v2673_v2 = vsub.f32 %v2545_v18, %v2609_v10  ;;  %v12259_v24 = vld [vmem:[#allocation3 + $0xe0] sm:$0xff] }
 0x3d5   : > { %7965 = vpow2.f32 %v5928_v5  ;;  %vm3464_vm4 = vweird.f32 %v12060_v19  ;;  %v5310_v38 = vmul.f32 %v11960_v22, %v5246_v30  ;;  %v4863_v23 = vadd.f32 -1.135204, %v4799_v4  ;;  %v15295_v18 = vld [vmem:[#allocation59_spill] sm:$0xff] }
 0x3d6   : > { %v4608_v54 = vadd.f32 -0.82215226, %v4544_v17  ;;  %v5977_v48 = vmul.f32 %v15294_v47, %v15293_v14  ;;  %v12257_v5 = vmul.f32 %v12151_v43, %v3142_v26  ;;  %v4895_v28 = vmul.f32 %v12108_v57, %v4831_v0  ;;  %v2054_v17 = vpop.xlane.xlu0 %2053  ;;  %vm3466_vm8 = vmor %vm3464_vm4, %vm3465_vm2 }
 0x3d7   : > { %v12264_v10 = vadd.f32 1e-06, %v2704_v31  ;;  %vm6074_vm5 = vcmp.ge.f32.partialorder %v15295_v18, 0.0  ;;  %7967 = vpow2.f32 %v5864_v6  ;;  %v5406_v30 = vmul.f32 %v11924_v27, %v5342_v37  ;;  %v12341_v18 = vld [vmem:[%s14742_s4] ss:$0 sm:$0xff] }
 0x3d8   : > { %v3470_v4 = vmul.f32 %v12226_v52, %v3469_v12  ;;  %v12270_v26 = vmul.f32 0.70710677, %v12243_v58  ;;  %v2737_v14 = vmax.f32 %v2673_v2, 0.0  ;;  %v6105_v47 = vsub.f32 1.0, %v5977_v48  ;;  %v2381_v2 = vpop.xlane.xlu1 %2380 }
 0x3d9   : > { %v7516_v11 = vadd.f32 -1.0, %v5977_v48  ;;  %v6010_v9 = vmul.f32 %v15298_v16, %v15297_v56  ;;  %v5374_v31 = vadd.f32 0.37409195, %v5310_v38  ;;  %v12277_v55 = vmul.f32 0.5, %v15300_v50 }
 0x3da   : > { %15296 = vst [vmem:[#allocation49_spill] sm:$0xff] %v12270_v26  ;;  %v12274_v0 = vpop.eup %7963  ;;  %v4927_v6 = vmul.f32 %v12131_v63, %v4863_v23  ;;  %v4672_v37 = vmul.f32 %v12213_v39, %v4608_v54  ;;  %v4959_v56 = vadd.f32 0.27886808, %v4895_v28  ;;  %7969 = vrsqrt.f32 %v12264_v10 }
 0x3db   : > { %15299 = vst [vmem:[#allocation57_spill] sm:$0xff] %v12274_v0  ;;  %v12281_v12 = vpop.eup %7965  ;;  %v12293_v50 = vmul.f32 %v9658_v41, %v2054_v17  ;;  %v6233_v38 = vsel %vm6041_vm0, %v6105_v47, %v7516_v11  ;;  %v5470_v23 = vadd.f32 1.0000237, %v5406_v30  ;;  %v3147_v54 = vsel %vm12287_vm6, %v12151_v43, %v12257_v5 }
 0x3dc   : > { %15301 = vst [vmem:[#allocation36_spill] sm:$0xff] %v12277_v55  ;;  %v12302_v48 = vmul.f32 0.5, %v15305_v42  ;;  %v12305_v16 = vand.u32 2147483647, %v12270_v26  ;;  %v3471_v28 = vmul.f32 0.5, %v3470_v4  ;;  %v5438_v11 = vmul.f32 %v11960_v22, %v5374_v31 }
 0x3dd   : > { %15302 = vst [vmem:[#allocation50_spill] sm:$0xff] %v12281_v12  ;;  %v12307_v55 = vadd.f32 1e-06, %v2737_v14  ;;  %v4512_v17 = vmul.f32 0.17087276, %v12274_v0  ;;  %v6138_v12 = vsub.f32 1.0, %v6010_v9  ;;  %v12310_v13 = vpop.eup %7967  ;;  %v5023_v5 = vmul.f32 %v12108_v57, %v4959_v56 }
 0x3de   : > { %15306 = vst [vmem:[#allocation58_spill] sm:$0xff] %v12302_v48  ;;  %v4991_v30 = vadd.f32 0.27886808, %v4927_v6  ;;  %v4736_v47 = vadd.f32 1.4885159, %v4672_v37  ;;  %v6297_v43 = vadd.f32 1.0, %v6233_v38  ;;  %v2513_v4 = vmul.f32 %v2381_v2, %v9658_v41 }
 0x3df   : > { %15307 = vst [vmem:[#allocation81_spill] sm:$0xff] %v12310_v13  ;;  %v2577_v14 = vmul.f32 %v12293_v50, %v12293_v50  ;;  %v7549_v42 = vadd.f32 -1.0, %v6010_v9  ;;  %v5534_v26 = vmul.f32 %v11924_v27, %v5470_v23  ;;  %v4321_v31 = vmul.f32 0.5, %v12305_v16  ;;  %v15308_v6 = vld [vmem:[#allocation72_spill] sm:$0xff] }
 0x3e0   : > { %v6361_v37 = vmul.f32 %v6297_v43, %v15308_v6  ;;  %v3467_v38 = vsel %vm3466_vm8, %v12115_v44, %v12246_v34  ;;  %v12326_v48 = vpop.eup %7969  ;;  %7971 = vrsqrt.f32 %v12307_v55  ;;  %v4576_v19 = vadd.f32 -0.82215226, %v4512_v17  ;;  %v15311_v17 = vld [vmem:[#allocation64_spill] sm:$0xff] }
 0x3e1   : > { %v6266_v56 = vsel %vm6074_vm5, %v6138_v12, %v7549_v42  ;;  %v15309_v9 = vsub.f32 %v12037_v32, %v11968_v33  ;;  %v5502_v23 = vadd.f32 1.0000237, %v5438_v11  ;;  %v5055_v27 = vmul.f32 %v12131_v63, %v4991_v30 }
 0x3e2   : > { %v4800_v43 = vmul.f32 %v12213_v39, %v4736_v47  ;;  %7580 = vmatmul.msk.f32.gmra.mxu1 %vm6426_vm7, %v6361_v37  ;;  %v6330_v44 = vadd.f32 1.0, %v6266_v56  ;;  %vm3474_vm9 = vweird.f32 %v12180_v60  ;;  %v5087_v34 = vadd.f32 -0.18628806, %v5023_v5  ;;  %v15312_v5 = vld [vmem:[#allocation73_spill] sm:$0xff] }
 0x3e3   : > { %v3567_v2 = vmul.f32 %v3467_v38, %v15309_v9  ;;  %v2641_v6 = vsub.f32 %v2513_v4, %v2577_v14  ;;  %v15310_v32 = vsub.f32 %v12086_v51, %v11998_v25  ;;  %vm6042_vm10 = vcmp.ge.f32.partialorder %v15311_v17, 0.0  ;;  %v15313_v25 = vld [vmem:[#allocation85_spill] sm:$0xff] }
 0x3e4   : > { %v3472_v11 = vsub.f32 1.5, %v3471_v28  ;;  %v3149_v30 = vmul.f32 %v12326_v48, %v12264_v10  ;;  %v4385_v47 = vadd.f32 1.0, %v4321_v31  ;;  %v6394_v4 = vmul.f32 %v6330_v44, %v15312_v5  ;;  %v4063_v28 = vpop.f32.mrf.mxu3 }
 0x3e5   : > { %v3635_v33 = vmul.f32 %v12341_v18, %v3567_v2  ;;  %v3535_v12 = vmul.f32 %v3147_v54, %v15310_v32  ;;  %v5598_v14 = vadd.f32 -1.2655122, %v5534_v26  ;;  %vm3475_vm11 = vweird.f32 %v12226_v52 }
 0x3e6   : > { %v4640_v42 = vmul.f32 %v12274_v0, %v4576_v19  ;;  %v5566_v38 = vmul.f32 %v11960_v22, %v5502_v23  ;;  %v5663_v51 = vsub.f32 0.0, %v15313_v25  ;;  %v5119_v54 = vadd.f32 -0.18628806, %v5055_v27  ;;  %7613 = vmatmul.msk.f32.gmra.mxu2 %vm6426_vm7, %v6394_v4  ;;  %v12357_v9 = vpop.eup %7971  ;;  %v15314_v27 = vld [vmem:[#allocation53_spill] sm:$0xff]  ;;  %vm12383_vm12 = vmor %vm3474_vm9, %vm3475_vm11 }
 0x3e7   : > { %v3703_v37 = vadd.f32 %v12223_v7, %v3635_v33  ;;  %v4864_v56 = vadd.f32 -1.135204, %v4800_v43  ;;  %v5151_v31 = vmul.f32 %v12108_v57, %v5087_v34  ;;  %v5695_v26 = vsub.f32 0.0, %v12035_v1  ;;  %v15315_v43 = vld [vmem:[#allocation44_spill] sm:$0xff] }
 0x3e8   : > { %v2705_v2 = vmax.f32 %v2641_v6, 0.0  ;;  %v3603_v19 = vmul.f32 %v12341_v18, %v3535_v12  ;;  %v3473_v23 = vmul.f32 %v12226_v52, %v3472_v11  ;;  %v3150_v44 = vmul.f32 %v12326_v48, %v3149_v30 }
 0x3e9   : > { %7504 = vmatmul.msk.f32.gmra.mxu3 %vm1964_vm3, %v3703_v37  ;;  %7973 = vrcp.f32 %v4385_v47  ;;  %v5978_v33 = vmul.f32 %v15315_v43, %v15314_v27  ;;  %v5790_v32 = vadd.f32 %v12154_v40, %v5598_v14  ;;  %v4704_v5 = vadd.f32 1.4885159, %v4640_v42 }
 0x3ea   : > { %v3671_v34 = vadd.f32 %v12223_v7, %v3603_v19  ;;  %v12370_v4 = vadd.f32 %v11974_v15, %v4063_v28  ;;  %v5630_v6 = vadd.f32 -1.2655122, %v5566_v38  ;;  %v5183_v37 = vmul.f32 %v12131_v63, %v5119_v54 }
 0x3eb   : > { %v3479_v12 = vmul.f32 %v12357_v9, %v12307_v55  ;;  %v4928_v11 = vmul.f32 %v12213_v39, %v4864_v56  ;;  %v5215_v30 = vadd.f32 0.09678418, %v5151_v31  ;;  %v12376_v47 = vadd.f32 1e-06, %v2705_v2  ;;  %v12393_v56 = vld [vmem:[#allocation3 + $0x1e8] sm:$0xff] }
 0x3ec   : > { %7472 = vmatmul.msk.f32.gmra.mxu0 %vm1964_vm3, %v3671_v34  ;;  %v6106_v40 = vsub.f32 1.0, %v5978_v33  ;;  %v7517_v14 = vadd.f32 -1.0, %v5978_v33  ;;  %v12388_v38 = vmul.f32 %v5663_v51, %v15313_v25  ;;  %v12391_v54 = vmul.f32 %v5695_v26, %v12035_v1 }
 0x3ed   : > { %v3151_v31 = vmul.f32 0.5, %v3150_v44  ;;  %v3477_v60 = vsel %vm12383_vm12, %v12226_v52, %v3473_v23  ;;  %v4768_v2 = vmul.f32 %v12274_v0, %v4704_v5  ;;  %v12402_v19 = vmul.f32 0.70710677, %v12370_v4 }
 0x3ee   : > { %v6234_v25 = vsel %vm6042_vm10, %v6106_v40, %v7517_v14  ;;  %v5866_v51 = vmul.f32 1.442695, %v5790_v32  ;;  %v5822_v26 = vadd.f32 %v12202_v46, %v5630_v6  ;;  %v4992_v27 = vadd.f32 0.27886808, %v4928_v11  ;;  %v15321_v40 = vld [vmem:[#allocation77_spill] sm:$0xff]  ;;  %v2153_v6 = vpop.xlane.xlu2 %2152 }
 0x3ef   : > { %15318 = vst [vmem:[#allocation68_spill] sm:$0xff] %v12402_v19  ;;  %v12406_v1 = vpop.eup %7973  ;;  %v6298_v43 = vadd.f32 1.0, %v6234_v25  ;;  %v5279_v44 = vmul.f32 %v12108_v57, %v5215_v30  ;;  %v5247_v33 = vadd.f32 0.09678418, %v5183_v37  ;;  %v3480_v52 = vmul.f32 %v12357_v9, %v3479_v12 }
 0x3f0   : > { %15319 = vst [vmem:[#allocation55_spill] sm:$0xff] %v12406_v1  ;;  %7975 = vrsqrt.f32 %v12376_v47  ;;  %v15320_v23 = vsub.f32 %v12248_v61, %v12082_v29  ;;  %v3152_v17 = vsub.f32 1.5, %v3151_v31  ;;  %v5696_v34 = vsub.f32 0.0, %v12129_v3  ;;  %v3970_v31 = vpop.f32.mrf.mxu0 }
 0x3f1   : > { %v6362_v32 = vmul.f32 %v6298_v43, %v15321_v40  ;;  %vm3154_vm13 = vweird.f32 %v12264_v10  ;;  %v4832_v46 = vadd.f32 -1.135204, %v4768_v2  ;;  %v4513_v11 = vmul.f32 0.17087276, %v12406_v1 }
 0x3f2   : > { %v3568_v5 = vmul.f32 %v3477_v60, %v15320_v23  ;;  %v12420_v37 = vand.u32 2147483647, %v12402_v19  ;;  %7977 = vpow2.f32 %v5866_v51  ;;  %v5930_v12 = vmul.f32 1.442695, %v5822_v26 }
 0x3f3   : > { %v12423_v30 = vmul.f32 0.5, %v12101_v20  ;;  %v5056_v29 = vmul.f32 %v12213_v39, %v4992_v27  ;;  %7581 = vmatmul.msk.f32.gmra.mxu1 %vm6426_vm7, %v6362_v32  ;;  %v5343_v61 = vadd.f32 0.37409195, %v5279_v44  ;;  %v5311_v14 = vmul.f32 %v12131_v63, %v5247_v33  ;;  %v2057_v27 = vpop.xlane.xlu1 %2056  ;;  %v2480_v44 = vpop.xlane.xlu0 %2479 }
 0x3f4   : > { %vm3155_vm14 = vweird.f32 %v12326_v48  ;;  %v3481_v42 = vmul.f32 0.5, %v3480_v52  ;;  %v12430_v60 = vmul.f32 %v12326_v48, %v3152_v17  ;;  %v12433_v2 = vmul.f32 %v5696_v34, %v12129_v3  ;;  %v15325_v17 = vld [vmem:[#allocation67_spill] sm:$0xff] }
 0x3f5   : > { %15322 = vst [vmem:[#allocation69_spill] sm:$0xff] %v12423_v30  ;;  %v12436_v20 = vmul.f32 0.5, %v12146_v62  ;;  %v12439_v25 = vmul.f32 %v9658_v41, %v2153_v6  ;;  %v4896_v26 = vmul.f32 %v12274_v0, %v4832_v46  ;;  %v4577_v43 = vadd.f32 -0.82215226, %v4513_v11  ;;  %v4066_v6 = vpop.f32.mrf.mxu3  ;;  %vm12468_vm1 = vmor %vm3154_vm13, %vm3155_vm14 }
 0x3f6   : > { %v12441_v51 = vpop.eup %7975  ;;  %v4353_v33 = vmul.f32 0.5, %v12420_v37  ;;  %v3636_v52 = vmul.f32 %v12341_v18, %v3568_v5  ;;  %7979 = vpow2.f32 %v5930_v12  ;;  %v5120_v3 = vadd.f32 -0.18628806, %v5056_v29  ;;  %v2384_v30 = vpop.xlane.xlu2 %2383 }
 0x3f7   : > { %15323 = vst [vmem:[#allocation61_spill] sm:$0xff] %v12436_v20  ;;  %v5664_v23 = vsub.f32 0.0, %v12189_v35  ;;  %v12448_v62 = vadd.f32 %v11974_v15, %v3970_v31  ;;  %vm6075_vm15 = vcmp.ge.f32.partialorder %v15325_v17, 0.0  ;;  %v5407_v34 = vmul.f32 %v12108_v57, %v5343_v61 }
 0x3f8   : > { %v5375_v40 = vadd.f32 0.37409195, %v5311_v14  ;;  %v3482_v32 = vsub.f32 1.5, %v3481_v42  ;;  %v3704_v46 = vadd.f32 %v12223_v7, %v3636_v52  ;;  %v12453_v11 = vpop.eup %7977  ;;  %vm3485_vm0 = vweird.f32 %v12357_v9 }
 0x3f9   : > { %15324 = vst [vmem:[#allocation62_spill] sm:$0xff] %v12448_v62  ;;  %v3159_v5 = vmul.f32 %v12441_v51, %v12376_v47  ;;  %v2610_v12 = vmul.f32 %v12439_v25, %v12439_v25  ;;  %v12461_v29 = vmul.f32 %v9658_v41, %v2057_v27  ;;  %v2546_v61 = vmul.f32 %v2480_v44, %v9658_v41 }
 0x3fa   : > { %15326 = vst [vmem:[#allocation59_spill] sm:$0xff] %v12453_v11  ;;  %v4960_v42 = vadd.f32 0.27886808, %v4896_v26  ;;  %v4641_v31 = vmul.f32 %v12406_v1, %v4577_v43  ;;  %v4417_v52 = vadd.f32 1.0, %v4353_v33  ;;  %7505 = vmatmul.msk.f32.gmra.mxu3 %vm1964_vm3, %v3704_v46  ;;  %v12475_v28 = vmul.f32 0.70710677, %v12448_v62 }
 0x3fb   : > { %v3157_v27 = vsel %vm12468_vm1, %v12326_v48, %v12430_v60  ;;  %vm3484_vm2 = vweird.f32 %v12307_v55  ;;  %v5184_v10 = vmul.f32 %v12213_v39, %v5120_v3  ;;  %v12484_v44 = vadd.f32 %v11974_v15, %v4066_v6  ;;  %v15331_v26 = vld [vmem:[#allocation43_spill] sm:$0xff]  ;;  %v15335_v60 = vld [vmem:[#allocation70_spill] sm:$0xff] }
 0x3fc   : > { %15329 = vst [vmem:[#allocation65_spill] sm:$0xff] %v12475_v28  ;;  %v15332_v43 = vld [vmem:[#allocation83_spill] sm:$0xff]  ;;  %v5471_v19 = vadd.f32 1.0000237, %v5407_v34  ;;  %v5439_v46 = vmul.f32 %v12131_v63, %v5375_v40  ;;  %v12490_v20 = vmul.f32 %v5664_v23, %v12189_v35  ;;  %v12493_v14 = vand.u32 2147483647, %v12475_v28  ;;  %v12495_v48 = vpop.eup %7979  ;;  %vm12525_vm5 = vmor %vm3484_vm2, %vm3485_vm0 }
 0x3fd   : > { %15330 = vst [vmem:[#allocation66_spill] sm:$0xff] %v12484_v44  ;;  %v6011_v33 = vmul.f32 %v15332_v43, %v15331_v26  ;;  %vm6043_vm4 = vcmp.ge.f32.partialorder %v15335_v60, 0.0  ;;  %v3160_v3 = vmul.f32 %v12441_v51, %v3159_v5  ;;  %v2578_v6 = vmul.f32 %v12461_v29, %v12461_v29  ;;  %v15337_v62 = vld [vmem:[#allocation74_spill] sm:$0xff] }
 0x3fe   : > { %15333 = vst [vmem:[#allocation42_spill] sm:$0xff] %v12493_v14  ;;  %v2674_v26 = vsub.f32 %v2546_v61, %v2610_v12  ;;  %v5024_v40 = vmul.f32 %v12274_v0, %v4960_v42  ;;  %v4705_v43 = vadd.f32 1.4885159, %v4641_v31  ;;  %7981 = vrcp.f32 %v4417_v52  ;;  %v15338_v12 = vld [vmem:[#allocation46_spill] sm:$0xff] }
 0x3ff   : > { %15334 = vst [vmem:[#allocation48_spill] sm:$0xff] %v12495_v48  ;;  %v6139_v34 = vsub.f32 1.0, %v6011_v33  ;;  %v4322_v35 = vmul.f32 0.5, %v12493_v14  ;;  %v5248_v23 = vadd.f32 0.09678418, %v5184_v10  ;;  %v2514_v28 = vmul.f32 %v2384_v30, %v9658_v41 }
 0x400   : > { %v12505_v48 = vmul.f32 0.70710677, %v12484_v44  ;;  %v7550_v22 = vadd.f32 -1.0, %v6011_v33  ;;  %v5503_v11 = vadd.f32 1.0000237, %v5439_v46  ;;  %v3483_v5 = vmul.f32 %v12357_v9, %v3482_v32 }
 0x401   : > { %v4386_v13 = vadd.f32 1.0, %v4322_v35  ;;  %v5979_v61 = vmul.f32 %v15338_v12, %v15337_v62  ;;  %v5535_v42 = vmul.f32 %v12108_v57, %v5471_v19  ;;  %v2738_v31 = vmax.f32 %v2674_v26, 0.0 }
 0x402   : > { %15336 = vst [vmem:[#allocation72_spill] sm:$0xff] %v12505_v48  ;;  %v12512_v52 = vand.u32 2147483647, %v12505_v48  ;;  %v6267_v30 = vsel %vm6075_vm15, %v6139_v34, %v7550_v22  ;;  %v5088_v10 = vadd.f32 -0.18628806, %v5024_v40  ;;  %v4769_v44 = vmul.f32 %v12406_v1, %v4705_v43  ;;  %v15342_v22 = vld [vmem:[#allocation80_spill] sm:$0xff] }
 0x403   : > { %v6331_v33 = vadd.f32 1.0, %v6267_v30  ;;  %v6107_v46 = vsub.f32 1.0, %v5979_v61  ;;  %v5312_v32 = vmul.f32 %v12213_v39, %v5248_v23  ;;  %v3161_v35 = vmul.f32 0.5, %v3160_v3 }
 0x404   : > { %v2642_v14 = vsub.f32 %v2514_v28, %v2578_v6  ;;  %v4354_v62 = vmul.f32 0.5, %v12512_v52  ;;  %v12519_v12 = vpop.eup %7981  ;;  %7983 = vrcp.f32 %v4386_v13  ;;  %v7518_v26 = vadd.f32 -1.0, %v5979_v61  ;;  %v2156_v13 = vpop.xlane.xlu0 %2155 }
 0x405   : > { %15339 = vst [vmem:[#allocation64_spill] sm:$0xff] %v12519_v12  ;;  %v6395_v17 = vmul.f32 %v6331_v33, %v15342_v22  ;;  %v15343_v3 = vsub.f32 %v12259_v24, %v12175_v59  ;;  %v5599_v6 = vadd.f32 -1.2655122, %v5535_v42  ;;  %v5567_v34 = vmul.f32 %v12131_v63, %v5503_v11 }
 0x406   : > { %v3487_v40 = vsel %vm12525_vm5, %v12357_v9, %v3483_v5  ;;  %v12537_v55 = vadd.f32 1e-06, %v2738_v31  ;;  %v5152_v43 = vmul.f32 %v12274_v0, %v5088_v10  ;;  %v4833_v23 = vadd.f32 -1.135204, %v4769_v44 }
 0x407   : > { %v3536_v28 = vmul.f32 %v3157_v27, %v15343_v3  ;;  %v4418_v30 = vadd.f32 1.0, %v4354_v62  ;;  %7614 = vmatmul.msk.f32.gmra.mxu2 %vm6426_vm7, %v6395_v17  ;;  %v6235_v59 = vsel %vm6043_vm4, %v6107_v46, %v7518_v26  ;;  %v5376_v24 = vadd.f32 0.37409195, %v5312_v32  ;;  %v12543_v27 = vld [vmem:[#allocation3 + $0xe8] sm:$0xff]  ;;  %v15345_v32 = vld [vmem:[#allocation82_spill] sm:$0xff] }
 0x408   : > { %v2769_v11 = vsub.f32 %v12543_v27, %v12293_v50  ;;  %v4545_v9 = vmul.f32 0.17087276, %v12519_v12  ;;  %v6299_v5 = vadd.f32 1.0, %v6235_v59  ;;  %v3162_v61 = vsub.f32 1.5, %v3161_v35  ;;  %v4069_v50 = vpop.f32.mrf.mxu3  ;;  %v2483_v35 = vpop.xlane.xlu1 %2482 }
 0x409   : > { %v2706_v42 = vmax.f32 %v2642_v14, 0.0  ;;  %v3604_v44 = vmul.f32 %v12341_v18, %v3536_v28  ;;  %v15344_v31 = vsub.f32 %v12393_v56, %v12208_v49  ;;  %v5791_v60 = vadd.f32 %v12388_v38, %v5599_v6 }
 0x40a   : > { %v5631_v33 = vadd.f32 -1.2655122, %v5567_v34  ;;  %v12554_v46 = vmul.f32 %v9658_v41, %v2156_v13  ;;  %v6363_v62 = vmul.f32 %v6299_v5, %v15345_v32  ;;  %v12557_v19 = vpop.eup %7983  ;;  %v5216_v22 = vadd.f32 0.09678418, %v5152_v43 }
 0x40b   : > { %v3569_v10 = vmul.f32 %v3487_v40, %v15344_v31  ;;  %15346 = vst [vmem:[#allocation73_spill] sm:$0xff] %v12557_v19  ;;  %v4897_v14 = vmul.f32 %v12406_v1, %v4833_v23  ;;  %7985 = vrcp.f32 %v4418_v30  ;;  %v3672_v17 = vadd.f32 %v12223_v7, %v3604_v44 }
 0x40c   : > { %v5440_v49 = vmul.f32 %v12213_v39, %v5376_v24  ;;  %7987 = vrsqrt.f32 %v12537_v55  ;;  %v4609_v38 = vadd.f32 -0.82215226, %v4545_v9  ;;  %7582 = vmatmul.msk.f32.gmra.mxu1 %vm6426_vm7, %v6363_v62  ;;  %v3163_v26 = vmul.f32 %v12441_v51, %v3162_v61  ;;  %v12585_v24 = vld [vmem:[#allocation3 + $0x1f0] sm:$0xff] }
 0x40d   : > { %v3637_v56 = vmul.f32 %v12341_v18, %v3569_v10  ;;  %vm3165_vm6 = vweird.f32 %v12441_v51  ;;  %v12567_v3 = vadd.f32 1e-06, %v2706_v42  ;;  %7473 = vmatmul.msk.f32.gmra.mxu0 %vm1964_vm3, %v3672_v17  ;;  %v12571_v28 = vadd.f32 %v11974_v15, %v4069_v50  ;;  %v12589_v9 = vld [vmem:[#allocation3 + $0xf0] sm:$0xff]  ;;  %v3973_v50 = vpop.f32.mrf.mxu0 }
 0x40e   : > { %v2611_v6 = vmul.f32 %v12554_v46, %v12554_v46  ;;  %v2547_v34 = vmul.f32 %v2483_v35, %v9658_v41  ;;  %v4514_v40 = vmul.f32 0.17087276, %v12557_v19  ;;  %v5823_v23 = vadd.f32 %v12391_v54, %v5631_v33  ;;  %v2387_v54 = vpop.xlane.xlu0 %2386 }
 0x40f   : > { %v3705_v43 = vadd.f32 %v12223_v7, %v3637_v56  ;;  %v5280_v13 = vmul.f32 %v12274_v0, %v5216_v22  ;;  %vm3164_vm8 = vweird.f32 %v12376_v47  ;;  %v4961_v30 = vadd.f32 0.27886808, %v4897_v14 }
 0x410   : > { %v5504_v59 = vadd.f32 1.0000237, %v5440_v49  ;;  %vm12581_vm9 = vmor %vm3164_vm8, %vm3165_vm6  ;;  %v4673_v5 = vmul.f32 %v12519_v12, %v4609_v38  ;;  %v5868_v61 = vmul.f32 1.442695, %v5791_v60  ;;  %7989 = vrsqrt.f32 %v12567_v3  ;;  %v15352_v60 = vld [vmem:[#allocation37_spill] sm:$0xff] }
 0x411   : > { %7506 = vmatmul.msk.f32.gmra.mxu3 %vm1964_vm3, %v3705_v43  ;;  %v12595_v47 = vpop.eup %7985  ;;  %v3167_v42 = vsel %vm12581_vm9, %v12441_v51, %v3163_v26  ;;  %v12602_v44 = vmul.f32 0.70710677, %v12571_v28  ;;  %v12607_v10 = vmul.f32 0.5, %v12243_v58  ;;  %v5665_v33 = vsub.f32 0.0, %v12305_v16 }
 0x412   : > { %15349 = vst [vmem:[#allocation85_spill] sm:$0xff] %v12595_v47  ;;  %v12604_v31 = vpop.eup %7987  ;;  %v2675_v32 = vsub.f32 %v2547_v34, %v2611_v6  ;;  %v4578_v62 = vadd.f32 -0.82215226, %v4514_v40  ;;  %vm6044_vm10 = vcmp.ge.f32.partialorder %v15352_v60, 0.0  ;;  %v5932_v22 = vmul.f32 1.442695, %v5823_v23 }
 0x413   : > { %15350 = vst [vmem:[#allocation53_spill] sm:$0xff] %v12602_v44  ;;  %v5344_v14 = vadd.f32 0.37409195, %v5280_v13  ;;  %v5025_v51 = vmul.f32 %v12406_v1, %v4961_v30  ;;  %v12613_v35 = vand.u32 2147483647, %v12602_v44  ;;  %v5568_v17 = vmul.f32 %v12213_v39, %v5504_v59 }
 0x414   : > { %15351 = vst [vmem:[#allocation44_spill] sm:$0xff] %v12607_v10  ;;  %v3537_v49 = vmul.f32 %v3167_v42, %v2769_v11  ;;  %v4737_v38 = vadd.f32 1.4885159, %v4673_v5  ;;  %v4546_v58 = vmul.f32 0.17087276, %v12595_v47  ;;  %7991 = vpow2.f32 %v5868_v61 }
 0x415   : > { %v3489_v56 = vmul.f32 %v12604_v31, %v12537_v55  ;;  %v4355_v26 = vmul.f32 0.5, %v12613_v35  ;;  %v12623_v6 = vld [vmem:[%s14745_s7] ss:$0 sm:$0xff]  ;;  %v12629_v40 = vmul.f32 %v5665_v33, %v12305_v16  ;;  %v2739_v11 = vmax.f32 %v2675_v32, 0.0  ;;  %v2060_v16 = vpop.xlane.xlu2 %2059 }
 0x416   : > { %v12626_v34 = vadd.f32 %v12623_v6, %v3973_v50  ;;  %v4642_v43 = vmul.f32 %v12557_v19, %v4578_v62  ;;  %v5980_v23 = vmul.f32 %v12177_v8, %v11648_v21  ;;  %v12634_v13 = vpop.eup %7989  ;;  %7993 = vpow2.f32 %v5932_v22  ;;  %v15354_v8 = vld [vmem:[#allocation76_spill] sm:$0xff] }
 0x417   : > { %v5408_v30 = vmul.f32 %v12274_v0, %v5344_v14  ;;  %v5089_v59 = vadd.f32 -0.18628806, %v5025_v51  ;;  %v4419_v15 = vadd.f32 1.0, %v4355_v26  ;;  %v5632_v5 = vadd.f32 -1.2655122, %v5568_v17 }
 0x418   : > { %v3605_v61 = vmul.f32 %v12341_v18, %v3537_v49  ;;  %v4801_v42 = vmul.f32 %v12519_v12, %v4737_v38  ;;  %v4610_v33 = vadd.f32 -0.82215226, %v4546_v58  ;;  %v3490_v32 = vmul.f32 %v12604_v31, %v3489_v56 }
 0x419   : > { %7995 = vrcp.f32 %v4419_v15  ;;  %v12641_v62 = vmul.f32 0.70710677, %v12626_v34  ;;  %v6108_v21 = vsub.f32 1.0, %v5980_v23  ;;  %vm6076_vm11 = vcmp.ge.f32.partialorder %v15354_v8, 0.0 }
 0x41a   : > { %v3169_v50 = vmul.f32 %v12634_v13, %v12567_v3  ;;  %v12646_v22 = vadd.f32 1e-06, %v2739_v11  ;;  %v4706_v14 = vadd.f32 1.4885159, %v4642_v43  ;;  %v7519_v51 = vadd.f32 -1.0, %v5980_v23  ;;  %v12648_v17 = vpop.eup %7991 }
 0x41b   : > { %15353 = vst [vmem:[#allocation77_spill] sm:$0xff] %v12641_v62  ;;  %v5472_v49 = vadd.f32 1.0000237, %v5408_v30  ;;  %v5153_v38 = vmul.f32 %v12406_v1, %v5089_v59  ;;  %v12652_v58 = vmul.f32 %v9658_v41, %v2060_v16  ;;  %v12655_v56 = vand.u32 2147483647, %v12641_v62 }
 0x41c   : > { %v12658_v26 = vmul.f32 0.5, %v12370_v4  ;;  %v4865_v15 = vadd.f32 -1.135204, %v4801_v42  ;;  %v4674_v11 = vmul.f32 %v12595_v47, %v4610_v33  ;;  %v6236_v43 = vsel %vm6044_vm10, %v6108_v21, %v7519_v51  ;;  %v12663_v23 = vpop.eup %7993  ;;  %v15357_v51 = vld [vmem:[#allocation38_spill] sm:$0xff] }
 0x41d   : > { %v3491_v30 = vmul.f32 0.5, %v3490_v32  ;;  %v4323_v59 = vmul.f32 0.5, %v12655_v56  ;;  %v6300_v16 = vadd.f32 1.0, %v6236_v43  ;;  %v6012_v27 = vmul.f32 %v12183_v53, %v11677_v36 }
 0x41e   : > { %15355 = vst [vmem:[#allocation67_spill] sm:$0xff] %v12658_v26  ;;  %v5824_v62 = vadd.f32 %v12433_v2, %v5632_v5  ;;  %v3170_v4 = vmul.f32 %v12634_v13, %v3169_v50  ;;  %7997 = vrsqrt.f32 %v12646_v22  ;;  %v4770_v42 = vmul.f32 %v12557_v19, %v4706_v14 }
 0x41f   : > { %v12672_v60 = vpop.eup %7995  ;;  %v5536_v33 = vmul.f32 %v12274_v0, %v5472_v49  ;;  %v5217_v32 = vadd.f32 0.09678418, %v5153_v38  ;;  %v2579_v21 = vmul.f32 %v12652_v58, %v12652_v58  ;;  %v6364_v43 = vmul.f32 %v6300_v16, %v15357_v51 }
 0x420   : > { %15356 = vst [vmem:[#allocation43_spill] sm:$0xff] %v12672_v60  ;;  %vm3494_vm12 = vweird.f32 %v12537_v55  ;;  %v4929_v36 = vmul.f32 %v12519_v12, %v4865_v15  ;;  %v4738_v53 = vadd.f32 1.4885159, %v4674_v11  ;;  %v2515_v2 = vmul.f32 %v2387_v54, %v9658_v41 }
 0x421   : > { %v4547_v5 = vmul.f32 0.17087276, %v12672_v60  ;;  %v3492_v50 = vsub.f32 1.5, %v3491_v30  ;;  %v4387_v14 = vadd.f32 1.0, %v4323_v59  ;;  %7583 = vmatmul.msk.f32.gmra.mxu1 %vm6426_vm7, %v6364_v43  ;;  %v6140_v49 = vsub.f32 1.0, %v6012_v27 }
 0x422   : > { %v7551_v38 = vadd.f32 -1.0, %v6012_v27  ;;  %v3171_v44 = vmul.f32 0.5, %v3170_v4  ;;  %v4834_v48 = vadd.f32 -1.135204, %v4770_v42  ;;  %v3673_v16 = vadd.f32 %v12223_v7, %v3605_v61  ;;  %v3976_v42 = vpop.f32.mrf.mxu0  ;;  %v15358_v61 = vld [vmem:[#allocation78_spill] sm:$0xff] }
 0x423   : > { %v4611_v26 = vadd.f32 -0.82215226, %v4547_v5  ;;  %v5281_v51 = vmul.f32 %v12406_v1, %v5217_v32  ;;  %vm3495_vm13 = vweird.f32 %v12604_v31  ;;  %v5697_v15 = vsub.f32 0.0, %v12420_v37 }
 0x424   : > { %v6268_v54 = vsel %vm6076_vm11, %v6140_v49, %v7551_v38  ;;  %v12689_v11 = vpop.eup %7997  ;;  %v4993_v30 = vadd.f32 0.27886808, %v4929_v36  ;;  %v4802_v59 = vmul.f32 %v12595_v47, %v4738_v53  ;;  %v2643_v27 = vsub.f32 %v2515_v2, %v2579_v21  ;;  %7474 = vmatmul.msk.f32.gmra.mxu0 %vm1964_vm3, %v3673_v16  ;;  %v15359_v53 = vld [vmem:[#allocation41_spill] sm:$0xff]  ;;  %vm12714_vm1 = vmor %vm3494_vm12, %vm3495_vm13 }
 0x425   : > { %v6332_v4 = vadd.f32 1.0, %v6268_v54  ;;  %vm6077_vm14 = vcmp.ge.f32.partialorder %v15358_v61, 0.0  ;;  %v5934_v32 = vmul.f32 1.442695, %v5824_v62  ;;  %v5600_v43 = vadd.f32 -1.2655122, %v5536_v33 }
 0x426   : > { %vm3174_vm15 = vweird.f32 %v12567_v3  ;;  %v4675_v5 = vmul.f32 %v12672_v60, %v4611_v26  ;;  %7999 = vrcp.f32 %v4387_v14  ;;  %v3493_v8 = vmul.f32 %v12604_v31, %v3492_v50  ;;  %v15360_v62 = vld [vmem:[#allocation50_spill] sm:$0xff] }
 0x427   : > { %v3172_v49 = vsub.f32 1.5, %v3171_v44  ;;  %v4898_v36 = vmul.f32 %v12557_v19, %v4834_v48  ;;  %v6396_v21 = vmul.f32 %v6332_v4, %v15359_v53  ;;  %v5345_v2 = vadd.f32 0.37409195, %v5281_v51  ;;  %v15368_v53 = vld [vmem:[#allocation62_spill] sm:$0xff] }
 0x428   : > { %v3499_v38 = vmul.f32 %v12689_v11, %v12646_v22  ;;  %v12702_v16 = vadd.f32 %v12623_v6, %v3976_v42  ;;  %v6013_v33 = vmul.f32 %v15360_v62, %v11766_v45  ;;  %vm3175_vm0 = vweird.f32 %v12634_v13  ;;  %v15365_v62 = vld [vmem:[#allocation79_spill] sm:$0xff] }
 0x429   : > { %v5057_v26 = vmul.f32 %v12519_v12, %v4993_v30  ;;  %v4866_v50 = vadd.f32 -1.135204, %v4802_v59  ;;  %v2707_v44 = vmax.f32 %v2643_v27, 0.0  ;;  %7615 = vmatmul.msk.f32.gmra.mxu2 %vm6426_vm7, %v6396_v21  ;;  %8001 = vpow2.f32 %v5934_v32  ;;  %v12725_v59 = vld [vmem:[#allocation3 + $0x1f8] sm:$0xff]  ;;  %vm12754_vm4 = vmor %vm3174_vm15, %vm3175_vm0 }
 0x42a   : > { %v5792_v48 = vadd.f32 %v12490_v20, %v5600_v43  ;;  %v12719_v45 = vmul.f32 %v5697_v15, %v12420_v37  ;;  %v4739_v51 = vadd.f32 1.4885159, %v4675_v5  ;;  %v3497_v54 = vsel %vm12714_vm1, %v12604_v31, %v3493_v8  ;;  %v2063_v15 = vpop.xlane.xlu1 %2062 }
 0x42b   : > { %v3173_v30 = vmul.f32 %v12634_v13, %v3172_v49  ;;  %v4962_v55 = vadd.f32 0.27886808, %v4898_v36  ;;  %v5409_v4 = vmul.f32 %v12406_v1, %v5345_v2  ;;  %v3500_v37 = vmul.f32 %v12689_v11, %v3499_v38  ;;  %v12741_v36 = vld [vmem:[#allocation3 + $0xf8] sm:$0xff] }
 0x42c   : > { %v12729_v27 = vpop.eup %7999  ;;  %v12734_v42 = vmul.f32 0.70710677, %v12702_v16  ;;  %v6141_v32 = vsub.f32 1.0, %v6013_v33  ;;  %v5121_v31 = vadd.f32 -0.18628806, %v5057_v26  ;;  %v4930_v43 = vmul.f32 %v12595_v47, %v4866_v50 }
 0x42d   : > { %v12737_v5 = vadd.f32 1e-06, %v2707_v44  ;;  %v7552_v8 = vadd.f32 -1.0, %v6013_v33  ;;  %v12739_v49 = vmul.f32 1.442695, %v5792_v48  ;;  %v4803_v21 = vmul.f32 %v12672_v60, %v4739_v51  ;;  %v2390_v44 = vpop.xlane.xlu2 %2389 }
 0x42e   : > { %15363 = vst [vmem:[#allocation83_spill] sm:$0xff] %v12734_v42  ;;  %v15364_v2 = vsub.f32 %v12585_v24, %v12439_v25  ;;  %vm6045_vm2 = vcmp.ge.f32.partialorder %v15365_v62, 0.0  ;;  %v5026_v26 = vmul.f32 %v12557_v19, %v4962_v55  ;;  %v12760_v50 = vmul.f32 %v9658_v41, %v2063_v15 }
 0x42f   : > { %v4515_v48 = vmul.f32 0.17087276, %v12729_v27  ;;  %v6269_v25 = vsel %vm6077_vm14, %v6141_v32, %v7552_v8  ;;  %v12765_v24 = vpop.eup %8001  ;;  %v5473_v14 = vadd.f32 1.0000237, %v5409_v4  ;;  %v3177_v3 = vsel %vm12754_vm4, %v12634_v13, %v3173_v30 }
 0x430   : > { %v3570_v38 = vmul.f32 %v3497_v54, %v15364_v2  ;;  %v3501_v51 = vmul.f32 0.5, %v3500_v37  ;;  %v12771_v54 = vand.u32 2147483647, %v12734_v42  ;;  %v5185_v55 = vmul.f32 %v12519_v12, %v5121_v31  ;;  %v15370_v37 = vld [vmem:[#allocation40_spill] sm:$0xff]  ;;  %v2066_v31 = vpop.xlane.xlu0 %2065 }
 0x431   : > { %v4994_v15 = vadd.f32 0.27886808, %v4930_v43  ;;  %8003 = vrsqrt.f32 %v12737_v5  ;;  %v6333_v2 = vadd.f32 1.0, %v6269_v25  ;;  %v12776_v61 = vmul.f32 0.5, %v15368_v53  ;;  %v15371_v25 = vld [vmem:[#allocation39_spill] sm:$0xff] }
 0x432   : > { %v4867_v32 = vadd.f32 -1.135204, %v4803_v21  ;;  %v2516_v4 = vmul.f32 %v2390_v44, %v9658_v41  ;;  %v3638_v8 = vmul.f32 %v12341_v18, %v3570_v38  ;;  %v5090_v33 = vadd.f32 -0.18628806, %v5026_v26  ;;  %v15372_v21 = vld [vmem:[#allocation81_spill] sm:$0xff] }
 0x433   : > { %15369 = vst [vmem:[#allocation70_spill] sm:$0xff] %v12776_v61  ;;  %v2580_v13 = vmul.f32 %v12760_v50, %v12760_v50  ;;  %v4579_v30 = vadd.f32 -0.82215226, %v4515_v48  ;;  %v6397_v20 = vmul.f32 %v6333_v2, %v15370_v37  ;;  %vm3504_vm5 = vweird.f32 %v12646_v22  ;;  %v15374_v37 = vld [vmem:[#allocation42_spill] sm:$0xff] }
 0x434   : > { %v4324_v43 = vmul.f32 0.5, %v12771_v54  ;;  %v3706_v53 = vadd.f32 %v12223_v7, %v3638_v8  ;;  %v5981_v42 = vmul.f32 %v15372_v21, %v15371_v25  ;;  %v15373_v38 = vsub.f32 %v12589_v9, %v12461_v29 }
 0x435   : > { %v5537_v44 = vmul.f32 %v12406_v1, %v5473_v14  ;;  %v5249_v61 = vadd.f32 0.09678418, %v5185_v55  ;;  %v3502_v48 = vsub.f32 1.5, %v3501_v51  ;;  %v5058_v2 = vmul.f32 %v12595_v47, %v4994_v15  ;;  %7616 = vmatmul.msk.f32.gmra.mxu2 %vm6426_vm7, %v6397_v20 }
 0x436   : > { %v3538_v26 = vmul.f32 %v3177_v3, %v15373_v38  ;;  %v5666_v10 = vsub.f32 0.0, %v15374_v37  ;;  %v4931_v0 = vmul.f32 %v12672_v60, %v4867_v32  ;;  %7507 = vmatmul.msk.f32.gmra.mxu3 %vm1964_vm3, %v3706_v53  ;;  %v6109_v8 = vsub.f32 1.0, %v5981_v42  ;;  %v15375_v38 = vld [vmem:[#allocation47_spill] sm:$0xff] }
 0x437   : > { %v7520_v25 = vadd.f32 -1.0, %v5981_v42  ;;  %v12797_v21 = vpop.eup %8003  ;;  %v5154_v29 = vmul.f32 %v12557_v19, %v5090_v33  ;;  %v2644_v9 = vsub.f32 %v2516_v4, %v2580_v13  ;;  %v4643_v14 = vmul.f32 %v12729_v27, %v4579_v30  ;;  %v2393_v4 = vpop.xlane.xlu1 %2392 }
 0x438   : > { %v12802_v3 = vmul.f32 %v9658_v41, %v2066_v31  ;;  %vm3505_vm6 = vweird.f32 %v12689_v11  ;;  %v4388_v20 = vadd.f32 1.0, %v4324_v43  ;;  %v3606_v55 = vmul.f32 %v12341_v18, %v3538_v26  ;;  %v4072_v13 = vpop.f32.mrf.mxu3 }
 0x439   : > { %v6237_v51 = vsel %vm6045_vm2, %v6109_v8, %v7520_v25  ;;  %v5601_v15 = vadd.f32 -1.2655122, %v5537_v44  ;;  %v5313_v42 = vmul.f32 %v12519_v12, %v5249_v61  ;;  %v3503_v32 = vmul.f32 %v12689_v11, %v3502_v48  ;;  %v15376_v48 = vld [vmem:[#allocation71_spill] sm:$0xff]  ;;  %vm12827_vm9 = vmor %vm3504_vm5, %vm3505_vm6 }
 0x43a   : > { %v5122_v33 = vadd.f32 -0.18628806, %v5058_v2  ;;  %v3179_v30 = vmul.f32 %v12797_v21, %v12737_v5  ;;  %v4995_v31 = vadd.f32 0.27886808, %v4931_v0  ;;  %v6301_v53 = vadd.f32 1.0, %v6237_v51 }
 0x43b   : > { %v3674_v43 = vadd.f32 %v12223_v7, %v3606_v55  ;;  %vm6046_vm8 = vcmp.ge.f32.partialorder %v15375_v38, 0.0  ;;  %v5218_v62 = vadd.f32 0.09678418, %v5154_v29  ;;  %v2708_v8 = vmax.f32 %v2644_v9, 0.0  ;;  %v12884_v38 = vld [vmem:[%s14743_s5] ss:$0 sm:$0xff] }
 0x43c   : > { %v4707_v26 = vadd.f32 1.4885159, %v4643_v14  ;;  %v2581_v61 = vmul.f32 %v12802_v3, %v12802_v3  ;;  %v2517_v44 = vmul.f32 %v2393_v4, %v9658_v41  ;;  %8005 = vrcp.f32 %v4388_v20 }
 0x43d   : > { %v6365_v2 = vmul.f32 %v6301_v53, %v15376_v48  ;;  %7475 = vmatmul.msk.f32.gmra.mxu0 %vm1964_vm3, %v3674_v43  ;;  %v12820_v0 = vadd.f32 %v12623_v6, %v4072_v13  ;;  %8007 = vpow2.f32 %v12739_v49  ;;  %v5377_v7 = vadd.f32 0.37409195, %v5313_v42  ;;  %v15379_v49 = vld [vmem:[#allocation66_spill] sm:$0xff]  ;;  %v15383_v13 = vld [vmem:[#allocation59_spill] sm:$0xff] }
 0x43e   : > { %v5186_v29 = vmul.f32 %v12595_v47, %v5122_v33  ;;  %v5698_v9 = vsub.f32 0.0, %v12512_v52  ;;  %v5793_v14 = vadd.f32 %v12629_v40, %v5601_v15  ;;  %v3507_v20 = vsel %vm12827_vm9, %v12689_v11, %v3503_v32  ;;  %v15382_v32 = vld [vmem:[#allocation54_spill] sm:$0xff] }
 0x43f   : > { %v12838_v51 = vmul.f32 0.5, %v15379_v49  ;;  %v5059_v55 = vmul.f32 %v12672_v60, %v4995_v31  ;;  %7584 = vmatmul.msk.f32.gmra.mxu1 %vm6426_vm7, %v6365_v2  ;;  %v12843_v22 = vmul.f32 %v5666_v10, %v15374_v37  ;;  %v3180_v42 = vmul.f32 %v12797_v21, %v3179_v30 }
 0x440   : > { %v12846_v33 = vadd.f32 1e-06, %v2708_v8  ;;  %v4771_v40 = vmul.f32 %v12729_v27, %v4707_v26  ;;  %v5282_v15 = vmul.f32 %v12557_v19, %v5218_v62  ;;  %v2645_v4 = vsub.f32 %v2517_v44, %v2581_v61 }
 0x441   : > { %15380 = vst [vmem:[#allocation74_spill] sm:$0xff] %v12838_v51  ;;  %v12851_v11 = vmul.f32 0.70710677, %v12820_v0  ;;  %v5982_v31 = vmul.f32 %v15383_v13, %v15382_v32  ;;  %v5441_v53 = vmul.f32 %v12519_v12, %v5377_v7  ;;  %v5250_v43 = vadd.f32 0.09678418, %v5186_v29  ;;  %v2069_v13 = vpop.xlane.xlu2 %2068 }
 0x442   : > { %v12857_v10 = vmul.f32 %v5698_v9, %v12512_v52  ;;  %v15384_v37 = vsub.f32 %v12725_v59, %v12554_v46  ;;  %v12862_v8 = vpop.eup %8005  ;;  %v5872_v62 = vmul.f32 1.442695, %v5793_v14  ;;  %v5123_v26 = vadd.f32 -0.18628806, %v5059_v55  ;;  %v3979_v59 = vpop.f32.mrf.mxu0 }
 0x443   : > { %15381 = vst [vmem:[#allocation46_spill] sm:$0xff] %v12851_v11  ;;  %v6110_v61 = vsub.f32 1.0, %v5982_v31  ;;  %v7521_v44 = vadd.f32 -1.0, %v5982_v31  ;;  %v12864_v48 = vpop.eup %8007  ;;  %v3181_v2 = vmul.f32 0.5, %v3180_v42  ;;  %8009 = vrsqrt.f32 %v12846_v33  ;;  %v12876_v42 = vld [vmem:[#allocation3 + $0x100] sm:$0xff]  ;;  %v15385_v31 = vld [vmem:[#allocation52_spill] sm:$0xff] }
 0x444   : > { %v3571_v30 = vmul.f32 %v3507_v20, %v15384_v37  ;;  %v4835_v7 = vadd.f32 -1.135204, %v4771_v40  ;;  %v5346_v52 = vadd.f32 0.37409195, %v5282_v15  ;;  %v2709_v29 = vmax.f32 %v2645_v4, 0.0  ;;  %v4075_v37 = vpop.f32.mrf.mxu3 }
 0x445   : > { %v12869_v9 = vand.u32 2147483647, %v12851_v11  ;;  %v6238_v46 = vsel %vm6046_vm8, %v6110_v61, %v7521_v44  ;;  %v5505_v14 = vadd.f32 1.0000237, %v5441_v53  ;;  %v5314_v20 = vmul.f32 %v12595_v47, %v5250_v43  ;;  %v15390_v11 = vld [vmem:[#allocation56_spill] sm:$0xff] }
 0x446   : > { %v3639_v25 = vmul.f32 %v12341_v18, %v3571_v30  ;;  %v4516_v49 = vmul.f32 0.17087276, %v12862_v8  ;;  %v6302_v55 = vadd.f32 1.0, %v6238_v46  ;;  %vm3184_vm10 = vweird.f32 %v12737_v5 }
 0x447   : > { %v5187_v40 = vmul.f32 %v12672_v60, %v5123_v26  ;;  %v3182_v4 = vsub.f32 1.5, %v3181_v2  ;;  %v4899_v32 = vmul.f32 %v12729_v27, %v4835_v7  ;;  %v12890_v43 = vadd.f32 %v12623_v6, %v3979_v59  ;;  %v15387_v59 = vld [vmem:[#allocation75_spill] sm:$0xff] }
 0x448   : > { %v3707_v15 = vadd.f32 %v12884_v38, %v3639_v25  ;;  %v6366_v53 = vmul.f32 %v6302_v55, %v15385_v31  ;;  %v5410_v30 = vmul.f32 %v12557_v19, %v5346_v52  ;;  %v12894_v26 = vmul.f32 0.5, %v12571_v28 }
 0x449   : > { %v12896_v61 = vadd.f32 1e-06, %v2709_v29  ;;  %v4356_v44 = vmul.f32 0.5, %v12869_v9  ;;  %v12900_v2 = vpop.eup %8009  ;;  %8011 = vpow2.f32 %v5872_v62  ;;  %v5569_v7 = vmul.f32 %v12519_v12, %v5505_v14  ;;  %v2396_v62 = vpop.xlane.xlu0 %2395 }
 0x44a   : > { %15386 = vst [vmem:[#allocation80_spill] sm:$0xff] %v12894_v26  ;;  %7508 = vmatmul.msk.f32.gmra.mxu3 %vm1964_vm3, %v3707_v15  ;;  %v5378_v25 = vadd.f32 0.37409195, %v5314_v20  ;;  %v4580_v46 = vadd.f32 -0.82215226, %v4516_v49  ;;  %7585 = vmatmul.msk.f32.gmra.mxu1 %vm6426_vm7, %v6366_v53  ;;  %vm3185_vm11 = vweird.f32 %v12797_v21  ;;  %v5699_v28 = vsub.f32 0.0, %v12613_v35 }
 0x44b   : > { %v5251_v52 = vadd.f32 0.09678418, %v5187_v40  ;;  %v12907_v29 = vmul.f32 %v9658_v41, %v2069_v13  ;;  %vm6078_vm12 = vcmp.ge.f32.partialorder %v15387_v59, 0.0  ;;  %v3183_v55 = vmul.f32 %v12797_v21, %v3182_v4  ;;  %v15391_v26 = vld [vmem:[#allocation48_spill] sm:$0xff]  ;;  %vm12937_vm13 = vmor %vm3184_vm10, %vm3185_vm11 }
 0x44c   : > { %v4963_v15 = vadd.f32 0.27886808, %v4899_v32  ;;  %v12912_v14 = vmul.f32 0.70710677, %v12890_v43  ;;  %v12915_v20 = vadd.f32 %v12623_v6, %v4075_v37  ;;  %v5474_v49 = vadd.f32 1.0000237, %v5410_v30 }
 0x44d   : > { %v3189_v40 = vmul.f32 %v12900_v2, %v12846_v33  ;;  %8013 = vrsqrt.f32 %v12896_v61  ;;  %v4420_v13 = vadd.f32 1.0, %v4356_v44  ;;  %v5633_v31 = vadd.f32 -1.2655122, %v5569_v7 }
 0x44e   : > { %15388 = vst [vmem:[#allocation82_spill] sm:$0xff] %v12912_v14  ;;  %v5442_v53 = vmul.f32 %v12595_v47, %v5378_v25  ;;  %v12922_v4 = vmul.f32 0.5, %v12626_v34  ;;  %v4644_v32 = vmul.f32 %v12862_v8, %v4580_v46  ;;  %v5315_v18 = vmul.f32 %v12672_v60, %v5251_v52 }
 0x44f   : > { %v2582_v37 = vmul.f32 %v12907_v29, %v12907_v29  ;;  %v2518_v30 = vmul.f32 %v2396_v62, %v9658_v41  ;;  %v6014_v51 = vmul.f32 %v15391_v26, %v15390_v11  ;;  %v12931_v12 = vpop.eup %8011  ;;  %v12942_v44 = vmul.f32 %v5699_v28, %v12613_v35  ;;  %v4078_v62 = vpop.f32.mrf.mxu3 }
 0x450   : > { %15389 = vst [vmem:[#allocation37_spill] sm:$0xff] %v12922_v4  ;;  %v5027_v7 = vmul.f32 %v12729_v27, %v4963_v15  ;;  %v12946_v25 = vand.u32 2147483647, %v12912_v14  ;;  %v12949_v11 = vmul.f32 0.70710677, %v12915_v20  ;;  %v5538_v26 = vmul.f32 %v12557_v19, %v5474_v49 }
 0x451   : > { %15392 = vst [vmem:[#allocation76_spill] sm:$0xff] %v12931_v12  ;;  %v3187_v5 = vsel %vm12937_vm13, %v12797_v21, %v3183_v55  ;;  %v3190_v46 = vmul.f32 %v12900_v2, %v3189_v40  ;;  %8015 = vrcp.f32 %v4420_v13  ;;  %v5825_v35 = vadd.f32 %v12719_v45, %v5633_v31 }
 0x452   : > { %15395 = vst [vmem:[#allocation38_spill] sm:$0xff] %v12949_v11  ;;  %v5506_v52 = vadd.f32 1.0000237, %v5442_v53  ;;  %v5667_v28 = vsub.f32 0.0, %v12655_v56  ;;  %v4708_v15 = vadd.f32 1.4885159, %v4644_v32  ;;  %v2646_v12 = vsub.f32 %v2518_v30, %v2582_v37 }
 0x453   : > { %v12958_v14 = vpop.eup %8013  ;;  %v5379_v4 = vadd.f32 0.37409195, %v5315_v18  ;;  %v6142_v1 = vsub.f32 1.0, %v6014_v51  ;;  %v7553_v49 = vadd.f32 -1.0, %v6014_v51  ;;  %v5091_v19 = vadd.f32 -0.18628806, %v5027_v7 }
 0x454   : > { %v4325_v34 = vmul.f32 0.5, %v12946_v25  ;;  %v12962_v21 = vand.u32 2147483647, %v12949_v11  ;;  %v15396_v45 = vsub.f32 %v12741_v36, %v12652_v58  ;;  %v5602_v40 = vadd.f32 -1.2655122, %v5538_v26 }
 0x455   : > { %v3191_v13 = vmul.f32 0.5, %v3190_v46  ;;  %v6270_v31 = vsel %vm6078_vm12, %v6142_v1, %v7553_v49  ;;  %v12970_v18 = vadd.f32 %v12623_v6, %v4078_v62  ;;  %v5570_v51 = vmul.f32 %v12595_v47, %v5506_v52  ;;  %v12982_v1 = vld [vmem:[%s14742_s4] ss:$0 sm:$0xff]  ;;  %v15399_v52 = vld [vmem:[#allocation45_spill] sm:$0xff] }
 0x456   : > { %v3539_v55 = vmul.f32 %v3187_v5, %v15396_v45  ;;  %v3199_v53 = vmul.f32 %v12958_v14, %v12896_v61  ;;  %v4772_v32 = vmul.f32 %v12862_v8, %v4708_v15  ;;  %v6334_v37 = vadd.f32 1.0, %v6270_v31 }
 0x457   : > { %15397 = vst [vmem:[#allocation78_spill] sm:$0xff] %v12970_v18  ;;  %v12976_v30 = vpop.eup %8015  ;;  %v5443_v58 = vmul.f32 %v12672_v60, %v5379_v4  ;;  %v2710_v36 = vmax.f32 %v2646_v12, 0.0  ;;  %v12986_v7 = vmul.f32 0.70710677, %v12970_v18  ;;  %v5155_v26 = vmul.f32 %v12729_v27, %v5091_v19 }
 0x458   : > { %v3607_v59 = vmul.f32 %v12982_v1, %v3539_v55  ;;  %v4389_v5 = vadd.f32 1.0, %v4325_v34  ;;  %v4357_v46 = vmul.f32 0.5, %v12962_v21  ;;  %v6398_v15 = vmul.f32 %v6334_v37, %v15399_v52 }
 0x459   : > { %15398 = vst [vmem:[#allocation41_spill] sm:$0xff] %v12986_v7  ;;  %v5936_v62 = vmul.f32 1.442695, %v5825_v35  ;;  %v3192_v4 = vsub.f32 1.5, %v3191_v13  ;;  %v12993_v49 = vand.u32 2147483647, %v12986_v7  ;;  %vm3194_vm14 = vweird.f32 %v12846_v33 }
 0x45a   : > { %v3675_v12 = vadd.f32 %v12884_v38, %v3607_v59  ;;  %v3200_v45 = vmul.f32 %v12958_v14, %v3199_v53  ;;  %v4836_v55 = vadd.f32 -1.135204, %v4772_v32  ;;  %v4548_v31 = vmul.f32 0.17087276, %v12976_v30  ;;  %7617 = vmatmul.msk.f32.gmra.mxu2 %vm6426_vm7, %v6398_v15  ;;  %v2072_v59 = vpop.xlane.xlu1 %2071  ;;  %v3982_v53 = vpop.f32.mrf.mxu0 }
 0x45b   : > { %15400 = vst [vmem:[#allocation50_spill] sm:$0xff] %v12993_v49  ;;  %v5794_v19 = vadd.f32 %v12843_v22, %v5602_v40  ;;  %v5634_v34 = vadd.f32 -1.2655122, %v5570_v51  ;;  %vm3195_vm15 = vweird.f32 %v12900_v2  ;;  %v13001_v35 = vadd.f32 1e-06, %v2710_v36 }
 0x45c   : > { %7476 = vmatmul.msk.f32.gmra.mxu0 %vm1964_vm3, %v3675_v12  ;;  %v5507_v13 = vadd.f32 1.0000237, %v5443_v58  ;;  %v5219_v37 = vadd.f32 0.09678418, %v5155_v26  ;;  %8017 = vrcp.f32 %v4389_v5  ;;  %v4421_v52 = vadd.f32 1.0, %v4357_v46  ;;  %vm13013_vm0 = vmor %vm3194_vm14, %vm3195_vm15 }
 0x45d   : > { %8019 = vpow2.f32 %v5936_v62  ;;  %v13005_v32 = vmul.f32 %v12900_v2, %v3192_v4  ;;  %v13008_v15 = vmul.f32 %v5667_v28, %v12655_v56  ;;  %v4358_v22 = vmul.f32 0.5, %v12993_v49 }
 0x45e   : > { %v3201_v51 = vmul.f32 0.5, %v3200_v45  ;;  %v13018_v58 = vmul.f32 0.5, %v12702_v16  ;;  %v4900_v36 = vmul.f32 %v12862_v8, %v4836_v55  ;;  %v4612_v26 = vadd.f32 -0.82215226, %v4548_v31  ;;  %v2399_v16 = vpop.xlane.xlu2 %2398 }
 0x45f   : > { %v5826_v5 = vadd.f32 %v12857_v10, %v5634_v34  ;;  %8021 = vrsqrt.f32 %v13001_v35  ;;  %v13024_v56 = vmul.f32 %v9658_v41, %v2072_v59  ;;  %v13027_v33 = vadd.f32 %v12623_v6, %v3982_v53 }
 0x460   : > { %15403 = vst [vmem:[#allocation79_spill] sm:$0xff] %v13018_v58  ;;  %v5874_v28 = vmul.f32 1.442695, %v5794_v19  ;;  %v5571_v46 = vmul.f32 %v12672_v60, %v5507_v13  ;;  %v5283_v62 = vmul.f32 %v12729_v27, %v5219_v37  ;;  %8023 = vrcp.f32 %v4421_v52  ;;  %v13087_v58 = vld [vmem:[#allocation3 + $0x110] sm:$0xff] }
 0x461   : > { %15404 = vst [vmem:[#allocation62_spill] sm:$0xff] %v13027_v33  ;;  %vm3204_vm1 = vweird.f32 %v12896_v61  ;;  %v4422_v4 = vadd.f32 1.0, %v4358_v22  ;;  %v13037_v12 = vmul.f32 0.70710677, %v13027_v33  ;;  %v3202_v55 = vsub.f32 1.5, %v3201_v51  ;;  %v15407_v22 = vld [vmem:[#allocation35_spill] sm:$0xff] }
 0x462   : > { %v13039_v45 = vpop.eup %8017  ;;  %v4964_v31 = vadd.f32 0.27886808, %v4900_v36  ;;  %v5668_v19 = vsub.f32 0.0, %v12771_v54  ;;  %v4676_v34 = vmul.f32 %v12976_v30, %v4612_v26  ;;  %v5938_v37 = vmul.f32 1.442695, %v5826_v5  ;;  %v13055_v26 = vld [vmem:[#allocation3 + $0x108] sm:$0xff]  ;;  %v2402_v18 = vpop.xlane.xlu1 %2401 }
 0x463   : > { %15405 = vst [vmem:[#allocation40_spill] sm:$0xff] %v13037_v12  ;;  %v13043_v13 = vpop.eup %8019  ;;  %v2583_v59 = vmul.f32 %v13024_v56, %v13024_v56  ;;  %v2519_v52 = vmul.f32 %v2399_v16, %v9658_v41  ;;  %v13049_v53 = vand.u32 2147483647, %v13037_v12  ;;  %vm6047_vm2 = vcmp.ge.f32.partialorder %v15407_v22, 0.0 }
 0x464   : > { %8025 = vpow2.f32 %v5874_v28  ;;  %v5635_v51 = vadd.f32 -1.2655122, %v5571_v46  ;;  %v5347_v36 = vadd.f32 0.37409195, %v5283_v62  ;;  %vm3205_vm4 = vweird.f32 %v12958_v14 }
 0x465   : > { %15406 = vst [vmem:[#allocation39_spill] sm:$0xff] %v13049_v53  ;;  %v13053_v10 = vpop.eup %8021  ;;  %v4517_v7 = vmul.f32 0.17087276, %v13039_v45  ;;  %8027 = vrcp.f32 %v4422_v4  ;;  %v5983_v16 = vmul.f32 %v12648_v17, %v12108_v57  ;;  %v13065_v28 = vmul.f32 %v12958_v14, %v3202_v55  ;;  %vm13071_vm5 = vmor %vm3204_vm1, %vm3205_vm4  ;;  %v15411_v55 = vld [vmem:[#allocation84_spill] sm:$0xff] }
 0x466   : > { %v13062_v12 = vpop.eup %8023  ;;  %v5028_v46 = vmul.f32 %v12862_v8, %v4964_v31  ;;  %v4740_v62 = vadd.f32 1.4885159, %v4676_v34  ;;  %v4326_v11 = vmul.f32 0.5, %v13049_v53  ;;  %8029 = vpow2.f32 %v5938_v37 }
 0x467   : > { %v13076_v4 = vmul.f32 %v5668_v19, %v12771_v54  ;;  %v5700_v57 = vsub.f32 0.0, %v12869_v9  ;;  %v2647_v17 = vsub.f32 %v2519_v52, %v2583_v59  ;;  %vm6079_vm6 = vcmp.ge.f32.partialorder %v15411_v55, 0.0  ;;  %v2075_v52 = vpop.xlane.xlu0 %2074 }
 0x468   : > { %v5827_v31 = vadd.f32 %v12942_v44, %v5635_v51  ;;  %v5411_v34 = vmul.f32 %v12729_v27, %v5347_v36  ;;  %v13083_v37 = vmul.f32 0.5, %v12820_v0  ;;  %v3209_v61 = vmul.f32 %v13053_v10, %v13001_v35 }
 0x469   : > { %15410 = vst [vmem:[#allocation81_spill] sm:$0xff] %v13076_v4  ;;  %v4581_v19 = vadd.f32 -0.82215226, %v4517_v7  ;;  %v4549_v59 = vmul.f32 0.17087276, %v13062_v12  ;;  %v6111_v60 = vsub.f32 1.0, %v5983_v16  ;;  %v4804_v51 = vmul.f32 %v12976_v30, %v4740_v62 }
 0x46a   : > { %15412 = vst [vmem:[#allocation42_spill] sm:$0xff] %v13083_v37  ;;  %v13092_v53 = vpop.eup %8025  ;;  %v5092_v44 = vadd.f32 -0.18628806, %v5028_v46  ;;  %v4390_v36 = vadd.f32 1.0, %v4326_v11  ;;  %v13102_v54 = vmul.f32 %v5700_v57, %v12869_v9  ;;  %v2711_v7 = vmax.f32 %v2647_v17, 0.0 }
 0x46b   : > { %15413 = vst [vmem:[#allocation47_spill] sm:$0xff] %v13092_v53  ;;  %v13099_v37 = vpop.eup %8027  ;;  %v7522_v47 = vadd.f32 -1.0, %v5983_v16  ;;  %v6015_v33 = vmul.f32 %v12663_v23, %v12131_v63  ;;  %v5940_v4 = vmul.f32 1.442695, %v5827_v31  ;;  %v5475_v53 = vadd.f32 1.0000237, %v5411_v34 }
 0x46c   : > { %v3210_v49 = vmul.f32 %v13053_v10, %v3209_v61  ;;  %v13108_v0 = vmul.f32 %v9658_v41, %v2075_v52  ;;  %v13110_v46 = vpop.eup %8029  ;;  %v4645_v11 = vmul.f32 %v13039_v45, %v4581_v19  ;;  %v4613_v62 = vadd.f32 -0.82215226, %v4549_v59  ;;  %v13128_v19 = vld [vmem:[#allocation3 + $0x118] sm:$0xff] }
 0x46d   : > { %v6239_v9 = vsel %vm6047_vm2, %v6111_v60, %v7522_v47  ;;  %v6143_v16 = vsub.f32 1.0, %v6015_v33  ;;  %v5156_v57 = vmul.f32 %v12862_v8, %v5092_v44  ;;  %v4868_v63 = vadd.f32 -1.135204, %v4804_v51 }
 0x46e   : > { %v4550_v23 = vmul.f32 0.17087276, %v13099_v37  ;;  %8031 = vrcp.f32 %v4390_v36  ;;  %vm3214_vm8 = vweird.f32 %v13001_v35  ;;  %v13118_v17 = vadd.f32 1e-06, %v2711_v7 }
 0x46f   : > { %v6303_v31 = vadd.f32 1.0, %v6239_v9  ;;  %v7554_v34 = vadd.f32 -1.0, %v6015_v33  ;;  %v15414_v61 = vsub.f32 %v12876_v42, %v12760_v50  ;;  %v15415_v47 = vsel %vm13013_vm0, %v12900_v2, %v13005_v32  ;;  %v15416_v42 = vld [vmem:[#allocation36_spill] sm:$0xff]  ;;  %v3985_v32 = vpop.f32.mrf.mxu0 }
 0x470   : > { %v3211_v22 = vmul.f32 0.5, %v3210_v49  ;;  %v2584_v52 = vmul.f32 %v13108_v0, %v13108_v0  ;;  %v2520_v33 = vmul.f32 %v2402_v18, %v9658_v41  ;;  %v4709_v44 = vadd.f32 1.4885159, %v4645_v11  ;;  %v15417_v9 = vld [vmem:[#allocation60_spill] sm:$0xff] }
 0x471   : > { %v3540_v60 = vmul.f32 %v15415_v47, %v15414_v61  ;;  %v4677_v50 = vmul.f32 %v13062_v12, %v4613_v62  ;;  %v6367_v40 = vmul.f32 %v6303_v31, %v15416_v42  ;;  %v6271_v2 = vsel %vm6079_vm6, %v6143_v16, %v7554_v34 }
 0x472   : > { %v5539_v49 = vmul.f32 %v12729_v27, %v5475_v53  ;;  %v4932_v51 = vmul.f32 %v12976_v30, %v4868_v63  ;;  %v13142_v36 = vmul.f32 0.5, %v12890_v43  ;;  %v4614_v7 = vadd.f32 -0.82215226, %v4550_v23  ;;  %v15419_v23 = vld [vmem:[#allocation58_spill] sm:$0xff] }
 0x473   : > { %vm6080_vm9 = vcmp.ge.f32.partialorder %v15417_v9, 0.0  ;;  %v5220_v41 = vadd.f32 0.09678418, %v5156_v57  ;;  %8033 = vrsqrt.f32 %v13118_v17  ;;  %7586 = vmatmul.msk.f32.gmra.mxu1 %vm6426_vm7, %v6367_v40  ;;  %v6335_v18 = vadd.f32 1.0, %v6271_v2 }
 0x474   : > { %v3608_v55 = vmul.f32 %v12982_v1, %v3540_v60  ;;  %v13148_v11 = vpop.eup %8031  ;;  %v3212_v62 = vsub.f32 1.5, %v3211_v22  ;;  %v13151_v53 = vmul.f32 0.5, %v12915_v20  ;;  %v2648_v16 = vsub.f32 %v2520_v33, %v2584_v52 }
 0x475   : > { %v13154_v43 = vadd.f32 %v12623_v6, %v3985_v32  ;;  %v4773_v63 = vmul.f32 %v13039_v45, %v4709_v44  ;;  %v4741_v57 = vadd.f32 1.4885159, %v4677_v50  ;;  %v6399_v31 = vmul.f32 %v6335_v18, %v15419_v23 }
 0x476   : > { %15418 = vst [vmem:[#allocation71_spill] sm:$0xff] %v13151_v53  ;;  %v3676_v34 = vadd.f32 %v12884_v38, %v3608_v55  ;;  %v5603_v61 = vadd.f32 -1.2655122, %v5539_v49  ;;  %v4996_v47 = vadd.f32 0.27886808, %v4932_v51  ;;  %vm3215_vm10 = vweird.f32 %v13053_v10 }
 0x477   : > { %v4678_v60 = vmul.f32 %v13099_v37, %v4614_v7  ;;  %v5284_v20 = vmul.f32 %v12862_v8, %v5220_v41  ;;  %v4518_v22 = vmul.f32 0.17087276, %v13148_v11  ;;  %7618 = vmatmul.msk.f32.gmra.mxu2 %vm6426_vm7, %v6399_v31  ;;  %v13166_v52 = vmul.f32 0.70710677, %v13154_v43  ;;  %vm13192_vm12 = vmor %vm3214_vm8, %vm3215_vm10 }
 0x478   : > { %7477 = vmatmul.msk.f32.gmra.mxu0 %vm1964_vm3, %v3676_v34  ;;  %v6016_v33 = vmul.f32 %v12765_v24, %v12213_v39  ;;  %8035 = vpow2.f32 %v5940_v4  ;;  %v5669_v44 = vsub.f32 0.0, %v12946_v25  ;;  %v2712_v50 = vmax.f32 %v2648_v16, 0.0  ;;  %v15423_v4 = vld [vmem:[#allocation63_spill] sm:$0xff]  ;;  %v4081_v34 = vpop.f32.mrf.mxu3 }
 0x479   : > { %15420 = vst [vmem:[#allocation66_spill] sm:$0xff] %v13166_v52  ;;  %v15421_v42 = vsub.f32 %v13055_v26, %v12802_v3  ;;  %v15422_v40 = vsel %vm13071_vm5, %v12958_v14, %v13065_v28  ;;  %v13179_v32 = vpop.eup %8033  ;;  %v3213_v49 = vmul.f32 %v13053_v10, %v3212_v62  ;;  %v4837_v51 = vadd.f32 -1.135204, %v4773_v63 }
 0x47a   : > { %v4805_v39 = vmul.f32 %v13062_v12, %v4741_v57  ;;  %v13184_v24 = vand.u32 2147483647, %v13166_v52  ;;  %vm6048_vm11 = vcmp.ge.f32.partialorder %v15423_v4, 0.0  ;;  %v5060_v3 = vmul.f32 %v12976_v30, %v4996_v47  ;;  %v15432_v4 = vld [vmem:[#allocation76_spill] sm:$0xff] }
 0x47b   : > { %v3541_v2 = vmul.f32 %v15422_v40, %v15421_v42  ;;  %v4742_v26 = vadd.f32 1.4885159, %v4678_v60  ;;  %v6144_v5 = vsub.f32 1.0, %v6016_v33  ;;  %v7555_v28 = vadd.f32 -1.0, %v6016_v33  ;;  %v15427_v40 = vld [vmem:[#allocation69_spill] sm:$0xff] }
 0x47c   : > { %v13197_v7 = vadd.f32 %v13008_v15, %v5603_v61  ;;  %v5348_v41 = vadd.f32 0.37409195, %v5284_v20  ;;  %v4582_v18 = vadd.f32 -0.82215226, %v4518_v22  ;;  %v4327_v55 = vmul.f32 0.5, %v13184_v24 }
 0x47d   : > { %v3219_v62 = vmul.f32 %v13179_v32, %v13118_v17  ;;  %v13202_v16 = vadd.f32 1e-06, %v2712_v50  ;;  %v6272_v35 = vsel %vm6080_vm9, %v6144_v5, %v7555_v28  ;;  %v3609_v63 = vmul.f32 %v12982_v1, %v3541_v2  ;;  %v15426_v50 = vld [vmem:[#allocation57_spill] sm:$0xff] }
 0x47e   : > { %v3217_v57 = vsel %vm13192_vm12, %v13053_v10, %v3213_v49  ;;  %v4901_v15 = vmul.f32 %v13039_v45, %v4837_v51  ;;  %v4869_v23 = vadd.f32 -1.135204, %v4805_v39  ;;  %v4391_v31 = vadd.f32 1.0, %v4327_v55  ;;  %v13211_v61 = vpop.eup %8035  ;;  %v15428_v51 = vld [vmem:[#allocation49_spill] sm:$0xff] }
 0x47f   : > { %v5124_v47 = vadd.f32 -0.18628806, %v5060_v3  ;;  %v4806_v60 = vmul.f32 %v13099_v37, %v4742_v26  ;;  %v6336_v20 = vadd.f32 1.0, %v6272_v35  ;;  %v3677_v9 = vadd.f32 %v12884_v38, %v3609_v63 }
 0x480   : > { %v5412_v22 = vmul.f32 %v12862_v8, %v5348_v41  ;;  %v4646_v33 = vmul.f32 %v13148_v11, %v4582_v18  ;;  %8037 = vrcp.f32 %v4391_v31  ;;  %v5984_v10 = vmul.f32 %v12864_v48, %v15426_v50 }
 0x481   : > { %v3220_v42 = vmul.f32 %v13179_v32, %v3219_v62  ;;  %8039 = vrsqrt.f32 %v13202_v16  ;;  %v6400_v2 = vmul.f32 %v6336_v20, %v15427_v40  ;;  %7478 = vmatmul.msk.f32.gmra.mxu0 %vm1964_vm3, %v3677_v9  ;;  %v13224_v49 = vadd.f32 %v12623_v6, %v4081_v34 }
 0x482   : > { %vm6049_vm13 = vcmp.ge.f32.partialorder %v15428_v51, 0.0  ;;  %v4965_v39 = vadd.f32 0.27886808, %v4901_v15  ;;  %v4933_v3 = vmul.f32 %v13062_v12, %v4869_v23  ;;  %v6112_v14 = vsub.f32 1.0, %v5984_v10 }
 0x483   : > { %v7523_v26 = vadd.f32 -1.0, %v5984_v10  ;;  %v5188_v48 = vmul.f32 %v12976_v30, %v5124_v47  ;;  %v13230_v5 = vmul.f32 %v5669_v44, %v12946_v25  ;;  %v4870_v28 = vadd.f32 -1.135204, %v4806_v60  ;;  %7619 = vmatmul.msk.f32.gmra.mxu2 %vm6426_vm7, %v6400_v2  ;;  %v15431_v47 = vld [vmem:[#allocation55_spill] sm:$0xff]  ;;  %v4084_v2 = vpop.f32.mrf.mxu3 }
 0x484   : > { %v13234_v41 = vmul.f32 0.70710677, %v13224_v49  ;;  %vm3224_vm14 = vweird.f32 %v13118_v17  ;;  %v4710_v6 = vadd.f32 1.4885159, %v4646_v33  ;;  %v15430_v55 = vsub.f32 %v13087_v58, %v12907_v29  ;;  %v3988_v33 = vpop.f32.mrf.mxu0 }
 0x485   : > { %v6240_v18 = vsel %vm6048_vm11, %v6112_v14, %v7523_v26  ;;  %v5476_v35 = vadd.f32 1.0000237, %v5412_v22  ;;  %v3221_v63 = vmul.f32 0.5, %v3220_v42  ;;  %v5029_v23 = vmul.f32 %v13039_v45, %v4965_v39 }
 0x486   : > { %15429 = vst [vmem:[#allocation54_spill] sm:$0xff] %v13234_v41  ;;  %v3542_v62 = vmul.f32 %v3217_v57, %v15430_v55  ;;  %v6304_v25 = vadd.f32 1.0, %v6240_v18  ;;  %v13243_v44 = vand.u32 2147483647, %v13234_v41  ;;  %v13245_v15 = vpop.eup %8037  ;;  %v4997_v31 = vadd.f32 0.27886808, %v4933_v3 }
 0x487   : > { %v5985_v60 = vmul.f32 %v15432_v4, %v15431_v47  ;;  %v13251_v20 = vpop.eup %8039  ;;  %v5252_v29 = vadd.f32 0.09678418, %v5188_v48  ;;  %v4934_v58 = vmul.f32 %v13099_v37, %v4870_v28  ;;  %v15433_v57 = vld [vmem:[#allocation61_spill] sm:$0xff]  ;;  %v4774_v50 = vmul.f32 %v13148_v11, %v4710_v6  ;;  %v13268_v6 = vld [vmem:[%s14745_s7] ss:$0 sm:$0xff] }
 0x488   : > { %v3610_v34 = vmul.f32 %v12982_v1, %v3542_v62  ;;  %v6368_v9 = vmul.f32 %v6304_v25, %v15433_v57  ;;  %v4359_v22 = vmul.f32 0.5, %v13243_v44  ;;  %v4519_v10 = vmul.f32 0.17087276, %v13245_v15  ;;  %v15434_v25 = vld [vmem:[#allocation68_spill] sm:$0xff] }
 0x489   : > { %v6113_v40 = vsub.f32 1.0, %v5985_v60  ;;  %v3222_v39 = vsub.f32 1.5, %v3221_v63  ;;  %vm3225_vm15 = vweird.f32 %v13179_v32  ;;  %v7524_v14 = vadd.f32 -1.0, %v5985_v60 }
 0x48a   : > { %v3678_v42 = vadd.f32 %v12884_v38, %v3610_v34  ;;  %7587 = vmatmul.msk.f32.gmra.mxu1 %vm6426_vm7, %v6368_v9  ;;  %v4423_v3 = vadd.f32 1.0, %v4359_v22  ;;  %v5093_v26 = vadd.f32 -0.18628806, %v5029_v23  ;;  %v5061_v48 = vmul.f32 %v13062_v12, %v4997_v31  ;;  %vm13291_vm1 = vmor %vm3224_vm14, %vm3225_vm15  ;;  %v15438_v22 = vld [vmem:[#allocation44_spill] sm:$0xff] }
 0x48b   : > { %v3229_v28 = vmul.f32 %v13251_v20, %v13202_v16  ;;  %v13271_v18 = vadd.f32 %v13268_v6, %v3988_v33  ;;  %v4998_v55 = vadd.f32 0.27886808, %v4934_v58  ;;  %v6241_v62 = vsel %vm6049_vm13, %v6113_v40, %v7524_v14  ;;  %v15440_v40 = vld [vmem:[#allocation64_spill] sm:$0xff] }
 0x48c   : > { %7479 = vmatmul.msk.f32.gmra.mxu0 %vm1964_vm3, %v3678_v42  ;;  %8041 = vrcp.f32 %v4423_v3  ;;  %v13276_v63 = vadd.f32 %v13268_v6, %v4084_v2  ;;  %vm6081_vm0 = vcmp.ge.f32.partialorder %v15434_v25, 0.0  ;;  %v5316_v23 = vmul.f32 %v12976_v30, %v5252_v29 }
 0x48d   : > { %v4838_v31 = vadd.f32 -1.135204, %v4774_v50  ;;  %v4583_v34 = vadd.f32 -0.82215226, %v4519_v10  ;;  %v6305_v47 = vadd.f32 1.0, %v6241_v62  ;;  %v5540_v4 = vmul.f32 %v12862_v8, %v5476_v35 }
 0x48e   : > { %v5701_v60 = vsub.f32 0.0, %v12962_v21  ;;  %v3223_v58 = vmul.f32 %v13179_v32, %v3222_v39  ;;  %v13284_v57 = vmul.f32 0.70710677, %v13271_v18  ;;  %v5157_v51 = vmul.f32 %v13039_v45, %v5093_v26 }
 0x48f   : > { %v5125_v9 = vadd.f32 -0.18628806, %v5061_v48  ;;  %v6369_v35 = vmul.f32 %v6305_v47, %v15438_v22  ;;  %v13297_v33 = vmul.f32 0.70710677, %v13276_v63  ;;  %v5062_v50 = vmul.f32 %v13099_v37, %v4998_v55 }
 0x490   : > { %15435 = vst [vmem:[#allocation59_spill] sm:$0xff] %v13284_v57  ;;  %v3230_v10 = vmul.f32 %v13251_v20, %v3229_v28  ;;  %v13302_v42 = vand.u32 2147483647, %v13284_v57  ;;  %v6017_v2 = vmul.f32 %v13043_v13, %v15440_v40  ;;  %v5380_v17 = vadd.f32 0.37409195, %v5316_v23 }
 0x491   : > { %15439 = vst [vmem:[#allocation52_spill] sm:$0xff] %v13297_v33  ;;  %v4902_v39 = vmul.f32 %v13148_v11, %v4838_v31  ;;  %v4647_v3 = vmul.f32 %v13245_v15, %v4583_v34  ;;  %v13309_v14 = vand.u32 2147483647, %v13297_v33  ;;  %v5604_v48 = vadd.f32 -1.2655122, %v5540_v4 }
 0x492   : > { %v13311_v26 = vpop.eup %8041  ;;  %v3227_v28 = vsel %vm13291_vm1, %v13179_v32, %v3223_v58  ;;  %7588 = vmatmul.msk.f32.gmra.mxu1 %vm6426_vm7, %v6369_v35  ;;  %v4328_v55 = vmul.f32 0.5, %v13302_v42  ;;  %v6145_v13 = vsub.f32 1.0, %v6017_v2  ;;  %v5221_v62 = vadd.f32 0.09678418, %v5157_v51  ;;  %v4087_v35 = vpop.f32.mrf.mxu3 }
 0x493   : > { %v5189_v23 = vmul.f32 %v13062_v12, %v5125_v9  ;;  %v4551_v31 = vmul.f32 0.17087276, %v13311_v26  ;;  %v4360_v34 = vmul.f32 0.5, %v13309_v14  ;;  %v5126_v47 = vadd.f32 -0.18628806, %v5062_v50 }
 0x494   : > { %v3231_v22 = vmul.f32 0.5, %v3230_v10  ;;  %v4392_v40 = vadd.f32 1.0, %v4328_v55  ;;  %v7556_v4 = vadd.f32 -1.0, %v6017_v2  ;;  %v5444_v59 = vmul.f32 %v12976_v30, %v5380_v17 }
 0x495   : > { %v4966_v29 = vadd.f32 0.27886808, %v4902_v39  ;;  %v4711_v32 = vadd.f32 1.4885159, %v4647_v3  ;;  %v4424_v58 = vadd.f32 1.0, %v4360_v34  ;;  %v15441_v9 = vsub.f32 %v13128_v19, %v13024_v56  ;;  %v15442_v56 = vld [vmem:[#allocation67_spill] sm:$0xff] }
 0x496   : > { %v4615_v33 = vadd.f32 -0.82215226, %v4551_v31  ;;  %8043 = vrcp.f32 %v4392_v40  ;;  %v6273_v51 = vsel %vm6081_vm0, %v6145_v13, %v7556_v4  ;;  %v5285_v50 = vmul.f32 %v13039_v45, %v5221_v62  ;;  %v15443_v34 = vld [vmem:[#allocation78_spill] sm:$0xff]  ;;  %v15445_v40 = vld [vmem:[#allocation65_spill] sm:$0xff] }
 0x497   : > { %v3543_v57 = vmul.f32 %v3227_v28, %v15441_v9  ;;  %vm3234_vm2 = vweird.f32 %v13202_v16  ;;  %8045 = vrcp.f32 %v4424_v58  ;;  %v6337_v10 = vadd.f32 1.0, %v6273_v51  ;;  %v15446_v4 = vld [vmem:[#allocation50_spill] sm:$0xff] }
 0x498   : > { %v5253_v2 = vadd.f32 0.09678418, %v5189_v23  ;;  %v3232_v17 = vsub.f32 1.5, %v3231_v22  ;;  %v13331_v3 = vadd.f32 %v13268_v6, %v4087_v35  ;;  %v5508_v55 = vadd.f32 1.0000237, %v5444_v59  ;;  %v8226_v35 = vld [vmem:[#allocation3 + $0x120] sm:$0xff] }
 0x499   : > { %v3611_v39 = vmul.f32 %v12982_v1, %v3543_v57  ;;  %v5190_v25 = vmul.f32 %v13099_v37, %v5126_v47  ;;  %v5030_v13 = vmul.f32 %v13148_v11, %v4966_v29  ;;  %v6401_v19 = vmul.f32 %v6337_v10, %v15442_v56  ;;  %v15450_v10 = vld [vmem:[#allocation73_spill] sm:$0xff] }
 0x49a   : > { %vm3235_vm4 = vweird.f32 %v13251_v20  ;;  %v4775_v28 = vmul.f32 %v13245_v15, %v4711_v32  ;;  %v4679_v62 = vmul.f32 %v13311_v26, %v4615_v33  ;;  %v13341_v57 = vmul.f32 1.442695, %v13197_v7 }
 0x49b   : > { %v3679_v23 = vadd.f32 %v12884_v38, %v3611_v39  ;;  %v5349_v31 = vadd.f32 0.37409195, %v5285_v50  ;;  %v13344_v59 = vmul.f32 %v5701_v60, %v12962_v21  ;;  %v13347_v47 = vmul.f32 0.5, %v15443_v34  ;;  %7620 = vmatmul.msk.f32.gmra.mxu2 %vm6426_vm7, %v6401_v19  ;;  %v3991_v60 = vpop.f32.mrf.mxu0  ;;  %vm13367_vm6 = vmor %vm3234_vm2, %vm3235_vm4  ;;  %v15452_v39 = vld [vmem:[#allocation81_spill] sm:$0xff]  ;;  %v15453_v34 = vld [vmem:[#allocation62_spill] sm:$0xff] }
 0x49c   : > { %v13350_v22 = vpop.eup %8043  ;;  %vm6050_vm5 = vcmp.ge.f32.partialorder %v15445_v40, 0.0  ;;  %v5317_v33 = vmul.f32 %v13062_v12, %v5253_v2  ;;  %v3233_v7 = vmul.f32 %v13251_v20, %v3232_v17  ;;  %v13358_v21 = vmul.f32 0.70710677, %v13331_v3  ;;  %v15451_v2 = vld [vmem:[#allocation47_spill] sm:$0xff]  ;;  %v15458_v40 = vld [vmem:[#allocation70_spill] sm:$0xff] }
 0x49d   : > { %15444 = vst [vmem:[#allocation75_spill] sm:$0xff] %v13347_v47  ;;  %7480 = vmatmul.msk.f32.gmra.mxu0 %vm1964_vm3, %v3679_v23  ;;  %v13360_v32 = vpop.eup %8045  ;;  %v5254_v58 = vadd.f32 0.09678418, %v5190_v25  ;;  %v2776_v51 = vsub.f32 %v8226_v35, %v13108_v0  ;;  %v5094_v50 = vadd.f32 -0.18628806, %v5030_v13  ;;  %v5986_v17 = vmul.f32 %v15451_v2, %v15450_v10  ;;  %v15455_v13 = vld [vmem:[#allocation72_spill] sm:$0xff] }
 0x49e   : > { %15447 = vst [vmem:[#allocation56_spill] sm:$0xff] %v13358_v21  ;;  %v5796_v56 = vadd.f32 %v15452_v39, %v5604_v48  ;;  %v5572_v19 = vmul.f32 %v12976_v30, %v5508_v55  ;;  %v4839_v25 = vadd.f32 -1.135204, %v4775_v28  ;;  %v4743_v23 = vadd.f32 1.4885159, %v4679_v62  ;;  %v15456_v2 = vld [vmem:[#allocation85_spill] sm:$0xff] }
 0x49f   : > { %v5413_v0 = vmul.f32 %v13039_v45, %v5349_v31  ;;  %v13377_v35 = vmul.f32 0.5, %v15453_v34  ;;  %v4520_v16 = vmul.f32 0.17087276, %v13350_v22  ;;  %v13381_v29 = vadd.f32 %v13268_v6, %v3991_v60 }
 0x4a0   : > { %vm6082_vm8 = vcmp.ge.f32.partialorder %v15455_v13, 0.0  ;;  %v5381_v41 = vadd.f32 0.37409195, %v5317_v33  ;;  %v3237_v48 = vsel %vm13367_vm6, %v13251_v20, %v3233_v7  ;;  %v4552_v55 = vmul.f32 0.17087276, %v13360_v32 }
 0x4a1   : > { %15454 = vst [vmem:[#allocation48_spill] sm:$0xff] %v13377_v35  ;;  %v13389_v28 = vand.u32 2147483647, %v13358_v21  ;;  %v5318_v62 = vmul.f32 %v13099_v37, %v5254_v58  ;;  %v5158_v31 = vmul.f32 %v13148_v11, %v5094_v50  ;;  %v6114_v10 = vsub.f32 1.0, %v5986_v17 }
 0x4a2   : > { %v6018_v60 = vmul.f32 %v13110_v46, %v15456_v2  ;;  %v5878_v39 = vmul.f32 1.442695, %v5796_v56  ;;  %v5636_v34 = vadd.f32 -1.2655122, %v5572_v19  ;;  %v4903_v33 = vmul.f32 %v13245_v15, %v4839_v25 }
 0x4a3   : > { %v4807_v9 = vmul.f32 %v13311_v26, %v4743_v23  ;;  %v4584_v20 = vadd.f32 -0.82215226, %v4520_v16  ;;  %v13398_v7 = vmul.f32 0.70710677, %v13381_v29  ;;  %v7525_v21 = vadd.f32 -1.0, %v5986_v17 }
 0x4a4   : > { %v3544_v52 = vmul.f32 %v3237_v48, %v2776_v51  ;;  %v5477_v35 = vadd.f32 1.0000237, %v5413_v0  ;;  %v5445_v58 = vmul.f32 %v13062_v12, %v5381_v41  ;;  %v4616_v50 = vadd.f32 -0.82215226, %v4552_v55 }
 0x4a5   : > { %15457 = vst [vmem:[#allocation45_spill] sm:$0xff] %v13398_v7  ;;  %v4361_v47 = vmul.f32 0.5, %v13389_v28  ;;  %v5382_v53 = vadd.f32 0.37409195, %v5318_v62  ;;  %v5222_v46 = vadd.f32 0.09678418, %v5158_v31  ;;  %v6242_v56 = vsel %vm6050_vm5, %v6114_v10, %v7525_v21  ;;  %v3994_v31 = vpop.f32.mrf.mxu0 }
 0x4a6   : > { %v6146_v19 = vsub.f32 1.0, %v6018_v60  ;;  %v5828_v25 = vadd.f32 %v13102_v54, %v5636_v34  ;;  %v4967_v23 = vadd.f32 0.27886808, %v4903_v33  ;;  %v4871_v16 = vadd.f32 -1.135204, %v4807_v9  ;;  %v15459_v9 = vld [vmem:[#allocation39_spill] sm:$0xff] }
 0x4a7   : > { %v6306_v2 = vadd.f32 1.0, %v6242_v56  ;;  %v4648_v17 = vmul.f32 %v13350_v22, %v4584_v20  ;;  %v13407_v51 = vand.u32 2147483647, %v13398_v7  ;;  %v7557_v41 = vadd.f32 -1.0, %v6018_v60 }
 0x4a8   : > { %v3612_v0 = vmul.f32 %v12982_v1, %v3544_v52  ;;  %v5509_v48 = vadd.f32 1.0000237, %v5445_v58  ;;  %v4680_v55 = vmul.f32 %v13360_v32, %v4616_v50  ;;  %v4425_v62 = vadd.f32 1.0, %v4361_v47  ;;  %v15460_v50 = vld [vmem:[#allocation74_spill] sm:$0xff] }
 0x4a9   : > { %v6370_v21 = vmul.f32 %v6306_v2, %v15458_v40  ;;  %v5541_v54 = vmul.f32 %v13039_v45, %v5477_v35  ;;  %v5446_v10 = vmul.f32 %v13099_v37, %v5382_v53  ;;  %v6274_v34 = vsel %vm6082_vm8, %v6146_v19, %v7557_v41 }
 0x4aa   : > { %v3680_v33 = vadd.f32 %v12884_v38, %v3612_v0  ;;  %v5286_v60 = vmul.f32 %v13148_v11, %v5222_v46  ;;  %v5670_v1 = vsub.f32 0.0, %v15459_v9  ;;  %v4935_v52 = vmul.f32 %v13311_v26, %v4871_v16 }
 0x4ab   : > { %7589 = vmatmul.msk.f32.gmra.mxu1 %vm6426_vm7, %v6370_v21  ;;  %v6338_v47 = vadd.f32 1.0, %v6274_v34  ;;  %v5031_v20 = vmul.f32 %v13245_v15, %v4967_v23  ;;  %v4712_v58 = vadd.f32 1.4885159, %v4648_v17  ;;  %v4329_v35 = vmul.f32 0.5, %v13407_v51  ;;  %v15461_v23 = vld [vmem:[#allocation53_spill] sm:$0xff] }
 0x4ac   : > { %7481 = vmatmul.msk.f32.gmra.mxu0 %vm1964_vm3, %v3680_v33  ;;  %v13425_v53 = vadd.f32 %v13268_v6, %v3994_v31  ;;  %v5573_v38 = vmul.f32 %v13062_v12, %v5509_v48  ;;  %v4744_v13 = vadd.f32 1.4885159, %v4680_v55  ;;  %8047 = vrcp.f32 %v4425_v62 }
 0x4ad   : > { %v6402_v46 = vmul.f32 %v6338_v47, %v15460_v50  ;;  %8049 = vpow2.f32 %v13341_v57  ;;  %v5942_v56 = vmul.f32 1.442695, %v5828_v25  ;;  %v5605_v19 = vadd.f32 -1.2655122, %v5541_v54  ;;  %v15463_v25 = vld [vmem:[#allocation43_spill] sm:$0xff] }
 0x4ae   : > { %v5510_v16 = vadd.f32 1.0000237, %v5446_v10  ;;  %vm6083_vm9 = vcmp.ge.f32.partialorder %v15461_v23, 0.0  ;;  %v15462_v2 = vsub.f32 0.0, %v15446_v4  ;;  %v5350_v41 = vadd.f32 0.37409195, %v5286_v60 }
 0x4af   : > { %v4999_v0 = vadd.f32 0.27886808, %v4935_v52  ;;  %7621 = vmatmul.msk.f32.gmra.mxu2 %vm6426_vm7, %v6402_v46  ;;  %v13436_v48 = vmul.f32 0.70710677, %v13425_v53  ;;  %v5095_v55 = vadd.f32 -0.18628806, %v5031_v20  ;;  %v4776_v62 = vmul.f32 %v13350_v22, %v4712_v58 }
 0x4b0   : > { %v5766_v17 = vmul.f32 %v15462_v2, %v15446_v4  ;;  %v4393_v57 = vadd.f32 1.0, %v4329_v35  ;;  %v6019_v40 = vmul.f32 %v13211_v61, %v15463_v25  ;;  %8051 = vpow2.f32 %v5878_v39  ;;  %v15464_v60 = vld [vmem:[#allocation77_spill] sm:$0xff] }
 0x4b1   : > { %v5637_v21 = vadd.f32 -1.2655122, %v5573_v38  ;;  %v4808_v31 = vmul.f32 %v13360_v32, %v4744_v13  ;;  %v13443_v4 = vand.u32 2147483647, %v13436_v48  ;;  %8053 = vpow2.f32 %v5942_v56 }
 0x4b2   : > { %v5797_v54 = vadd.f32 %v13230_v5, %v5605_v19  ;;  %v13447_v10 = vmul.f32 %v5670_v1, %v15459_v9  ;;  %v5671_v34 = vsub.f32 0.0, %v13184_v24  ;;  %v13450_v33 = vpop.eup %8047  ;;  %vm6051_vm10 = vcmp.ge.f32.partialorder %v15464_v60, 0.0 }
 0x4b3   : > { %v5574_v61 = vmul.f32 %v13099_v37, %v5510_v16  ;;  %v5414_v39 = vmul.f32 %v13148_v11, %v5350_v41  ;;  %v5063_v52 = vmul.f32 %v13311_v26, %v4999_v0  ;;  %v4330_v47 = vmul.f32 0.5, %v13443_v4  ;;  %v8050_v20 = vpop.eup %8049 }
 0x4b4   : > { %v5159_v5 = vmul.f32 %v13245_v15, %v5095_v55  ;;  %v4840_v58 = vadd.f32 -1.135204, %v4776_v62  ;;  %8055 = vrcp.f32 %v4393_v57  ;;  %v6147_v9 = vsub.f32 1.0, %v6019_v40 }
 0x4b5   : > { %v5829_v1 = vadd.f32 %v13344_v59, %v5637_v21  ;;  %v13460_v35 = vmul.f32 0.5, %v13154_v43  ;;  %v4872_v38 = vadd.f32 -1.135204, %v4808_v31  ;;  %v4394_v13 = vadd.f32 1.0, %v4330_v47  ;;  %v15465_v47 = vld [vmem:[#allocation80_spill] sm:$0xff] }
 0x4b6   : > { %v5880_v50 = vmul.f32 1.442695, %v5797_v54  ;;  %v13463_v46 = vmul.f32 %v5671_v34, %v13184_v24  ;;  %v4553_v56 = vmul.f32 0.17087276, %v13450_v33  ;;  %v7558_v19 = vadd.f32 -1.0, %v6019_v40  ;;  %v8052_v16 = vpop.eup %8051  ;;  %v4090_v24 = vpop.f32.mrf.mxu3 }
 0x4b7   : > { %v5478_v2 = vadd.f32 1.0000237, %v5414_v39  ;;  %v5127_v41 = vadd.f32 -0.18628806, %v5063_v52  ;;  %8057 = vrcp.f32 %v4394_v13  ;;  %v5987_v0 = vmul.f32 %v8050_v20, %v12729_v27  ;;  %v13467_v55 = vpop.eup %8053 }
 0x4b8   : > { %v5638_v59 = vadd.f32 -1.2655122, %v5574_v61  ;;  %v5223_v43 = vadd.f32 0.09678418, %v5159_v5  ;;  %v4904_v62 = vmul.f32 %v13350_v22, %v4840_v58  ;;  %v6275_v57 = vsel %vm6083_vm9, %v6147_v9, %v7558_v19 }
 0x4b9   : > { %v5944_v25 = vmul.f32 1.442695, %v5829_v1  ;;  %v4936_v21 = vmul.f32 %v13360_v32, %v4872_v38  ;;  %v6339_v40 = vadd.f32 1.0, %v6275_v57  ;;  %v6115_v31 = vsub.f32 1.0, %v5987_v0 }
 0x4ba   : > { %v13473_v54 = vpop.eup %8055  ;;  %8059 = vpow2.f32 %v5880_v50  ;;  %v5703_v27 = vsub.f32 0.0, %v13243_v44  ;;  %v4617_v34 = vadd.f32 -0.82215226, %v4553_v56  ;;  %v7526_v39 = vadd.f32 -1.0, %v5987_v0 }
 0x4bb   : > { %v5542_v61 = vmul.f32 %v13148_v11, %v5478_v2  ;;  %v5191_v52 = vmul.f32 %v13311_v26, %v5127_v41  ;;  %v6403_v23 = vmul.f32 %v6339_v40, %v15465_v47  ;;  %v13480_v20 = vadd.f32 %v13268_v6, %v4090_v24  ;;  %v15469_v24 = vld [vmem:[#allocation83_spill] sm:$0xff] }
 0x4bc   : > { %v5830_v5 = vadd.f32 %v5766_v17, %v5638_v59  ;;  %v5287_v58 = vmul.f32 %v13245_v15, %v5223_v43  ;;  %v4968_v9 = vadd.f32 0.27886808, %v4904_v62  ;;  %v6243_v1 = vsel %vm6051_vm10, %v6115_v31, %v7526_v39  ;;  %v15468_v43 = vld [vmem:[#allocation37_spill] sm:$0xff] }
 0x4bd   : > { %v13485_v38 = vpop.eup %8057  ;;  %8061 = vpow2.f32 %v5944_v25  ;;  %v5000_v13 = vadd.f32 0.27886808, %v4936_v21  ;;  %v4521_v50 = vmul.f32 0.17087276, %v13473_v54  ;;  %7622 = vmatmul.msk.f32.gmra.mxu2 %vm6426_vm7, %v6403_v23  ;;  %v6307_v56 = vadd.f32 1.0, %v6243_v1 }
 0x4be   : > { %v13490_v19 = vmul.f32 0.5, %v13224_v49  ;;  %v4681_v17 = vmul.f32 %v13450_v33, %v4617_v34  ;;  %v4522_v2 = vmul.f32 0.17087276, %v13485_v38  ;;  %v13495_v41 = vmul.f32 0.70710677, %v13480_v20 }
 0x4bf   : > { %v5606_v60 = vadd.f32 -1.2655122, %v5542_v61  ;;  %v5255_v0 = vadd.f32 0.09678418, %v5191_v52  ;;  %v13498_v59 = vmul.f32 %v5703_v27, %v13243_v44  ;;  %v6371_v62 = vmul.f32 %v6307_v56, %v15468_v43  ;;  %v4093_v43 = vpop.f32.mrf.mxu3 }
 0x4c0   : > { %15466 = vst [vmem:[#allocation35_spill] sm:$0xff] %v13490_v19  ;;  %v13501_v57 = vpop.eup %8059  ;;  %vm6052_vm11 = vcmp.ge.f32.partialorder %v15469_v24, 0.0  ;;  %v5946_v49 = vmul.f32 1.442695, %v5830_v5  ;;  %v5351_v25 = vadd.f32 0.37409195, %v5287_v58  ;;  %v5032_v21 = vmul.f32 %v13350_v22, %v4968_v9 }
 0x4c1   : > { %15467 = vst [vmem:[#allocation84_spill] sm:$0xff] %v13495_v41  ;;  %v4586_v40 = vadd.f32 -0.82215226, %v4522_v2  ;;  %v5672_v31 = vsub.f32 0.0, %v13302_v42  ;;  %v5064_v34 = vmul.f32 %v13360_v32, %v5000_v13  ;;  %v5704_v39 = vsub.f32 0.0, %v13309_v14  ;;  %7590 = vmatmul.msk.f32.gmra.mxu1 %vm6426_vm7, %v6371_v62  ;;  %v3997_v2 = vpop.f32.mrf.mxu0 }
 0x4c2   : > { %v4585_v61 = vadd.f32 -0.82215226, %v4521_v50  ;;  %v4745_v44 = vadd.f32 1.4885159, %v4681_v17  ;;  %v13511_v52 = vand.u32 2147483647, %v13495_v41  ;;  %v5988_v47 = vmul.f32 %v8052_v16, %v12862_v8 }
 0x4c3   : > { %v4650_v27 = vmul.f32 %v13485_v38, %v4586_v40  ;;  %v13514_v23 = vpop.eup %8061  ;;  %v5798_v5 = vadd.f32 %v13447_v10, %v5606_v60  ;;  %v5319_v58 = vmul.f32 %v13311_v26, %v5255_v0  ;;  %v13519_v9 = vmul.f32 0.5, %v13271_v18 }
 0x4c4   : > { %v13522_v1 = vmul.f32 0.5, %v13276_v63  ;;  %8063 = vpow2.f32 %v5946_v49  ;;  %v5415_v13 = vmul.f32 %v13245_v15, %v5351_v25  ;;  %v5096_v50 = vadd.f32 -0.18628806, %v5032_v21 }
 0x4c5   : > { %15470 = vst [vmem:[#allocation36_spill] sm:$0xff] %v13519_v9  ;;  %v4714_v56 = vadd.f32 1.4885159, %v4650_v27  ;;  %v13526_v17 = vmul.f32 %v5672_v31, %v13302_v42  ;;  %v5128_v8 = vadd.f32 -0.18628806, %v5064_v34  ;;  %v13529_v16 = vmul.f32 %v5704_v39, %v13309_v14 }
 0x4c6   : > { %15471 = vst [vmem:[#allocation60_spill] sm:$0xff] %v13522_v1  ;;  %v4649_v10 = vmul.f32 %v13473_v54, %v4585_v61  ;;  %v4809_v18 = vmul.f32 %v13450_v33, %v4745_v44  ;;  %v4362_v60 = vmul.f32 0.5, %v13511_v52  ;;  %v6116_v0 = vsub.f32 1.0, %v5988_v47 }
 0x4c7   : > { %v4778_v63 = vmul.f32 %v13485_v38, %v4714_v56  ;;  %v5882_v62 = vmul.f32 1.442695, %v5798_v5  ;;  %v5383_v49 = vadd.f32 0.37409195, %v5319_v58  ;;  %v13536_v42 = vmul.f32 0.5, %v13331_v3  ;;  %v15473_v3 = vld [vmem:[#allocation46_spill] sm:$0xff] }
 0x4c8   : > { %v7527_v25 = vadd.f32 -1.0, %v5988_v47  ;;  %v5479_v21 = vadd.f32 1.0000237, %v5415_v13  ;;  %v5160_v14 = vmul.f32 %v13350_v22, %v5096_v50  ;;  %v13540_v31 = vadd.f32 %v13268_v6, %v3997_v2 }
 0x4c9   : > { %15472 = vst [vmem:[#allocation58_spill] sm:$0xff] %v13536_v42  ;;  %v4842_v40 = vadd.f32 -1.135204, %v4778_v63  ;;  %v5192_v34 = vmul.f32 %v13360_v32, %v5128_v8  ;;  %v4713_v39 = vadd.f32 1.4885159, %v4649_v10  ;;  %v13546_v44 = vadd.f32 %v13268_v6, %v4093_v43  ;;  %v4096_v42 = vpop.f32.mrf.mxu3 }
 0x4ca   : > { %v6244_v61 = vsel %vm6052_vm11, %v6116_v0, %v7527_v25  ;;  %v13548_v27 = vpop.eup %8063  ;;  %vm6084_vm12 = vcmp.ge.f32.partialorder %v15473_v3, 0.0  ;;  %v4873_v47 = vadd.f32 -1.135204, %v4809_v18  ;;  %v4426_v58 = vadd.f32 1.0, %v4362_v60  ;;  %v15475_v18 = vld [vmem:[#allocation79_spill] sm:$0xff] }
 0x4cb   : > { %v4906_v5 = vmul.f32 %v13485_v38, %v4842_v40  ;;  %v6308_v13 = vadd.f32 1.0, %v6244_v61  ;;  %v5447_v50 = vmul.f32 %v13311_v26, %v5383_v49  ;;  %v13554_v56 = vmul.f32 0.70710677, %v13540_v31 }
 0x4cc   : > { %v13557_v24 = vmul.f32 0.70710677, %v13546_v44  ;;  %v6020_v8 = vmul.f32 %v13467_v55, %v12976_v30  ;;  %v5224_v10 = vadd.f32 0.09678418, %v5160_v14  ;;  %v5705_v2 = vsub.f32 0.0, %v13389_v28 }
 0x4cd   : > { %v4970_v63 = vadd.f32 0.27886808, %v4906_v5  ;;  %v6372_v0 = vmul.f32 %v6308_v13, %v15475_v18  ;;  %v5543_v60 = vmul.f32 %v13245_v15, %v5479_v21  ;;  %v5256_v43 = vadd.f32 0.09678418, %v5192_v34 }
 0x4ce   : > { %15474 = vst [vmem:[#allocation63_spill] sm:$0xff] %v13557_v24  ;;  %v4777_v49 = vmul.f32 %v13473_v54, %v4713_v39  ;;  %v13566_v25 = vand.u32 2147483647, %v13554_v56  ;;  %v4937_v40 = vmul.f32 %v13450_v33, %v4873_v47  ;;  %8065 = vrcp.f32 %v4426_v58 }
 0x4cf   : > { %v5034_v61 = vmul.f32 %v13485_v38, %v4970_v63  ;;  %7591 = vmatmul.msk.f32.gmra.mxu1 %vm6426_vm7, %v6372_v0  ;;  %v13572_v30 = vand.u32 2147483647, %v13557_v24  ;;  %v5511_v55 = vadd.f32 1.0000237, %v5447_v50  ;;  %v6148_v21 = vsub.f32 1.0, %v6020_v8 }
 0x4d0   : > { %v4331_v14 = vmul.f32 0.5, %v13566_v25  ;;  %v7559_v34 = vadd.f32 -1.0, %v6020_v8  ;;  %v5288_v39 = vmul.f32 %v13350_v22, %v5224_v10  ;;  %v5673_v5 = vsub.f32 0.0, %v13407_v51 }
 0x4d1   : > { %v5098_v13 = vadd.f32 -0.18628806, %v5034_v61  ;;  %v4363_v47 = vmul.f32 0.5, %v13572_v30  ;;  %v5607_v18 = vadd.f32 -1.2655122, %v5543_v60  ;;  %v5320_v58 = vmul.f32 %v13360_v32, %v5256_v43 }
 0x4d2   : > { %v4841_v63 = vadd.f32 -1.135204, %v4777_v49  ;;  %v4395_v0 = vadd.f32 1.0, %v4331_v14  ;;  %8067 = vpow2.f32 %v5882_v62  ;;  %v5001_v24 = vadd.f32 0.27886808, %v4937_v40 }
 0x4d3   : > { %v13580_v50 = vmul.f32 0.5, %v13381_v29  ;;  %v5162_v41 = vmul.f32 %v13485_v38, %v5098_v13  ;;  %v5575_v8 = vmul.f32 %v13311_v26, %v5511_v55  ;;  %v13585_v10 = vmul.f32 %v5705_v2, %v13389_v28  ;;  %v4000_v29 = vpop.f32.mrf.mxu0  ;;  %v13596_v2 = vpop.f32.mrf.mxu1 }
 0x4d4   : > { %v4427_v61 = vadd.f32 1.0, %v4363_v47  ;;  %v6276_v60 = vsel %vm6084_vm12, %v6148_v21, %v7559_v34  ;;  %v13589_v43 = vpop.eup %8065  ;;  %v5352_v49 = vadd.f32 0.37409195, %v5288_v39  ;;  %8069 = vrcp.f32 %v4395_v0  ;;  %15477 = vst [vmem:[#allocation69_spill] sm:$0xff] %v13596_v2  ;;  %v15478_v34 = vld [vmem:[#allocation42_spill] sm:$0xff] }
 0x4d5   : > { %15476 = vst [vmem:[#allocation57_spill] sm:$0xff] %v13580_v50  ;;  %v5226_v62 = vadd.f32 0.09678418, %v5162_v41  ;;  %v6340_v40 = vadd.f32 1.0, %v6276_v60  ;;  %v5799_v14 = vadd.f32 %v13463_v46, %v5607_v18  ;;  %v5384_v13 = vadd.f32 0.37409195, %v5320_v58 }
 0x4d6   : > { %v4905_v55 = vmul.f32 %v13473_v54, %v4841_v63  ;;  %v13594_v28 = vmul.f32 %v5673_v5, %v13407_v51  ;;  %v5065_v3 = vmul.f32 %v13450_v33, %v5001_v24  ;;  %v13602_v41 = vadd.f32 %v13268_v6, %v4096_v42  ;;  %v15481_v42 = vld [vmem:[#allocation82_spill] sm:$0xff] }
 0x4d7   : > { %v5290_v21 = vmul.f32 %v13485_v38, %v5226_v62  ;;  %v6404_v39 = vmul.f32 %v6340_v40, %v15478_v34  ;;  %v5674_v47 = vsub.f32 0.0, %v13443_v4  ;;  %v4554_v46 = vmul.f32 0.17087276, %v13589_v43  ;;  %v15483_v34 = vld [vmem:[#allocation38_spill] sm:$0xff] }
 0x4d8   : > { %15479 = vst [vmem:[#allocation49_spill] sm:$0xff] %v13602_v41  ;;  %8071 = vrcp.f32 %v4427_v61  ;;  %v13607_v18 = vadd.f32 %v13268_v6, %v4000_v29  ;;  %v13609_v51 = vpop.eup %8067  ;;  %v5639_v5 = vadd.f32 -1.2655122, %v5575_v8  ;;  %v5416_v24 = vmul.f32 %v13350_v22, %v5352_v49 }
 0x4d9   : > { %v5354_v58 = vadd.f32 0.37409195, %v5290_v21  ;;  %7623 = vmatmul.msk.f32.gmra.mxu2 %vm6426_vm7, %v6404_v39  ;;  %v13614_v63 = vmul.f32 0.70710677, %v13602_v41  ;;  %vm6053_vm13 = vcmp.ge.f32.partialorder %v15481_v42, 0.0  ;;  %v5448_v61 = vmul.f32 %v13360_v32, %v5384_v13 }
 0x4da   : > { %v13617_v0 = vmul.f32 1.442695, %v5799_v14  ;;  %v4969_v60 = vadd.f32 0.27886808, %v4905_v55  ;;  %v13621_v62 = vmul.f32 0.70710677, %v13607_v18  ;;  %v13623_v40 = vpop.eup %8069  ;;  %v5989_v21 = vmul.f32 %v13501_v57, %v13039_v45 }
 0x4db   : > { %15480 = vst [vmem:[#allocation55_spill] sm:$0xff] %v13614_v63  ;;  %v5129_v8 = vadd.f32 -0.18628806, %v5065_v3  ;;  %v5418_v49 = vmul.f32 %v13485_v38, %v5354_v58  ;;  %v13627_v29 = vand.u32 2147483647, %v13614_v63  ;;  %vm6085_vm14 = vcmp.ge.f32.partialorder %v15483_v34, 0.0  ;;  %v13649_v41 = vpop.f32.mrf.mxu1 }
 0x4dc   : > { %v5738_v14 = vmul.f32 %v5674_v47, %v13443_v4  ;;  %v4618_v13 = vadd.f32 -0.82215226, %v4554_v46  ;;  %v4523_v55 = vmul.f32 0.17087276, %v13623_v40  ;;  %v13635_v39 = vand.u32 2147483647, %v13621_v62 }
 0x4dd   : > { %15482 = vst [vmem:[#allocation76_spill] sm:$0xff] %v13627_v29  ;;  %v5831_v3 = vadd.f32 %v13498_v59, %v5639_v5  ;;  %v5480_v2 = vadd.f32 1.0000237, %v5416_v24  ;;  %v5482_v58 = vadd.f32 1.0000237, %v5418_v49  ;;  %v4364_v63 = vmul.f32 0.5, %v13627_v29 }
 0x4de   : > { %v13639_v50 = vpop.eup %8071  ;;  %v5033_v45 = vmul.f32 %v13473_v54, %v4969_v60  ;;  %v4587_v57 = vadd.f32 -0.82215226, %v4523_v55  ;;  %v4332_v7 = vmul.f32 0.5, %v13635_v39  ;;  %v6021_v4 = vmul.f32 %v13514_v23, %v13062_v12  ;;  %15484 = vst [vmem:[#allocation61_spill] sm:$0xff] %v13649_v41 }
 0x4df   : > { %v5512_v47 = vadd.f32 1.0000237, %v5448_v61  ;;  %v5546_v46 = vmul.f32 %v13485_v38, %v5482_v58  ;;  %v4428_v1 = vadd.f32 1.0, %v4364_v63  ;;  %v6117_v9 = vsub.f32 1.0, %v5989_v21 }
 0x4e0   : > { %v5193_v59 = vmul.f32 %v13450_v33, %v5129_v8  ;;  %v4682_v5 = vmul.f32 %v13589_v43, %v4618_v13  ;;  %v4651_v24 = vmul.f32 %v13623_v40, %v4587_v57  ;;  %v4396_v49 = vadd.f32 1.0, %v4332_v7 }
 0x4e1   : > { %v5610_v60 = vadd.f32 -1.2655122, %v5546_v46  ;;  %v4555_v55 = vmul.f32 0.17087276, %v13639_v50  ;;  %8073 = vrcp.f32 %v4428_v1  ;;  %v7528_v29 = vadd.f32 -1.0, %v5989_v21 }
 0x4e2   : > { %v5097_v12 = vadd.f32 -0.18628806, %v5033_v45  ;;  %v4715_v23 = vadd.f32 1.4885159, %v4651_v24  ;;  %8075 = vrcp.f32 %v4396_v49  ;;  %v6149_v61 = vsub.f32 1.0, %v6021_v4 }
 0x4e3   : > { %v5544_v63 = vmul.f32 %v13350_v22, %v5480_v2  ;;  %v5802_v58 = vadd.f32 %v5738_v14, %v5610_v60  ;;  %v6245_v8 = vsel %vm6053_vm13, %v6117_v9, %v7528_v29  ;;  %v7560_v13 = vadd.f32 -1.0, %v6021_v4  ;;  %v4003_v9 = vpop.f32.mrf.mxu0 }
 0x4e4   : > { %v5576_v7 = vmul.f32 %v13360_v32, %v5512_v47  ;;  %v5257_v57 = vadd.f32 0.09678418, %v5193_v59  ;;  %v4779_v46 = vmul.f32 %v13623_v40, %v4715_v23  ;;  %v6309_v41 = vadd.f32 1.0, %v6245_v8 }
 0x4e5   : > { %v5890_v19 = vmul.f32 1.442695, %v5802_v58  ;;  %v4746_v1 = vadd.f32 1.4885159, %v4682_v5  ;;  %v4619_v21 = vadd.f32 -0.82215226, %v4555_v55  ;;  %v6277_v45 = vsel %vm6085_vm14, %v6149_v61, %v7560_v13  ;;  %v13683_v58 = vpop.f32.mrf.mxu1 }
 0x4e6   : > { %v5161_v24 = vmul.f32 %v13473_v54, %v5097_v12  ;;  %v4843_v2 = vadd.f32 -1.135204, %v4779_v46  ;;  %v6373_v14 = vmul.f32 %v6309_v41, %v13142_v36  ;;  %v6341_v42 = vadd.f32 1.0, %v6277_v45  ;;  %v15485_v36 = vld [vmem:[#allocation71_spill] sm:$0xff]  ;;  %15487 = vst [vmem:[#allocation68_spill] sm:$0xff] %v13683_v58 }
 0x4e7   : > { %v13661_v29 = vpop.eup %8073  ;;  %v5948_v4 = vmul.f32 1.442695, %v5831_v3  ;;  %v5608_v47 = vadd.f32 -1.2655122, %v5544_v63  ;;  %v13664_v59 = vmul.f32 0.5, %v13425_v53  ;;  %8077 = vpow2.f32 %v5890_v19  ;;  %v15486_v63 = vld [vmem:[#allocation41_spill] sm:$0xff] }
 0x4e8   : > { %v13666_v5 = vpop.eup %8075  ;;  %v5640_v49 = vadd.f32 -1.2655122, %v5576_v7  ;;  %v5321_v34 = vmul.f32 %v13450_v33, %v5257_v57  ;;  %v4907_v60 = vmul.f32 %v13623_v40, %v4843_v2  ;;  %7592 = vmatmul.msk.f32.gmra.mxu1 %vm6426_vm7, %v6373_v14  ;;  %v6405_v41 = vmul.f32 %v6341_v42, %v15485_v36 }
 0x4e9   : > { %vm6058_vm15 = vcmp.ge.f32.partialorder %v13436_v48, 0.0  ;;  %v4810_v3 = vmul.f32 %v13589_v43, %v4746_v1  ;;  %v4683_v55 = vmul.f32 %v13639_v50, %v4619_v21  ;;  %v4524_v53 = vmul.f32 0.17087276, %v13666_v5 }
 0x4ea   : > { %v13677_v19 = vadd.f32 %v13268_v6, %v4003_v9  ;;  %8079 = vpow2.f32 %v13617_v0  ;;  %v5225_v12 = vadd.f32 0.09678418, %v5161_v24  ;;  %v4971_v23 = vadd.f32 0.27886808, %v4907_v60  ;;  %7624 = vmatmul.msk.f32.gmra.mxu2 %vm6426_vm7, %v6405_v41 }
 0x4eb   : > { %v4556_v61 = vmul.f32 0.17087276, %v13661_v29  ;;  %vm6086_vm0 = vcmp.ge.f32.partialorder %v15486_v63, 0.0  ;;  %8081 = vpow2.f32 %v5948_v4  ;;  %v13686_v8 = vmul.f32 0.5, %v13480_v20 }
 0x4ec   : > { %v4588_v13 = vadd.f32 -0.82215226, %v4524_v53  ;;  %v6022_v7 = vmul.f32 %v13548_v27, %v13099_v37  ;;  %v5800_v0 = vadd.f32 %v13526_v17, %v5608_v47  ;;  %v5832_v57 = vadd.f32 %v13529_v16, %v5640_v49 }
 0x4ed   : > { %v5035_v46 = vmul.f32 %v13623_v40, %v4971_v23  ;;  %v13694_v1 = vmul.f32 0.70710677, %v13677_v19  ;;  %v8078_v21 = vpop.eup %8077  ;;  %v5385_v45 = vadd.f32 0.37409195, %v5321_v34  ;;  %v4874_v24 = vadd.f32 -1.135204, %v4810_v3 }
 0x4ee   : > { %v4747_v2 = vadd.f32 1.4885159, %v4683_v55  ;;  %v4652_v20 = vmul.f32 %v13666_v5, %v4588_v13  ;;  %v5289_v14 = vmul.f32 %v13473_v54, %v5225_v12  ;;  %v5994_v42 = vmul.f32 %v8078_v21, %v13485_v38  ;;  %v15488_v3 = vld [vmem:[#allocation40_spill] sm:$0xff] }
 0x4ef   : > { %v5099_v37 = vadd.f32 -0.18628806, %v5035_v46  ;;  %v4620_v27 = vadd.f32 -0.82215226, %v4556_v61  ;;  %v5706_v17 = vsub.f32 0.0, %v13511_v52  ;;  %v6150_v4 = vsub.f32 1.0, %v6022_v7 }
 0x4f0   : > { %v4716_v16 = vadd.f32 1.4885159, %v4652_v20  ;;  %v13701_v9 = vand.u32 2147483647, %v13694_v1  ;;  %v13703_v47 = vpop.eup %8079  ;;  %v6122_v49 = vsub.f32 1.0, %v5994_v42  ;;  %v7533_v34 = vadd.f32 -1.0, %v5994_v42 }
 0x4f1   : > { %v5163_v60 = vmul.f32 %v13623_v40, %v5099_v37  ;;  %v7561_v36 = vadd.f32 -1.0, %v6022_v7  ;;  %v13706_v41 = vpop.eup %8081  ;;  %vm6054_vm1 = vcmp.ge.f32.partialorder %v15488_v3, 0.0  ;;  %v4938_v38 = vmul.f32 %v13589_v43, %v4874_v24 }
 0x4f2   : > { %v4811_v55 = vmul.f32 %v13639_v50, %v4747_v2  ;;  %v4780_v53 = vmul.f32 %v13666_v5, %v4716_v16  ;;  %v4333_v12 = vmul.f32 0.5, %v13701_v9  ;;  %v5886_v23 = vmul.f32 1.442695, %v5800_v0 }
 0x4f3   : > { %v5353_v61 = vadd.f32 0.37409195, %v5289_v14  ;;  %v6250_v13 = vsel %vm6058_vm15, %v6122_v49, %v7533_v34  ;;  %v5227_v46 = vadd.f32 0.09678418, %v5163_v60  ;;  %v4684_v7 = vmul.f32 %v13661_v29, %v4620_v27  ;;  %v13722_v14 = vpop.f32.mrf.mxu1 }
 0x4f4   : > { %v6314_v21 = vadd.f32 1.0, %v6250_v13  ;;  %v4397_v20 = vadd.f32 1.0, %v4333_v12  ;;  %v5990_v42 = vmul.f32 %v13609_v51, %v13148_v11  ;;  %v5449_v24 = vmul.f32 %v13450_v33, %v5385_v45  ;;  %15489 = vst [vmem:[#allocation44_spill] sm:$0xff] %v13722_v14 }
 0x4f5   : > { %v5291_v2 = vmul.f32 %v13623_v40, %v5227_v46  ;;  %v4844_v37 = vadd.f32 -1.135204, %v4780_v53  ;;  %v6278_v0 = vsel %vm6086_vm0, %v6150_v4, %v7561_v36  ;;  %v5002_v16 = vadd.f32 0.27886808, %v4938_v38  ;;  %v4099_v36 = vpop.f32.mrf.mxu3 }
 0x4f6   : > { %v13725_v48 = vmul.f32 %v6314_v21, %v13664_v59  ;;  %v4875_v49 = vadd.f32 -1.135204, %v4811_v55  ;;  %8083 = vrcp.f32 %v4397_v20  ;;  %v5950_v27 = vmul.f32 1.442695, %v5832_v57 }
 0x4f7   : > { %v13728_v34 = vmul.f32 %v5706_v17, %v13511_v52  ;;  %v5355_v11 = vadd.f32 0.37409195, %v5291_v2  ;;  %v4908_v51 = vmul.f32 %v13666_v5, %v4844_v37  ;;  %v5417_v45 = vmul.f32 %v13473_v54, %v5353_v61  ;;  %v15490_v17 = vld [vmem:[#allocation75_spill] sm:$0xff] }
 0x4f8   : > { %v4748_v60 = vadd.f32 1.4885159, %v4684_v7  ;;  %v6342_v63 = vadd.f32 1.0, %v6278_v0  ;;  %v6118_v4 = vsub.f32 1.0, %v5990_v42  ;;  %v5513_v53 = vadd.f32 1.0000237, %v5449_v24 }
 0x4f9   : > { %v5419_v59 = vmul.f32 %v13623_v40, %v5355_v11  ;;  %v4972_v12 = vadd.f32 0.27886808, %v4908_v51  ;;  %v7529_v38 = vadd.f32 -1.0, %v5990_v42  ;;  %v5066_v55 = vmul.f32 %v13589_v43, %v5002_v16  ;;  %v15491_v51 = vld [vmem:[#allocation48_spill] sm:$0xff] }
 0x4fa   : > { %v5675_v57 = vsub.f32 0.0, %v13566_v25  ;;  %v4939_v52 = vmul.f32 %v13639_v50, %v4875_v49  ;;  %v6406_v13 = vmul.f32 %v6342_v63, %v15490_v17  ;;  %v13741_v7 = vadd.f32 %v13268_v6, %v4099_v36 }
 0x4fb   : > { %v5483_v46 = vadd.f32 1.0000237, %v5419_v59  ;;  %v5036_v61 = vmul.f32 %v13666_v5, %v4972_v12  ;;  %v6246_v21 = vsel %vm6054_vm1, %v6118_v4, %v7529_v38  ;;  %8085 = vpow2.f32 %v5886_v23  ;;  %v15492_v23 = vld [vmem:[#allocation66_spill] sm:$0xff]  ;;  %v13758_v59 = vpop.f32.mrf.mxu1 }
 0x4fc   : > { %v13743_v20 = vpop.eup %8083  ;;  %v5481_v42 = vadd.f32 1.0000237, %v5417_v45  ;;  %v4812_v24 = vmul.f32 %v13661_v29, %v4748_v60  ;;  %7625 = vmatmul.msk.f32.gmra.mxu2 %vm6426_vm7, %v6406_v13  ;;  %v6310_v2 = vadd.f32 1.0, %v6246_v21  ;;  %v5577_v37 = vmul.f32 %v13450_v33, %v5513_v53  ;;  %15493 = vst [vmem:[#allocation64_spill] sm:$0xff] %v13758_v59 }
 0x4fd   : > { %v5547_v0 = vmul.f32 %v13623_v40, %v5483_v46  ;;  %v5100_v16 = vadd.f32 -0.18628806, %v5036_v61  ;;  %v4525_v3 = vmul.f32 0.17087276, %v13743_v20  ;;  %v5130_v49 = vadd.f32 -0.18628806, %v5066_v55 }
 0x4fe   : > { %v5739_v6 = vmul.f32 %v5675_v57, %v13566_v25  ;;  %v5003_v11 = vadd.f32 0.27886808, %v4939_v52  ;;  %v6374_v63 = vmul.f32 %v6310_v2, %v15491_v51  ;;  %vm6055_vm2 = vcmp.ge.f32.partialorder %v15492_v23, 0.0 }
 0x4ff   : > { %v5611_v45 = vadd.f32 -1.2655122, %v5547_v0  ;;  %v5164_v60 = vmul.f32 %v13666_v5, %v5100_v16  ;;  %v4589_v4 = vadd.f32 -0.82215226, %v4525_v3  ;;  %v13755_v36 = vmul.f32 0.70710677, %v13741_v7 }
 0x500   : > { %8087 = vpow2.f32 %v5950_v27  ;;  %v5545_v53 = vmul.f32 %v13473_v54, %v5481_v42  ;;  %v4876_v12 = vadd.f32 -1.135204, %v4812_v24  ;;  %7593 = vmatmul.msk.f32.gmra.mxu1 %vm6426_vm7, %v6374_v63  ;;  %v5991_v25 = vmul.f32 %v13703_v47, %v13245_v15 }
 0x501   : > { %v5803_v38 = vadd.f32 %v5739_v6, %v5611_v45  ;;  %v5228_v55 = vadd.f32 0.09678418, %v5164_v60  ;;  %v4653_v57 = vmul.f32 %v13743_v20, %v4589_v4  ;;  %v13765_v52 = vand.u32 2147483647, %v13755_v36  ;;  %v13767_v17 = vpop.eup %8085  ;;  %v4102_v6 = vpop.f32.mrf.mxu3 }
 0x502   : > { %v5641_v27 = vadd.f32 -1.2655122, %v5577_v37  ;;  %v5194_v13 = vmul.f32 %v13589_v43, %v5130_v49  ;;  %v13771_v46 = vmul.f32 0.5, %v13540_v31  ;;  %v5067_v61 = vmul.f32 %v13639_v50, %v5003_v11  ;;  %v4006_v49 = vpop.f32.mrf.mxu0 }
 0x503   : > { %v5892_v21 = vmul.f32 1.442695, %v5803_v38  ;;  %v5292_v15 = vmul.f32 %v13666_v5, %v5228_v55  ;;  %v4717_v47 = vadd.f32 1.4885159, %v4653_v57  ;;  %v4365_v42 = vmul.f32 0.5, %v13765_v52 }
 0x504   : > { %v5609_v24 = vadd.f32 -1.2655122, %v5545_v53  ;;  %v13777_v2 = vmul.f32 0.5, %v13546_v44  ;;  %v4940_v0 = vmul.f32 %v13661_v29, %v4876_v12  ;;  %v6119_v37 = vsub.f32 1.0, %v5991_v25  ;;  %v13792_v55 = vld [vmem:[%s14745_s7] ss:$0 sm:$0xff] }
 0x505   : > { %8089 = vpow2.f32 %v5892_v21  ;;  %v5356_v16 = vadd.f32 0.37409195, %v5292_v15  ;;  %v4781_v31 = vmul.f32 %v13743_v20, %v4717_v47  ;;  %v4429_v3 = vadd.f32 1.0, %v4365_v42  ;;  %v13805_v15 = vpop.f32.mrf.mxu1 }
 0x506   : > { %v13781_v11 = vpop.eup %8087  ;;  %v5833_v51 = vadd.f32 %v13585_v10, %v5641_v27  ;;  %v5258_v63 = vadd.f32 0.09678418, %v5194_v13  ;;  %v5131_v45 = vadd.f32 -0.18628806, %v5067_v61  ;;  %v7530_v60 = vadd.f32 -1.0, %v5991_v25  ;;  %15494 = vst [vmem:[#allocation67_spill] sm:$0xff] %v13805_v15 }
 0x507   : > { %vm6059_vm4 = vcmp.ge.f32.partialorder %v13554_v56, 0.0  ;;  %v5707_v44 = vsub.f32 0.0, %v13572_v30  ;;  %v5420_v4 = vmul.f32 %v13666_v5, %v5356_v16  ;;  %v4845_v53 = vadd.f32 -1.135204, %v4781_v31 }
 0x508   : > { %8091 = vrcp.f32 %v4429_v3  ;;  %v5004_v12 = vadd.f32 0.27886808, %v4940_v0  ;;  %v6247_v38 = vsel %vm6055_vm2, %v6119_v37, %v7530_v60  ;;  %v13795_v10 = vadd.f32 %v13792_v55, %v4006_v49 }
 0x509   : > { %v13798_v25 = vadd.f32 %v13792_v55, %v4102_v6  ;;  %v5484_v57 = vadd.f32 1.0000237, %v5420_v4  ;;  %v5676_v27 = vsub.f32 0.0, %v13635_v39  ;;  %v4909_v13 = vmul.f32 %v13743_v20, %v4845_v53 }
 0x50a   : > { %v6311_v61 = vadd.f32 1.0, %v6247_v38  ;;  %v13802_v21 = vmul.f32 1.442695, %v5833_v51  ;;  %v5322_v23 = vmul.f32 %v13589_v43, %v5258_v63  ;;  %v5195_v47 = vmul.f32 %v13639_v50, %v5131_v45  ;;  %v15496_v38 = vld [vmem:[#allocation54_spill] sm:$0xff] }
 0x50b   : > { %v13809_v42 = vmul.f32 0.70710677, %v13795_v10  ;;  %v8090_v0 = vpop.eup %8089  ;;  %v5548_v37 = vmul.f32 %v13666_v5, %v5484_v57  ;;  %v4973_v16 = vadd.f32 0.27886808, %v4909_v13  ;;  %v13814_v3 = vmul.f32 0.70710677, %v13798_v25 }
 0x50c   : > { %v6375_v31 = vmul.f32 %v6311_v61, %v13460_v35  ;;  %v5801_v49 = vadd.f32 %v13594_v28, %v5609_v24  ;;  %v5995_v6 = vmul.f32 %v8090_v0, %v13623_v40  ;;  %v5068_v51 = vmul.f32 %v13661_v29, %v5004_v12 }
 0x50d   : > { %15495 = vst [vmem:[#allocation78_spill] sm:$0xff] %v13814_v3  ;;  %v13820_v63 = vand.u32 2147483647, %v13809_v42  ;;  %v5612_v60 = vadd.f32 -1.2655122, %v5548_v37  ;;  %v5740_v4 = vmul.f32 %v5676_v27, %v13635_v39  ;;  %v5037_v53 = vmul.f32 %v13743_v20, %v4973_v16 }
 0x50e   : > { %v13822_v45 = vpop.eup %8091  ;;  %7594 = vmatmul.msk.f32.gmra.mxu1 %vm6426_vm7, %v6375_v31  ;;  %v13828_v35 = vand.u32 2147483647, %v13814_v3  ;;  %v6123_v28 = vsub.f32 1.0, %v5995_v6  ;;  %v7534_v24 = vadd.f32 -1.0, %v5995_v6  ;;  %v5259_v40 = vadd.f32 0.09678418, %v5195_v47 }
 0x50f   : > { %v4557_v12 = vmul.f32 0.17087276, %v13822_v45  ;;  %vm6087_vm5 = vcmp.ge.f32.partialorder %v15496_v38, 0.0  ;;  %v5386_v57 = vadd.f32 0.37409195, %v5322_v23  ;;  %v5804_v13 = vadd.f32 %v5740_v4, %v5612_v60 }
 0x510   : > { %v5101_v61 = vadd.f32 -0.18628806, %v5037_v53  ;;  %v4334_v0 = vmul.f32 0.5, %v13820_v63  ;;  %v6251_v39 = vsel %vm6059_vm4, %v6123_v28, %v7534_v24  ;;  %v5132_v27 = vadd.f32 -0.18628806, %v5068_v51  ;;  %v13848_v24 = vpop.f32.mrf.mxu1 }
 0x511   : > { %v4621_v37 = vadd.f32 -0.82215226, %v4557_v12  ;;  %v4366_v16 = vmul.f32 0.5, %v13828_v35  ;;  %v6315_v31 = vadd.f32 1.0, %v6251_v39  ;;  %v5894_v58 = vmul.f32 1.442695, %v5804_v13 }
 0x512   : > { %v5165_v47 = vmul.f32 %v13743_v20, %v5101_v61  ;;  %v4398_v6 = vadd.f32 1.0, %v4334_v0  ;;  %v5323_v14 = vmul.f32 %v13639_v50, %v5259_v40  ;;  %v13839_v23 = vmul.f32 %v5707_v44, %v13572_v30  ;;  %15497 = vst [vmem:[#allocation65_spill] sm:$0xff] %v13848_v24  ;;  %v4105_v44 = vpop.f32.mrf.mxu3 }
 0x513   : > { %v4685_v60 = vmul.f32 %v13822_v45, %v4621_v37  ;;  %v4430_v4 = vadd.f32 1.0, %v4366_v16  ;;  %v13842_v53 = vmul.f32 1.442695, %v5801_v49  ;;  %v13845_v56 = vmul.f32 %v6315_v31, %v13771_v46  ;;  %v4009_v46 = vpop.f32.mrf.mxu0 }
 0x514   : > { %8093 = vpow2.f32 %v5894_v58  ;;  %v5229_v51 = vadd.f32 0.09678418, %v5165_v47  ;;  %v5450_v28 = vmul.f32 %v13589_v43, %v5386_v57  ;;  %v6023_v30 = vmul.f32 %v13706_v41, %v13311_v26 }
 0x515   : > { %v4749_v12 = vadd.f32 1.4885159, %v4685_v60  ;;  %8095 = vrcp.f32 %v4398_v6  ;;  %v5196_v40 = vmul.f32 %v13661_v29, %v5132_v27  ;;  %v5677_v13 = vsub.f32 0.0, %v13701_v9 }
 0x516   : > { %v5293_v49 = vmul.f32 %v13743_v20, %v5229_v51  ;;  %8097 = vrcp.f32 %v4430_v4  ;;  %v5387_v58 = vadd.f32 0.37409195, %v5323_v14  ;;  %v6151_v57 = vsub.f32 1.0, %v6023_v30 }
 0x517   : > { %v4813_v61 = vmul.f32 %v13822_v45, %v4749_v12  ;;  %v7562_v0 = vadd.f32 -1.0, %v6023_v30  ;;  %v4140_v39 = vmul.f32 0.5, %v13607_v18  ;;  %vm6060_vm6 = vcmp.ge.f32.partialorder %v13621_v62, 0.0 }
 0x518   : > { %v5357_v37 = vadd.f32 0.37409195, %v5293_v49  ;;  %v13859_v26 = vadd.f32 %v13792_v55, %v4105_v44  ;;  %v5514_v41 = vadd.f32 1.0000237, %v5450_v28  ;;  %v13864_v31 = vadd.f32 %v13792_v55, %v4009_v46  ;;  %v15500_v49 = vld [vmem:[#allocation35_spill] sm:$0xff] }
 0x519   : > { %v4877_v27 = vadd.f32 -1.135204, %v4813_v61  ;;  %v6279_v16 = vsel %vm6087_vm5, %v6151_v57, %v7562_v0  ;;  %v5260_v47 = vadd.f32 0.09678418, %v5196_v40  ;;  %v5451_v51 = vmul.f32 %v13639_v50, %v5387_v58 }
 0x51a   : > { %15498 = vst [vmem:[#allocation50_spill] sm:$0xff] %v13859_v26  ;;  %v8094_v14 = vpop.eup %8093  ;;  %v5421_v6 = vmul.f32 %v13743_v20, %v5357_v37  ;;  %v6343_v60 = vadd.f32 1.0, %v6279_v16  ;;  %v13868_v18 = vmul.f32 0.70710677, %v13859_v26  ;;  %v5741_v38 = vmul.f32 %v5677_v13, %v13701_v9  ;;  %v15501_v16 = vld [vmem:[#allocation59_spill] sm:$0xff] }
 0x51b   : > { %v13870_v4 = vpop.eup %8095  ;;  %v5996_v28 = vmul.f32 %v8094_v14, %v13666_v5  ;;  %v4941_v12 = vmul.f32 %v13822_v45, %v4877_v27  ;;  %v13885_v5 = vmul.f32 0.70710677, %v13864_v31  ;;  %v5324_v9 = vmul.f32 %v13661_v29, %v5260_v47 }
 0x51c   : > { %15499 = vst [vmem:[#allocation73_spill] sm:$0xff] %v13868_v18  ;;  %v13876_v30 = vpop.eup %8097  ;;  %v5485_v44 = vadd.f32 1.0000237, %v5421_v6  ;;  %v4526_v40 = vmul.f32 0.17087276, %v13870_v4  ;;  %v6407_v46 = vmul.f32 %v6343_v60, %v15500_v49  ;;  %vm6056_vm8 = vcmp.ge.f32.partialorder %v15501_v16, 0.0  ;;  %v13894_v6 = vpop.f32.mrf.mxu1 }
 0x51d   : > { %v13881_v61 = vand.u32 2147483647, %v13868_v18  ;;  %v6124_v57 = vsub.f32 1.0, %v5996_v28  ;;  %v7535_v0 = vadd.f32 -1.0, %v5996_v28  ;;  %v4558_v58 = vmul.f32 0.17087276, %v13876_v30 }
 0x51e   : > { %v5549_v13 = vmul.f32 %v13743_v20, %v5485_v44  ;;  %v4590_v37 = vadd.f32 -0.82215226, %v4526_v40  ;;  %7626 = vmatmul.msk.f32.gmra.mxu2 %vm6426_vm7, %v6407_v46  ;;  %15502 = vst [vmem:[#allocation47_spill] sm:$0xff] %v13894_v6  ;;  %v5005_v60 = vadd.f32 0.27886808, %v4941_v12  ;;  %v5992_v49 = vmul.f32 %v13767_v17, %v13350_v22  ;;  %v15503_v46 = vld [vmem:[#allocation52_spill] sm:$0xff] }
 0x51f   : > { %v4367_v27 = vmul.f32 0.5, %v13881_v61  ;;  %v6252_v14 = vsel %vm6060_vm6, %v6124_v57, %v7535_v0  ;;  %v4622_v28 = vadd.f32 -0.82215226, %v4558_v58  ;;  %vm6088_vm9 = vcmp.ge.f32.partialorder %v15503_v46, 0.0  ;;  %v15504_v12 = vld [vmem:[#allocation76_spill] sm:$0xff] }
 0x520   : > { %v6316_v47 = vadd.f32 1.0, %v6252_v14  ;;  %v5613_v26 = vadd.f32 -1.2655122, %v5549_v13  ;;  %v4654_v44 = vmul.f32 %v13870_v4, %v4590_v37  ;;  %v5578_v18 = vmul.f32 %v13589_v43, %v5514_v41 }
 0x521   : > { %v4431_v40 = vadd.f32 1.0, %v4367_v27  ;;  %v5515_v59 = vadd.f32 1.0000237, %v5451_v51  ;;  %v4686_v62 = vmul.f32 %v13876_v30, %v4622_v28  ;;  %v13903_v57 = vand.u32 2147483647, %v13885_v5 }
 0x522   : > { %v5708_v0 = vsub.f32 0.0, %v15504_v12  ;;  %v13906_v58 = vmul.f32 %v6316_v47, %v4140_v39  ;;  %v5805_v22 = vadd.f32 %v5741_v38, %v5613_v26  ;;  %v4718_v17 = vadd.f32 1.4885159, %v4654_v44 }
 0x523   : > { %v5388_v13 = vadd.f32 0.37409195, %v5324_v9  ;;  %v5069_v37 = vmul.f32 %v13822_v45, %v5005_v60  ;;  %v4750_v27 = vadd.f32 1.4885159, %v4686_v62  ;;  %v4335_v14 = vmul.f32 0.5, %v13903_v57 }
 0x524   : > { %v5896_v15 = vmul.f32 1.442695, %v5805_v22  ;;  %v4782_v41 = vmul.f32 %v13870_v4, %v4718_v17  ;;  %8099 = vrcp.f32 %v4431_v40  ;;  %v6120_v51 = vsub.f32 1.0, %v5992_v49  ;;  %v13920_v22 = vpop.f32.mrf.mxu1 }
 0x525   : > { %v5642_v28 = vadd.f32 -1.2655122, %v5578_v18  ;;  %v5579_v24 = vmul.f32 %v13639_v50, %v5515_v59  ;;  %v4814_v6 = vmul.f32 %v13876_v30, %v4750_v27  ;;  %v4399_v39 = vadd.f32 1.0, %v4335_v14  ;;  %15505 = vst [vmem:[#allocation81_spill] sm:$0xff] %v13920_v22  ;;  %v15507_v27 = vld [vmem:[#allocation36_spill] sm:$0xff] }
 0x526   : > { %8101 = vpow2.f32 %v5896_v15  ;;  %v4846_v26 = vadd.f32 -1.135204, %v4782_v41  ;;  %v7531_v38 = vadd.f32 -1.0, %v5992_v49  ;;  %v6024_v9 = vmul.f32 %v13781_v11, %v13360_v32  ;;  %v4012_v41 = vpop.f32.mrf.mxu0 }
 0x527   : > { %v5452_v60 = vmul.f32 %v13661_v29, %v5388_v13  ;;  %v5133_v47 = vadd.f32 -0.18628806, %v5069_v37  ;;  %v4878_v44 = vadd.f32 -1.135204, %v4814_v6  ;;  %8103 = vrcp.f32 %v4399_v39  ;;  %v15506_v6 = vld [vmem:[#allocation49_spill] sm:$0xff] }
 0x528   : > { %v4910_v40 = vmul.f32 %v13870_v4, %v4846_v26  ;;  %v6248_v18 = vsel %vm6056_vm8, %v6120_v51, %v7531_v38  ;;  %v6152_v59 = vsub.f32 1.0, %v6024_v9  ;;  %v7563_v62 = vadd.f32 -1.0, %v6024_v9 }
 0x529   : > { %8105 = vpow2.f32 %v13802_v21  ;;  %v5643_v15 = vadd.f32 -1.2655122, %v5579_v24  ;;  %v4942_v49 = vmul.f32 %v13876_v30, %v4878_v44  ;;  %v6312_v32 = vadd.f32 1.0, %v6248_v18 }
 0x52a   : > { %v13923_v11 = vpop.eup %8099  ;;  %8107 = vpow2.f32 %v13842_v53  ;;  %v13927_v17 = vmul.f32 0.5, %v15506_v6  ;;  %v4974_v13 = vadd.f32 0.27886808, %v4910_v40  ;;  %v6280_v16 = vsel %vm6088_vm9, %v6152_v59, %v7563_v62 }
 0x52b   : > { %v5834_v37 = vadd.f32 %v13728_v34, %v5642_v28  ;;  %v5516_v21 = vadd.f32 1.0000237, %v5452_v60  ;;  %v5772_v24 = vmul.f32 %v5708_v0, %v15504_v12  ;;  %v6376_v14 = vmul.f32 %v6312_v32, %v15507_v27 }
 0x52c   : > { %v8102_v51 = vpop.eup %8101  ;;  %v4141_v39 = vmul.f32 0.5, %v13677_v19  ;;  %v5197_v53 = vmul.f32 %v13822_v45, %v5133_v47  ;;  %v5038_v26 = vmul.f32 %v13870_v4, %v4974_v13  ;;  %v6344_v38 = vadd.f32 1.0, %v6280_v16  ;;  %v15508_v19 = vld [vmem:[#allocation60_spill] sm:$0xff] }
 0x52d   : > { %v13937_v9 = vpop.eup %8103  ;;  %v5835_v46 = vadd.f32 %v13839_v23, %v5643_v15  ;;  %v5997_v34 = vmul.f32 %v8102_v51, %v13743_v20  ;;  %v5006_v28 = vadd.f32 0.27886808, %v4942_v49  ;;  %v4559_v12 = vmul.f32 0.17087276, %v13923_v11  ;;  %7595 = vmatmul.msk.f32.gmra.mxu1 %vm6426_vm7, %v6376_v14 }
 0x52e   : > { %v5102_v0 = vadd.f32 -0.18628806, %v5038_v26  ;;  %v4527_v60 = vmul.f32 0.17087276, %v13937_v9  ;;  %v6408_v44 = vmul.f32 %v6344_v38, %v15508_v19  ;;  %v13946_v47 = vadd.f32 %v13792_v55, %v4012_v41  ;;  %v6663_v26 = vpop.f32.mrf.mxu1 }
 0x52f   : > { %v8106_v40 = vpop.eup %8105  ;;  %v5954_v18 = vmul.f32 1.442695, %v5834_v37  ;;  %v5580_v59 = vmul.f32 %v13661_v29, %v5516_v21  ;;  %v6125_v23 = vsub.f32 1.0, %v5997_v34  ;;  %v7536_v62 = vadd.f32 -1.0, %v5997_v34  ;;  %v15509_v37 = vld [vmem:[#allocation56_spill] sm:$0xff] }
 0x530   : > { %v8108_v20 = vpop.eup %8107  ;;  %vm6061_vm10 = vcmp.ge.f32.partialorder %v13694_v1, 0.0  ;;  %v5261_v15 = vadd.f32 0.09678418, %v5197_v53  ;;  %v5166_v49 = vmul.f32 %v13870_v4, %v5102_v0  ;;  %v4591_v32 = vadd.f32 -0.82215226, %v4527_v60  ;;  %7627 = vmatmul.msk.f32.gmra.mxu2 %vm6426_vm7, %v6408_v44 }
 0x531   : > { %v5956_v6 = vmul.f32 1.442695, %v5835_v46  ;;  %v6253_v13 = vsel %vm6061_vm10, %v6125_v23, %v7536_v62  ;;  %v4623_v16 = vadd.f32 -0.82215226, %v4559_v12  ;;  %v13953_v27 = vmul.f32 0.70710677, %v13946_v47 }
 0x532   : > { %vm6089_vm11 = vcmp.ge.f32.partialorder %v15509_v37, 0.0  ;;  %v6317_v21 = vadd.f32 1.0, %v6253_v13  ;;  %v5230_v14 = vadd.f32 0.09678418, %v5166_v49  ;;  %v5070_v41 = vmul.f32 %v13876_v30, %v5006_v28  ;;  %v15510_v46 = vld [vmem:[#allocation45_spill] sm:$0xff] }
 0x533   : > { %v4655_v1 = vmul.f32 %v13937_v9, %v4591_v32  ;;  %8109 = vpow2.f32 %v5954_v18  ;;  %v5644_v51 = vadd.f32 -1.2655122, %v5580_v59  ;;  %v5709_v53 = vsub.f32 0.0, %v13765_v52  ;;  %v13977_v62 = vld [vmem:[%s14747_s9] ss:$0 sm:$0xff] }
 0x534   : > { %v13960_v38 = vand.u32 2147483647, %v13953_v27  ;;  %vm6057_vm12 = vcmp.ge.f32.partialorder %v15510_v46, 0.0  ;;  %v13963_v34 = vmul.f32 %v6317_v21, %v4141_v39  ;;  %v5325_v12 = vmul.f32 %v13822_v45, %v5261_v15 }
 0x535   : > { %v5294_v0 = vmul.f32 %v13870_v4, %v5230_v14  ;;  %v4719_v60 = vadd.f32 1.4885159, %v4655_v1  ;;  %8111 = vpow2.f32 %v5956_v6  ;;  %v13968_v28 = vmul.f32 0.5, %v13741_v7 }
 0x536   : > { %v4687_v19 = vmul.f32 %v13923_v11, %v4623_v16  ;;  %v4336_v44 = vmul.f32 0.5, %v13960_v38  ;;  %v5134_v59 = vadd.f32 -0.18628806, %v5070_v41  ;;  %v6025_v39 = vmul.f32 %v8106_v40, %v13450_v33 }
 0x537   : > { %v5358_v18 = vadd.f32 0.37409195, %v5294_v0  ;;  %v4783_v23 = vmul.f32 %v13937_v9, %v4719_v60  ;;  %v5836_v15 = vadd.f32 %v5772_v24, %v5644_v51  ;;  %v13980_v49 = vmul.f32 %v5709_v53, %v13765_v52  ;;  %v4108_v53 = vpop.f32.mrf.mxu3 }
 0x538   : > { %v5678_v7 = vsub.f32 0.0, %v13820_v63  ;;  %v4400_v32 = vadd.f32 1.0, %v4336_v44  ;;  %v5389_v6 = vadd.f32 0.37409195, %v5325_v12  ;;  %v6153_v21 = vsub.f32 1.0, %v6025_v39 }
 0x539   : > { %v5422_v13 = vmul.f32 %v13870_v4, %v5358_v18  ;;  %v4847_v16 = vadd.f32 -1.135204, %v4783_v23  ;;  %v13984_v14 = vpop.eup %8109  ;;  %v4751_v33 = vadd.f32 1.4885159, %v4687_v19  ;;  %v7564_v40 = vadd.f32 -1.0, %v6025_v39 }
 0x53a   : > { %8113 = vrcp.f32 %v4400_v32  ;;  %v5993_v41 = vmul.f32 %v8108_v20, %v13473_v54  ;;  %v13988_v24 = vadd.f32 %v13977_v62, %v6663_v26  ;;  %v5198_v1 = vmul.f32 %v13876_v30, %v5134_v59  ;;  %v6666_v59 = vpop.f32.mrf.mxu1 }
 0x53b   : > { %v5486_v52 = vadd.f32 1.0000237, %v5422_v13  ;;  %v4911_v51 = vmul.f32 %v13937_v9, %v4847_v16  ;;  %v13992_v12 = vpop.eup %8111  ;;  %v5958_v0 = vmul.f32 1.442695, %v5836_v15  ;;  %v6281_v60 = vsel %vm6089_vm11, %v6153_v21, %v7564_v40 }
 0x53c   : > { %15511 = vst [vmem:[#allocation62_spill] sm:$0xff] %v13988_v24  ;;  %v6121_v19 = vsub.f32 1.0, %v5993_v41  ;;  %v7532_v44 = vadd.f32 -1.0, %v5993_v41  ;;  %v5453_v18 = vmul.f32 %v13822_v45, %v5389_v6  ;;  %v6345_v26 = vadd.f32 1.0, %v6281_v60  ;;  %v15512_v6 = vld [vmem:[#allocation58_spill] sm:$0xff]  ;;  %v15514_v60 = vld [vmem:[#allocation57_spill] sm:$0xff] }
 0x53d   : > { %v5550_v54 = vmul.f32 %v13870_v4, %v5486_v52  ;;  %v4975_v20 = vadd.f32 0.27886808, %v4911_v51  ;;  %v5742_v23 = vmul.f32 %v5678_v7, %v13820_v63  ;;  %v4815_v39 = vmul.f32 %v13923_v11, %v4751_v33 }
 0x53e   : > { %v6249_v32 = vsel %vm6057_vm12, %v6121_v19, %v7532_v44  ;;  %v14003_v15 = vadd.f32 %v13792_v55, %v4108_v53  ;;  %v5262_v13 = vadd.f32 0.09678418, %v5198_v1  ;;  %v6409_v21 = vmul.f32 %v6345_v26, %v15512_v6 }
 0x53f   : > { %v5614_v37 = vadd.f32 -1.2655122, %v5550_v54  ;;  %v5039_v16 = vmul.f32 %v13937_v9, %v4975_v20  ;;  %v14010_v41 = vmul.f32 0.5, %v13795_v10  ;;  %v14013_v63 = vmul.f32 0.5, %v13798_v25 }
 0x540   : > { %v14007_v40 = vpop.eup %8113  ;;  %v5710_v46 = vsub.f32 0.0, %v13828_v35  ;;  %v6313_v7 = vadd.f32 1.0, %v6249_v32  ;;  %v5517_v33 = vadd.f32 1.0000237, %v5453_v18  ;;  %7628 = vmatmul.msk.f32.gmra.mxu2 %vm6426_vm7, %v6409_v21  ;;  %8115 = vpow2.f32 %v5958_v0  ;;  %v4015_v18 = vpop.f32.mrf.mxu0 }
 0x541   : > { %15513 = vst [vmem:[#allocation72_spill] sm:$0xff] %v14013_v63  ;;  %v5806_v52 = vadd.f32 %v5742_v23, %v5614_v37  ;;  %v5103_v51 = vadd.f32 -0.18628806, %v5039_v16  ;;  %v4528_v1 = vmul.f32 0.17087276, %v14007_v40  ;;  %v5326_v25 = vmul.f32 %v13876_v30, %v5262_v13  ;;  %v4111_v32 = vpop.f32.mrf.mxu3 }
 0x542   : > { %v4879_v53 = vadd.f32 -1.135204, %v4815_v39  ;;  %v6377_v19 = vmul.f32 %v6313_v7, %v15514_v60  ;;  %v14020_v10 = vmul.f32 0.70710677, %v14003_v15  ;;  %v14025_v26 = vmul.f32 %v5710_v46, %v13828_v35 }
 0x543   : > { %v5898_v44 = vmul.f32 1.442695, %v5806_v52  ;;  %v5167_v54 = vmul.f32 %v13937_v9, %v5103_v51  ;;  %v4592_v20 = vadd.f32 -0.82215226, %v4528_v1  ;;  %v14028_v23 = vadd.f32 %v13977_v62, %v6666_v59  ;;  %v6669_v59 = vpop.f32.mrf.mxu1 }
 0x544   : > { %v5711_v0 = vsub.f32 0.0, %v13881_v61  ;;  %7596 = vmatmul.msk.f32.gmra.mxu1 %vm6426_vm7, %v6377_v19  ;;  %v14033_v39 = vand.u32 2147483647, %v14020_v10  ;;  %v5581_v37 = vmul.f32 %v13822_v45, %v5517_v33  ;;  %v4943_v35 = vmul.f32 %v13923_v11, %v4879_v53 }
 0x545   : > { %15515 = vst [vmem:[#allocation85_spill] sm:$0xff] %v14028_v23  ;;  %8117 = vpow2.f32 %v5898_v44  ;;  %v5231_v13 = vadd.f32 0.09678418, %v5167_v54  ;;  %v4656_v16 = vmul.f32 %v14007_v40, %v4592_v20  ;;  %v5679_v6 = vsub.f32 0.0, %v13903_v57 }
 0x546   : > { %v4368_v21 = vmul.f32 0.5, %v14033_v39  ;;  %v14041_v46 = vadd.f32 %v13792_v55, %v4015_v18  ;;  %vm6062_vm13 = vcmp.ge.f32.partialorder %v13809_v42, 0.0  ;;  %v5390_v7 = vadd.f32 0.37409195, %v5326_v25  ;;  %v14048_v1 = vpop.eup %8115 }
 0x547   : > { %v5295_v52 = vmul.f32 %v13937_v9, %v5231_v13  ;;  %v4720_v33 = vadd.f32 1.4885159, %v4656_v16  ;;  %v14046_v51 = vadd.f32 %v13792_v55, %v4111_v32  ;;  %v14051_v53 = vmul.f32 %v5711_v0, %v13881_v61  ;;  %v14070_v0 = vld [vmem:[%s14748_s10] ss:$0 sm:$0xff] }
 0x548   : > { %v14054_v60 = vmul.f32 0.5, %v13864_v31  ;;  %v4432_v19 = vadd.f32 1.0, %v4368_v21  ;;  %v14057_v44 = vmul.f32 0.70710677, %v14041_v46  ;;  %v5645_v54 = vadd.f32 -1.2655122, %v5581_v37 }
 0x549   : > { %15516 = vst [vmem:[#allocation70_spill] sm:$0xff] %v14051_v53  ;;  %v5359_v25 = vadd.f32 0.37409195, %v5295_v52  ;;  %v6670_v20 = vadd.f32 %v13977_v62, %v6669_v59  ;;  %v4784_v18 = vmul.f32 %v14007_v40, %v4720_v33  ;;  %v5007_v32 = vadd.f32 0.27886808, %v4943_v35  ;;  %v15517_v37 = vld [vmem:[#allocation84_spill] sm:$0xff] }
 0x54a   : > { %8119 = vrcp.f32 %v4432_v19  ;;  %v14062_v13 = vand.u32 2147483647, %v14057_v44  ;;  %v14065_v61 = vmul.f32 0.70710677, %v14046_v51  ;;  %vm6090_vm14 = vcmp.ge.f32.partialorder %v15517_v37, 0.0 }
 0x54b   : > { %v8118_v31 = vpop.eup %8117  ;;  %v5454_v16 = vmul.f32 %v13876_v30, %v5390_v7  ;;  %v5423_v59 = vmul.f32 %v13937_v9, %v5359_v25  ;;  %v5743_v35 = vmul.f32 %v5679_v6, %v13903_v57  ;;  %v4848_v21 = vadd.f32 -1.135204, %v4784_v18 }
 0x54c   : > { %v5998_v52 = vmul.f32 %v8118_v31, %v13870_v4  ;;  %7597 = vmatmul.msk.f32.gmra.mxu1 %vm6426_vm7, %v13725_v48  ;;  %v4337_v33 = vmul.f32 0.5, %v14062_v13  ;;  %v14081_v19 = vand.u32 2147483647, %v14065_v61  ;;  %v6026_v24 = vmul.f32 %v13984_v14, %v13589_v43  ;;  %v4018_v4 = vpop.f32.mrf.mxu0 }
 0x54d   : > { %v5837_v7 = vadd.f32 %v13980_v49, %v5645_v54  ;;  %v5487_v63 = vadd.f32 1.0000237, %v5423_v59  ;;  %v14087_v25 = vmul.f32 %v14070_v0, %v6670_v20  ;;  %v4912_v57 = vmul.f32 %v14007_v40, %v4848_v21 }
 0x54e   : > { %v6126_v6 = vsub.f32 1.0, %v5998_v52  ;;  %v7537_v18 = vadd.f32 -1.0, %v5998_v52  ;;  %v5071_v48 = vmul.f32 %v13923_v11, %v5007_v32  ;;  %v4401_v31 = vadd.f32 1.0, %v4337_v33 }
 0x54f   : > { %15518 = vst [vmem:[#allocation39_spill] sm:$0xff] %v14087_v25  ;;  %v5551_v22 = vmul.f32 %v13937_v9, %v5487_v63  ;;  %v14093_v53 = vmul.f32 0.5, %v13946_v47  ;;  %v4976_v43 = vadd.f32 0.27886808, %v4912_v57  ;;  %v4369_v49 = vmul.f32 0.5, %v14081_v19  ;;  %v15519_v63 = vld [vmem:[#allocation63_spill] sm:$0xff] }
 0x550   : > { %v14096_v14 = vpop.eup %8119  ;;  %v6254_v54 = vsel %vm6062_vm13, %v6126_v6, %v7537_v18  ;;  %v5518_v20 = vadd.f32 1.0000237, %v5454_v16  ;;  %8121 = vrcp.f32 %v4401_v31  ;;  %v6154_v59 = vsub.f32 1.0, %v6026_v24 }
 0x551   : > { %v5960_v21 = vmul.f32 1.442695, %v5837_v7  ;;  %v6318_v52 = vadd.f32 1.0, %v6254_v54  ;;  %v5615_v32 = vadd.f32 -1.2655122, %v5551_v22  ;;  %v5040_v33 = vmul.f32 %v14007_v40, %v4976_v43 }
 0x552   : > { %vm6091_vm15 = vcmp.ge.f32.partialorder %v15519_v63, 0.0  ;;  %v5135_v47 = vadd.f32 -0.18628806, %v5071_v48  ;;  %v4560_v57 = vmul.f32 0.17087276, %v14096_v14  ;;  %v4433_v25 = vadd.f32 1.0, %v4369_v49 }
 0x553   : > { %v7565_v23 = vadd.f32 -1.0, %v6026_v24  ;;  %v14104_v3 = vmul.f32 %v6318_v52, %v14010_v41  ;;  %v5807_v42 = vadd.f32 %v5743_v35, %v5615_v32  ;;  %v5104_v6 = vadd.f32 -0.18628806, %v5040_v33 }
 0x554   : > { %v5680_v16 = vsub.f32 0.0, %v13960_v38  ;;  %v5582_v7 = vmul.f32 %v13876_v30, %v5518_v20  ;;  %v4624_v18 = vadd.f32 -0.82215226, %v4560_v57  ;;  %8123 = vrcp.f32 %v4433_v25  ;;  %7598 = vmatmul.msk.f32.gmra.mxu1 %vm6426_vm7, %v13845_v56  ;;  %v6672_v56 = vpop.f32.mrf.mxu1  ;;  %v4021_v20 = vpop.f32.mrf.mxu0 }
 0x555   : > { %v6282_v22 = vsel %vm6090_vm14, %v6154_v59, %v7565_v23  ;;  %8125 = vpow2.f32 %v5960_v21  ;;  %v5900_v48 = vmul.f32 1.442695, %v5807_v42  ;;  %v5168_v24 = vmul.f32 %v14007_v40, %v5104_v6 }
 0x556   : > { %v6346_v41 = vadd.f32 1.0, %v6282_v22  ;;  %v14113_v31 = vpop.eup %8121  ;;  %v5199_v35 = vmul.f32 %v13923_v11, %v5135_v47  ;;  %v4688_v43 = vmul.f32 %v14096_v14, %v4624_v18  ;;  %v14118_v49 = vadd.f32 %v13792_v55, %v4018_v4 }
 0x557   : > { %v6027_v23 = vmul.f32 %v13992_v12, %v13639_v50  ;;  %8127 = vpow2.f32 %v5900_v48  ;;  %v5232_v37 = vadd.f32 0.09678418, %v5168_v24  ;;  %v4529_v25 = vmul.f32 0.17087276, %v14113_v31 }
 0x558   : > { %v6410_v54 = vmul.f32 %v6346_v41, %v13686_v8  ;;  %v5646_v59 = vadd.f32 -1.2655122, %v5582_v7  ;;  %v5744_v21 = vmul.f32 %v5680_v16, %v13960_v38  ;;  %v4752_v52 = vadd.f32 1.4885159, %v4688_v43 }
 0x559   : > { %v14126_v32 = vmul.f32 0.70710677, %v14118_v49  ;;  %vm6063_vm0 = vcmp.ge.f32.partialorder %v13885_v5, 0.0  ;;  %v5296_v4 = vmul.f32 %v14007_v40, %v5232_v37  ;;  %v4593_v50 = vadd.f32 -0.82215226, %v4529_v25 }
 0x55a   : > { %7629 = vmatmul.msk.f32.gmra.mxu2 %vm6426_vm7, %v6410_v54  ;;  %v6155_v12 = vsub.f32 1.0, %v6027_v23  ;;  %v7566_v33 = vadd.f32 -1.0, %v6027_v23  ;;  %v14131_v47 = vpop.eup %8123  ;;  %v5263_v8 = vadd.f32 0.09678418, %v5199_v35  ;;  %v4816_v57 = vmul.f32 %v14096_v14, %v4752_v52 }
 0x55b   : > { %v14135_v38 = vand.u32 2147483647, %v14126_v32  ;;  %v14138_v42 = vadd.f32 %v13792_v55, %v4021_v20  ;;  %v14140_v6 = vpop.eup %8125  ;;  %v5360_v16 = vadd.f32 0.37409195, %v5296_v4  ;;  %v4657_v7 = vmul.f32 %v14113_v31, %v4593_v50 }
 0x55c   : > { %v4561_v18 = vmul.f32 0.17087276, %v14131_v47  ;;  %v6283_v22 = vsel %vm6091_vm15, %v6155_v12, %v7566_v33  ;;  %v5838_v48 = vadd.f32 %v14025_v26, %v5646_v59  ;;  %v4880_v24 = vadd.f32 -1.135204, %v4816_v57  ;;  %7599 = vmatmul.msk.f32.gmra.mxu1 %vm6426_vm7, %v13906_v58  ;;  %v14160_v12 = vpop.f32.mrf.mxu1 }
 0x55d   : > { %v4338_v41 = vmul.f32 0.5, %v14135_v38  ;;  %v6347_v35 = vadd.f32 1.0, %v6283_v22  ;;  %v8128_v43 = vpop.eup %8127  ;;  %v5424_v23 = vmul.f32 %v14007_v40, %v5360_v16  ;;  %v4721_v37 = vadd.f32 1.4885159, %v4657_v7 }
 0x55e   : > { %v4625_v25 = vadd.f32 -0.82215226, %v4561_v18  ;;  %v14152_v54 = vmul.f32 0.70710677, %v14138_v42  ;;  %v5999_v63 = vmul.f32 %v8128_v43, %v13937_v9  ;;  %v4944_v20 = vmul.f32 %v14096_v14, %v4880_v24 }
 0x55f   : > { %v4402_v26 = vadd.f32 1.0, %v4338_v41  ;;  %v6411_v59 = vmul.f32 %v6347_v35, %v13777_v2  ;;  %v5327_v52 = vmul.f32 %v13923_v11, %v5263_v8  ;;  %v5488_v4 = vadd.f32 1.0000237, %v5424_v23  ;;  %v15520_v35 = vld [vmem:[#allocation55_spill] sm:$0xff] }
 0x560   : > { %v4785_v58 = vmul.f32 %v14113_v31, %v4721_v37  ;;  %v4689_v50 = vmul.f32 %v14131_v47, %v4625_v25  ;;  %v6127_v33 = vsub.f32 1.0, %v5999_v63  ;;  %v7538_v57 = vadd.f32 -1.0, %v5999_v63 }
 0x561   : > { %v5008_v16 = vadd.f32 0.27886808, %v4944_v20  ;;  %8129 = vrcp.f32 %v4402_v26  ;;  %v5552_v9 = vmul.f32 %v14007_v40, %v5488_v4  ;;  %v6673_v7 = vadd.f32 %v13977_v62, %v6672_v56 }
 0x562   : > { %v4849_v18 = vadd.f32 -1.135204, %v4785_v58  ;;  %v4753_v22 = vadd.f32 1.4885159, %v4689_v50  ;;  %7630 = vmatmul.msk.f32.gmra.mxu2 %vm6426_vm7, %v6411_v59  ;;  %v5962_v2 = vmul.f32 1.442695, %v5838_v48  ;;  %v6255_v8 = vsel %vm6063_vm0, %v6127_v33, %v7538_v57 }
 0x563   : > { %v5072_v24 = vmul.f32 %v14096_v14, %v5008_v16  ;;  %v14169_v41 = vand.u32 2147483647, %v14152_v54  ;;  %vm6092_vm1 = vcmp.ge.f32.partialorder %v15520_v35, 0.0  ;;  %v6319_v43 = vadd.f32 1.0, %v6255_v8 }
 0x564   : > { %v5616_v23 = vadd.f32 -1.2655122, %v5552_v9  ;;  %v4913_v37 = vmul.f32 %v14113_v31, %v4849_v18  ;;  %v4817_v56 = vmul.f32 %v14131_v47, %v4753_v22  ;;  %v5391_v25 = vadd.f32 0.37409195, %v5327_v52  ;;  %7600 = vmatmul.msk.f32.gmra.mxu1 %vm6426_vm7, %v13963_v34  ;;  %v14195_v9 = vpop.f32.mrf.mxu2 }
 0x565   : > { %v14175_v63 = vmul.f32 0.5, %v14003_v15  ;;  %v5136_v48 = vadd.f32 -0.18628806, %v5072_v24  ;;  %v4339_v5 = vmul.f32 0.5, %v14169_v41  ;;  %v14181_v20 = vmul.f32 %v6319_v43, %v14054_v60 }
 0x566   : > { %v5808_v26 = vadd.f32 %v5744_v21, %v5616_v23  ;;  %v4977_v59 = vadd.f32 0.27886808, %v4913_v37  ;;  %v4881_v4 = vadd.f32 -1.135204, %v4817_v56  ;;  %v5712_v52 = vsub.f32 0.0, %v14033_v39  ;;  %v14193_v21 = vpop.f32.mrf.mxu1  ;;  %v4024_v23 = vpop.f32.mrf.mxu0 }
 0x567   : > { %v14183_v58 = vpop.eup %8129  ;;  %v5200_v50 = vmul.f32 %v14096_v14, %v5136_v48  ;;  %v14188_v15 = vmul.f32 %v14070_v0, %v6673_v7  ;;  %v4403_v33 = vadd.f32 1.0, %v4339_v5  ;;  %v5455_v18 = vmul.f32 %v13923_v11, %v5391_v25 }
 0x568   : > { %v5902_v57 = vmul.f32 1.442695, %v5808_v26  ;;  %v5041_v16 = vmul.f32 %v14113_v31, %v4977_v59  ;;  %v4945_v34 = vmul.f32 %v14131_v47, %v4881_v4  ;;  %v4530_v60 = vmul.f32 0.17087276, %v14183_v58 }
 0x569   : > { %v5264_v22 = vadd.f32 0.09678418, %v5200_v50  ;;  %8131 = vrcp.f32 %v4403_v33  ;;  %v6028_v7 = vmul.f32 %v14048_v1, %v13661_v29  ;;  %vm6064_vm2 = vcmp.ge.f32.partialorder %v13953_v27, 0.0 }
 0x56a   : > { %8133 = vpow2.f32 %v5902_v57  ;;  %v5105_v8 = vadd.f32 -0.18628806, %v5041_v16  ;;  %v5009_v24 = vadd.f32 0.27886808, %v4945_v34  ;;  %v4594_v43 = vadd.f32 -0.82215226, %v4530_v60 }
 0x56b   : > { %8135 = vpow2.f32 %v5962_v2  ;;  %v5328_v37 = vmul.f32 %v14096_v14, %v5264_v22  ;;  %v6156_v56 = vsub.f32 1.0, %v6028_v7  ;;  %v7567_v48 = vadd.f32 -1.0, %v6028_v7 }
 0x56c   : > { %v14203_v5 = vmul.f32 0.5, %v14041_v46  ;;  %v5169_v25 = vmul.f32 %v14113_v31, %v5105_v8  ;;  %v5073_v26 = vmul.f32 %v14131_v47, %v5009_v24  ;;  %v4658_v29 = vmul.f32 %v14183_v58, %v4594_v43  ;;  %7601 = vmatmul.msk.f32.gmra.mxu1 %vm6426_vm7, %v14104_v3  ;;  %v14229_v24 = vpop.f32.mrf.mxu2 }
 0x56d   : > { %v14208_v1 = vadd.f32 1.0000237, %v5455_v18  ;;  %v5392_v59 = vadd.f32 0.37409195, %v5328_v37  ;;  %v5681_v2 = vsub.f32 0.0, %v14062_v13  ;;  %v6284_v4 = vsel %vm6092_vm1, %v6156_v56, %v7567_v48 }
 0x56e   : > { %v5776_v46 = vmul.f32 %v5712_v52, %v14033_v39  ;;  %v5233_v50 = vadd.f32 0.09678418, %v5169_v25  ;;  %v5137_v33 = vadd.f32 -0.18628806, %v5073_v26  ;;  %v4722_v57 = vadd.f32 1.4885159, %v4658_v29 }
 0x56f   : > { %v14216_v16 = vpop.eup %8131  ;;  %v5456_v34 = vmul.f32 %v14096_v14, %v5392_v59  ;;  %v5713_v60 = vsub.f32 0.0, %v14081_v19  ;;  %v6348_v18 = vadd.f32 1.0, %v6284_v4  ;;  %v14221_v22 = vadd.f32 %v13792_v55, %v4024_v23  ;;  %v6681_v59 = vpop.f32.mrf.mxu1 }
 0x570   : > { %v8134_v35 = vpop.eup %8133  ;;  %v5297_v7 = vmul.f32 %v14113_v31, %v5233_v50  ;;  %v5201_v3 = vmul.f32 %v14131_v47, %v5137_v33  ;;  %v4786_v39 = vmul.f32 %v14183_v58, %v4722_v57  ;;  %v4531_v52 = vmul.f32 0.17087276, %v14216_v16 }
 0x571   : > { %v14227_v8 = vpop.eup %8135  ;;  %v6000_v43 = vmul.f32 %v8134_v35, %v14007_v40  ;;  %v5520_v37 = vadd.f32 1.0000237, %v5456_v34  ;;  %v6412_v56 = vmul.f32 %v6348_v18, %v13927_v17  ;;  %v14234_v23 = vmul.f32 0.70710677, %v14221_v22 }
 0x572   : > { %v5361_v48 = vadd.f32 0.37409195, %v5297_v7  ;;  %v5745_v25 = vmul.f32 %v5681_v2, %v14062_v13  ;;  %v5265_v26 = vadd.f32 0.09678418, %v5201_v3  ;;  %v4850_v29 = vadd.f32 -1.135204, %v4786_v39  ;;  %v4027_v13 = vpop.f32.mrf.mxu0 }
 0x573   : > { %v6128_v4 = vsub.f32 1.0, %v6000_v43  ;;  %v7539_v50 = vadd.f32 -1.0, %v6000_v43  ;;  %v5584_v33 = vmul.f32 %v14096_v14, %v5520_v37  ;;  %v4595_v57 = vadd.f32 -0.82215226, %v4531_v52  ;;  %7631 = vmatmul.msk.f32.gmra.mxu2 %vm6426_vm7, %v6412_v56 }
 0x574   : > { %v5425_v40 = vmul.f32 %v14113_v31, %v5361_v48  ;;  %v5329_v17 = vmul.f32 %v14131_v47, %v5265_v26  ;;  %v4914_v34 = vmul.f32 %v14183_v58, %v4850_v29  ;;  %v14243_v18 = vand.u32 2147483647, %v14234_v23  ;;  %7602 = vmatmul.msk.f32.gmra.mxu1 %vm6426_vm7, %v14181_v20 }
 0x575   : > { %v6256_v2 = vsel %vm6064_vm2, %v6128_v4, %v7539_v50  ;;  %v5648_v35 = vadd.f32 -1.2655122, %v5584_v33  ;;  %v4659_v7 = vmul.f32 %v14216_v16, %v4595_v57  ;;  %v6682_v3 = vadd.f32 %v13977_v62, %v6681_v59 }
 0x576   : > { %v6320_v39 = vadd.f32 1.0, %v6256_v2  ;;  %v5489_v52 = vadd.f32 1.0000237, %v5425_v40  ;;  %v5393_v43 = vadd.f32 0.37409195, %v5329_v17  ;;  %v4340_v37 = vmul.f32 0.5, %v14243_v18 }
 0x577   : > { %v5840_v56 = vadd.f32 %v5776_v46, %v5648_v35  ;;  %v4978_v48 = vadd.f32 0.27886808, %v4914_v34  ;;  %v4723_v26 = vadd.f32 1.4885159, %v4659_v7  ;;  %v14253_v29 = vadd.f32 %v13792_v55, %v4027_v13  ;;  %v6843_v35 = vld [vmem:[#allocation4 + $0x78] sm:$0xff] }
 0x578   : > { %v6384_v27 = vmul.f32 %v6320_v39, %v14093_v53  ;;  %v5553_v4 = vmul.f32 %v14113_v31, %v5489_v52  ;;  %v5457_v59 = vmul.f32 %v14131_v47, %v5393_v43  ;;  %v4404_v50 = vadd.f32 1.0, %v4340_v37  ;;  %v14265_v53 = vpop.f32.mrf.mxu2 }
 0x579   : > { %v5966_v33 = vmul.f32 1.442695, %v5840_v56  ;;  %v5042_v20 = vmul.f32 %v14183_v58, %v4978_v48  ;;  %v4787_v57 = vmul.f32 %v14216_v16, %v4723_v26  ;;  %v6911_v40 = vmul.f32 %v14070_v0, %v6682_v3 }
 0x57a   : > { %vm6093_vm4 = vcmp.ge.f32.partialorder %v13755_v36, 0.0  ;;  %v5617_v46 = vadd.f32 -1.2655122, %v5553_v4  ;;  %v5521_v17 = vadd.f32 1.0000237, %v5457_v59  ;;  %8137 = vrcp.f32 %v4404_v50 }
 0x57b   : > { %v14263_v55 = vmul.f32 0.70710677, %v14253_v29  ;;  %8139 = vpow2.f32 %v5966_v33  ;;  %v14268_v34 = vmul.f32 0.5, %v14046_v51  ;;  %v5106_v13 = vadd.f32 -0.18628806, %v5042_v20 }
 0x57c   : > { %v4851_v2 = vadd.f32 -1.135204, %v4787_v57  ;;  %v5583_v7 = vmul.f32 %v13923_v11, %v14208_v1  ;;  %v5809_v3 = vadd.f32 %v5745_v25, %v5617_v46  ;;  %v5585_v39 = vmul.f32 %v14131_v47, %v5521_v17  ;;  %7603 = vmatmul.msk.f32.gmra.mxu1 %vm6426_vm7, %v6384_v27 }
 0x57d   : > { %v14274_v52 = vand.u32 2147483647, %v14263_v55  ;;  %vm6096_vm5 = vcmp.ge.f32.partialorder %v14020_v10, 0.0  ;;  %v5777_v43 = vmul.f32 %v5713_v60, %v14081_v19  ;;  %v5170_v51 = vmul.f32 %v14183_v58, %v5106_v13  ;;  %v4030_v10 = vpop.f32.mrf.mxu0 }
 0x57e   : > { %v4915_v37 = vmul.f32 %v14216_v16, %v4851_v2  ;;  %v6029_v56 = vmul.f32 %v14140_v6, %v13822_v45  ;;  %v5904_v1 = vmul.f32 1.442695, %v5809_v3  ;;  %v5649_v25 = vadd.f32 -1.2655122, %v5585_v39 }
 0x57f   : > { %v4341_v48 = vmul.f32 0.5, %v14274_v52  ;;  %v6975_v26 = vadd.f32 %v6911_v40, %v6843_v35  ;;  %v5234_v4 = vadd.f32 0.09678418, %v5170_v51  ;;  %v6679_v60 = vadd.f32 %v13977_v62, %v14193_v21 }
 0x580   : > { %v4979_v59 = vadd.f32 0.27886808, %v4915_v37  ;;  %v6157_v50 = vsub.f32 1.0, %v6029_v56  ;;  %v7568_v33 = vadd.f32 -1.0, %v6029_v56  ;;  %v14286_v20 = vpop.eup %8137  ;;  %8141 = vpow2.f32 %v5904_v1  ;;  %v14299_v2 = vpop.f32.mrf.mxu2 }
 0x581   : > { %v5841_v19 = vadd.f32 %v5777_v43, %v5649_v25  ;;  %v4405_v57 = vadd.f32 1.0, %v4341_v48  ;;  %7637 = vmatpush.xpose.msk.msrb.mxu2 %vm1964_vm3, %v6975_v26  ;;  %v8140_v45 = vpop.eup %8139  ;;  %v6676_v6 = vadd.f32 %v13977_v62, %v14160_v12  ;;  %v5298_v27 = vmul.f32 %v14183_v58, %v5234_v4  ;;  %v6842_v48 = vld [vmem:[#allocation4 + $0x70] sm:$0xff] }
 0x582   : > { %v5043_v40 = vmul.f32 %v14216_v16, %v4979_v59  ;;  %v4532_v46 = vmul.f32 0.17087276, %v14286_v20  ;;  %v6032_v17 = vmul.f32 %v8140_v45, %v14096_v14  ;;  %vm6065_vm6 = vcmp.ge.f32.partialorder %v14057_v44, 0.0 }
 0x583   : > { %v5968_v13 = vmul.f32 1.442695, %v5841_v19  ;;  %v5682_v21 = vsub.f32 0.0, %v14135_v38  ;;  %8143 = vrcp.f32 %v4405_v57  ;;  %v5362_v35 = vadd.f32 0.37409195, %v5298_v27 }
 0x584   : > { %v5107_v3 = vadd.f32 -0.18628806, %v5043_v40  ;;  %v4596_v39 = vadd.f32 -0.82215226, %v4532_v46  ;;  %v6285_v12 = vsel %vm6093_vm4, %v6157_v50, %v7568_v33  ;;  %v6160_v43 = vsub.f32 1.0, %v6032_v17 }
 0x585   : > { %v7571_v51 = vadd.f32 -1.0, %v6032_v17  ;;  %8145 = vpow2.f32 %v5968_v13  ;;  %v6910_v37 = vmul.f32 %v14070_v0, %v6679_v60  ;;  %v14304_v14 = vadd.f32 -1.2655122, %v5583_v7 }
 0x586   : > { %v5426_v56 = vmul.f32 %v14183_v58, %v5362_v35  ;;  %v5171_v1 = vmul.f32 %v14216_v16, %v5107_v3  ;;  %v4660_v25 = vmul.f32 %v14286_v20, %v4596_v39  ;;  %v8142_v26 = vpop.eup %8141  ;;  %vm6097_vm8 = vcmp.ge.f32.partialorder %v14065_v61, 0.0  ;;  %v6841_v35 = vld [vmem:[#allocation4 + $0x68] sm:$0xff] }
 0x587   : > { %v6288_v4 = vsel %vm6096_vm5, %v6160_v43, %v7571_v51  ;;  %v6909_v36 = vmul.f32 %v14070_v0, %v6676_v6  ;;  %v6349_v59 = vadd.f32 1.0, %v6285_v12  ;;  %v6001_v7 = vmul.f32 %v8142_v26, %v14113_v31 }
 0x588   : > { %v6352_v50 = vadd.f32 1.0, %v6288_v4  ;;  %v5490_v33 = vadd.f32 1.0000237, %v5426_v56  ;;  %v5235_v19 = vadd.f32 0.09678418, %v5171_v1  ;;  %v5746_v57 = vmul.f32 %v5682_v21, %v14135_v38 }
 0x589   : > { %v14314_v60 = vpop.eup %8143  ;;  %v4724_v45 = vadd.f32 1.4885159, %v4660_v25  ;;  %v6413_v27 = vmul.f32 %v6349_v59, %v13968_v28  ;;  %v6974_v40 = vadd.f32 %v6910_v37, %v6842_v48  ;;  %v6129_v17 = vsub.f32 1.0, %v6001_v7  ;;  %v15521_v28 = vld [vmem:[#allocation78_spill] sm:$0xff]  ;;  %v8228_v37 = vld [vmem:[%s14745_s7] ss:$0 sm:$0xff] }
 0x58a   : > { %v14319_v46 = vmul.f32 %v6352_v50, %v14175_v63  ;;  %v7540_v6 = vadd.f32 -1.0, %v6001_v7  ;;  %v5554_v13 = vmul.f32 %v14183_v58, %v5490_v33  ;;  %v5299_v3 = vmul.f32 %v14216_v16, %v5235_v19  ;;  %v14328_v63 = vpop.f32.mrf.mxu2  ;;  %v6840_v7 = vld [vmem:[#allocation4 + $0x60] sm:$0xff] }
 0x58b   : > { %v8146_v31 = vpop.eup %8145  ;;  %v5683_v39 = vsub.f32 0.0, %v14169_v41  ;;  %v4788_v38 = vmul.f32 %v14286_v20, %v4724_v45  ;;  %v4533_v21 = vmul.f32 0.17087276, %v14314_v60  ;;  %7632 = vmatmul.msk.f32.gmra.mxu2 %vm6426_vm7, %v6413_v27  ;;  %vm6094_vm9 = vcmp.ge.f32.partialorder %v15521_v28, 0.0 }
 0x58c   : > { %v6257_v12 = vsel %vm6065_vm6, %v6129_v17, %v7540_v6  ;;  %v6033_v43 = vmul.f32 %v8146_v31, %v14131_v47  ;;  %v5618_v51 = vadd.f32 -1.2655122, %v5554_v13  ;;  %7638 = vmatpush.xpose.msk.msrb.mxu2 %vm1964_vm3, %v6974_v40  ;;  %v14337_v56 = vadd.f32 %v8228_v37, %v4030_v10 }
 0x58d   : > { %v6321_v1 = vadd.f32 1.0, %v6257_v12  ;;  %v5363_v25 = vadd.f32 0.37409195, %v5299_v3  ;;  %v4852_v48 = vadd.f32 -1.135204, %v4788_v38  ;;  %v6973_v26 = vadd.f32 %v6909_v36, %v6841_v35  ;;  %v6839_v38 = vld [vmem:[#allocation4 + $0x58] sm:$0xff] }
 0x58e   : > { %v6161_v4 = vsub.f32 1.0, %v6033_v43  ;;  %v7572_v59 = vadd.f32 -1.0, %v6033_v43  ;;  %v5810_v50 = vadd.f32 %v5746_v57, %v5618_v51  ;;  %v4597_v44 = vadd.f32 -0.82215226, %v4533_v21  ;;  %v15522_v21 = vld [vmem:[#allocation85_spill] sm:$0xff]  ;;  %v15523_v12 = vld [vmem:[#allocation70_spill] sm:$0xff] }
 0x58f   : > { %v6385_v47 = vmul.f32 %v6321_v1, %v14203_v5  ;;  %v5427_v33 = vmul.f32 %v14216_v16, %v5363_v25  ;;  %v4916_v19 = vmul.f32 %v14286_v20, %v4852_v48  ;;  %v14343_v45 = vmul.f32 0.70710677, %v14337_v56 }
 0x590   : > { %v6289_v27 = vsel %vm6097_vm8, %v6161_v4, %v7572_v59  ;;  %v5906_v40 = vmul.f32 1.442695, %v5810_v50  ;;  %v4661_v36 = vmul.f32 %v14314_v60, %v4597_v44  ;;  %7639 = vmatpush.xpose.msk.msrb.mxu2 %vm1964_vm3, %v6973_v26  ;;  %v6030_v57 = vmul.f32 %v14227_v8, %v13876_v30  ;;  %v15524_v44 = vld [vmem:[#allocation39_spill] sm:$0xff] }
 0x591   : > { %v6353_v10 = vadd.f32 1.0, %v6289_v27  ;;  %v5491_v5 = vadd.f32 1.0000237, %v5427_v33  ;;  %v4980_v17 = vadd.f32 0.27886808, %v4916_v19  ;;  %v6972_v6 = vadd.f32 %v14188_v15, %v6840_v7  ;;  %7604 = vmatmul.msk.f32.gmra.mxu1 %vm6426_vm7, %v6385_v47  ;;  %v6838_v33 = vld [vmem:[#allocation4 + $0x50] sm:$0xff] }
 0x592   : > { %8147 = vpow2.f32 %v5906_v40  ;;  %v4725_v13 = vadd.f32 1.4885159, %v4661_v36  ;;  %v14354_v61 = vand.u32 2147483647, %v14343_v45  ;;  %v6158_v35 = vsub.f32 1.0, %v6030_v57  ;;  %v14371_v26 = vpop.f32.mrf.mxu2  ;;  %v15525_v27 = vld [vmem:[#allocation81_spill] sm:$0xff] }
 0x593   : > { %v14357_v31 = vmul.f32 %v6353_v10, %v14268_v34  ;;  %v5555_v3 = vmul.f32 %v14216_v16, %v5491_v5  ;;  %v5044_v30 = vmul.f32 %v14286_v20, %v4980_v17  ;;  %v7569_v8 = vadd.f32 -1.0, %v6030_v57  ;;  %v15527_v17 = vld [vmem:[#allocation62_spill] sm:$0xff] }
 0x594   : > { %v6906_v15 = vmul.f32 %v14070_v0, %v15522_v21  ;;  %v5839_v43 = vadd.f32 %v15523_v12, %v14304_v14  ;;  %v4789_v51 = vmul.f32 %v14314_v60, %v4725_v13  ;;  %v4342_v37 = vmul.f32 0.5, %v14354_v61  ;;  %7640 = vmatpush.xpose.msk.msrb.mxu2 %vm1964_vm3, %v6972_v6  ;;  %v15528_v21 = vld [vmem:[#allocation47_spill] sm:$0xff] }
 0x595   : > { %v5619_v34 = vadd.f32 -1.2655122, %v5555_v3  ;;  %v5747_v1 = vmul.f32 %v5683_v39, %v14169_v41  ;;  %v5108_v25 = vadd.f32 -0.18628806, %v5044_v30  ;;  %v6286_v48 = vsel %vm6094_vm9, %v6158_v35, %v7569_v8  ;;  %v15526_v39 = vld [vmem:[#allocation72_spill] sm:$0xff] }
 0x596   : > { %v4853_v4 = vadd.f32 -1.135204, %v4789_v51  ;;  %v4406_v59 = vadd.f32 1.0, %v4342_v37  ;;  %v6350_v50 = vadd.f32 1.0, %v6286_v48  ;;  %v6971_v14 = vadd.f32 %v15524_v44, %v6839_v38  ;;  %v6837_v38 = vld [vmem:[#allocation4 + $0x48] sm:$0xff]  ;;  %v15529_v44 = vld [vmem:[#allocation65_spill] sm:$0xff] }
 0x597   : > { %v5811_v7 = vadd.f32 %v5747_v1, %v5619_v34  ;;  %v5172_v47 = vmul.f32 %v14286_v20, %v5108_v25  ;;  %v6661_v40 = vadd.f32 %v13977_v62, %v15525_v27  ;;  %v5964_v36 = vmul.f32 1.442695, %v5839_v43 }
 0x598   : > { %v8148_v19 = vpop.eup %8147  ;;  %v4917_v41 = vmul.f32 %v14314_v60, %v4853_v4  ;;  %8149 = vrcp.f32 %v4406_v59  ;;  %v6414_v28 = vmul.f32 %v6350_v50, %v15526_v39  ;;  %7641 = vmatpush.xpose.msk.msrb.mxu2 %vm1964_vm3, %v6971_v14  ;;  %v6905_v6 = vmul.f32 %v14070_v0, %v15527_v17  ;;  %v6836_v50 = vld [vmem:[#allocation4 + $0x40] sm:$0xff] }
 0x599   : > { %v6002_v57 = vmul.f32 %v8148_v19, %v14183_v58  ;;  %v5908_v10 = vmul.f32 1.442695, %v5811_v7  ;;  %v5236_v5 = vadd.f32 0.09678418, %v5172_v47  ;;  %v6970_v35 = vadd.f32 %v6906_v15, %v6838_v33 }
 0x59a   : > { %v4981_v13 = vadd.f32 0.27886808, %v4917_v41  ;;  %7633 = vmatmul.msk.f32.gmra.mxu2 %vm6426_vm7, %v6414_v28  ;;  %v6658_v12 = vadd.f32 %v13977_v62, %v15528_v21  ;;  %vm6066_vm10 = vcmp.ge.f32.partialorder %v14126_v32, 0.0  ;;  %v6904_v43 = vmul.f32 %v14070_v0, %v6661_v40  ;;  %v14393_v34 = vpop.f32.mrf.mxu2 }
 0x59b   : > { %v6130_v3 = vsub.f32 1.0, %v6002_v57  ;;  %v7541_v30 = vadd.f32 -1.0, %v6002_v57  ;;  %8151 = vpow2.f32 %v5908_v10  ;;  %v5300_v8 = vmul.f32 %v14286_v20, %v5236_v5  ;;  %v15530_v57 = vld [vmem:[#allocation67_spill] sm:$0xff] }
 0x59c   : > { %v5045_v58 = vmul.f32 %v14314_v60, %v4981_v13  ;;  %7642 = vmatpush.xpose.msk.msrb.mxu2 %vm1964_vm3, %v6970_v35  ;;  %8153 = vpow2.f32 %v5964_v36  ;;  %v4146_v1 = vmul.f32 0.5, %v14118_v49  ;;  %v6969_v4 = vadd.f32 %v6905_v6, %v6837_v38  ;;  %v6835_v6 = vld [vmem:[#allocation4 + $0x38] sm:$0xff] }
 0x59d   : > { %v6258_v51 = vsel %vm6066_vm10, %v6130_v3, %v7541_v30  ;;  %v5364_v15 = vadd.f32 0.37409195, %v5300_v8  ;;  %v6655_v14 = vadd.f32 %v13977_v62, %v15529_v44  ;;  %v5684_v49 = vsub.f32 0.0, %v14243_v18 }
 0x59e   : > { %v14391_v37 = vpop.eup %8149  ;;  %v6322_v25 = vadd.f32 1.0, %v6258_v51  ;;  %v5109_v48 = vadd.f32 -0.18628806, %v5045_v58  ;;  %v6903_v40 = vmul.f32 %v14070_v0, %v6658_v12  ;;  %v6968_v28 = vadd.f32 %v6904_v43, %v6836_v50 }
 0x59f   : > { %v5428_v32 = vmul.f32 %v14286_v20, %v5364_v15  ;;  %v4534_v59 = vmul.f32 0.17087276, %v14391_v37  ;;  %v6652_v10 = vadd.f32 %v13977_v62, %v15530_v57  ;;  %v6902_v13 = vmul.f32 %v14070_v0, %v6655_v14  ;;  %v15534_v57 = vld [vmem:[#allocation50_spill] sm:$0xff] }
 0x5a0   : > { %v6386_v7 = vmul.f32 %v6322_v25, %v4146_v1  ;;  %v5173_v47 = vmul.f32 %v14314_v60, %v5109_v48  ;;  %7643 = vmatpush.xpose.msk.msrb.mxu2 %vm1964_vm3, %v6969_v4  ;;  %vm6067_vm11 = vcmp.ge.f32.partialorder %v14152_v54, 0.0  ;;  %v5748_v8 = vmul.f32 %v5684_v49, %v14243_v18  ;;  %v14418_v1 = vpop.f32.mrf.mxu1  ;;  %v6834_v54 = vld [vmem:[#allocation4 + $0x30] sm:$0xff]  ;;  %v14425_v18 = vld [vmem:[%s14747_s9] ss:$0 sm:$0xff]  ;;  %v15531_v4 = vld [vmem:[#allocation64_spill] sm:$0xff] }
 0x5a1   : > { %v8152_v33 = vpop.eup %8151  ;;  %v5492_v19 = vadd.f32 1.0000237, %v5428_v32  ;;  %v4598_v27 = vadd.f32 -0.82215226, %v4534_v59  ;;  %v4147_v21 = vmul.f32 0.5, %v14138_v42  ;;  %v6967_v43 = vadd.f32 %v6903_v40, %v6835_v6  ;;  %v15532_v49 = vld [vmem:[#allocation73_spill] sm:$0xff] }
 0x5a2   : > { %v6003_v41 = vmul.f32 %v8152_v33, %v14216_v16  ;;  %v5237_v39 = vadd.f32 0.09678418, %v5173_v47  ;;  %7605 = vmatmul.msk.f32.gmra.mxu1 %vm6426_vm7, %v6386_v7  ;;  %v8154_v36 = vpop.eup %8153  ;;  %v14415_v62 = vpop.f32.mrf.mxu2  ;;  %v6649_v42 = vadd.f32 %v14425_v18, %v15531_v4  ;;  %v6901_v32 = vmul.f32 %v14070_v0, %v6652_v10  ;;  %v6833_v40 = vld [vmem:[#allocation4 + $0x28] sm:$0xff] }
 0x5a3   : > { %v5556_v5 = vmul.f32 %v14286_v20, %v5492_v19  ;;  %v4662_v17 = vmul.f32 %v14391_v37, %v4598_v27  ;;  %v6031_v48 = vmul.f32 %v8154_v36, %v13923_v11  ;;  %v5685_v47 = vsub.f32 0.0, %v14274_v52 }
 0x5a4   : > { %v6131_v35 = vsub.f32 1.0, %v6003_v41  ;;  %v7542_v3 = vadd.f32 -1.0, %v6003_v41  ;;  %v5301_v30 = vmul.f32 %v14314_v60, %v5237_v39  ;;  %7644 = vmatpush.xpose.msk.msrb.mxu2 %vm1964_vm3, %v6968_v28  ;;  %v6966_v19 = vadd.f32 %v6902_v13, %v6834_v54  ;;  %v15533_v28 = vld [vmem:[#allocation44_spill] sm:$0xff] }
 0x5a5   : > { %v5620_v16 = vadd.f32 -1.2655122, %v5556_v5  ;;  %v4726_v38 = vadd.f32 1.4885159, %v4662_v17  ;;  %v6159_v7 = vsub.f32 1.0, %v6031_v48  ;;  %v7570_v33 = vadd.f32 -1.0, %v6031_v48 }
 0x5a6   : > { %v6259_v12 = vsel %vm6067_vm11, %v6131_v35, %v7542_v3  ;;  %v5365_v58 = vadd.f32 0.37409195, %v5301_v30  ;;  %vm6095_vm12 = vcmp.ge.f32.partialorder %v15532_v49, 0.0  ;;  %v6646_v36 = vadd.f32 %v14425_v18, %v15533_v28  ;;  %v15537_v28 = vld [vmem:[#allocation69_spill] sm:$0xff] }
 0x5a7   : > { %v6323_v51 = vadd.f32 1.0, %v6259_v12  ;;  %v5812_v15 = vadd.f32 %v5748_v8, %v5620_v16  ;;  %v4790_v25 = vmul.f32 %v14391_v37, %v4726_v38  ;;  %v6287_v39 = vsel %vm6095_vm12, %v6159_v7, %v7570_v33  ;;  %v6832_v38 = vld [vmem:[#allocation4 + $0x20] sm:$0xff] }
 0x5a8   : > { %v5429_v59 = vmul.f32 %v14314_v60, %v5365_v58  ;;  %7645 = vmatpush.xpose.msk.msrb.mxu2 %vm1964_vm3, %v6967_v43  ;;  %v4175_v10 = vmul.f32 0.5, %v15534_v57  ;;  %v6351_v17 = vadd.f32 1.0, %v6287_v39  ;;  %v6900_v6 = vmul.f32 %v14070_v0, %v6649_v42  ;;  %v14444_v16 = vpop.f32.mrf.mxu1  ;;  %v15535_v43 = vld [vmem:[#allocation68_spill] sm:$0xff]  ;;  %v6831_v42 = vld [vmem:[#allocation4 + $0x18] sm:$0xff] }
 0x5a9   : > { %v6387_v50 = vmul.f32 %v6323_v51, %v4147_v21  ;;  %v5910_v44 = vmul.f32 1.442695, %v5812_v15  ;;  %v4854_v14 = vadd.f32 -1.135204, %v4790_v25  ;;  %v5749_v35 = vmul.f32 %v5685_v47, %v14274_v52 }
 0x5aa   : > { %v5493_v11 = vadd.f32 1.0000237, %v5429_v59  ;;  %v6965_v3 = vadd.f32 %v6901_v32, %v6833_v40  ;;  %v6415_v8 = vmul.f32 %v6351_v17, %v4175_v10  ;;  %v6774_v21 = vpop.f32.mrf.mxu2  ;;  %v6643_v51 = vadd.f32 %v14425_v18, %v15535_v43 }
 0x5ab   : > { %8155 = vpow2.f32 %v5910_v44  ;;  %v4918_v27 = vmul.f32 %v14391_v37, %v4854_v14  ;;  %7606 = vmatmul.msk.f32.gmra.mxu1 %vm6426_vm7, %v6387_v50  ;;  %v6899_v52 = vmul.f32 %v14070_v0, %v6646_v36  ;;  %v6964_v54 = vadd.f32 %v6900_v6, %v6832_v38  ;;  %v15536_v44 = vld [vmem:[#allocation61_spill] sm:$0xff]  ;;  %v6829_v6 = vld [vmem:[#allocation4 + $0x8] sm:$0xff] }
 0x5ac   : > { %v5557_v41 = vmul.f32 %v14314_v60, %v5493_v11  ;;  %7646 = vmatpush.xpose.msk.msrb.mxu2 %vm1964_vm3, %v6966_v19  ;;  %vm6068_vm13 = vcmp.ge.f32.partialorder %v14234_v23, 0.0  ;;  %v6640_v14 = vadd.f32 %v14425_v18, %v15536_v44  ;;  %v6898_v7 = vmul.f32 %v14070_v0, %v6643_v51  ;;  %v6828_v51 = vld [vmem:[#allocation4] sm:$0xff] }
 0x5ad   : > { %v4982_v5 = vadd.f32 0.27886808, %v4918_v27  ;;  %7634 = vmatmul.msk.f32.gmra.mxu2 %vm6426_vm7, %v6415_v8  ;;  %v4148_v47 = vmul.f32 0.5, %v14221_v22  ;;  %v6830_v27 = vld [vmem:[#allocation4 + $0x10] sm:$0xff]  ;;  %v6637_v36 = vadd.f32 %v14425_v18, %v15537_v28  ;;  %vm6069_vm14 = vcmp.ge.f32.partialorder %v14263_v55, 0.0 }
 0x5ae   : > { %v5621_v13 = vadd.f32 -1.2655122, %v5557_v41  ;;  %v6897_v22 = vmul.f32 %v14070_v0, %v6640_v14  ;;  %v6962_v57 = vadd.f32 %v6898_v7, %v6830_v27  ;;  %v14477_v0 = vld [vmem:[%s14748_s10] ss:$0 sm:$0xff]  ;;  %v6775_v8 = vadd.f32 %v14425_v18, %v6774_v21  ;;  %v6873_v14 = vld [vmem:[#allocation4 + $0x168] sm:$0xff] }
 0x5af   : > { %v5046_v30 = vmul.f32 %v14391_v37, %v4982_v5  ;;  %v6766_v7 = vadd.f32 %v14425_v18, %v14371_v26  ;;  %vm6070_vm15 = vcmp.ge.f32.partialorder %v14343_v45, 0.0  ;;  %v6760_v28 = vadd.f32 %v14425_v18, %v14299_v2  ;;  %v6869_v2 = vld [vmem:[#allocation4 + $0x148] sm:$0xff] }
 0x5b0   : > { %v5813_v12 = vadd.f32 %v5749_v35, %v5621_v13  ;;  %7647 = vmatpush.xpose.msk.msrb.mxu2 %vm1964_vm3, %v6965_v3  ;;  %v14460_v49 = vpop.f32.mrf.mxu1  ;;  %v5686_v3 = vsub.f32 0.0, %v14354_v61 }
 0x5b1   : > { %v8156_v58 = vpop.eup %8155  ;;  %v5110_v15 = vadd.f32 -0.18628806, %v5046_v30  ;;  %v6961_v30 = vadd.f32 %v6897_v22, %v6829_v6  ;;  %v6939_v27 = vmul.f32 %v14477_v0, %v6766_v7  ;;  %v6937_v45 = vmul.f32 %v14477_v0, %v6760_v28 }
 0x5b2   : > { %v6004_v25 = vmul.f32 %v8156_v58, %v14286_v20  ;;  %v5912_v48 = vmul.f32 1.442695, %v5813_v12  ;;  %v6963_v20 = vadd.f32 %v6899_v52, %v6831_v42  ;;  %v6777_v40 = vpop.f32.mrf.mxu2  ;;  %v5750_v55 = vmul.f32 %v5686_v3, %v14354_v61 }
 0x5b3   : > { %v5174_v4 = vmul.f32 %v14391_v37, %v5110_v15  ;;  %v6778_v5 = vadd.f32 %v14425_v18, %v6777_v40  ;;  %v4149_v15 = vmul.f32 0.5, %v14253_v29  ;;  %v6942_v42 = vmul.f32 %v14477_v0, %v6775_v8  ;;  %v6874_v29 = vld [vmem:[#allocation4 + $0x170] sm:$0xff] }
 0x5b4   : > { %v6132_v32 = vsub.f32 1.0, %v6004_v25  ;;  %v7543_v59 = vadd.f32 -1.0, %v6004_v25  ;;  %8157 = vpow2.f32 %v5912_v48  ;;  %7648 = vmatpush.xpose.msk.msrb.mxu2 %vm1964_vm3, %v6964_v54  ;;  %v6875_v25 = vld [vmem:[#allocation4 + $0x178] sm:$0xff]  ;;  %v6769_v61 = vadd.f32 %v14425_v18, %v14393_v34 }
 0x5b5   : > { %v5238_v50 = vadd.f32 0.09678418, %v5174_v4  ;;  %7635 = vmatmul.msk.f32.gmra.mxu2 %vm6426_vm7, %v14319_v46  ;;  %v6943_v12 = vmul.f32 %v14477_v0, %v6778_v5  ;;  %v6772_v4 = vadd.f32 %v14425_v18, %v14415_v62  ;;  %v7006_v44 = vadd.f32 %v6942_v42, %v6874_v29 }
 0x5b6   : > { %v6260_v11 = vsel %vm6068_vm13, %v6132_v32, %v7543_v59  ;;  %v7001_v3 = vadd.f32 %v6937_v45, %v6869_v2  ;;  %v6855_v2 = vld [vmem:[#allocation4 + $0xd8] sm:$0xff] }
 0x5b7   : > { %v6324_v33 = vadd.f32 1.0, %v6260_v11  ;;  %v5302_v19 = vmul.f32 %v14391_v37, %v5238_v50  ;;  %v7007_v32 = vadd.f32 %v6943_v12, %v6875_v25  ;;  %v6940_v11 = vmul.f32 %v14477_v0, %v6769_v61  ;;  %v15538_v12 = vld [vmem:[#allocation51_spill] sm:$0xff] }
 0x5b8   : > { %7649 = vmatpush.xpose.msk.msrb.mxu2 %vm1964_vm3, %v6963_v20  ;;  %v14484_v43 = vpop.f32.mrf.mxu1 }
 0x5b9   : > { %v6388_v23 = vmul.f32 %v6324_v33, %v4148_v47  ;;  %v5366_v41 = vadd.f32 0.37409195, %v5302_v19  ;;  %v6872_v47 = vld [vmem:[#allocation4 + $0x160] sm:$0xff]  ;;  %v6763_v19 = vadd.f32 %v14425_v18, %v14328_v63  ;;  %v4150_v63 = vmul.f32 0.5, %v14337_v56 }
 0x5ba   : > { %v8158_v39 = vpop.eup %8157  ;;  %v7004_v40 = vadd.f32 %v6940_v11, %v6872_v47  ;;  %v6754_v56 = vadd.f32 %v14425_v18, %v14229_v24 }
 0x5bb   : > { %v6005_v10 = vmul.f32 %v8158_v39, %v14314_v60  ;;  %v5430_v17 = vmul.f32 %v14391_v37, %v5366_v41  ;;  %7607 = vmatmul.msk.f32.gmra.mxu1 %vm6426_vm7, %v6388_v23  ;;  %v6896_v60 = vmul.f32 %v14477_v0, %v6637_v36  ;;  %v6871_v41 = vld [vmem:[#allocation4 + $0x158] sm:$0xff] }
 0x5bc   : > { %7650 = vmatpush.xpose.msk.msrb.mxu2 %vm1964_vm3, %v6962_v57  ;;  %v7003_v22 = vadd.f32 %v6939_v27, %v6871_v41 }
 0x5bd   : > { %v6133_v13 = vsub.f32 1.0, %v6005_v10  ;;  %v7544_v46 = vadd.f32 -1.0, %v6005_v10  ;;  %v5494_v35 = vadd.f32 1.0000237, %v5430_v17  ;;  %7636 = vmatmul.msk.f32.gmra.mxu2 %vm6426_vm7, %v14357_v31  ;;  %v6960_v54 = vadd.f32 %v6896_v60, %v6828_v51  ;;  %v6870_v10 = vld [vmem:[#allocation4 + $0x150] sm:$0xff]  ;;  %v6868_v60 = vld [vmem:[#allocation4 + $0x140] sm:$0xff] }
 0x5be   : > { %v6941_v31 = vmul.f32 %v14477_v0, %v6772_v4  ;;  %v6757_v17 = vadd.f32 %v14425_v18, %v14265_v53  ;;  %v6751_v53 = vadd.f32 %v14425_v18, %v14195_v9 }
 0x5bf   : > { %v6261_v38 = vsel %vm6069_vm14, %v6133_v13, %v7544_v46  ;;  %v5558_v58 = vmul.f32 %v14391_v37, %v5494_v35  ;;  %v14527_v46 = vpop.f32.mrf.mxu2 }
 0x5c0   : > { %v6325_v52 = vadd.f32 1.0, %v6261_v38  ;;  %7651 = vmatpush.xpose.msk.msrb.mxu2 %vm1964_vm3, %v6961_v30  ;;  %v14500_v62 = vpop.f32.mrf.mxu1  ;;  %v7005_v20 = vadd.f32 %v6941_v31, %v6873_v14  ;;  %v6936_v35 = vmul.f32 %v14477_v0, %v6757_v17  ;;  %v6935_v30 = vmul.f32 %v14477_v0, %v6754_v56 }
 0x5c1   : > { %v5622_v48 = vadd.f32 -1.2655122, %v5558_v58  ;;  %v6867_v58 = vld [vmem:[#allocation4 + $0x138] sm:$0xff]  ;;  %v6934_v24 = vmul.f32 %v14477_v0, %v6751_v53  ;;  %v6854_v53 = vld [vmem:[#allocation4 + $0xd0] sm:$0xff] }
 0x5c2   : > { %v6389_v21 = vmul.f32 %v6325_v52, %v4149_v15  ;;  %v7000_v8 = vadd.f32 %v6936_v35, %v6868_v60  ;;  %v6999_v51 = vadd.f32 %v6935_v30, %v6867_v58  ;;  %v6866_v15 = vld [vmem:[#allocation4 + $0x130] sm:$0xff]  ;;  %v6853_v58 = vld [vmem:[#allocation4 + $0xc8] sm:$0xff] }
 0x5c3   : > { %v5814_v59 = vadd.f32 %v5750_v55, %v5622_v48  ;;  %v6998_v9 = vadd.f32 %v6934_v24, %v6866_v15 }
 0x5c4   : > { %7652 = vmatpush.xpose.msk.msrb.mxu2 %vm1964_vm3, %v6960_v54  ;;  %7608 = vmatmul.msk.f32.gmra.mxu1 %vm6426_vm7, %v6389_v21 }
 0x5c5   : > { %v5914_v50 = vmul.f32 1.442695, %v5814_v59 }
 0x5c7   : > { %8159 = vpow2.f32 %v5914_v50  ;;  %v14542_v52 = vpop.f32.mrf.mxu2 }
 0x5c8   : > { %7671 = vmatpush.xpose.msk.msra.mxu2 %vm1964_vm3, %v7007_v32  ;;  %v14511_v23 = vpop.f32.mrf.mxu1 }
 0x5cc   : > { %7672 = vmatpush.xpose.msk.msra.mxu2 %vm1964_vm3, %v7006_v44 }
 0x5cd   : > { %v8160_v33 = vpop.eup %8159 }
 0x5ce   : > { %v6006_v34 = vmul.f32 %v8160_v33, %v14391_v37  ;;  %v6938_v37 = vmul.f32 %v14477_v0, %v6763_v19  ;;  %v6859_v33 = vld [vmem:[#allocation4 + $0xf8] sm:$0xff] }
 0x5cf   : > { %v14546_v48 = vpop.f32.mrf.mxu2 }
 0x5d0   : > { %7673 = vmatpush.xpose.msk.msra.mxu2 %vm1964_vm3, %v7005_v20  ;;  %v6134_v39 = vsub.f32 1.0, %v6006_v34  ;;  %v7545_v26 = vadd.f32 -1.0, %v6006_v34  ;;  %v7002_v6 = vadd.f32 %v6938_v37, %v6870_v10  ;;  %v14523_v13 = vpop.f32.mrf.mxu1  ;;  %v6856_v10 = vld [vmem:[#allocation4 + $0xe0] sm:$0xff] }
 0x5d2   : > { %v6262_v36 = vsel %vm6070_vm15, %v6134_v39, %v7545_v26 }
 0x5d3   : > { %v6326_v57 = vadd.f32 1.0, %v6262_v36  ;;  %v6857_v36 = vld [vmem:[#allocation4 + $0xe8] sm:$0xff] }
 0x5d4   : > { %7674 = vmatpush.xpose.msk.msra.mxu2 %vm1964_vm3, %v7004_v40  ;;  %v6858_v40 = vld [vmem:[#allocation4 + $0xf0] sm:$0xff] }
 0x5d5   : > { %v6390_v5 = vmul.f32 %v6326_v57, %v4150_v63 }
 0x5d7   : > { %7609 = vmatmul.msk.f32.gmra.mxu1 %vm6426_vm7, %v6390_v5  ;;  %v14548_v21 = vpop.f32.mrf.mxu2 }
 0x5d8   : > { %7675 = vmatpush.xpose.msk.msra.mxu2 %vm1964_vm3, %v7003_v22  ;;  %v14536_v38 = vpop.f32.mrf.mxu1 }
 0x5dc   : > { %7676 = vmatpush.xpose.msk.msra.mxu2 %vm1964_vm3, %v7002_v6 }
 0x5df   : > { %7610 = vmatmul.msk.f32.gmra.mxu1 %vm6426_vm7, %v15538_v12  ;;  %v14550_v4 = vpop.f32.mrf.mxu2 }
 0x5e0   : > { %7677 = vmatpush.xpose.msk.msra.mxu2 %vm1964_vm3, %v7001_v3  ;;  %v6708_v25 = vpop.f32.mrf.mxu1 }
 0x5e1   : > { %v6709_v30 = vadd.f32 %v14425_v18, %v6708_v25  ;;  %v6703_v25 = vadd.f32 %v14425_v18, %v14523_v13  ;;  %v6697_v13 = vadd.f32 %v14425_v18, %v14500_v62  ;;  %v6691_v62 = vadd.f32 %v14425_v18, %v14460_v49 }
 0x5e3   : > { %v6920_v15 = vmul.f32 %v14477_v0, %v6709_v30 }
 0x5e4   : > { %7678 = vmatpush.xpose.msk.msra.mxu2 %vm1964_vm3, %v7000_v8 }
 0x5e7   : > { %v14552_v32 = vpop.f32.mrf.mxu2 }
 0x5e8   : > { %7679 = vmatpush.xpose.msk.msra.mxu2 %vm1964_vm3, %v6999_v51  ;;  %v6711_v55 = vpop.f32.mrf.mxu1  ;;  %v6706_v51 = vadd.f32 %v14425_v18, %v14536_v38  ;;  %v6700_v38 = vadd.f32 %v14425_v18, %v14511_v23  ;;  %v6694_v23 = vadd.f32 %v14425_v18, %v14484_v43  ;;  %v6688_v43 = vadd.f32 %v14425_v18, %v14444_v16 }
 0x5e9   : > { %v6712_v56 = vadd.f32 %v14425_v18, %v6711_v55 }
 0x5eb   : > { %v6921_v8 = vmul.f32 %v14477_v0, %v6712_v56  ;;  %v6685_v56 = vadd.f32 %v14425_v18, %v14418_v1 }
 0x5ec   : > { %7680 = vmatpush.xpose.msk.msra.mxu2 %vm1964_vm3, %v6998_v9 }
 0x5ed   : > { %v6985_v55 = vadd.f32 %v6921_v8, %v6853_v58  ;;  %v6845_v8 = vld [vmem:[#allocation4 + $0x88] sm:$0xff] }
 0x5ef   : > { %v14554_v29 = vpop.f32.mrf.mxu2 }
 0x5f0   : > { %v6714_v54 = vpop.f32.mrf.mxu1 }
 0x5f1   : > { %v6715_v5 = vadd.f32 %v14425_v18, %v6714_v54  ;;  %v6852_v54 = vld [vmem:[#allocation4 + $0xc0] sm:$0xff] }
 0x5f3   : > { %v6922_v35 = vmul.f32 %v14477_v0, %v6715_v5  ;;  %v6846_v5 = vld [vmem:[#allocation4 + $0x90] sm:$0xff] }
 0x5f5   : > { %v6986_v12 = vadd.f32 %v6922_v35, %v6854_v53  ;;  %v6913_v35 = vmul.f32 %v14477_v0, %v6688_v43  ;;  %v6888_v43 = vld [vmem:[#allocation4 + $0x1e0] sm:$0xff] }
 0x5f7   : > { %v14556_v61 = vpop.f32.mrf.mxu2  ;;  %v6977_v1 = vadd.f32 %v6913_v35, %v6845_v8 }
 0x5f8   : > { %v6717_v42 = vpop.f32.mrf.mxu1 }
 0x5f9   : > { %v6718_v22 = vadd.f32 %v14425_v18, %v6717_v42  ;;  %v6919_v42 = vmul.f32 %v14477_v0, %v6706_v51 }
 0x5fb   : > { %v6923_v17 = vmul.f32 %v14477_v0, %v6718_v22 }
 0x5fd   : > { %v6987_v60 = vadd.f32 %v6923_v17, %v6855_v2 }
 0x5ff   : > { %v14558_v44 = vpop.f32.mrf.mxu2 }
 0x600   : > { %v6720_v59 = vpop.f32.mrf.mxu1 }
 0x601   : > { %v6721_v39 = vadd.f32 %v14425_v18, %v6720_v59  ;;  %v6984_v59 = vadd.f32 %v6920_v15, %v6852_v54  ;;  %v6912_v15 = vmul.f32 %v14477_v0, %v6685_v56 }
 0x603   : > { %v6924_v63 = vmul.f32 %v14477_v0, %v6721_v39  ;;  %v6848_v39 = vld [vmem:[#allocation4 + $0xa0] sm:$0xff] }
 0x605   : > { %v6988_v6 = vadd.f32 %v6924_v63, %v6856_v10  ;;  %v6847_v63 = vld [vmem:[#allocation4 + $0x98] sm:$0xff] }
 0x607   : > { %v14563_v47 = vpop.f32.mrf.mxu2 }
 0x608   : > { %v6723_v50 = vpop.f32.mrf.mxu1 }
 0x609   : > { %v6724_v34 = vadd.f32 %v14425_v18, %v6723_v50  ;;  %v6851_v50 = vld [vmem:[#allocation4 + $0xb8] sm:$0xff] }
 0x60b   : > { %v6925_v26 = vmul.f32 %v14477_v0, %v6724_v34 }
 0x60d   : > { %v6989_v57 = vadd.f32 %v6925_v26, %v6857_v36  ;;  %v6915_v36 = vmul.f32 %v14477_v0, %v6694_v23 }
 0x60f   : > { %v14573_v37 = vpop.f32.mrf.mxu2  ;;  %v6979_v10 = vadd.f32 %v6915_v36, %v6847_v63  ;;  %v6861_v36 = vld [vmem:[#allocation4 + $0x108] sm:$0xff] }
 0x610   : > { %v6726_v31 = vpop.f32.mrf.mxu1 }
 0x611   : > { %v6727_v11 = vadd.f32 %v14425_v18, %v6726_v31  ;;  %v6918_v31 = vmul.f32 %v14477_v0, %v6703_v25 }
 0x613   : > { %v6926_v19 = vmul.f32 %v14477_v0, %v6727_v11  ;;  %v6850_v11 = vld [vmem:[#allocation4 + $0xb0] sm:$0xff] }
 0x614   : > { %v6982_v34 = vadd.f32 %v6918_v31, %v6850_v11 }
 0x615   : > { %v6990_v28 = vadd.f32 %v6926_v19, %v6858_v40  ;;  %v6849_v19 = vld [vmem:[#allocation4 + $0xa8] sm:$0xff] }
 0x617   : > { %v14585_v3 = vpop.f32.mrf.mxu2 }
 0x618   : > { %v6729_v14 = vpop.f32.mrf.mxu1 }
 0x619   : > { %v6730_v7 = vadd.f32 %v14425_v18, %v6729_v14 }
 0x61b   : > { %v6927_v20 = vmul.f32 %v14477_v0, %v6730_v7  ;;  %v6983_v7 = vadd.f32 %v6919_v42, %v6851_v50  ;;  %v6844_v42 = vld [vmem:[#allocation4 + $0x80] sm:$0xff] }
 0x61d   : > { %v6991_v27 = vadd.f32 %v6927_v20, %v6859_v33  ;;  %v6917_v33 = vmul.f32 %v14477_v0, %v6700_v38 }
 0x61f   : > { %7654 = vmatpush.xpose.msk.msrb.mxu3 %vm1964_vm3, %v6991_v27  ;;  %v14596_v9 = vpop.f32.mrf.mxu2  ;;  %v6916_v27 = vmul.f32 %v14477_v0, %v6697_v13  ;;  %v6981_v40 = vadd.f32 %v6917_v33, %v6849_v19 }
 0x620   : > { %v14568_v41 = vpop.f32.mrf.mxu1 }
 0x621   : > { %v6980_v22 = vadd.f32 %v6916_v27, %v6848_v39  ;;  %v6862_v27 = vld [vmem:[#allocation4 + $0x110] sm:$0xff] }
 0x623   : > { %7655 = vmatpush.xpose.msk.msrb.mxu3 %vm1964_vm3, %v6990_v28 }
 0x627   : > { %7656 = vmatpush.xpose.msk.msrb.mxu3 %vm1964_vm3, %v6989_v57  ;;  %v6914_v57 = vmul.f32 %v14477_v0, %v6691_v62 }
 0x628   : > { %v14580_v45 = vpop.f32.mrf.mxu1 }
 0x629   : > { %v6978_v53 = vadd.f32 %v6914_v57, %v6846_v5  ;;  %v6736_v19 = vadd.f32 %v14425_v18, %v14580_v45  ;;  %v6811_v5 = vadd.f32 %v14425_v18, %v14573_v37  ;;  %v6805_v37 = vadd.f32 %v14425_v18, %v14558_v44 }
 0x62b   : > { %7657 = vmatpush.xpose.msk.msrb.mxu3 %vm1964_vm3, %v6988_v6  ;;  %v6929_v45 = vmul.f32 %v14477_v0, %v6736_v19  ;;  %v6954_v56 = vmul.f32 %v14477_v0, %v6811_v5  ;;  %v6952_v8 = vmul.f32 %v14477_v0, %v6805_v37 }
 0x62f   : > { %7658 = vmatpush.xpose.msk.msrb.mxu3 %vm1964_vm3, %v6987_v60  ;;  %v6865_v60 = vld [vmem:[#allocation4 + $0x128] sm:$0xff] }
 0x630   : > { %v6819_v20 = vpop.f32.mrf.mxu2 }
 0x631   : > { %v6820_v11 = vadd.f32 %v14425_v18, %v6819_v20  ;;  %v6817_v20 = vadd.f32 %v14425_v18, %v14596_v9 }
 0x633   : > { %7659 = vmatpush.xpose.msk.msrb.mxu3 %vm1964_vm3, %v6986_v12  ;;  %v6956_v9 = vmul.f32 %v14477_v0, %v6817_v20  ;;  %v6877_v20 = vld [vmem:[#allocation4 + $0x188] sm:$0xff] }
 0x637   : > { %7660 = vmatpush.xpose.msk.msrb.mxu3 %vm1964_vm3, %v6985_v55  ;;  %v6864_v55 = vld [vmem:[#allocation4 + $0x120] sm:$0xff] }
 0x638   : > { %v14590_v24 = vpop.f32.mrf.mxu1  ;;  %v6822_v26 = vpop.f32.mrf.mxu2 }
 0x639   : > { %v6823_v54 = vadd.f32 %v14425_v18, %v6822_v26  ;;  %v6739_v50 = vadd.f32 %v14425_v18, %v14590_v24  ;;  %v6889_v26 = vld [vmem:[#allocation4 + $0x1e8] sm:$0xff] }
 0x63b   : > { %7661 = vmatpush.xpose.msk.msrb.mxu3 %vm1964_vm3, %v6984_v59  ;;  %v6891_v59 = vld [vmem:[#allocation4 + $0x1f8] sm:$0xff]  ;;  %v6958_v13 = vmul.f32 %v14477_v0, %v6823_v54  ;;  %v6930_v24 = vmul.f32 %v14477_v0, %v6739_v50 }
 0x63d   : > { %v6994_v62 = vadd.f32 %v6930_v24, %v6862_v27  ;;  %v6878_v24 = vld [vmem:[#allocation4 + $0x190] sm:$0xff] }
 0x63f   : > { %7662 = vmatpush.xpose.msk.msrb.mxu3 %vm1964_vm3, %v6983_v7  ;;  %v6976_v7 = vadd.f32 %v6912_v15, %v6844_v42  ;;  %v6793_v42 = vadd.f32 %v14425_v18, %v14550_v4  ;;  %v6787_v4 = vadd.f32 %v14425_v18, %v14546_v48  ;;  %v6781_v48 = vadd.f32 %v14425_v18, %v14527_v46 }
 0x640   : > { %v6825_v17 = vpop.f32.mrf.mxu2 }
 0x641   : > { %v6741_v14 = vpop.f32.mrf.mxu1  ;;  %v6826_v16 = vadd.f32 %v14425_v18, %v6825_v17 }
 0x642   : > { %v6742_v12 = vadd.f32 %v14425_v18, %v6741_v14  ;;  %v6863_v14 = vld [vmem:[#allocation4 + $0x118] sm:$0xff] }
 0x643   : > { %7663 = vmatpush.xpose.msk.msrb.mxu3 %vm1964_vm3, %v6982_v34  ;;  %v6959_v25 = vmul.f32 %v14477_v0, %v6826_v16  ;;  %v6890_v34 = vld [vmem:[#allocation4 + $0x1f0] sm:$0xff] }
 0x644   : > { %v6931_v38 = vmul.f32 %v14477_v0, %v6742_v12  ;;  %v7022_v39 = vadd.f32 %v6958_v13, %v6890_v34  ;;  %v6784_v34 = vadd.f32 %v14425_v18, %v14542_v52  ;;  %v6944_v52 = vmul.f32 %v14477_v0, %v6781_v48 }
 0x645   : > { %v7023_v33 = vadd.f32 %v6959_v25, %v6891_v59  ;;  %v6882_v25 = vld [vmem:[#allocation4 + $0x1b0] sm:$0xff] }
 0x646   : > { %v6995_v23 = vadd.f32 %v6931_v38, %v6863_v14  ;;  %v6881_v38 = vld [vmem:[#allocation4 + $0x1a8] sm:$0xff] }
 0x647   : > { %7664 = vmatpush.xpose.msk.msrb.mxu3 %vm1964_vm3, %v6981_v40  ;;  %v6957_v40 = vmul.f32 %v14477_v0, %v6820_v11 }
 0x649   : > { %v7021_v63 = vadd.f32 %v6957_v40, %v6889_v26 }
 0x64b   : > { %7665 = vmatpush.xpose.msk.msrb.mxu3 %vm1964_vm3, %v6980_v22  ;;  %v6814_v22 = vadd.f32 %v14425_v18, %v14585_v3  ;;  %v6887_v3 = vld [vmem:[#allocation4 + $0x1d8] sm:$0xff] }
 0x64d   : > { %v6955_v17 = vmul.f32 %v14477_v0, %v6814_v22 }
 0x64f   : > { %7666 = vmatpush.xpose.msk.msrb.mxu3 %vm1964_vm3, %v6979_v10  ;;  %v6993_v10 = vadd.f32 %v6929_v45, %v6861_v36  ;;  %v7019_v35 = vadd.f32 %v6955_v17, %v6887_v3 }
 0x653   : > { %7667 = vmatpush.xpose.msk.msrb.mxu3 %vm1964_vm3, %v6978_v53 }
 0x654   : > { %v6744_v28 = vpop.f32.mrf.mxu1 }
 0x655   : > { %v6745_v2 = vadd.f32 %v14425_v18, %v6744_v28  ;;  %v6733_v28 = vadd.f32 %v14425_v18, %v14568_v41  ;;  %v6860_v41 = vld [vmem:[#allocation4 + $0x100] sm:$0xff] }
 0x657   : > { %v6932_v58 = vmul.f32 %v14477_v0, %v6745_v2  ;;  %7668 = vmatpush.xpose.msk.msrb.mxu3 %vm1964_vm3, %v6977_v1  ;;  %v6928_v57 = vmul.f32 %v14477_v0, %v6733_v28  ;;  %v7024_v1 = vld [vmem:[%s14739_s1] sm:$0xff] }
 0x658   : > { %7653 = vmatmul.msk.f32.vlgmr.msrb.gmra.mxu2 %vm1964_vm3, %v7024_v1 }
 0x659   : > { %v6996_v31 = vadd.f32 %v6932_v58, %v6864_v55  ;;  %v6992_v2 = vadd.f32 %v6928_v57, %v6860_v41  ;;  %v6884_v58 = vld [vmem:[#allocation4 + $0x1c0] sm:$0xff]  ;;  %v6883_v55 = vld [vmem:[#allocation4 + $0x1b8] sm:$0xff] }
 0x65a   : > { %v7016_v15 = vadd.f32 %v6952_v8, %v6884_v58 }
 0x65b   : > { %7669 = vmatpush.xpose.msk.msrb.mxu3 %vm1964_vm3, %v6976_v7  ;;  %v6880_v7 = vld [vmem:[#allocation4 + $0x1a0] sm:$0xff] }
 0x65c   : > { %v6747_v6 = vpop.f32.mrf.mxu1 }
 0x65d   : > { %v6748_v49 = vadd.f32 %v14425_v18, %v6747_v6  ;;  %v7020_v6 = vadd.f32 %v6956_v9, %v6888_v43 }
 0x65e   : > { %7670 = vmatmul.msk.f32.vlgmr.msrb.gmra.mxu3 %vm1964_vm3, %v7024_v1 }
 0x65f   : > { %v6933_v30 = vmul.f32 %v14477_v0, %v6748_v49  ;;  %7688 = vmatpush.xpose.msk.msra.mxu3 %vm1964_vm3, %v7023_v33  ;;  %v6808_v49 = vadd.f32 %v14425_v18, %v14563_v47  ;;  %v6802_v47 = vadd.f32 %v14425_v18, %v14556_v61  ;;  %v6796_v61 = vadd.f32 %v14425_v18, %v14552_v32  ;;  %v6879_v33 = vld [vmem:[#allocation4 + $0x198] sm:$0xff] }
 0x660   : > { %v6790_v32 = vadd.f32 %v14425_v18, %v14548_v21  ;;  %v6946_v21 = vmul.f32 %v14477_v0, %v6787_v4 }
 0x661   : > { %v6997_v51 = vadd.f32 %v6933_v30, %v6865_v60  ;;  %v6886_v60 = vld [vmem:[#allocation4 + $0x1d0] sm:$0xff]  ;;  %v6953_v53 = vmul.f32 %v14477_v0, %v6808_v49  ;;  %v6885_v30 = vld [vmem:[#allocation4 + $0x1c8] sm:$0xff]  ;;  %v6951_v44 = vmul.f32 %v14477_v0, %v6802_v47  ;;  %v6949_v59 = vmul.f32 %v14477_v0, %v6796_v61 }
 0x662   : > { %v7018_v16 = vadd.f32 %v6954_v56, %v6886_v60  ;;  %v6947_v11 = vmul.f32 %v14477_v0, %v6790_v32  ;;  %v7010_v27 = vadd.f32 %v6946_v21, %v6878_v24 }
 0x663   : > { %7681 = vmatpush.xpose.msk.msra.mxu2 %vm1964_vm3, %v6997_v51  ;;  %7689 = vmatpush.xpose.msk.msra.mxu3 %vm1964_vm3, %v7022_v39  ;;  %v7017_v12 = vadd.f32 %v6953_v53, %v6885_v30  ;;  %v6799_v51 = vadd.f32 %v14425_v18, %v14554_v29  ;;  %v7015_v29 = vadd.f32 %v6951_v44, %v6883_v55  ;;  %v6876_v39 = vld [vmem:[#allocation4 + $0x180] sm:$0xff] }
 0x664   : > { %v7013_v14 = vadd.f32 %v6949_v59, %v6881_v38  ;;  %v7011_v19 = vadd.f32 %v6947_v11, %v6879_v33  ;;  %v7008_v26 = vadd.f32 %v6944_v52, %v6876_v39 }
 0x665   : > { %v6950_v54 = vmul.f32 %v14477_v0, %v6799_v51 }
 0x667   : > { %7682 = vmatpush.xpose.msk.msra.mxu2 %vm1964_vm3, %v6996_v31  ;;  %7690 = vmatpush.xpose.msk.msra.mxu3 %vm1964_vm3, %v7021_v63  ;;  %v7014_v50 = vadd.f32 %v6950_v54, %v6882_v25  ;;  %v6948_v31 = vmul.f32 %v14477_v0, %v6793_v42 }
 0x669   : > { %v7012_v13 = vadd.f32 %v6948_v31, %v6880_v7 }
 0x66b   : > { %7683 = vmatpush.xpose.msk.msra.mxu2 %vm1964_vm3, %v6995_v23  ;;  %7691 = vmatpush.xpose.msk.msra.mxu3 %vm1964_vm3, %v7020_v6  ;;  %v6945_v23 = vmul.f32 %v14477_v0, %v6784_v34 }
 0x66d   : > { %v7009_v40 = vadd.f32 %v6945_v23, %v6877_v20 }
 0x66f   : > { %7684 = vmatpush.xpose.msk.msra.mxu2 %vm1964_vm3, %v6994_v62  ;;  %7692 = vmatpush.xpose.msk.msra.mxu3 %vm1964_vm3, %v7019_v35 }
 0x673   : > { %7685 = vmatpush.xpose.msk.msra.mxu2 %vm1964_vm3, %v6993_v10  ;;  %7693 = vmatpush.xpose.msk.msra.mxu3 %vm1964_vm3, %v7018_v16 }
 0x677   : > { %7686 = vmatpush.xpose.msk.msra.mxu2 %vm1964_vm3, %v6992_v2  ;;  %7694 = vmatpush.xpose.msk.msra.mxu3 %vm1964_vm3, %v7017_v12 }
 0x67a   : > { %7687 = vmatmul.msk.f32.vlgmr.msra.gmra.mxu2 %vm1964_vm3, %v7024_v1 }
 0x67b   : > { %7695 = vmatpush.xpose.msk.msra.mxu3 %vm1964_vm3, %v7016_v15 }
 0x67f   : > { %7696 = vmatpush.xpose.msk.msra.mxu3 %vm1964_vm3, %v7015_v29 }
 0x683   : > { %7697 = vmatpush.xpose.msk.msra.mxu3 %vm1964_vm3, %v7014_v50 }
 0x687   : > { %7698 = vmatpush.xpose.msk.msra.mxu3 %vm1964_vm3, %v7013_v14 }
 0x68b   : > { %7699 = vmatpush.xpose.msk.msra.mxu3 %vm1964_vm3, %v7012_v13 }
 0x68f   : > { %7700 = vmatpush.xpose.msk.msra.mxu3 %vm1964_vm3, %v7011_v19 }
 0x693   : > { %7701 = vmatpush.xpose.msk.msra.mxu3 %vm1964_vm3, %v7010_v27 }
 0x697   : > { %7702 = vmatpush.xpose.msk.msra.mxu3 %vm1964_vm3, %v7009_v40 }
 0x69b   : > { %7703 = vmatpush.xpose.msk.msra.mxu3 %vm1964_vm3, %v7008_v26 }
 0x69e   : > { %7704 = vmatmul.msk.f32.vlgmr.msra.gmra.mxu3 %vm1964_vm3, %v7024_v1 }
 0x6db   : > { %v7237_v18 = vpop.f32.mrf.mxu2 }
 0x6dc   : > { %7300 = vst [vmem:[%s8382_s29] sm:$0xff] %v7237_v18 }
 0x6e1   : > { %v7257_v46 = vpop.f32.mrf.mxu3 }
 0x6e2   : > { %7301 = vst [vmem:[%s8382_s29 + $0x8] sm:$0xff] %v7257_v46 }
 0x6fd   : > { %v7277_v28 = vpop.f32.mrf.mxu2 }
 0x6fe   : > { %7302 = vst [vmem:[%s8382_s29 + $0x10] sm:$0xff] %v7277_v28 }
 0x721   : > { %v7297_v45 = vpop.f32.mrf.mxu3 }
 0x722   : > { %7303 = vst [vmem:[%s8382_s29 + $0x18] sm:$0xff] %v7297_v45 }
 0x723 PF: > { %s21_s21 = sadd.s32 1, %s8273_s21   ;;  %s15539_s18 = sld [smem:[#allocation5_spill]] }
 0x724   : > { %p18_p4 = scmp.ge.s32.totalorder %s21_s21, 30   ;;  %s15540_s25 = sld [smem:[#allocation6_spill]] }
 0x725   : > { %s15541_s20 = sld [smem:[#allocation7_spill]]  ;;  %s15542_s17 = smov %s8265_s19 }
 0x726   :  { %20 = sbr.rel (!%p18_p4) target bundleno = 3 (0x3), region = 141 }
 0x72a   : > { %s15543_s19 = smov %s15540_s25 }

</bundles_post_ra>
